<compile_context>
chip_gen: v7x
topology: tpu7x:2x2x1
jax: 0.10.0
libtpu: 0.0.40
codegen_flags: <defaults>
</compile_context>

<pallas_src>
import functools

import jax
import jax.numpy as jnp
from jax.experimental import pallas as pl
from jax.experimental.pallas import tpu as pltpu

CONV_COUT = 64              # real conv output channels
COUT_PAD = 128              # padded output channel count (lane-dense stores)
NCLS_PAD = 128              # padded class count for the FC kernel
MAX_IMAGES_PER_BLOCK = 16   # keeps 2x-buffered blocks well under v7x's 64 MiB VMEM


def _images_per_block(batch):
    g = min(MAX_IMAGES_PER_BLOCK, batch)
    if batch >= 2:
        g = min(g, max(1, batch // 2))   # >= 2 parallel blocks for v7x's 2 TensorCores
    while batch % g:
        g -= 1
    return g


def _row_block(batch, cap):
    g = min(cap, batch)
    while batch % g:
        g -= 1
    return g


# ---------------------------------------------------------------------------
# Pallas kernels
# ---------------------------------------------------------------------------

def conv_bn_relu_pool_kernel(a_ref, w_ref, b_ref, o_ref):
    """Fused conv3x3(pad1) + folded-BN shift + ReLU + 2x2 max-pool for G images.

    a_ref: (4, G*M, K) bf16 im2col LHS; plane o = 2*dh+dw is the pool offset,
           row g*M + m = (image g, pooled position m), lane (kh*3+kw)*Cin + c.
    w_ref: (K, 128) bf16 conv weights with the BN scale already folded in.
    b_ref: (1, 128) f32 folded BN/conv shift.
    o_ref: (G*M, 128) bf16 pooled output (row g*M + ho*Wo + wo).

    Because the (possibly negative) BN scale is folded into W before the max,
    max-over-offsets then +shift then ReLU is exactly max(ReLU(BN(conv))).
    """
    w = w_ref[...]
    acc = jnp.dot(a_ref[0], w, preferred_element_type=jnp.float32)
    acc = jnp.maximum(acc, jnp.dot(a_ref[1], w, preferred_element_type=jnp.float32))
    acc = jnp.maximum(acc, jnp.dot(a_ref[2], w, preferred_element_type=jnp.float32))
    acc = jnp.maximum(acc, jnp.dot(a_ref[3], w, preferred_element_type=jnp.float32))
    o_ref[...] = jnp.maximum(acc + b_ref[...], 0.0).astype(o_ref.dtype)


def fc_relu_softmax_kernel(num_classes, x_ref, w_ref, b_ref, o_ref):
    """Linear + ReLU + Softmax, class dim padded to 128 lanes (padded lanes masked)."""
    logits = jnp.dot(x_ref[...], w_ref[...], preferred_element_type=jnp.float32)
    act = jnp.maximum(logits + b_ref[...], 0.0)
    lane = jax.lax.broadcasted_iota(jnp.int32, act.shape, 1)
    act = jnp.where(lane < num_classes, act, -jnp.inf)
    m = jnp.max(act, axis=1, keepdims=True)
    e = jnp.exp(act - m)                              # exp(-inf) -> 0 for padded lanes
    denom = jnp.sum(e, axis=1, keepdims=True)
    o_ref[...] = (e / denom).astype(o_ref.dtype)


# ---------------------------------------------------------------------------
# Pallas wrappers
# ---------------------------------------------------------------------------

def conv_bn_relu_pool(lhs, w, shift, *, B, M):
    K = lhs.shape[-1]
    G = _images_per_block(B)
    GM = G * M
    return pl.pallas_call(
        conv_bn_relu_pool_kernel,
        out_shape=jax.ShapeDtypeStruct((B * M, COUT_PAD), jnp.bfloat16),
        grid=(B // G,),
        in_specs=[pl.BlockSpec((4, GM, K), lambda b: (0, b, 0)),
                  pl.BlockSpec((K, COUT_PAD), lambda b: (0, 0)),
                  pl.BlockSpec((1, COUT_PAD), lambda b: (0, 0))],
        out_specs=pl.BlockSpec((GM, COUT_PAD), lambda b: (b, 0)),
        compiler_params=pltpu.CompilerParams(dimension_semantics=("parallel",)),
    )(lhs, w, shift)


def fc_relu_softmax(x2d, w2d, bias, num_classes, *, rows_per_block=256):
    B, K = x2d.shape
    TB = _row_block(B, rows_per_block)
    kern = functools.partial(fc_relu_softmax_kernel, num_classes)
    out = pl.pallas_call(
        kern,
        out_shape=jax.ShapeDtypeStruct((B, NCLS_PAD), jnp.float32),
        grid=(B // TB,),
        in_specs=[pl.BlockSpec((TB, K), lambda i: (i, 0)),
                  pl.BlockSpec((K, NCLS_PAD), lambda i: (0, 0)),
                  pl.BlockSpec((1, NCLS_PAD), lambda i: (0, 0))],
        out_specs=pl.BlockSpec((TB, NCLS_PAD), lambda i: (i, 0)),
        compiler_params=pltpu.CompilerParams(dimension_semantics=("parallel",)),
    )(x2d, w2d, bias)
    return out[:, :num_classes]


# ---------------------------------------------------------------------------
# Model glue (LHS building, parameter folding — folding hoisted out of the jit)
# ---------------------------------------------------------------------------

def build_im2col_pool_lhs(xp, Ho, Wo, k_pad):
    """xp: (B, Hp, Wp, C) zero-padded (pad=1) NHWC input.

    Returns (4, B*Ho*Wo, k_pad) bf16: plane o = 2*dh+dw (pool offset),
    row b*Ho*Wo + ho*Wo + wo, lane (kh*3+kw)*C + c == xp[b, 2*ho+dh+kh, 2*wo+dw+kw, c].
    """
    B, _, _, C = xp.shape
    planes = []
    for dh in (0, 1):
        for dw in (0, 1):
            taps = [xp[:, dh + kh: dh + kh + 2 * Ho: 2, dw + kw: dw + kw + 2 * Wo: 2, :]
                    for kh in range(3) for kw in range(3)]
            a = jnp.concatenate(taps, axis=-1)                # (B, Ho, Wo, 9*C)
            planes.append(a.reshape(B * Ho * Wo, 9 * C))
    lhs = jnp.stack(planes, axis=0)                           # (4, B*Ho*Wo, 9*C)
    if k_pad > 9 * C:
        lhs = jnp.pad(lhs, ((0, 0), (0, 0), (0, k_pad - 9 * C)))
    return lhs.astype(jnp.bfloat16)


def fold_conv_bn(w_oihw, b_conv, gamma, beta, mean, var, eps=1e-5):
    cout, cin = w_oihw.shape[0], w_oihw.shape[1]
    scale = gamma / jnp.sqrt(var + eps)                       # (cout,)
    shift = (b_conv - mean) * scale + beta                    # (cout,)
    w = jnp.transpose(w_oihw, (2, 3, 1, 0)) * scale           # (kh, kw, cin, cout), BN folded
    w = w.reshape(9 * cin, cout)                              # row = (kh*3+kw)*cin + c
    k_pad = -(-(9 * cin) // 8) * 8                            # 27 -> 32 ; 576 -> 576
    w = jnp.pad(w, ((0, k_pad - 9 * cin), (0, COUT_PAD - cout))).astype(jnp.bfloat16)
    shift = jnp.pad(shift, (0, COUT_PAD - cout)).reshape(1, COUT_PAD).astype(jnp.float32)
    return w, shift


def prep_fc_params(wf, bf, num_classes, h, w, c):
    # PyTorch flatten order of (B, 64, h, w) is (c, h, w); our features are flattened
    # (h, w, c) over the 64 REAL channels, so rearrange the FC weight to match.
    wm = wf.reshape(num_classes, c, h, w)                     # (o, c, h, w)
    wm = jnp.transpose(wm, (2, 3, 1, 0))                      # (h, w, c, o)
    wm = wm.reshape(h * w * c, num_classes)
    wm = jnp.pad(wm, ((0, 0), (0, NCLS_PAD - num_classes))).astype(jnp.bfloat16)
    b = jnp.pad(bf, (0, NCLS_PAD - num_classes)).reshape(1, NCLS_PAD).astype(jnp.float32)
    return wm, b


def prepare_params(p):
    """Fold BN + reshuffle/cast all weights ONCE, outside the jitted forward."""
    num_classes = int(p["bf"].shape[0])
    w1, s1 = fold_conv_bn(p["w1"], p["b1"], p["g1"], p["be1"], p["m1"], p["v1"])
    w2, s2 = fold_conv_bn(p["w2"], p["b2"], p["g2"], p["be2"], p["m2"], p["v2"])
    wf, bfc = prep_fc_params(p["wf"], p["bf"], num_classes, 8, 8, CONV_COUT)
    return {"w1": w1, "s1": s1, "w2": w2, "s2": s2, "wf": wf, "bf": bfc}, num_classes


def init_params(key, num_classes=10):
    ks = jax.random.split(key, 8)
    p = {}
    # layer1: Conv2d(3, 64, 3, pad=1) + BN(64)
    p["w1"] = 0.05 * jax.random.normal(ks[0], (64, 3, 3, 3), jnp.float32)     # OIHW
    p["b1"] = 0.01 * jax.random.normal(ks[1], (64,), jnp.float32)
    p["g1"] = 1.0 + 0.1 * jax.random.normal(ks[2], (64,), jnp.float32)
    p["be1"] = 0.1 * jax.random.normal(ks[3], (64,), jnp.float32)
    p["m1"] = 0.1 * jax.random.normal(ks[4], (64,), jnp.float32)
    p["v1"] = jnp.abs(1.0 + 0.1 * jax.random.normal(ks[5], (64,), jnp.float32))
    # layer2: Conv2d(64, 64, 3, pad=1) + BN(64)
    ks2 = jax.random.split(ks[6], 8)
    p["w2"] = 0.02 * jax.random.normal(ks2[0], (64, 64, 3, 3), jnp.float32)   # OIHW
    p["b2"] = 0.01 * jax.random.normal(ks2[1], (64,), jnp.float32)
    p["g2"] = 1.0 + 0.1 * jax.random.normal(ks2[2], (64,), jnp.float32)
    p["be2"] = 0.1 * jax.random.normal(ks2[3], (64,), jnp.float32)
    p["m2"] = 0.1 * jax.random.normal(ks2[4], (64,), jnp.float32)
    p["v2"] = jnp.abs(1.0 + 0.1 * jax.random.normal(ks2[5], (64,), jnp.float32))
    # fc: Linear(8*8*64, num_classes)  (PyTorch layout: (out, in), in flattened (c,h,w))
    p["wf"] = 0.02 * jax.random.normal(ks2[6], (num_classes, 8 * 8 * 64), jnp.float32)
    p["bf"] = 0.01 * jax.random.normal(ks2[7], (num_classes,), jnp.float32)
    return p


@functools.partial(jax.jit, static_argnames=("num_classes",))
def cifar_part1_forward(x_nchw, pp, num_classes=10):
    B, _, H, W = x_nchw.shape
    Ho1, Wo1 = H // 2, W // 2
    Ho2, Wo2 = Ho1 // 2, Wo1 // 2
    assert Ho2 * Wo2 * CONV_COUT == pp["wf"].shape[0], "fc expects an 8x8x64 feature map"

    x = jnp.transpose(x_nchw, (0, 2, 3, 1)).astype(jnp.bfloat16)   # NCHW -> NHWC

    # ---- layer1: fused conv+BN+ReLU+pool, K = 27 (pad 32), G images / grid step ----
    xp1 = jnp.pad(x, ((0, 0), (1, 1), (1, 1), (0, 0)))
    lhs1 = build_im2col_pool_lhs(xp1, Ho1, Wo1, pp["w1"].shape[0])
    y1 = conv_bn_relu_pool(lhs1, pp["w1"], pp["s1"], B=B, M=Ho1 * Wo1)   # (B*256, 128)
    y1 = y1.reshape(B, Ho1, Wo1, COUT_PAD)[:, :, :, :CONV_COUT]          # real channels only

    # ---- layer2: fused conv+BN+ReLU+pool, K = 9*64 = 576 (no zero-padded K) ----
    xp2 = jnp.pad(y1, ((0, 0), (1, 1), (1, 1), (0, 0)))
    lhs2 = build_im2col_pool_lhs(xp2, Ho2, Wo2, pp["w2"].shape[0])
    y2 = conv_bn_relu_pool(lhs2, pp["w2"], pp["s2"], B=B, M=Ho2 * Wo2)   # (B*64, 128)

    # ---- FC + ReLU + Softmax over the 64 real channels (K = 8*8*64 = 4096) ----
    feat = (y2.reshape(B, Ho2 * Wo2, COUT_PAD)[:, :, :CONV_COUT]
            .reshape(B, Ho2 * Wo2 * CONV_COUT))
    return fc_relu_softmax(feat, pp["wf"], pp["bf"], num_classes)        # (B, ncls) f32


if __name__ == "__main__":
    key = jax.random.PRNGKey(0)
    k_x, k_p = jax.random.split(key)
    # fc expects 8*8*64 features, which pins the spatial size to 32x32 (CIFAR).
    x = jax.random.normal(k_x, (8, 3, 32, 32), jnp.float32)
    params = init_params(k_p, num_classes=10)
    prepped, ncls = prepare_params(params)   # BN folding / weight reshuffle done once

    out = jax.block_until_ready(cifar_part1_forward(x, prepped, num_classes=ncls))

    assert out.shape == (8, 10)
    assert bool(jnp.all(jnp.isfinite(out)))
    assert bool(jnp.allclose(jnp.sum(out, axis=1), 1.0, atol=1e-3))   # exact-div softmax
    print("KERNEL_OK")
</pallas_src>

<mosaic_0001>
module attributes {stable_mosaic.version = 11 : i64} {
  func.func @conv_bn_relu_pool_kernel(%arg0: i32, %arg1: memref<4x1024x32xbf16, #tpu.memory_space<vmem>>, %arg2: memref<32x128xbf16, #tpu.memory_space<vmem>>, %arg3: memref<1x128xf32, #tpu.memory_space<vmem>>, %arg4: memref<1024x128xbf16, #tpu.memory_space<vmem>>) attributes {dimension_semantics = [#tpu.dimension_semantics<parallel>], iteration_bounds = array<i64: 2>, scalar_prefetch = 0 : i64, scratch_operands = 0 : i64, tpu.core_type = #tpu.core_type<tc>, window_params = [{transform_indices = @transform_0, window_bounds = array<i64: 4, 1024, 32>}, {pipeline_mode = #tpu.pipeline_mode<synchronous>, transform_indices = @transform_1, window_bounds = array<i64: 32, 128>}, {pipeline_mode = #tpu.pipeline_mode<synchronous>, transform_indices = @transform_2, window_bounds = array<i64: 1, 128>}, {transform_indices = @transform_3, window_bounds = array<i64: 1024, 128>}]} {
    %c0 = arith.constant 0 : index
    %c0_0 = arith.constant 0 : index
    %0 = vector.load %arg2[%c0, %c0_0] : memref<32x128xbf16, #tpu.memory_space<vmem>>, vector<32x128xbf16>
    %c0_1 = arith.constant 0 : index
    %c0_2 = arith.constant 0 : index
    %c0_3 = arith.constant 0 : index
    %1 = vector.load %arg1[%c0_1, %c0_2, %c0_3] : memref<4x1024x32xbf16, #tpu.memory_space<vmem>>, vector<1x1024x32xbf16>
    %2 = vector.shape_cast %1 : vector<1x1024x32xbf16> to vector<1024x32xbf16>
    %cst = arith.constant dense<0.000000e+00> : vector<1024x128xf32>
    %3 = tpu.matmul %2, %0, %cst {dimension_numbers = #tpu.dot_dimension_numbers<[1], [0], [0], [1], [0, 0, 1, 1], [], []>} : vector<1024x32xbf16>, vector<32x128xbf16>, vector<1024x128xf32> -> vector<1024x128xf32>
    %c1 = arith.constant 1 : index
    %c0_4 = arith.constant 0 : index
    %c0_5 = arith.constant 0 : index
    %4 = vector.load %arg1[%c1, %c0_4, %c0_5] : memref<4x1024x32xbf16, #tpu.memory_space<vmem>>, vector<1x1024x32xbf16>
    %5 = vector.shape_cast %4 : vector<1x1024x32xbf16> to vector<1024x32xbf16>
    %cst_6 = arith.constant dense<0.000000e+00> : vector<1024x128xf32>
    %6 = tpu.matmul %5, %0, %cst_6 {dimension_numbers = #tpu.dot_dimension_numbers<[1], [0], [0], [1], [0, 0, 1, 1], [], []>} : vector<1024x32xbf16>, vector<32x128xbf16>, vector<1024x128xf32> -> vector<1024x128xf32>
    %7 = arith.maximumf %3, %6 : vector<1024x128xf32>
    %c2 = arith.constant 2 : index
    %c0_7 = arith.constant 0 : index
    %c0_8 = arith.constant 0 : index
    %8 = vector.load %arg1[%c2, %c0_7, %c0_8] : memref<4x1024x32xbf16, #tpu.memory_space<vmem>>, vector<1x1024x32xbf16>
    %9 = vector.shape_cast %8 : vector<1x1024x32xbf16> to vector<1024x32xbf16>
    %cst_9 = arith.constant dense<0.000000e+00> : vector<1024x128xf32>
    %10 = tpu.matmul %9, %0, %cst_9 {dimension_numbers = #tpu.dot_dimension_numbers<[1], [0], [0], [1], [0, 0, 1, 1], [], []>} : vector<1024x32xbf16>, vector<32x128xbf16>, vector<1024x128xf32> -> vector<1024x128xf32>
    %11 = arith.maximumf %7, %10 : vector<1024x128xf32>
    %c3 = arith.constant 3 : index
    %c0_10 = arith.constant 0 : index
    %c0_11 = arith.constant 0 : index
    %12 = vector.load %arg1[%c3, %c0_10, %c0_11] : memref<4x1024x32xbf16, #tpu.memory_space<vmem>>, vector<1x1024x32xbf16>
    %13 = vector.shape_cast %12 : vector<1x1024x32xbf16> to vector<1024x32xbf16>
    %cst_12 = arith.constant dense<0.000000e+00> : vector<1024x128xf32>
    %14 = tpu.matmul %13, %0, %cst_12 {dimension_numbers = #tpu.dot_dimension_numbers<[1], [0], [0], [1], [0, 0, 1, 1], [], []>} : vector<1024x32xbf16>, vector<32x128xbf16>, vector<1024x128xf32> -> vector<1024x128xf32>
    %15 = arith.maximumf %11, %14 : vector<1024x128xf32>
    %c0_13 = arith.constant 0 : index
    %c0_14 = arith.constant 0 : index
    %16 = vector.load %arg3[%c0_13, %c0_14] : memref<1x128xf32, #tpu.memory_space<vmem>>, vector<1x128xf32>
    %17 = vector.broadcast %16 : vector<1x128xf32> to vector<1024x128xf32>
    %18 = arith.addf %15, %17 : vector<1024x128xf32>
    %cst_15 = arith.constant 0.000000e+00 : f32
    %19 = vector.broadcast %cst_15 : f32 to vector<1024x128xf32>
    %20 = arith.maximumf %18, %19 : vector<1024x128xf32>
    %21 = arith.truncf %20 : vector<1024x128xf32> to vector<1024x128xbf16>
    %c0_16 = arith.constant 0 : index
    %c0_17 = arith.constant 0 : index
    %22 = vector.load %arg4[%c0_16, %c0_17] : memref<1024x128xbf16, #tpu.memory_space<vmem>>, vector<1024x128xbf16>
    tpu.vector_store %arg4[%c0_16, %c0_17], %21 {strides = array<i32>} : memref<1024x128xbf16, #tpu.memory_space<vmem>>, vector<1024x128xbf16>,
    return
  }
  func.func @transform_0(%arg0: i32) -> (i32, i32, i32) {
    %c0_i32 = arith.constant 0 : i32
    %c0_i32_0 = arith.constant 0 : i32
    %c0_i32_1 = arith.constant 0 : i32
    return %c0_i32, %arg0, %c0_i32_0 : i32, i32, i32
  }
  func.func @transform_1(%arg0: i32) -> (i32, i32) {
    %c0_i32 = arith.constant 0 : i32
    %c0_i32_0 = arith.constant 0 : i32
    %c0_i32_1 = arith.constant 0 : i32
    return %c0_i32, %c0_i32_0 : i32, i32
  }
  func.func @transform_2(%arg0: i32) -> (i32, i32) {
    %c0_i32 = arith.constant 0 : i32
    %c0_i32_0 = arith.constant 0 : i32
    %c0_i32_1 = arith.constant 0 : i32
    return %c0_i32, %c0_i32_0 : i32, i32
  }
  func.func @transform_3(%arg0: i32) -> (i32, i32) {
    %c0_i32 = arith.constant 0 : i32
    %c0_i32_0 = arith.constant 0 : i32
    return %arg0, %c0_i32 : i32, i32
  }
}

module attributes {stable_mosaic.version = 11 : i64} {
  func.func @conv_bn_relu_pool_kernel(%arg0: i32, %arg1: memref<4x256x576xbf16, #tpu.memory_space<vmem>>, %arg2: memref<576x128xbf16, #tpu.memory_space<vmem>>, %arg3: memref<1x128xf32, #tpu.memory_space<vmem>>, %arg4: memref<256x128xbf16, #tpu.memory_space<vmem>>) attributes {dimension_semantics = [#tpu.dimension_semantics<parallel>], iteration_bounds = array<i64: 2>, scalar_prefetch = 0 : i64, scratch_operands = 0 : i64, tpu.core_type = #tpu.core_type<tc>, window_params = [{transform_indices = @transform_0, window_bounds = array<i64: 4, 256, 576>}, {pipeline_mode = #tpu.pipeline_mode<synchronous>, transform_indices = @transform_1, window_bounds = array<i64: 576, 128>}, {pipeline_mode = #tpu.pipeline_mode<synchronous>, transform_indices = @transform_2, window_bounds = array<i64: 1, 128>}, {transform_indices = @transform_3, window_bounds = array<i64: 256, 128>}]} {
    %c0 = arith.constant 0 : index
    %c0_0 = arith.constant 0 : index
    %0 = vector.load %arg2[%c0, %c0_0] : memref<576x128xbf16, #tpu.memory_space<vmem>>, vector<576x128xbf16>
    %c0_1 = arith.constant 0 : index
    %c0_2 = arith.constant 0 : index
    %c0_3 = arith.constant 0 : index
    %1 = vector.load %arg1[%c0_1, %c0_2, %c0_3] : memref<4x256x576xbf16, #tpu.memory_space<vmem>>, vector<1x256x576xbf16>
    %2 = vector.shape_cast %1 : vector<1x256x576xbf16> to vector<256x576xbf16>
    %cst = arith.constant dense<0.000000e+00> : vector<256x128xf32>
    %3 = tpu.matmul %2, %0, %cst {dimension_numbers = #tpu.dot_dimension_numbers<[1], [0], [0], [1], [0, 0, 1, 1], [], []>} : vector<256x576xbf16>, vector<576x128xbf16>, vector<256x128xf32> -> vector<256x128xf32>
    %c1 = arith.constant 1 : index
    %c0_4 = arith.constant 0 : index
    %c0_5 = arith.constant 0 : index
    %4 = vector.load %arg1[%c1, %c0_4, %c0_5] : memref<4x256x576xbf16, #tpu.memory_space<vmem>>, vector<1x256x576xbf16>
    %5 = vector.shape_cast %4 : vector<1x256x576xbf16> to vector<256x576xbf16>
    %cst_6 = arith.constant dense<0.000000e+00> : vector<256x128xf32>
    %6 = tpu.matmul %5, %0, %cst_6 {dimension_numbers = #tpu.dot_dimension_numbers<[1], [0], [0], [1], [0, 0, 1, 1], [], []>} : vector<256x576xbf16>, vector<576x128xbf16>, vector<256x128xf32> -> vector<256x128xf32>
    %7 = arith.maximumf %3, %6 : vector<256x128xf32>
    %c2 = arith.constant 2 : index
    %c0_7 = arith.constant 0 : index
    %c0_8 = arith.constant 0 : index
    %8 = vector.load %arg1[%c2, %c0_7, %c0_8] : memref<4x256x576xbf16, #tpu.memory_space<vmem>>, vector<1x256x576xbf16>
    %9 = vector.shape_cast %8 : vector<1x256x576xbf16> to vector<256x576xbf16>
    %cst_9 = arith.constant dense<0.000000e+00> : vector<256x128xf32>
    %10 = tpu.matmul %9, %0, %cst_9 {dimension_numbers = #tpu.dot_dimension_numbers<[1], [0], [0], [1], [0, 0, 1, 1], [], []>} : vector<256x576xbf16>, vector<576x128xbf16>, vector<256x128xf32> -> vector<256x128xf32>
    %11 = arith.maximumf %7, %10 : vector<256x128xf32>
    %c3 = arith.constant 3 : index
    %c0_10 = arith.constant 0 : index
    %c0_11 = arith.constant 0 : index
    %12 = vector.load %arg1[%c3, %c0_10, %c0_11] : memref<4x256x576xbf16, #tpu.memory_space<vmem>>, vector<1x256x576xbf16>
    %13 = vector.shape_cast %12 : vector<1x256x576xbf16> to vector<256x576xbf16>
    %cst_12 = arith.constant dense<0.000000e+00> : vector<256x128xf32>
    %14 = tpu.matmul %13, %0, %cst_12 {dimension_numbers = #tpu.dot_dimension_numbers<[1], [0], [0], [1], [0, 0, 1, 1], [], []>} : vector<256x576xbf16>, vector<576x128xbf16>, vector<256x128xf32> -> vector<256x128xf32>
    %15 = arith.maximumf %11, %14 : vector<256x128xf32>
    %c0_13 = arith.constant 0 : index
    %c0_14 = arith.constant 0 : index
    %16 = vector.load %arg3[%c0_13, %c0_14] : memref<1x128xf32, #tpu.memory_space<vmem>>, vector<1x128xf32>
    %17 = vector.broadcast %16 : vector<1x128xf32> to vector<256x128xf32>
    %18 = arith.addf %15, %17 : vector<256x128xf32>
    %cst_15 = arith.constant 0.000000e+00 : f32
    %19 = vector.broadcast %cst_15 : f32 to vector<256x128xf32>
    %20 = arith.maximumf %18, %19 : vector<256x128xf32>
    %21 = arith.truncf %20 : vector<256x128xf32> to vector<256x128xbf16>
    %c0_16 = arith.constant 0 : index
    %c0_17 = arith.constant 0 : index
    %22 = vector.load %arg4[%c0_16, %c0_17] : memref<256x128xbf16, #tpu.memory_space<vmem>>, vector<256x128xbf16>
    tpu.vector_store %arg4[%c0_16, %c0_17], %21 {strides = array<i32>} : memref<256x128xbf16, #tpu.memory_space<vmem>>, vector<256x128xbf16>,
    return
  }
  func.func @transform_0(%arg0: i32) -> (i32, i32, i32) {
    %c0_i32 = arith.constant 0 : i32
    %c0_i32_0 = arith.constant 0 : i32
    %c0_i32_1 = arith.constant 0 : i32
    return %c0_i32, %arg0, %c0_i32_0 : i32, i32, i32
  }
  func.func @transform_1(%arg0: i32) -> (i32, i32) {
    %c0_i32 = arith.constant 0 : i32
    %c0_i32_0 = arith.constant 0 : i32
    %c0_i32_1 = arith.constant 0 : i32
    return %c0_i32, %c0_i32_0 : i32, i32
  }
  func.func @transform_2(%arg0: i32) -> (i32, i32) {
    %c0_i32 = arith.constant 0 : i32
    %c0_i32_0 = arith.constant 0 : i32
    %c0_i32_1 = arith.constant 0 : i32
    return %c0_i32, %c0_i32_0 : i32, i32
  }
  func.func @transform_3(%arg0: i32) -> (i32, i32) {
    %c0_i32 = arith.constant 0 : i32
    %c0_i32_0 = arith.constant 0 : i32
    return %arg0, %c0_i32 : i32, i32
  }
}

module attributes {stable_mosaic.version = 11 : i64} {
  func.func @fc_relu_softmax_kernel(%arg0: i32, %arg1: memref<8x4096xbf16, #tpu.memory_space<vmem>>, %arg2: memref<4096x128xbf16, #tpu.memory_space<vmem>>, %arg3: memref<1x128xf32, #tpu.memory_space<vmem>>, %arg4: memref<8x128xf32, #tpu.memory_space<vmem>>) attributes {dimension_semantics = [#tpu.dimension_semantics<parallel>], iteration_bounds = array<i64: 1>, scalar_prefetch = 0 : i64, scratch_operands = 0 : i64, tpu.core_type = #tpu.core_type<tc>, window_params = [{transform_indices = @transform_0, window_bounds = array<i64: 8, 4096>}, {pipeline_mode = #tpu.pipeline_mode<synchronous>, transform_indices = @transform_1, window_bounds = array<i64: 4096, 128>}, {pipeline_mode = #tpu.pipeline_mode<synchronous>, transform_indices = @transform_2, window_bounds = array<i64: 1, 128>}, {transform_indices = @transform_3, window_bounds = array<i64: 8, 128>}]} {
    %c0 = arith.constant 0 : index
    %c0_0 = arith.constant 0 : index
    %0 = vector.load %arg1[%c0, %c0_0] : memref<8x4096xbf16, #tpu.memory_space<vmem>>, vector<8x4096xbf16>
    %c0_1 = arith.constant 0 : index
    %c0_2 = arith.constant 0 : index
    %1 = vector.load %arg2[%c0_1, %c0_2] : memref<4096x128xbf16, #tpu.memory_space<vmem>>, vector<4096x128xbf16>
    %cst = arith.constant dense<0.000000e+00> : vector<8x128xf32>
    %2 = tpu.matmul %0, %1, %cst {dimension_numbers = #tpu.dot_dimension_numbers<[1], [0], [0], [1], [0, 0, 1, 1], [], []>} : vector<8x4096xbf16>, vector<4096x128xbf16>, vector<8x128xf32> -> vector<8x128xf32>
    %c0_3 = arith.constant 0 : index
    %c0_4 = arith.constant 0 : index
    %3 = vector.load %arg3[%c0_3, %c0_4] : memref<1x128xf32, #tpu.memory_space<vmem>>, vector<1x128xf32>
    %4 = vector.broadcast %3 : vector<1x128xf32> to vector<8x128xf32>
    %5 = arith.addf %2, %4 : vector<8x128xf32>
    %cst_5 = arith.constant 0.000000e+00 : f32
    %6 = vector.broadcast %cst_5 : f32 to vector<8x128xf32>
    %7 = arith.maximumf %5, %6 : vector<8x128xf32>
    %8 = tpu.iota {dimensions = array<i32: 1>} : vector<8x128xi32>
    %c10_i32 = arith.constant 10 : i32
    %9 = vector.broadcast %c10_i32 : i32 to vector<8x128xi32>
    %10 = arith.cmpi slt, %8, %9 : vector<8x128xi32>
    %cst_6 = arith.constant 0xFF800000 : f32
    %11 = vector.broadcast %cst_6 : f32 to vector<8x128xf32>
    %12 = arith.select %10, %7, %11 : vector<8x128xi1>, vector<8x128xf32>
    %cst_7 = arith.constant dense<0xFF800000> : vector<8xf32>
    %13 = vector.multi_reduction <maximumf>, %12, %cst_7 [1] : vector<8x128xf32> to vector<8xf32>
    %14 = vector.shape_cast %13 : vector<8xf32> to vector<8x1xf32>
    %15 = vector.broadcast %14 : vector<8x1xf32> to vector<8x128xf32>
    %16 = arith.subf %12, %15 : vector<8x128xf32>
    %17 = math.exp %16 : vector<8x128xf32>
    %cst_8 = arith.constant dense<0.000000e+00> : vector<8xf32>
    %18 = vector.multi_reduction <add>, %17, %cst_8 [1] : vector<8x128xf32> to vector<8xf32>
    %19 = vector.shape_cast %18 : vector<8xf32> to vector<8x1xf32>
    %20 = vector.broadcast %19 : vector<8x1xf32> to vector<8x128xf32>
    %21 = arith.divf %17, %20 : vector<8x128xf32>
    %c0_9 = arith.constant 0 : index
    %c0_10 = arith.constant 0 : index
    %22 = vector.load %arg4[%c0_9, %c0_10] : memref<8x128xf32, #tpu.memory_space<vmem>>, vector<8x128xf32>
    tpu.vector_store %arg4[%c0_9, %c0_10], %21 {strides = array<i32>} : memref<8x128xf32, #tpu.memory_space<vmem>>, vector<8x128xf32>,
    return
  }
  func.func @transform_0(%arg0: i32) -> (i32, i32) {
    %c0_i32 = arith.constant 0 : i32
    %c0_i32_0 = arith.constant 0 : i32
    return %arg0, %c0_i32 : i32, i32
  }
  func.func @transform_1(%arg0: i32) -> (i32, i32) {
    %c0_i32 = arith.constant 0 : i32
    %c0_i32_0 = arith.constant 0 : i32
    %c0_i32_1 = arith.constant 0 : i32
    return %c0_i32, %c0_i32_0 : i32, i32
  }
  func.func @transform_2(%arg0: i32) -> (i32, i32) {
    %c0_i32 = arith.constant 0 : i32
    %c0_i32_0 = arith.constant 0 : i32
    %c0_i32_1 = arith.constant 0 : i32
    return %c0_i32, %c0_i32_0 : i32, i32
  }
  func.func @transform_3(%arg0: i32) -> (i32, i32) {
    %c0_i32 = arith.constant 0 : i32
    %c0_i32_0 = arith.constant 0 : i32
    return %arg0, %c0_i32 : i32, i32
  }
}

</mosaic_0001>

<bundles_post_ra>
// kernel: cifar_part1_forward.3
= control target key start
LH: loop header
LB: loop body
LE: loop exit
PB: predicated region body
PF: predicated region fallthrough
CT: control target
= control target key end

     0   :  { %s13126_s12 = smov 0   ;;  %s13128_s13 = smov 0   ;;  %s15571_s0 = inlined_call_operand.vmem [shape: bf16[4,2048,32], index: 0, kind: input, shape index: {}]   ;;  %s15572_s1 = inlined_call_operand.vmem [shape: bf16[32,128], index: 1, kind: input, shape index: {}]   ;;  %s15573_s2 = inlined_call_operand.vmem [shape: f32[1,128], index: 2, kind: input, shape index: {}]   ;;  %s15574_s3 = inlined_call_operand.vmem [shape: bf16[2048,128], index: 3, kind: output, shape index: {}]  }
   0x1   :  { %s13130_s14 = smov 0  }
   0x2 LB: > { %s10455_s15 = sadd.s32 4294967295, %s13104_s14   ;;  %s13143_s16 = sadd.s32 1, %s13104_s14   ;;  %s13104_s14 = sphi %s13130_s14, %s16338_s14   ;;  %s13100_s13 = sphi %s13128_s13, %s16337_s13   ;;  %s13096_s12 = sphi %s13126_s12, %s16336_s12  }
   0x3   : > { %s17_s17 = ssub.s32 %s13104_s14, %s13143_s16  ;;  %s20_s18 = sadd.s32 1, %s13100_s13 }
   0x4   : > { %p18_p0 = scmp.eq.s32.totalorder %s17_s17, 0  ;;  %p27_p1 = scmp.ne.s32.totalorder %s13100_s13, %s13096_s12 }
   0x5   : > { %p28_p2 = scmp.eq.s32.totalorder %s13104_s14, 0  ;;  %p10458_p4 = scmp.ge.s32.totalorder %s13104_s14, 2 }
   0x6   : > { %s13152_s19 = scalar_select %p18_p0, %s13100_s13, %s20_s18  }
   0x7   : > { %p29_p3 = por %p28_p2, %p27_p1  ;;  %127 = sbr.rel (%p10458_p4) target bundleno = 146 (0x92), region = 24 }
   0xe   : > { %130 = sbr.rel (!%p29_p3) target bundleno = 146 (0x92), region = 28  ;;  %s132_s20 = sand.u32 (%p29_p3), 1, %s13100_s13  }
   0xf   : > { %s11495_s21 = sshll.u32 (%p29_p3), %s13104_s14, 9  ;;  %s10459_s22 = sshll.u32 (%p29_p3), %s132_s20, 11 }
  0x10   : > { %s13160_s25 = scalar_lea.vmem (%p29_p3), %s15571_s0, %s11495_s21  ;;  %s13165_s26 = scalar_lea.vmem (%p29_p3), [#allocation2], %s10459_s22 }
  0x11   : > { %v153_v0 = vld [vmem:[%s13160_s25] sm:$0xff] (%p29_p3)   ;;  %v157_v1 = vld [vmem:[%s13160_s25 + $0x8] sm:$0xff] (%p29_p3)   ;;  %v161_v2 = vld [vmem:[%s13160_s25 + $0x10] sm:$0xff] (%p29_p3)  }
  0x12   : > { %154 = vst [vmem:[%s13165_s26] sm:$0xff] (%p29_p3), %v153_v0   ;;  %158 = vst [vmem:[%s13165_s26 + $0x8] sm:$0xff] (%p29_p3), %v157_v1   ;;  %v165_v3 = vld [vmem:[%s13160_s25 + $0x18] sm:$0xff] (%p29_p3)   ;;  %v169_v4 = vld [vmem:[%s13160_s25 + $0x20] sm:$0xff] (%p29_p3)  }
  0x13   : > { %162 = vst [vmem:[%s13165_s26 + $0x10] sm:$0xff] (%p29_p3), %v161_v2   ;;  %v173_v5 = vld [vmem:[%s13160_s25 + $0x28] sm:$0xff] (%p29_p3)   ;;  %166 = vst [vmem:[%s13165_s26 + $0x18] sm:$0xff] (%p29_p3), %v165_v3   ;;  %v177_v6 = vld [vmem:[%s13160_s25 + $0x30] sm:$0xff] (%p29_p3)  }
  0x14   : > { %170 = vst [vmem:[%s13165_s26 + $0x20] sm:$0xff] (%p29_p3), %v169_v4   ;;  %174 = vst [vmem:[%s13165_s26 + $0x28] sm:$0xff] (%p29_p3), %v173_v5   ;;  %v181_v7 = vld [vmem:[%s13160_s25 + $0x38] sm:$0xff] (%p29_p3)   ;;  %v185_v8 = vld [vmem:[%s13160_s25 + $0x40] sm:$0xff] (%p29_p3)  }
  0x15   : > { %178 = vst [vmem:[%s13165_s26 + $0x30] sm:$0xff] %v177_v6   ;;  %182 = vst [vmem:[%s13165_s26 + $0x38] sm:$0xff] %v181_v7   ;;  %v189_v9 = vld [vmem:[%s13160_s25 + $0x48] sm:$0xff]   ;;  %v193_v10 = vld [vmem:[%s13160_s25 + $0x50] sm:$0xff]  }
  0x16   : > { %186 = vst [vmem:[%s13165_s26 + $0x40] sm:$0xff] %v185_v8   ;;  %v197_v11 = vld [vmem:[%s13160_s25 + $0x58] sm:$0xff]   ;;  %190 = vst [vmem:[%s13165_s26 + $0x48] sm:$0xff] %v189_v9   ;;  %v201_v12 = vld [vmem:[%s13160_s25 + $0x60] sm:$0xff]  }
  0x17   : > { %194 = vst [vmem:[%s13165_s26 + $0x50] sm:$0xff] %v193_v10   ;;  %198 = vst [vmem:[%s13165_s26 + $0x58] sm:$0xff] %v197_v11   ;;  %v205_v13 = vld [vmem:[%s13160_s25 + $0x68] sm:$0xff]   ;;  %v209_v14 = vld [vmem:[%s13160_s25 + $0x70] sm:$0xff]  }
  0x18   : > { %202 = vst [vmem:[%s13165_s26 + $0x60] sm:$0xff] %v201_v12   ;;  %206 = vst [vmem:[%s13165_s26 + $0x68] sm:$0xff] %v205_v13   ;;  %v213_v15 = vld [vmem:[%s13160_s25 + $0x78] sm:$0xff]   ;;  %v217_v16 = vld [vmem:[%s13160_s25 + $0x80] sm:$0xff]  }
  0x19   : > { %210 = vst [vmem:[%s13165_s26 + $0x70] sm:$0xff] %v209_v14   ;;  %v221_v17 = vld [vmem:[%s13160_s25 + $0x88] sm:$0xff]   ;;  %214 = vst [vmem:[%s13165_s26 + $0x78] sm:$0xff] %v213_v15   ;;  %v225_v18 = vld [vmem:[%s13160_s25 + $0x90] sm:$0xff]  }
  0x1a   : > { %218 = vst [vmem:[%s13165_s26 + $0x80] sm:$0xff] %v217_v16   ;;  %222 = vst [vmem:[%s13165_s26 + $0x88] sm:$0xff] %v221_v17   ;;  %v229_v19 = vld [vmem:[%s13160_s25 + $0x98] sm:$0xff]   ;;  %v233_v20 = vld [vmem:[%s13160_s25 + $0xa0] sm:$0xff]  }
  0x1b   : > { %226 = vst [vmem:[%s13165_s26 + $0x90] sm:$0xff] %v225_v18   ;;  %230 = vst [vmem:[%s13165_s26 + $0x98] sm:$0xff] %v229_v19   ;;  %v237_v21 = vld [vmem:[%s13160_s25 + $0xa8] sm:$0xff]   ;;  %v241_v22 = vld [vmem:[%s13160_s25 + $0xb0] sm:$0xff]  }
  0x1c   : > { %234 = vst [vmem:[%s13165_s26 + $0xa0] sm:$0xff] %v233_v20   ;;  %v245_v23 = vld [vmem:[%s13160_s25 + $0xb8] sm:$0xff]   ;;  %238 = vst [vmem:[%s13165_s26 + $0xa8] sm:$0xff] %v237_v21   ;;  %v249_v24 = vld [vmem:[%s13160_s25 + $0xc0] sm:$0xff]  }
  0x1d   : > { %242 = vst [vmem:[%s13165_s26 + $0xb0] sm:$0xff] %v241_v22   ;;  %246 = vst [vmem:[%s13165_s26 + $0xb8] sm:$0xff] %v245_v23   ;;  %v253_v25 = vld [vmem:[%s13160_s25 + $0xc8] sm:$0xff]   ;;  %v257_v26 = vld [vmem:[%s13160_s25 + $0xd0] sm:$0xff]  }
  0x1e   : > { %250 = vst [vmem:[%s13165_s26 + $0xc0] sm:$0xff] %v249_v24   ;;  %254 = vst [vmem:[%s13165_s26 + $0xc8] sm:$0xff] %v253_v25   ;;  %v261_v27 = vld [vmem:[%s13160_s25 + $0xd8] sm:$0xff]   ;;  %v265_v28 = vld [vmem:[%s13160_s25 + $0xe0] sm:$0xff]  }
  0x1f   : > { %258 = vst [vmem:[%s13165_s26 + $0xd0] sm:$0xff] %v257_v26   ;;  %v269_v29 = vld [vmem:[%s13160_s25 + $0xe8] sm:$0xff]   ;;  %262 = vst [vmem:[%s13165_s26 + $0xd8] sm:$0xff] %v261_v27   ;;  %v273_v30 = vld [vmem:[%s13160_s25 + $0xf0] sm:$0xff]  }
  0x20   : > { %266 = vst [vmem:[%s13165_s26 + $0xe0] sm:$0xff] %v265_v28   ;;  %270 = vst [vmem:[%s13165_s26 + $0xe8] sm:$0xff] %v269_v29   ;;  %v277_v31 = vld [vmem:[%s13160_s25 + $0xf8] sm:$0xff]   ;;  %v281_v32 = vld [vmem:[%s13160_s25 + $0x100] sm:$0xff]  }
  0x21   : > { %274 = vst [vmem:[%s13165_s26 + $0xf0] sm:$0xff] %v273_v30   ;;  %278 = vst [vmem:[%s13165_s26 + $0xf8] sm:$0xff] %v277_v31   ;;  %v285_v33 = vld [vmem:[%s13160_s25 + $0x108] sm:$0xff]   ;;  %v289_v34 = vld [vmem:[%s13160_s25 + $0x110] sm:$0xff]  }
  0x22   : > { %282 = vst [vmem:[%s13165_s26 + $0x100] sm:$0xff] %v281_v32   ;;  %v293_v35 = vld [vmem:[%s13160_s25 + $0x118] sm:$0xff]   ;;  %286 = vst [vmem:[%s13165_s26 + $0x108] sm:$0xff] %v285_v33   ;;  %v297_v36 = vld [vmem:[%s13160_s25 + $0x120] sm:$0xff]  }
  0x23   : > { %290 = vst [vmem:[%s13165_s26 + $0x110] sm:$0xff] %v289_v34   ;;  %294 = vst [vmem:[%s13165_s26 + $0x118] sm:$0xff] %v293_v35   ;;  %v301_v37 = vld [vmem:[%s13160_s25 + $0x128] sm:$0xff]   ;;  %v305_v38 = vld [vmem:[%s13160_s25 + $0x130] sm:$0xff]  }
  0x24   : > { %298 = vst [vmem:[%s13165_s26 + $0x120] sm:$0xff] %v297_v36   ;;  %302 = vst [vmem:[%s13165_s26 + $0x128] sm:$0xff] %v301_v37   ;;  %v309_v39 = vld [vmem:[%s13160_s25 + $0x138] sm:$0xff]   ;;  %v313_v40 = vld [vmem:[%s13160_s25 + $0x140] sm:$0xff]  }
  0x25   : > { %306 = vst [vmem:[%s13165_s26 + $0x130] sm:$0xff] %v305_v38   ;;  %v317_v41 = vld [vmem:[%s13160_s25 + $0x148] sm:$0xff]   ;;  %310 = vst [vmem:[%s13165_s26 + $0x138] sm:$0xff] %v309_v39   ;;  %v321_v42 = vld [vmem:[%s13160_s25 + $0x150] sm:$0xff]  }
  0x26   : > { %314 = vst [vmem:[%s13165_s26 + $0x140] sm:$0xff] %v313_v40   ;;  %318 = vst [vmem:[%s13165_s26 + $0x148] sm:$0xff] %v317_v41   ;;  %v325_v43 = vld [vmem:[%s13160_s25 + $0x158] sm:$0xff]   ;;  %v329_v44 = vld [vmem:[%s13160_s25 + $0x160] sm:$0xff]  }
  0x27   : > { %322 = vst [vmem:[%s13165_s26 + $0x150] sm:$0xff] %v321_v42   ;;  %326 = vst [vmem:[%s13165_s26 + $0x158] sm:$0xff] %v325_v43   ;;  %v333_v45 = vld [vmem:[%s13160_s25 + $0x168] sm:$0xff]   ;;  %v337_v46 = vld [vmem:[%s13160_s25 + $0x170] sm:$0xff]  }
  0x28   : > { %330 = vst [vmem:[%s13165_s26 + $0x160] sm:$0xff] %v329_v44   ;;  %v341_v47 = vld [vmem:[%s13160_s25 + $0x178] sm:$0xff]   ;;  %334 = vst [vmem:[%s13165_s26 + $0x168] sm:$0xff] %v333_v45   ;;  %v345_v48 = vld [vmem:[%s13160_s25 + $0x180] sm:$0xff]  }
  0x29   : > { %338 = vst [vmem:[%s13165_s26 + $0x170] sm:$0xff] %v337_v46   ;;  %342 = vst [vmem:[%s13165_s26 + $0x178] sm:$0xff] %v341_v47   ;;  %v349_v49 = vld [vmem:[%s13160_s25 + $0x188] sm:$0xff]   ;;  %v353_v50 = vld [vmem:[%s13160_s25 + $0x190] sm:$0xff]  }
  0x2a   : > { %346 = vst [vmem:[%s13165_s26 + $0x180] sm:$0xff] %v345_v48   ;;  %350 = vst [vmem:[%s13165_s26 + $0x188] sm:$0xff] %v349_v49   ;;  %v357_v51 = vld [vmem:[%s13160_s25 + $0x198] sm:$0xff]   ;;  %v361_v52 = vld [vmem:[%s13160_s25 + $0x1a0] sm:$0xff]  }
  0x2b   : > { %354 = vst [vmem:[%s13165_s26 + $0x190] sm:$0xff] %v353_v50   ;;  %v365_v53 = vld [vmem:[%s13160_s25 + $0x1a8] sm:$0xff]   ;;  %358 = vst [vmem:[%s13165_s26 + $0x198] sm:$0xff] %v357_v51   ;;  %v369_v54 = vld [vmem:[%s13160_s25 + $0x1b0] sm:$0xff]  }
  0x2c   : > { %362 = vst [vmem:[%s13165_s26 + $0x1a0] sm:$0xff] %v361_v52   ;;  %366 = vst [vmem:[%s13165_s26 + $0x1a8] sm:$0xff] %v365_v53   ;;  %v373_v55 = vld [vmem:[%s13160_s25 + $0x1b8] sm:$0xff]   ;;  %v377_v56 = vld [vmem:[%s13160_s25 + $0x1c0] sm:$0xff]  }
  0x2d   : > { %370 = vst [vmem:[%s13165_s26 + $0x1b0] sm:$0xff] %v369_v54   ;;  %374 = vst [vmem:[%s13165_s26 + $0x1b8] sm:$0xff] %v373_v55   ;;  %v381_v57 = vld [vmem:[%s13160_s25 + $0x1c8] sm:$0xff]   ;;  %v385_v58 = vld [vmem:[%s13160_s25 + $0x1d0] sm:$0xff]  }
  0x2e   : > { %378 = vst [vmem:[%s13165_s26 + $0x1c0] sm:$0xff] %v377_v56   ;;  %v389_v59 = vld [vmem:[%s13160_s25 + $0x1d8] sm:$0xff]   ;;  %382 = vst [vmem:[%s13165_s26 + $0x1c8] sm:$0xff] %v381_v57   ;;  %v393_v60 = vld [vmem:[%s13160_s25 + $0x1e0] sm:$0xff]  }
  0x2f   : > { %386 = vst [vmem:[%s13165_s26 + $0x1d0] sm:$0xff] %v385_v58   ;;  %390 = vst [vmem:[%s13165_s26 + $0x1d8] sm:$0xff] %v389_v59   ;;  %v397_v61 = vld [vmem:[%s13160_s25 + $0x1e8] sm:$0xff]   ;;  %v401_v62 = vld [vmem:[%s13160_s25 + $0x1f0] sm:$0xff]  }
  0x30   : > { %394 = vst [vmem:[%s13165_s26 + $0x1e0] sm:$0xff] %v393_v60   ;;  %398 = vst [vmem:[%s13165_s26 + $0x1e8] sm:$0xff] %v397_v61   ;;  %v405_v63 = vld [vmem:[%s13160_s25 + $0x1f8] sm:$0xff]   ;;  %v409_v0 = vld [vmem:[%s13160_s25 + $0x400] sm:$0xff]  }
  0x31   : > { %402 = vst [vmem:[%s13165_s26 + $0x1f0] sm:$0xff] %v401_v62   ;;  %v413_v1 = vld [vmem:[%s13160_s25 + $0x408] sm:$0xff]   ;;  %406 = vst [vmem:[%s13165_s26 + $0x1f8] sm:$0xff] %v405_v63   ;;  %v417_v2 = vld [vmem:[%s13160_s25 + $0x410] sm:$0xff]  }
  0x32   : > { %410 = vst [vmem:[%s13165_s26 + $0x200] sm:$0xff] %v409_v0   ;;  %414 = vst [vmem:[%s13165_s26 + $0x208] sm:$0xff] %v413_v1   ;;  %v421_v3 = vld [vmem:[%s13160_s25 + $0x418] sm:$0xff]   ;;  %v425_v4 = vld [vmem:[%s13160_s25 + $0x420] sm:$0xff]  }
  0x33   : > { %418 = vst [vmem:[%s13165_s26 + $0x210] sm:$0xff] %v417_v2   ;;  %422 = vst [vmem:[%s13165_s26 + $0x218] sm:$0xff] %v421_v3   ;;  %v429_v5 = vld [vmem:[%s13160_s25 + $0x428] sm:$0xff]   ;;  %v433_v6 = vld [vmem:[%s13160_s25 + $0x430] sm:$0xff]  }
  0x34   : > { %426 = vst [vmem:[%s13165_s26 + $0x220] sm:$0xff] %v425_v4   ;;  %v437_v7 = vld [vmem:[%s13160_s25 + $0x438] sm:$0xff]   ;;  %430 = vst [vmem:[%s13165_s26 + $0x228] sm:$0xff] %v429_v5   ;;  %v441_v8 = vld [vmem:[%s13160_s25 + $0x440] sm:$0xff]  }
  0x35   : > { %434 = vst [vmem:[%s13165_s26 + $0x230] sm:$0xff] %v433_v6   ;;  %438 = vst [vmem:[%s13165_s26 + $0x238] sm:$0xff] %v437_v7   ;;  %v445_v9 = vld [vmem:[%s13160_s25 + $0x448] sm:$0xff]   ;;  %v449_v10 = vld [vmem:[%s13160_s25 + $0x450] sm:$0xff]  }
  0x36   : > { %442 = vst [vmem:[%s13165_s26 + $0x240] sm:$0xff] %v441_v8   ;;  %446 = vst [vmem:[%s13165_s26 + $0x248] sm:$0xff] %v445_v9   ;;  %v453_v11 = vld [vmem:[%s13160_s25 + $0x458] sm:$0xff]   ;;  %v457_v12 = vld [vmem:[%s13160_s25 + $0x460] sm:$0xff]  }
  0x37   : > { %450 = vst [vmem:[%s13165_s26 + $0x250] sm:$0xff] %v449_v10   ;;  %v461_v13 = vld [vmem:[%s13160_s25 + $0x468] sm:$0xff]   ;;  %454 = vst [vmem:[%s13165_s26 + $0x258] sm:$0xff] %v453_v11   ;;  %v465_v14 = vld [vmem:[%s13160_s25 + $0x470] sm:$0xff]  }
  0x38   : > { %458 = vst [vmem:[%s13165_s26 + $0x260] sm:$0xff] %v457_v12   ;;  %462 = vst [vmem:[%s13165_s26 + $0x268] sm:$0xff] %v461_v13   ;;  %v469_v15 = vld [vmem:[%s13160_s25 + $0x478] sm:$0xff]   ;;  %v473_v16 = vld [vmem:[%s13160_s25 + $0x480] sm:$0xff]  }
  0x39   : > { %466 = vst [vmem:[%s13165_s26 + $0x270] sm:$0xff] %v465_v14   ;;  %470 = vst [vmem:[%s13165_s26 + $0x278] sm:$0xff] %v469_v15   ;;  %v477_v17 = vld [vmem:[%s13160_s25 + $0x488] sm:$0xff]   ;;  %v481_v18 = vld [vmem:[%s13160_s25 + $0x490] sm:$0xff]  }
  0x3a   : > { %474 = vst [vmem:[%s13165_s26 + $0x280] sm:$0xff] %v473_v16   ;;  %v485_v19 = vld [vmem:[%s13160_s25 + $0x498] sm:$0xff]   ;;  %478 = vst [vmem:[%s13165_s26 + $0x288] sm:$0xff] %v477_v17   ;;  %v489_v20 = vld [vmem:[%s13160_s25 + $0x4a0] sm:$0xff]  }
  0x3b   : > { %482 = vst [vmem:[%s13165_s26 + $0x290] sm:$0xff] %v481_v18   ;;  %486 = vst [vmem:[%s13165_s26 + $0x298] sm:$0xff] %v485_v19   ;;  %v493_v21 = vld [vmem:[%s13160_s25 + $0x4a8] sm:$0xff]   ;;  %v497_v22 = vld [vmem:[%s13160_s25 + $0x4b0] sm:$0xff]  }
  0x3c   : > { %490 = vst [vmem:[%s13165_s26 + $0x2a0] sm:$0xff] %v489_v20   ;;  %494 = vst [vmem:[%s13165_s26 + $0x2a8] sm:$0xff] %v493_v21   ;;  %v501_v23 = vld [vmem:[%s13160_s25 + $0x4b8] sm:$0xff]   ;;  %v505_v24 = vld [vmem:[%s13160_s25 + $0x4c0] sm:$0xff]  }
  0x3d   : > { %498 = vst [vmem:[%s13165_s26 + $0x2b0] sm:$0xff] %v497_v22   ;;  %v509_v25 = vld [vmem:[%s13160_s25 + $0x4c8] sm:$0xff]   ;;  %502 = vst [vmem:[%s13165_s26 + $0x2b8] sm:$0xff] %v501_v23   ;;  %v513_v26 = vld [vmem:[%s13160_s25 + $0x4d0] sm:$0xff]  }
  0x3e   : > { %506 = vst [vmem:[%s13165_s26 + $0x2c0] sm:$0xff] %v505_v24   ;;  %510 = vst [vmem:[%s13165_s26 + $0x2c8] sm:$0xff] %v509_v25   ;;  %v517_v27 = vld [vmem:[%s13160_s25 + $0x4d8] sm:$0xff]   ;;  %v521_v28 = vld [vmem:[%s13160_s25 + $0x4e0] sm:$0xff]  }
  0x3f   : > { %514 = vst [vmem:[%s13165_s26 + $0x2d0] sm:$0xff] %v513_v26   ;;  %518 = vst [vmem:[%s13165_s26 + $0x2d8] sm:$0xff] %v517_v27   ;;  %v525_v29 = vld [vmem:[%s13160_s25 + $0x4e8] sm:$0xff]   ;;  %v529_v30 = vld [vmem:[%s13160_s25 + $0x4f0] sm:$0xff]  }
  0x40   : > { %522 = vst [vmem:[%s13165_s26 + $0x2e0] sm:$0xff] %v521_v28   ;;  %v533_v31 = vld [vmem:[%s13160_s25 + $0x4f8] sm:$0xff]   ;;  %526 = vst [vmem:[%s13165_s26 + $0x2e8] sm:$0xff] %v525_v29   ;;  %v537_v32 = vld [vmem:[%s13160_s25 + $0x500] sm:$0xff]  }
  0x41   : > { %530 = vst [vmem:[%s13165_s26 + $0x2f0] sm:$0xff] %v529_v30   ;;  %534 = vst [vmem:[%s13165_s26 + $0x2f8] sm:$0xff] %v533_v31   ;;  %v541_v33 = vld [vmem:[%s13160_s25 + $0x508] sm:$0xff]   ;;  %v545_v34 = vld [vmem:[%s13160_s25 + $0x510] sm:$0xff]  }
  0x42   : > { %538 = vst [vmem:[%s13165_s26 + $0x300] sm:$0xff] %v537_v32   ;;  %542 = vst [vmem:[%s13165_s26 + $0x308] sm:$0xff] %v541_v33   ;;  %v549_v35 = vld [vmem:[%s13160_s25 + $0x518] sm:$0xff]   ;;  %v553_v36 = vld [vmem:[%s13160_s25 + $0x520] sm:$0xff]  }
  0x43   : > { %546 = vst [vmem:[%s13165_s26 + $0x310] sm:$0xff] %v545_v34   ;;  %v557_v37 = vld [vmem:[%s13160_s25 + $0x528] sm:$0xff]   ;;  %550 = vst [vmem:[%s13165_s26 + $0x318] sm:$0xff] %v549_v35   ;;  %v561_v38 = vld [vmem:[%s13160_s25 + $0x530] sm:$0xff]  }
  0x44   : > { %554 = vst [vmem:[%s13165_s26 + $0x320] sm:$0xff] %v553_v36   ;;  %558 = vst [vmem:[%s13165_s26 + $0x328] sm:$0xff] %v557_v37   ;;  %v565_v39 = vld [vmem:[%s13160_s25 + $0x538] sm:$0xff]   ;;  %v569_v40 = vld [vmem:[%s13160_s25 + $0x540] sm:$0xff]  }
  0x45   : > { %562 = vst [vmem:[%s13165_s26 + $0x330] sm:$0xff] %v561_v38   ;;  %566 = vst [vmem:[%s13165_s26 + $0x338] sm:$0xff] %v565_v39   ;;  %v573_v41 = vld [vmem:[%s13160_s25 + $0x548] sm:$0xff]   ;;  %v577_v42 = vld [vmem:[%s13160_s25 + $0x550] sm:$0xff]  }
  0x46   : > { %570 = vst [vmem:[%s13165_s26 + $0x340] sm:$0xff] %v569_v40   ;;  %v581_v43 = vld [vmem:[%s13160_s25 + $0x558] sm:$0xff]   ;;  %574 = vst [vmem:[%s13165_s26 + $0x348] sm:$0xff] %v573_v41   ;;  %v585_v44 = vld [vmem:[%s13160_s25 + $0x560] sm:$0xff]  }
  0x47   : > { %578 = vst [vmem:[%s13165_s26 + $0x350] sm:$0xff] %v577_v42   ;;  %582 = vst [vmem:[%s13165_s26 + $0x358] sm:$0xff] %v581_v43   ;;  %v589_v45 = vld [vmem:[%s13160_s25 + $0x568] sm:$0xff]   ;;  %v593_v46 = vld [vmem:[%s13160_s25 + $0x570] sm:$0xff]  }
  0x48   : > { %586 = vst [vmem:[%s13165_s26 + $0x360] sm:$0xff] %v585_v44   ;;  %590 = vst [vmem:[%s13165_s26 + $0x368] sm:$0xff] %v589_v45   ;;  %v597_v47 = vld [vmem:[%s13160_s25 + $0x578] sm:$0xff]   ;;  %v601_v48 = vld [vmem:[%s13160_s25 + $0x580] sm:$0xff]  }
  0x49   : > { %594 = vst [vmem:[%s13165_s26 + $0x370] sm:$0xff] %v593_v46   ;;  %v605_v49 = vld [vmem:[%s13160_s25 + $0x588] sm:$0xff]   ;;  %598 = vst [vmem:[%s13165_s26 + $0x378] sm:$0xff] %v597_v47   ;;  %v609_v50 = vld [vmem:[%s13160_s25 + $0x590] sm:$0xff]  }
  0x4a   : > { %602 = vst [vmem:[%s13165_s26 + $0x380] sm:$0xff] %v601_v48   ;;  %606 = vst [vmem:[%s13165_s26 + $0x388] sm:$0xff] %v605_v49   ;;  %v613_v51 = vld [vmem:[%s13160_s25 + $0x598] sm:$0xff]   ;;  %v617_v52 = vld [vmem:[%s13160_s25 + $0x5a0] sm:$0xff]  }
  0x4b   : > { %610 = vst [vmem:[%s13165_s26 + $0x390] sm:$0xff] %v609_v50   ;;  %614 = vst [vmem:[%s13165_s26 + $0x398] sm:$0xff] %v613_v51   ;;  %v621_v53 = vld [vmem:[%s13160_s25 + $0x5a8] sm:$0xff]   ;;  %v625_v54 = vld [vmem:[%s13160_s25 + $0x5b0] sm:$0xff]  }
  0x4c   : > { %618 = vst [vmem:[%s13165_s26 + $0x3a0] sm:$0xff] %v617_v52   ;;  %v629_v55 = vld [vmem:[%s13160_s25 + $0x5b8] sm:$0xff]   ;;  %622 = vst [vmem:[%s13165_s26 + $0x3a8] sm:$0xff] %v621_v53   ;;  %v633_v56 = vld [vmem:[%s13160_s25 + $0x5c0] sm:$0xff]  }
  0x4d   : > { %626 = vst [vmem:[%s13165_s26 + $0x3b0] sm:$0xff] %v625_v54   ;;  %630 = vst [vmem:[%s13165_s26 + $0x3b8] sm:$0xff] %v629_v55   ;;  %v637_v57 = vld [vmem:[%s13160_s25 + $0x5c8] sm:$0xff]   ;;  %v641_v58 = vld [vmem:[%s13160_s25 + $0x5d0] sm:$0xff]  }
  0x4e   : > { %634 = vst [vmem:[%s13165_s26 + $0x3c0] sm:$0xff] %v633_v56   ;;  %638 = vst [vmem:[%s13165_s26 + $0x3c8] sm:$0xff] %v637_v57   ;;  %v645_v59 = vld [vmem:[%s13160_s25 + $0x5d8] sm:$0xff]   ;;  %v649_v60 = vld [vmem:[%s13160_s25 + $0x5e0] sm:$0xff]  }
  0x4f   : > { %642 = vst [vmem:[%s13165_s26 + $0x3d0] sm:$0xff] %v641_v58   ;;  %v653_v61 = vld [vmem:[%s13160_s25 + $0x5e8] sm:$0xff]   ;;  %646 = vst [vmem:[%s13165_s26 + $0x3d8] sm:$0xff] %v645_v59   ;;  %v657_v62 = vld [vmem:[%s13160_s25 + $0x5f0] sm:$0xff]  }
  0x50   : > { %650 = vst [vmem:[%s13165_s26 + $0x3e0] sm:$0xff] %v649_v60   ;;  %654 = vst [vmem:[%s13165_s26 + $0x3e8] sm:$0xff] %v653_v61   ;;  %v661_v63 = vld [vmem:[%s13160_s25 + $0x5f8] sm:$0xff]   ;;  %v665_v0 = vld [vmem:[%s13160_s25 + $0x800] sm:$0xff]  }
  0x51   : > { %658 = vst [vmem:[%s13165_s26 + $0x3f0] sm:$0xff] %v657_v62   ;;  %662 = vst [vmem:[%s13165_s26 + $0x3f8] sm:$0xff] %v661_v63   ;;  %v669_v1 = vld [vmem:[%s13160_s25 + $0x808] sm:$0xff]   ;;  %v673_v2 = vld [vmem:[%s13160_s25 + $0x810] sm:$0xff]  }
  0x52   : > { %666 = vst [vmem:[%s13165_s26 + $0x400] sm:$0xff] %v665_v0   ;;  %v677_v3 = vld [vmem:[%s13160_s25 + $0x818] sm:$0xff]   ;;  %670 = vst [vmem:[%s13165_s26 + $0x408] sm:$0xff] %v669_v1   ;;  %v681_v4 = vld [vmem:[%s13160_s25 + $0x820] sm:$0xff]  }
  0x53   : > { %674 = vst [vmem:[%s13165_s26 + $0x410] sm:$0xff] %v673_v2   ;;  %678 = vst [vmem:[%s13165_s26 + $0x418] sm:$0xff] %v677_v3   ;;  %v685_v5 = vld [vmem:[%s13160_s25 + $0x828] sm:$0xff]   ;;  %v689_v6 = vld [vmem:[%s13160_s25 + $0x830] sm:$0xff]  }
  0x54   : > { %682 = vst [vmem:[%s13165_s26 + $0x420] sm:$0xff] %v681_v4   ;;  %686 = vst [vmem:[%s13165_s26 + $0x428] sm:$0xff] %v685_v5   ;;  %v693_v7 = vld [vmem:[%s13160_s25 + $0x838] sm:$0xff]   ;;  %v697_v8 = vld [vmem:[%s13160_s25 + $0x840] sm:$0xff]  }
  0x55   : > { %690 = vst [vmem:[%s13165_s26 + $0x430] sm:$0xff] %v689_v6   ;;  %v701_v9 = vld [vmem:[%s13160_s25 + $0x848] sm:$0xff]   ;;  %694 = vst [vmem:[%s13165_s26 + $0x438] sm:$0xff] %v693_v7   ;;  %v705_v10 = vld [vmem:[%s13160_s25 + $0x850] sm:$0xff]  }
  0x56   : > { %698 = vst [vmem:[%s13165_s26 + $0x440] sm:$0xff] %v697_v8   ;;  %702 = vst [vmem:[%s13165_s26 + $0x448] sm:$0xff] %v701_v9   ;;  %v709_v11 = vld [vmem:[%s13160_s25 + $0x858] sm:$0xff]   ;;  %v713_v12 = vld [vmem:[%s13160_s25 + $0x860] sm:$0xff]  }
  0x57   : > { %706 = vst [vmem:[%s13165_s26 + $0x450] sm:$0xff] %v705_v10   ;;  %710 = vst [vmem:[%s13165_s26 + $0x458] sm:$0xff] %v709_v11   ;;  %v717_v13 = vld [vmem:[%s13160_s25 + $0x868] sm:$0xff]   ;;  %v721_v14 = vld [vmem:[%s13160_s25 + $0x870] sm:$0xff]  }
  0x58   : > { %714 = vst [vmem:[%s13165_s26 + $0x460] sm:$0xff] %v713_v12   ;;  %v725_v15 = vld [vmem:[%s13160_s25 + $0x878] sm:$0xff]   ;;  %718 = vst [vmem:[%s13165_s26 + $0x468] sm:$0xff] %v717_v13   ;;  %v729_v16 = vld [vmem:[%s13160_s25 + $0x880] sm:$0xff]  }
  0x59   : > { %722 = vst [vmem:[%s13165_s26 + $0x470] sm:$0xff] %v721_v14   ;;  %726 = vst [vmem:[%s13165_s26 + $0x478] sm:$0xff] %v725_v15   ;;  %v733_v17 = vld [vmem:[%s13160_s25 + $0x888] sm:$0xff]   ;;  %v737_v18 = vld [vmem:[%s13160_s25 + $0x890] sm:$0xff]  }
  0x5a   : > { %730 = vst [vmem:[%s13165_s26 + $0x480] sm:$0xff] %v729_v16   ;;  %734 = vst [vmem:[%s13165_s26 + $0x488] sm:$0xff] %v733_v17   ;;  %v741_v19 = vld [vmem:[%s13160_s25 + $0x898] sm:$0xff]   ;;  %v745_v20 = vld [vmem:[%s13160_s25 + $0x8a0] sm:$0xff]  }
  0x5b   : > { %738 = vst [vmem:[%s13165_s26 + $0x490] sm:$0xff] %v737_v18   ;;  %v749_v21 = vld [vmem:[%s13160_s25 + $0x8a8] sm:$0xff]   ;;  %742 = vst [vmem:[%s13165_s26 + $0x498] sm:$0xff] %v741_v19   ;;  %v753_v22 = vld [vmem:[%s13160_s25 + $0x8b0] sm:$0xff]  }
  0x5c   : > { %746 = vst [vmem:[%s13165_s26 + $0x4a0] sm:$0xff] %v745_v20   ;;  %750 = vst [vmem:[%s13165_s26 + $0x4a8] sm:$0xff] %v749_v21   ;;  %v757_v23 = vld [vmem:[%s13160_s25 + $0x8b8] sm:$0xff]   ;;  %v761_v24 = vld [vmem:[%s13160_s25 + $0x8c0] sm:$0xff]  }
  0x5d   : > { %754 = vst [vmem:[%s13165_s26 + $0x4b0] sm:$0xff] %v753_v22   ;;  %758 = vst [vmem:[%s13165_s26 + $0x4b8] sm:$0xff] %v757_v23   ;;  %v765_v25 = vld [vmem:[%s13160_s25 + $0x8c8] sm:$0xff]   ;;  %v769_v26 = vld [vmem:[%s13160_s25 + $0x8d0] sm:$0xff]  }
  0x5e   : > { %762 = vst [vmem:[%s13165_s26 + $0x4c0] sm:$0xff] %v761_v24   ;;  %v773_v27 = vld [vmem:[%s13160_s25 + $0x8d8] sm:$0xff]   ;;  %766 = vst [vmem:[%s13165_s26 + $0x4c8] sm:$0xff] %v765_v25   ;;  %v777_v28 = vld [vmem:[%s13160_s25 + $0x8e0] sm:$0xff]  }
  0x5f   : > { %770 = vst [vmem:[%s13165_s26 + $0x4d0] sm:$0xff] %v769_v26   ;;  %774 = vst [vmem:[%s13165_s26 + $0x4d8] sm:$0xff] %v773_v27   ;;  %v781_v29 = vld [vmem:[%s13160_s25 + $0x8e8] sm:$0xff]   ;;  %v785_v30 = vld [vmem:[%s13160_s25 + $0x8f0] sm:$0xff]  }
  0x60   : > { %778 = vst [vmem:[%s13165_s26 + $0x4e0] sm:$0xff] %v777_v28   ;;  %782 = vst [vmem:[%s13165_s26 + $0x4e8] sm:$0xff] %v781_v29   ;;  %v789_v31 = vld [vmem:[%s13160_s25 + $0x8f8] sm:$0xff]   ;;  %v793_v32 = vld [vmem:[%s13160_s25 + $0x900] sm:$0xff]  }
  0x61   : > { %786 = vst [vmem:[%s13165_s26 + $0x4f0] sm:$0xff] %v785_v30   ;;  %v797_v33 = vld [vmem:[%s13160_s25 + $0x908] sm:$0xff]   ;;  %790 = vst [vmem:[%s13165_s26 + $0x4f8] sm:$0xff] %v789_v31   ;;  %v801_v34 = vld [vmem:[%s13160_s25 + $0x910] sm:$0xff]  }
  0x62   : > { %794 = vst [vmem:[%s13165_s26 + $0x500] sm:$0xff] %v793_v32   ;;  %798 = vst [vmem:[%s13165_s26 + $0x508] sm:$0xff] %v797_v33   ;;  %v805_v35 = vld [vmem:[%s13160_s25 + $0x918] sm:$0xff]   ;;  %v809_v36 = vld [vmem:[%s13160_s25 + $0x920] sm:$0xff]  }
  0x63   : > { %802 = vst [vmem:[%s13165_s26 + $0x510] sm:$0xff] %v801_v34   ;;  %806 = vst [vmem:[%s13165_s26 + $0x518] sm:$0xff] %v805_v35   ;;  %v813_v37 = vld [vmem:[%s13160_s25 + $0x928] sm:$0xff]   ;;  %v817_v38 = vld [vmem:[%s13160_s25 + $0x930] sm:$0xff]  }
  0x64   : > { %810 = vst [vmem:[%s13165_s26 + $0x520] sm:$0xff] %v809_v36   ;;  %v821_v39 = vld [vmem:[%s13160_s25 + $0x938] sm:$0xff]   ;;  %814 = vst [vmem:[%s13165_s26 + $0x528] sm:$0xff] %v813_v37   ;;  %v825_v40 = vld [vmem:[%s13160_s25 + $0x940] sm:$0xff]  }
  0x65   : > { %818 = vst [vmem:[%s13165_s26 + $0x530] sm:$0xff] %v817_v38   ;;  %822 = vst [vmem:[%s13165_s26 + $0x538] sm:$0xff] %v821_v39   ;;  %v829_v41 = vld [vmem:[%s13160_s25 + $0x948] sm:$0xff]   ;;  %v833_v42 = vld [vmem:[%s13160_s25 + $0x950] sm:$0xff]  }
  0x66   : > { %826 = vst [vmem:[%s13165_s26 + $0x540] sm:$0xff] %v825_v40   ;;  %830 = vst [vmem:[%s13165_s26 + $0x548] sm:$0xff] %v829_v41   ;;  %v837_v43 = vld [vmem:[%s13160_s25 + $0x958] sm:$0xff]   ;;  %v841_v44 = vld [vmem:[%s13160_s25 + $0x960] sm:$0xff]  }
  0x67   : > { %834 = vst [vmem:[%s13165_s26 + $0x550] sm:$0xff] %v833_v42   ;;  %v845_v45 = vld [vmem:[%s13160_s25 + $0x968] sm:$0xff]   ;;  %838 = vst [vmem:[%s13165_s26 + $0x558] sm:$0xff] %v837_v43   ;;  %v849_v46 = vld [vmem:[%s13160_s25 + $0x970] sm:$0xff]  }
  0x68   : > { %842 = vst [vmem:[%s13165_s26 + $0x560] sm:$0xff] %v841_v44   ;;  %846 = vst [vmem:[%s13165_s26 + $0x568] sm:$0xff] %v845_v45   ;;  %v853_v47 = vld [vmem:[%s13160_s25 + $0x978] sm:$0xff]   ;;  %v857_v48 = vld [vmem:[%s13160_s25 + $0x980] sm:$0xff]  }
  0x69   : > { %850 = vst [vmem:[%s13165_s26 + $0x570] sm:$0xff] %v849_v46   ;;  %854 = vst [vmem:[%s13165_s26 + $0x578] sm:$0xff] %v853_v47   ;;  %v861_v49 = vld [vmem:[%s13160_s25 + $0x988] sm:$0xff]   ;;  %v865_v50 = vld [vmem:[%s13160_s25 + $0x990] sm:$0xff]  }
  0x6a   : > { %858 = vst [vmem:[%s13165_s26 + $0x580] sm:$0xff] %v857_v48   ;;  %v869_v51 = vld [vmem:[%s13160_s25 + $0x998] sm:$0xff]   ;;  %862 = vst [vmem:[%s13165_s26 + $0x588] sm:$0xff] %v861_v49   ;;  %v873_v52 = vld [vmem:[%s13160_s25 + $0x9a0] sm:$0xff]  }
  0x6b   : > { %866 = vst [vmem:[%s13165_s26 + $0x590] sm:$0xff] %v865_v50   ;;  %870 = vst [vmem:[%s13165_s26 + $0x598] sm:$0xff] %v869_v51   ;;  %v877_v53 = vld [vmem:[%s13160_s25 + $0x9a8] sm:$0xff]   ;;  %v881_v54 = vld [vmem:[%s13160_s25 + $0x9b0] sm:$0xff]  }
  0x6c   : > { %874 = vst [vmem:[%s13165_s26 + $0x5a0] sm:$0xff] %v873_v52   ;;  %878 = vst [vmem:[%s13165_s26 + $0x5a8] sm:$0xff] %v877_v53   ;;  %v885_v55 = vld [vmem:[%s13160_s25 + $0x9b8] sm:$0xff]   ;;  %v889_v56 = vld [vmem:[%s13160_s25 + $0x9c0] sm:$0xff]  }
  0x6d   : > { %882 = vst [vmem:[%s13165_s26 + $0x5b0] sm:$0xff] %v881_v54   ;;  %v893_v57 = vld [vmem:[%s13160_s25 + $0x9c8] sm:$0xff]   ;;  %886 = vst [vmem:[%s13165_s26 + $0x5b8] sm:$0xff] %v885_v55   ;;  %v897_v58 = vld [vmem:[%s13160_s25 + $0x9d0] sm:$0xff]  }
  0x6e   : > { %890 = vst [vmem:[%s13165_s26 + $0x5c0] sm:$0xff] %v889_v56   ;;  %894 = vst [vmem:[%s13165_s26 + $0x5c8] sm:$0xff] %v893_v57   ;;  %v901_v59 = vld [vmem:[%s13160_s25 + $0x9d8] sm:$0xff]   ;;  %v905_v60 = vld [vmem:[%s13160_s25 + $0x9e0] sm:$0xff]  }
  0x6f   : > { %898 = vst [vmem:[%s13165_s26 + $0x5d0] sm:$0xff] %v897_v58   ;;  %902 = vst [vmem:[%s13165_s26 + $0x5d8] sm:$0xff] %v901_v59   ;;  %v909_v61 = vld [vmem:[%s13160_s25 + $0x9e8] sm:$0xff]   ;;  %v913_v62 = vld [vmem:[%s13160_s25 + $0x9f0] sm:$0xff]  }
  0x70   : > { %906 = vst [vmem:[%s13165_s26 + $0x5e0] sm:$0xff] %v905_v60   ;;  %v917_v63 = vld [vmem:[%s13160_s25 + $0x9f8] sm:$0xff]   ;;  %910 = vst [vmem:[%s13165_s26 + $0x5e8] sm:$0xff] %v909_v61   ;;  %v921_v0 = vld [vmem:[%s13160_s25 + $0xc00] sm:$0xff]  }
  0x71   : > { %914 = vst [vmem:[%s13165_s26 + $0x5f0] sm:$0xff] %v913_v62   ;;  %918 = vst [vmem:[%s13165_s26 + $0x5f8] sm:$0xff] %v917_v63   ;;  %v925_v1 = vld [vmem:[%s13160_s25 + $0xc08] sm:$0xff]   ;;  %v929_v2 = vld [vmem:[%s13160_s25 + $0xc10] sm:$0xff]  }
  0x72   : > { %922 = vst [vmem:[%s13165_s26 + $0x600] sm:$0xff] %v921_v0   ;;  %926 = vst [vmem:[%s13165_s26 + $0x608] sm:$0xff] %v925_v1   ;;  %v933_v3 = vld [vmem:[%s13160_s25 + $0xc18] sm:$0xff]   ;;  %v937_v4 = vld [vmem:[%s13160_s25 + $0xc20] sm:$0xff]  }
  0x73   : > { %930 = vst [vmem:[%s13165_s26 + $0x610] sm:$0xff] %v929_v2   ;;  %v941_v5 = vld [vmem:[%s13160_s25 + $0xc28] sm:$0xff]   ;;  %934 = vst [vmem:[%s13165_s26 + $0x618] sm:$0xff] %v933_v3   ;;  %v945_v6 = vld [vmem:[%s13160_s25 + $0xc30] sm:$0xff]  }
  0x74   : > { %938 = vst [vmem:[%s13165_s26 + $0x620] sm:$0xff] %v937_v4   ;;  %942 = vst [vmem:[%s13165_s26 + $0x628] sm:$0xff] %v941_v5   ;;  %v949_v7 = vld [vmem:[%s13160_s25 + $0xc38] sm:$0xff]   ;;  %v953_v8 = vld [vmem:[%s13160_s25 + $0xc40] sm:$0xff]  }
  0x75   : > { %946 = vst [vmem:[%s13165_s26 + $0x630] sm:$0xff] %v945_v6   ;;  %950 = vst [vmem:[%s13165_s26 + $0x638] sm:$0xff] %v949_v7   ;;  %v957_v9 = vld [vmem:[%s13160_s25 + $0xc48] sm:$0xff]   ;;  %v961_v10 = vld [vmem:[%s13160_s25 + $0xc50] sm:$0xff]  }
  0x76   : > { %954 = vst [vmem:[%s13165_s26 + $0x640] sm:$0xff] %v953_v8   ;;  %v965_v11 = vld [vmem:[%s13160_s25 + $0xc58] sm:$0xff]   ;;  %958 = vst [vmem:[%s13165_s26 + $0x648] sm:$0xff] %v957_v9   ;;  %v969_v12 = vld [vmem:[%s13160_s25 + $0xc60] sm:$0xff]  }
  0x77   : > { %962 = vst [vmem:[%s13165_s26 + $0x650] sm:$0xff] %v961_v10   ;;  %966 = vst [vmem:[%s13165_s26 + $0x658] sm:$0xff] %v965_v11   ;;  %v973_v13 = vld [vmem:[%s13160_s25 + $0xc68] sm:$0xff]   ;;  %v977_v14 = vld [vmem:[%s13160_s25 + $0xc70] sm:$0xff]  }
  0x78   : > { %970 = vst [vmem:[%s13165_s26 + $0x660] sm:$0xff] %v969_v12   ;;  %974 = vst [vmem:[%s13165_s26 + $0x668] sm:$0xff] %v973_v13   ;;  %v981_v15 = vld [vmem:[%s13160_s25 + $0xc78] sm:$0xff]   ;;  %v985_v16 = vld [vmem:[%s13160_s25 + $0xc80] sm:$0xff]  }
  0x79   : > { %978 = vst [vmem:[%s13165_s26 + $0x670] sm:$0xff] %v977_v14   ;;  %v989_v17 = vld [vmem:[%s13160_s25 + $0xc88] sm:$0xff]   ;;  %982 = vst [vmem:[%s13165_s26 + $0x678] sm:$0xff] %v981_v15   ;;  %v993_v18 = vld [vmem:[%s13160_s25 + $0xc90] sm:$0xff]  }
  0x7a   : > { %986 = vst [vmem:[%s13165_s26 + $0x680] sm:$0xff] %v985_v16   ;;  %990 = vst [vmem:[%s13165_s26 + $0x688] sm:$0xff] %v989_v17   ;;  %v997_v19 = vld [vmem:[%s13160_s25 + $0xc98] sm:$0xff]   ;;  %v1001_v20 = vld [vmem:[%s13160_s25 + $0xca0] sm:$0xff]  }
  0x7b   : > { %994 = vst [vmem:[%s13165_s26 + $0x690] sm:$0xff] %v993_v18   ;;  %998 = vst [vmem:[%s13165_s26 + $0x698] sm:$0xff] %v997_v19   ;;  %v1005_v21 = vld [vmem:[%s13160_s25 + $0xca8] sm:$0xff]   ;;  %v1009_v22 = vld [vmem:[%s13160_s25 + $0xcb0] sm:$0xff]  }
  0x7c   : > { %1002 = vst [vmem:[%s13165_s26 + $0x6a0] sm:$0xff] %v1001_v20   ;;  %v1013_v23 = vld [vmem:[%s13160_s25 + $0xcb8] sm:$0xff]   ;;  %1006 = vst [vmem:[%s13165_s26 + $0x6a8] sm:$0xff] %v1005_v21   ;;  %v1017_v24 = vld [vmem:[%s13160_s25 + $0xcc0] sm:$0xff]  }
  0x7d   : > { %1010 = vst [vmem:[%s13165_s26 + $0x6b0] sm:$0xff] %v1009_v22   ;;  %1014 = vst [vmem:[%s13165_s26 + $0x6b8] sm:$0xff] %v1013_v23   ;;  %v1021_v25 = vld [vmem:[%s13160_s25 + $0xcc8] sm:$0xff]   ;;  %v1025_v26 = vld [vmem:[%s13160_s25 + $0xcd0] sm:$0xff]  }
  0x7e   : > { %1018 = vst [vmem:[%s13165_s26 + $0x6c0] sm:$0xff] %v1017_v24   ;;  %1022 = vst [vmem:[%s13165_s26 + $0x6c8] sm:$0xff] %v1021_v25   ;;  %v1029_v27 = vld [vmem:[%s13160_s25 + $0xcd8] sm:$0xff]   ;;  %v1033_v28 = vld [vmem:[%s13160_s25 + $0xce0] sm:$0xff]  }
  0x7f   : > { %1026 = vst [vmem:[%s13165_s26 + $0x6d0] sm:$0xff] %v1025_v26   ;;  %v1037_v29 = vld [vmem:[%s13160_s25 + $0xce8] sm:$0xff]   ;;  %1030 = vst [vmem:[%s13165_s26 + $0x6d8] sm:$0xff] %v1029_v27   ;;  %v1041_v30 = vld [vmem:[%s13160_s25 + $0xcf0] sm:$0xff]  }
  0x80   : > { %1034 = vst [vmem:[%s13165_s26 + $0x6e0] sm:$0xff] %v1033_v28   ;;  %1038 = vst [vmem:[%s13165_s26 + $0x6e8] sm:$0xff] %v1037_v29   ;;  %v1045_v31 = vld [vmem:[%s13160_s25 + $0xcf8] sm:$0xff]   ;;  %v1049_v32 = vld [vmem:[%s13160_s25 + $0xd00] sm:$0xff]  }
  0x81   : > { %1042 = vst [vmem:[%s13165_s26 + $0x6f0] sm:$0xff] %v1041_v30   ;;  %1046 = vst [vmem:[%s13165_s26 + $0x6f8] sm:$0xff] %v1045_v31   ;;  %v1053_v33 = vld [vmem:[%s13160_s25 + $0xd08] sm:$0xff]   ;;  %v1057_v34 = vld [vmem:[%s13160_s25 + $0xd10] sm:$0xff]  }
  0x82   : > { %1050 = vst [vmem:[%s13165_s26 + $0x700] sm:$0xff] %v1049_v32   ;;  %v1061_v35 = vld [vmem:[%s13160_s25 + $0xd18] sm:$0xff]   ;;  %1054 = vst [vmem:[%s13165_s26 + $0x708] sm:$0xff] %v1053_v33   ;;  %v1065_v36 = vld [vmem:[%s13160_s25 + $0xd20] sm:$0xff]  }
  0x83   : > { %1058 = vst [vmem:[%s13165_s26 + $0x710] sm:$0xff] %v1057_v34   ;;  %1062 = vst [vmem:[%s13165_s26 + $0x718] sm:$0xff] %v1061_v35   ;;  %v1069_v37 = vld [vmem:[%s13160_s25 + $0xd28] sm:$0xff]   ;;  %v1073_v38 = vld [vmem:[%s13160_s25 + $0xd30] sm:$0xff]  }
  0x84   : > { %1066 = vst [vmem:[%s13165_s26 + $0x720] sm:$0xff] %v1065_v36   ;;  %1070 = vst [vmem:[%s13165_s26 + $0x728] sm:$0xff] %v1069_v37   ;;  %v1077_v39 = vld [vmem:[%s13160_s25 + $0xd38] sm:$0xff]   ;;  %v1081_v40 = vld [vmem:[%s13160_s25 + $0xd40] sm:$0xff]  }
  0x85   : > { %1074 = vst [vmem:[%s13165_s26 + $0x730] sm:$0xff] %v1073_v38   ;;  %v1085_v41 = vld [vmem:[%s13160_s25 + $0xd48] sm:$0xff]   ;;  %1078 = vst [vmem:[%s13165_s26 + $0x738] sm:$0xff] %v1077_v39   ;;  %v1089_v42 = vld [vmem:[%s13160_s25 + $0xd50] sm:$0xff]  }
  0x86   : > { %1082 = vst [vmem:[%s13165_s26 + $0x740] sm:$0xff] %v1081_v40   ;;  %1086 = vst [vmem:[%s13165_s26 + $0x748] sm:$0xff] %v1085_v41   ;;  %v1093_v43 = vld [vmem:[%s13160_s25 + $0xd58] sm:$0xff]   ;;  %v1097_v44 = vld [vmem:[%s13160_s25 + $0xd60] sm:$0xff]  }
  0x87   : > { %1090 = vst [vmem:[%s13165_s26 + $0x750] sm:$0xff] %v1089_v42   ;;  %1094 = vst [vmem:[%s13165_s26 + $0x758] sm:$0xff] %v1093_v43   ;;  %v1101_v45 = vld [vmem:[%s13160_s25 + $0xd68] sm:$0xff]   ;;  %v1105_v46 = vld [vmem:[%s13160_s25 + $0xd70] sm:$0xff]  }
  0x88   : > { %1098 = vst [vmem:[%s13165_s26 + $0x760] sm:$0xff] %v1097_v44   ;;  %v1109_v47 = vld [vmem:[%s13160_s25 + $0xd78] sm:$0xff]   ;;  %1102 = vst [vmem:[%s13165_s26 + $0x768] sm:$0xff] %v1101_v45   ;;  %v1113_v48 = vld [vmem:[%s13160_s25 + $0xd80] sm:$0xff]  }
  0x89   : > { %1106 = vst [vmem:[%s13165_s26 + $0x770] sm:$0xff] %v1105_v46   ;;  %1110 = vst [vmem:[%s13165_s26 + $0x778] sm:$0xff] %v1109_v47   ;;  %v1117_v49 = vld [vmem:[%s13160_s25 + $0xd88] sm:$0xff]   ;;  %v1121_v50 = vld [vmem:[%s13160_s25 + $0xd90] sm:$0xff]  }
  0x8a   : > { %1114 = vst [vmem:[%s13165_s26 + $0x780] sm:$0xff] %v1113_v48   ;;  %1118 = vst [vmem:[%s13165_s26 + $0x788] sm:$0xff] %v1117_v49   ;;  %v1125_v51 = vld [vmem:[%s13160_s25 + $0xd98] sm:$0xff]   ;;  %v1129_v52 = vld [vmem:[%s13160_s25 + $0xda0] sm:$0xff]  }
  0x8b   : > { %1122 = vst [vmem:[%s13165_s26 + $0x790] sm:$0xff] %v1121_v50   ;;  %v1133_v53 = vld [vmem:[%s13160_s25 + $0xda8] sm:$0xff]   ;;  %1126 = vst [vmem:[%s13165_s26 + $0x798] sm:$0xff] %v1125_v51   ;;  %v1137_v54 = vld [vmem:[%s13160_s25 + $0xdb0] sm:$0xff]  }
  0x8c   : > { %1130 = vst [vmem:[%s13165_s26 + $0x7a0] sm:$0xff] %v1129_v52   ;;  %1134 = vst [vmem:[%s13165_s26 + $0x7a8] sm:$0xff] %v1133_v53   ;;  %v1141_v55 = vld [vmem:[%s13160_s25 + $0xdb8] sm:$0xff]   ;;  %v1145_v56 = vld [vmem:[%s13160_s25 + $0xdc0] sm:$0xff]  }
  0x8d   : > { %1138 = vst [vmem:[%s13165_s26 + $0x7b0] sm:$0xff] %v1137_v54   ;;  %1142 = vst [vmem:[%s13165_s26 + $0x7b8] sm:$0xff] %v1141_v55   ;;  %v1149_v57 = vld [vmem:[%s13160_s25 + $0xdc8] sm:$0xff]   ;;  %v1153_v58 = vld [vmem:[%s13160_s25 + $0xdd0] sm:$0xff]  }
  0x8e   : > { %1146 = vst [vmem:[%s13165_s26 + $0x7c0] sm:$0xff] %v1145_v56   ;;  %v1157_v59 = vld [vmem:[%s13160_s25 + $0xdd8] sm:$0xff]   ;;  %1150 = vst [vmem:[%s13165_s26 + $0x7c8] sm:$0xff] %v1149_v57   ;;  %v1161_v60 = vld [vmem:[%s13160_s25 + $0xde0] sm:$0xff]  }
  0x8f   : > { %1154 = vst [vmem:[%s13165_s26 + $0x7d0] sm:$0xff] %v1153_v58   ;;  %1158 = vst [vmem:[%s13165_s26 + $0x7d8] sm:$0xff] %v1157_v59   ;;  %v1165_v61 = vld [vmem:[%s13160_s25 + $0xde8] sm:$0xff]   ;;  %v1169_v62 = vld [vmem:[%s13160_s25 + $0xdf0] sm:$0xff]  }
  0x90   : > { %1162 = vst [vmem:[%s13165_s26 + $0x7e0] sm:$0xff] %v1161_v60   ;;  %1166 = vst [vmem:[%s13165_s26 + $0x7e8] sm:$0xff] %v1165_v61   ;;  %v1173_v63 = vld [vmem:[%s13160_s25 + $0xdf8] sm:$0xff]  }
  0x91   : > { %1170 = vst [vmem:[%s13165_s26 + $0x7f0] sm:$0xff] %v1169_v62   ;;  %1174 = vst [vmem:[%s13165_s26 + $0x7f8] sm:$0xff] %v1173_v63  }
  0x92 PF: > { %p10462_p5 = scmp.ge.s32.totalorder %s13104_s14, 1  ;;  %p4300_p6 = scmp.lt.s32.totalorder %s13104_s14, 3 }
  0x94   : > { %p4301_p7 = pnand %p10462_p5, %p4300_p6 }
  0x96   : > { %4304 = sbr.rel (%p4301_p7) target bundleno = 896 (0x380), region = 80 }
  0x9d   : > { %v12823_v0 = vld [vmem:[%s15572_s1] sm:$0xff]   ;;  %s4307_s29 = sand.u32 1, %s13096_s12   ;;  %v12824_v1 = vld [vmem:[%s15572_s1 + $0x8] sm:$0xff]   ;;  %vm4802_vm0 = vcmask 261120   ;;  %s10464_s7 = sshll.u32 %s10455_s15, 7 }
  0x9e   : > { %s10463_s5 = sshll.u32 %s4307_s29, 11  ;;  %12271 = vmatprep.subr.bf16.mxu0 %v12823_v0  ;;  %12403 = vmatprep.subr.bf16.mxu1 %v12823_v0  ;;  %p4332_p8 = scmp.lt.s32.totalorder %s10464_s7, 255 }
  0x9f   : > { %12272 = vmatpush3.bf16.msra.mxu0 %v12823_v0  ;;  %12404 = vmatpush3.bf16.msra.mxu1 %v12823_v0  ;;  %s13685_s6 = scalar_lea.vmem [#allocation2], %s10463_s5 }
  0xa0   : > { %v12825_v2 = vld [vmem:[%s13685_s6] sm:$0xff]   ;;  %12273 = vmatprep.subr.bf16.mxu0 %v12824_v1  ;;  %12405 = vmatprep.subr.bf16.mxu1 %v12824_v1  ;;  %v12827_v4 = vld [vmem:[%s13685_s6 + $0x8] sm:$0xff]   ;;  %v12829_v6 = vld [vmem:[%s13685_s6 + $0x10] sm:$0xff]   ;;  %s16340_s7 = smov (!%p4332_p8, %s10464_s7), 255 }
  0xa1   : > { %v12826_v3 = vld [vmem:[%s13685_s6 + $0x200] sm:$0xff]   ;;  %12275 = vmatprep.mubr.msk.bf16.mxu0 %vm4802_vm0, %v12825_v2  ;;  %v12828_v5 = vld [vmem:[%s13685_s6 + $0x208] sm:$0xff]   ;;  %v12830_v7 = vld [vmem:[%s13685_s6 + $0x210] sm:$0xff]   ;;  %s10465_s10 = sshll.u32 %s16340_s7, 2 }
  0xa2   : > { %12407 = vmatprep.mubr.msk.bf16.mxu1 %vm4802_vm0, %v12826_v3  ;;  %v12831_v8 = vld [vmem:[%s13685_s6 + $0x18] sm:$0xff]   ;;  %v12833_v10 = vld [vmem:[%s13685_s6 + $0x20] sm:$0xff]   ;;  %v12835_v12 = vld [vmem:[%s13685_s6 + $0x28] sm:$0xff]   ;;  %s14971_s14 = scalar_lea.vmem %s15574_s3, %s10465_s10 }
  0xa3   : > { %12274 = vmatpush3.bf16.msra.mxu0 %v12824_v1  ;;  %12406 = vmatpush3.bf16.msra.mxu1 %v12824_v1  ;;  %v12832_v9 = vld [vmem:[%s13685_s6 + $0x218] sm:$0xff]   ;;  %v12834_v11 = vld [vmem:[%s13685_s6 + $0x220] sm:$0xff]   ;;  %v12836_v13 = vld [vmem:[%s13685_s6 + $0x228] sm:$0xff]  }
  0xa4   : > { %12535 = vmatprep.subr.bf16.mxu0 %v12823_v0  ;;  %12667 = vmatprep.subr.bf16.mxu1 %v12823_v0  ;;  %v12837_v14 = vld [vmem:[%s13685_s6 + $0x30] sm:$0xff]   ;;  %v12839_v16 = vld [vmem:[%s13685_s6 + $0x38] sm:$0xff]   ;;  %v12841_v18 = vld [vmem:[%s13685_s6 + $0x40] sm:$0xff]  }
  0xa5   : > { %v12838_v15 = vld [vmem:[%s13685_s6 + $0x230] sm:$0xff]   ;;  %v12840_v17 = vld [vmem:[%s13685_s6 + $0x238] sm:$0xff]   ;;  %v12842_v19 = vld [vmem:[%s13685_s6 + $0x240] sm:$0xff]  }
  0xa6   : > { %12276 = vmatmul.mubr.msk.bf16.vlgmr.msra.gmra.mrb[0].mxu0 %vm4802_vm0, %v12827_v4  ;;  %12408 = vmatmul.mubr.msk.bf16.vlgmr.msra.gmra.mrb[0].mxu1 %vm4802_vm0, %v12828_v5  ;;  %v12843_v20 = vld [vmem:[%s13685_s6 + $0x48] sm:$0xff]   ;;  %v12845_v22 = vld [vmem:[%s13685_s6 + $0x50] sm:$0xff]   ;;  %v12847_v24 = vld [vmem:[%s13685_s6 + $0x58] sm:$0xff]  }
  0xa7   : > { %12536 = vmatpush3.bf16.msra.mxu0 %v12823_v0  ;;  %12668 = vmatpush3.bf16.msra.mxu1 %v12823_v0  ;;  %v12844_v21 = vld [vmem:[%s13685_s6 + $0x248] sm:$0xff]   ;;  %v12846_v23 = vld [vmem:[%s13685_s6 + $0x250] sm:$0xff]   ;;  %v12848_v25 = vld [vmem:[%s13685_s6 + $0x258] sm:$0xff]  }
  0xa8   : > { %12279 = vmatprep.mubr.msk.bf16.mxu0 %vm4802_vm0, %v12829_v6  ;;  %12411 = vmatprep.mubr.msk.bf16.mxu1 %vm4802_vm0, %v12830_v7  ;;  %v12849_v26 = vld [vmem:[%s13685_s6 + $0x60] sm:$0xff]   ;;  %v12851_v28 = vld [vmem:[%s13685_s6 + $0x68] sm:$0xff]   ;;  %v12853_v30 = vld [vmem:[%s13685_s6 + $0x70] sm:$0xff]  }
  0xa9   : > { %12537 = vmatprep.subr.bf16.mxu0 %v12824_v1  ;;  %12669 = vmatprep.subr.bf16.mxu1 %v12824_v1  ;;  %v12850_v27 = vld [vmem:[%s13685_s6 + $0x260] sm:$0xff]   ;;  %v12852_v29 = vld [vmem:[%s13685_s6 + $0x268] sm:$0xff]   ;;  %v12854_v31 = vld [vmem:[%s13685_s6 + $0x270] sm:$0xff]  }
  0xaa   : > { %v12855_v32 = vld [vmem:[%s13685_s6 + $0x78] sm:$0xff]   ;;  %v12857_v34 = vld [vmem:[%s13685_s6 + $0x80] sm:$0xff]   ;;  %v12859_v36 = vld [vmem:[%s13685_s6 + $0x88] sm:$0xff]  }
  0xab   : > { %12538 = vmatpush3.bf16.msra.mxu0 %v12824_v1  ;;  %12670 = vmatpush3.bf16.msra.mxu1 %v12824_v1  ;;  %v12856_v33 = vld [vmem:[%s13685_s6 + $0x278] sm:$0xff]   ;;  %v12858_v35 = vld [vmem:[%s13685_s6 + $0x280] sm:$0xff]   ;;  %v12860_v37 = vld [vmem:[%s13685_s6 + $0x288] sm:$0xff]  }
  0xac   : > { %v12861_v38 = vld [vmem:[%s13685_s6 + $0x90] sm:$0xff]   ;;  %v12863_v40 = vld [vmem:[%s13685_s6 + $0x98] sm:$0xff]   ;;  %v12865_v42 = vld [vmem:[%s13685_s6 + $0xa0] sm:$0xff]  }
  0xad   : > { %v12862_v39 = vld [vmem:[%s13685_s6 + $0x290] sm:$0xff]   ;;  %v12864_v41 = vld [vmem:[%s13685_s6 + $0x298] sm:$0xff]   ;;  %v12866_v43 = vld [vmem:[%s13685_s6 + $0x2a0] sm:$0xff]  }
  0xae   : > { %12280 = vmatmul.mubr.msk.bf16.gmra.mrb[4].mxu0 %vm4802_vm0, %v12831_v8  ;;  %12412 = vmatmul.mubr.msk.bf16.gmra.mrb[4].mxu1 %vm4802_vm0, %v12832_v9  ;;  %v12867_v44 = vld [vmem:[%s13685_s6 + $0xa8] sm:$0xff]   ;;  %v12869_v46 = vld [vmem:[%s13685_s6 + $0xb0] sm:$0xff]   ;;  %v12871_v48 = vld [vmem:[%s13685_s6 + $0xb8] sm:$0xff]  }
  0xaf   : > { %12283 = vmatprep.mubr.msk.bf16.mxu0 %vm4802_vm0, %v12833_v10  ;;  %12415 = vmatprep.mubr.msk.bf16.mxu1 %vm4802_vm0, %v12834_v11  ;;  %v12868_v45 = vld [vmem:[%s13685_s6 + $0x2a8] sm:$0xff]   ;;  %v12870_v47 = vld [vmem:[%s13685_s6 + $0x2b0] sm:$0xff]   ;;  %v12872_v49 = vld [vmem:[%s13685_s6 + $0x2b8] sm:$0xff]  }
  0xb0   : > { %v12873_v50 = vld [vmem:[%s13685_s6 + $0xc0] sm:$0xff]   ;;  %v12875_v52 = vld [vmem:[%s13685_s6 + $0xc8] sm:$0xff]   ;;  %v12877_v54 = vld [vmem:[%s13685_s6 + $0xd0] sm:$0xff]  }
  0xb1   : > { %v12874_v51 = vld [vmem:[%s13685_s6 + $0x2c0] sm:$0xff]   ;;  %v12876_v53 = vld [vmem:[%s13685_s6 + $0x2c8] sm:$0xff]   ;;  %v12878_v55 = vld [vmem:[%s13685_s6 + $0x2d0] sm:$0xff]  }
  0xb2   : > { %v12879_v56 = vld [vmem:[%s13685_s6 + $0xd8] sm:$0xff]   ;;  %v12881_v58 = vld [vmem:[%s13685_s6 + $0xe0] sm:$0xff]   ;;  %v12883_v60 = vld [vmem:[%s13685_s6 + $0xe8] sm:$0xff]  }
  0xb3   : > { %v12880_v57 = vld [vmem:[%s13685_s6 + $0x2d8] sm:$0xff]   ;;  %v12882_v59 = vld [vmem:[%s13685_s6 + $0x2e0] sm:$0xff]   ;;  %v12884_v61 = vld [vmem:[%s13685_s6 + $0x2e8] sm:$0xff]  }
  0xb4   : > { %v12885_v62 = vld [vmem:[%s13685_s6 + $0xf0] sm:$0xff]   ;;  %v12887_v0 = vld [vmem:[%s13685_s6 + $0xf8] sm:$0xff]   ;;  %v12889_v2 = vld [vmem:[%s13685_s6 + $0x100] sm:$0xff]  }
  0xb5   : > { %v12886_v63 = vld [vmem:[%s13685_s6 + $0x2f0] sm:$0xff]   ;;  %v12888_v1 = vld [vmem:[%s13685_s6 + $0x2f8] sm:$0xff]   ;;  %v12890_v3 = vld [vmem:[%s13685_s6 + $0x300] sm:$0xff]  }
  0xb6   : > { %12284 = vmatmul.mubr.msk.bf16.gmra.mrb[8].mxu0 %vm4802_vm0, %v12835_v12  ;;  %12416 = vmatmul.mubr.msk.bf16.gmra.mrb[8].mxu1 %vm4802_vm0, %v12836_v13  ;;  %v12891_v4 = vld [vmem:[%s13685_s6 + $0x108] sm:$0xff]   ;;  %v12893_v6 = vld [vmem:[%s13685_s6 + $0x110] sm:$0xff]   ;;  %v12895_v8 = vld [vmem:[%s13685_s6 + $0x118] sm:$0xff]  }
  0xb7   : > { %12287 = vmatprep.mubr.msk.bf16.mxu0 %vm4802_vm0, %v12837_v14  ;;  %12419 = vmatprep.mubr.msk.bf16.mxu1 %vm4802_vm0, %v12838_v15  ;;  %v12892_v5 = vld [vmem:[%s13685_s6 + $0x308] sm:$0xff]   ;;  %v12894_v7 = vld [vmem:[%s13685_s6 + $0x310] sm:$0xff]   ;;  %v12896_v9 = vld [vmem:[%s13685_s6 + $0x318] sm:$0xff]  }
  0xb8   : > { %v12897_v10 = vld [vmem:[%s13685_s6 + $0x120] sm:$0xff]   ;;  %v12899_v12 = vld [vmem:[%s13685_s6 + $0x128] sm:$0xff]   ;;  %v12901_v14 = vld [vmem:[%s13685_s6 + $0x130] sm:$0xff]  }
  0xb9   : > { %v12898_v11 = vld [vmem:[%s13685_s6 + $0x320] sm:$0xff]   ;;  %v12900_v13 = vld [vmem:[%s13685_s6 + $0x328] sm:$0xff]   ;;  %v12902_v15 = vld [vmem:[%s13685_s6 + $0x330] sm:$0xff]  }
  0xbe   : > { %12288 = vmatmul.mubr.msk.bf16.gmra.mrb[12].mxu0 %vm4802_vm0, %v12839_v16  ;;  %12420 = vmatmul.mubr.msk.bf16.gmra.mrb[12].mxu1 %vm4802_vm0, %v12840_v17  ;;  %v12903_v16 = vld [vmem:[%s13685_s6 + $0x138] sm:$0xff]  }
  0xbf   : > { %12291 = vmatprep.mubr.msk.bf16.mxu0 %vm4802_vm0, %v12841_v18  ;;  %12423 = vmatprep.mubr.msk.bf16.mxu1 %vm4802_vm0, %v12842_v19  ;;  %v12904_v17 = vld [vmem:[%s13685_s6 + $0x338] sm:$0xff]   ;;  %v12905_v18 = vld [vmem:[%s13685_s6 + $0x140] sm:$0xff]  }
  0xc0   : > { %v12906_v19 = vld [vmem:[%s13685_s6 + $0x340] sm:$0xff]  }
  0xc6   : > { %12292 = vmatmul.mubr.msk.bf16.gmra.mrb[16].mxu0 %vm4802_vm0, %v12843_v20  ;;  %12424 = vmatmul.mubr.msk.bf16.gmra.mrb[16].mxu1 %vm4802_vm0, %v12844_v21  ;;  %v12907_v20 = vld [vmem:[%s13685_s6 + $0x148] sm:$0xff]  }
  0xc7   : > { %12295 = vmatprep.mubr.msk.bf16.mxu0 %vm4802_vm0, %v12845_v22  ;;  %12427 = vmatprep.mubr.msk.bf16.mxu1 %vm4802_vm0, %v12846_v23  ;;  %v12908_v21 = vld [vmem:[%s13685_s6 + $0x348] sm:$0xff]   ;;  %v12909_v22 = vld [vmem:[%s13685_s6 + $0x150] sm:$0xff]  }
  0xc8   : > { %v12910_v23 = vld [vmem:[%s13685_s6 + $0x350] sm:$0xff]  }
  0xce   : > { %12296 = vmatmul.mubr.msk.bf16.gmra.mrb[20].mxu0 %vm4802_vm0, %v12847_v24  ;;  %12428 = vmatmul.mubr.msk.bf16.gmra.mrb[20].mxu1 %vm4802_vm0, %v12848_v25  ;;  %v12911_v24 = vld [vmem:[%s13685_s6 + $0x158] sm:$0xff]  }
  0xcf   : > { %12299 = vmatprep.mubr.msk.bf16.mxu0 %vm4802_vm0, %v12849_v26  ;;  %12431 = vmatprep.mubr.msk.bf16.mxu1 %vm4802_vm0, %v12850_v27  ;;  %v12912_v25 = vld [vmem:[%s13685_s6 + $0x358] sm:$0xff]   ;;  %v12913_v26 = vld [vmem:[%s13685_s6 + $0x160] sm:$0xff]  }
  0xd0   : > { %v12914_v27 = vld [vmem:[%s13685_s6 + $0x360] sm:$0xff]  }
  0xd6   : > { %12300 = vmatmul.mubr.msk.bf16.gmra.mrb[24].mxu0 %vm4802_vm0, %v12851_v28  ;;  %12432 = vmatmul.mubr.msk.bf16.gmra.mrb[24].mxu1 %vm4802_vm0, %v12852_v29  ;;  %v12915_v28 = vld [vmem:[%s13685_s6 + $0x168] sm:$0xff]  }
  0xd7   : > { %12303 = vmatprep.mubr.msk.bf16.mxu0 %vm4802_vm0, %v12853_v30  ;;  %12435 = vmatprep.mubr.msk.bf16.mxu1 %vm4802_vm0, %v12854_v31  ;;  %v12916_v29 = vld [vmem:[%s13685_s6 + $0x368] sm:$0xff]   ;;  %v12917_v30 = vld [vmem:[%s13685_s6 + $0x170] sm:$0xff]  }
  0xd8   : > { %v12918_v31 = vld [vmem:[%s13685_s6 + $0x370] sm:$0xff]  }
  0xde   : > { %12304 = vmatmul.mubr.msk.bf16.gmra.mrb[28].mxu0 %vm4802_vm0, %v12855_v32  ;;  %12436 = vmatmul.mubr.msk.bf16.gmra.mrb[28].mxu1 %vm4802_vm0, %v12856_v33  ;;  %v12919_v32 = vld [vmem:[%s13685_s6 + $0x178] sm:$0xff]  }
  0xdf   : > { %12307 = vmatprep.mubr.msk.bf16.mxu0 %vm4802_vm0, %v12857_v34  ;;  %12439 = vmatprep.mubr.msk.bf16.mxu1 %vm4802_vm0, %v12858_v35  ;;  %v12920_v33 = vld [vmem:[%s13685_s6 + $0x378] sm:$0xff]   ;;  %v12921_v34 = vld [vmem:[%s13685_s6 + $0x180] sm:$0xff]  }
  0xe0   : > { %v12922_v35 = vld [vmem:[%s13685_s6 + $0x380] sm:$0xff]  }
  0xe6   : > { %12308 = vmatmul.mubr.msk.bf16.gmra.mrb[32].mxu0 %vm4802_vm0, %v12859_v36  ;;  %12440 = vmatmul.mubr.msk.bf16.gmra.mrb[32].mxu1 %vm4802_vm0, %v12860_v37  ;;  %v12923_v36 = vld [vmem:[%s13685_s6 + $0x188] sm:$0xff]  }
  0xe7   : > { %12311 = vmatprep.mubr.msk.bf16.mxu0 %vm4802_vm0, %v12861_v38  ;;  %12443 = vmatprep.mubr.msk.bf16.mxu1 %vm4802_vm0, %v12862_v39  ;;  %v12924_v37 = vld [vmem:[%s13685_s6 + $0x388] sm:$0xff]   ;;  %v12925_v38 = vld [vmem:[%s13685_s6 + $0x190] sm:$0xff]  }
  0xe8   : > { %v12926_v39 = vld [vmem:[%s13685_s6 + $0x390] sm:$0xff]  }
  0xee   : > { %12312 = vmatmul.mubr.msk.bf16.gmra.mrb[36].mxu0 %vm4802_vm0, %v12863_v40  ;;  %12444 = vmatmul.mubr.msk.bf16.gmra.mrb[36].mxu1 %vm4802_vm0, %v12864_v41  ;;  %v12927_v40 = vld [vmem:[%s13685_s6 + $0x198] sm:$0xff]  }
  0xef   : > { %12315 = vmatprep.mubr.msk.bf16.mxu0 %vm4802_vm0, %v12865_v42  ;;  %12447 = vmatprep.mubr.msk.bf16.mxu1 %vm4802_vm0, %v12866_v43  ;;  %v12928_v41 = vld [vmem:[%s13685_s6 + $0x398] sm:$0xff]   ;;  %v12929_v42 = vld [vmem:[%s13685_s6 + $0x1a0] sm:$0xff]  }
  0xf0   : > { %v12930_v43 = vld [vmem:[%s13685_s6 + $0x3a0] sm:$0xff]  }
  0xf6   : > { %12316 = vmatmul.mubr.msk.bf16.gmra.mrb[40].mxu0 %vm4802_vm0, %v12867_v44  ;;  %12448 = vmatmul.mubr.msk.bf16.gmra.mrb[40].mxu1 %vm4802_vm0, %v12868_v45  ;;  %v12931_v44 = vld [vmem:[%s13685_s6 + $0x1a8] sm:$0xff]  }
  0xf7   : > { %12319 = vmatprep.mubr.msk.bf16.mxu0 %vm4802_vm0, %v12869_v46  ;;  %12451 = vmatprep.mubr.msk.bf16.mxu1 %vm4802_vm0, %v12870_v47  ;;  %v12932_v45 = vld [vmem:[%s13685_s6 + $0x3a8] sm:$0xff]   ;;  %v12933_v46 = vld [vmem:[%s13685_s6 + $0x1b0] sm:$0xff]  }
  0xf8   : > { %v12934_v47 = vld [vmem:[%s13685_s6 + $0x3b0] sm:$0xff]  }
  0xfe   : > { %12320 = vmatmul.mubr.msk.bf16.gmra.mrb[44].mxu0 %vm4802_vm0, %v12871_v48  ;;  %12452 = vmatmul.mubr.msk.bf16.gmra.mrb[44].mxu1 %vm4802_vm0, %v12872_v49  ;;  %v12935_v48 = vld [vmem:[%s13685_s6 + $0x1b8] sm:$0xff]  }
  0xff   : > { %12323 = vmatprep.mubr.msk.bf16.mxu0 %vm4802_vm0, %v12873_v50  ;;  %12455 = vmatprep.mubr.msk.bf16.mxu1 %vm4802_vm0, %v12874_v51  ;;  %v12936_v49 = vld [vmem:[%s13685_s6 + $0x3b8] sm:$0xff]  }
 0x106   : > { %12324 = vmatmul.mubr.msk.bf16.gmra.mrb[48].mxu0 %vm4802_vm0, %v12875_v52  ;;  %12456 = vmatmul.mubr.msk.bf16.gmra.mrb[48].mxu1 %vm4802_vm0, %v12876_v53 }
 0x107   : > { %12327 = vmatprep.mubr.msk.bf16.mxu0 %vm4802_vm0, %v12877_v54  ;;  %12459 = vmatprep.mubr.msk.bf16.mxu1 %vm4802_vm0, %v12878_v55  ;;  %v12963_v55 = vld [vmem:[%s13685_s6 + $0x428] sm:$0xff]  }
 0x10e   : > { %12328 = vmatmul.mubr.msk.bf16.gmra.mrb[52].mxu0 %vm4802_vm0, %v12879_v56  ;;  %12460 = vmatmul.mubr.msk.bf16.gmra.mrb[52].mxu1 %vm4802_vm0, %v12880_v57 }
 0x10f   : > { %12331 = vmatprep.mubr.msk.bf16.mxu0 %vm4802_vm0, %v12881_v58  ;;  %12463 = vmatprep.mubr.msk.bf16.mxu1 %vm4802_vm0, %v12882_v59  ;;  %v12937_v58 = vld [vmem:[%s13685_s6 + $0x1c0] sm:$0xff]  }
 0x110   : > { %v12938_v59 = vld [vmem:[%s13685_s6 + $0x3c0] sm:$0xff]  }
 0x116   : > { %12332 = vmatmul.mubr.msk.bf16.gmra.mrb[56].mxu0 %vm4802_vm0, %v12883_v60  ;;  %12464 = vmatmul.mubr.msk.bf16.gmra.mrb[56].mxu1 %vm4802_vm0, %v12884_v61 }
 0x117   : > { %12335 = vmatprep.mubr.msk.bf16.mxu0 %vm4802_vm0, %v12885_v62  ;;  %12467 = vmatprep.mubr.msk.bf16.mxu1 %vm4802_vm0, %v12886_v63 }
 0x11e   : > { %12336 = vmatmul.mubr.msk.bf16.gmra.mrb[60].mxu0 %vm4802_vm0, %v12887_v0  ;;  %12468 = vmatmul.mubr.msk.bf16.gmra.mrb[60].mxu1 %vm4802_vm0, %v12888_v1  ;;  %v12939_v0 = vld [vmem:[%s13685_s6 + $0x1c8] sm:$0xff]  }
 0x11f   : > { %12339 = vmatprep.mubr.msk.bf16.mxu0 %vm4802_vm0, %v12889_v2  ;;  %12471 = vmatprep.mubr.msk.bf16.mxu1 %vm4802_vm0, %v12890_v3  ;;  %v12940_v1 = vld [vmem:[%s13685_s6 + $0x3c8] sm:$0xff]  }
 0x126   : > { %12340 = vmatmul.mubr.msk.bf16.gmra.mrb[64].mxu0 %vm4802_vm0, %v12891_v4  ;;  %12472 = vmatmul.mubr.msk.bf16.gmra.mrb[64].mxu1 %vm4802_vm0, %v12892_v5  ;;  %v12962_v4 = vld [vmem:[%s13685_s6 + $0x620] sm:$0xff]  }
 0x127   : > { %12343 = vmatprep.mubr.msk.bf16.mxu0 %vm4802_vm0, %v12893_v6  ;;  %12475 = vmatprep.mubr.msk.bf16.mxu1 %vm4802_vm0, %v12894_v7  ;;  %v12960_v7 = vld [vmem:[%s13685_s6 + $0x618] sm:$0xff]  }
 0x12e   : > { %12344 = vmatmul.mubr.msk.bf16.gmra.mrb[68].mxu0 %vm4802_vm0, %v12895_v8  ;;  %12476 = vmatmul.mubr.msk.bf16.gmra.mrb[68].mxu1 %vm4802_vm0, %v12896_v9 }
 0x12f   : > { %12347 = vmatprep.mubr.msk.bf16.mxu0 %vm4802_vm0, %v12897_v10  ;;  %12479 = vmatprep.mubr.msk.bf16.mxu1 %vm4802_vm0, %v12898_v11  ;;  %v12941_v10 = vld [vmem:[%s13685_s6 + $0x1d0] sm:$0xff]  }
 0x130   : > { %v12942_v11 = vld [vmem:[%s13685_s6 + $0x3d0] sm:$0xff]  }
 0x136   : > { %12348 = vmatmul.mubr.msk.bf16.gmra.mrb[72].mxu0 %vm4802_vm0, %v12899_v12  ;;  %12480 = vmatmul.mubr.msk.bf16.gmra.mrb[72].mxu1 %vm4802_vm0, %v12900_v13 }
 0x137   : > { %12351 = vmatprep.mubr.msk.bf16.mxu0 %vm4802_vm0, %v12901_v14  ;;  %12483 = vmatprep.mubr.msk.bf16.mxu1 %vm4802_vm0, %v12902_v15 }
 0x13e   : > { %12352 = vmatmul.mubr.msk.bf16.gmra.mrb[76].mxu0 %vm4802_vm0, %v12903_v16  ;;  %12484 = vmatmul.mubr.msk.bf16.gmra.mrb[76].mxu1 %vm4802_vm0, %v12904_v17 }
 0x13f   : > { %12355 = vmatprep.mubr.msk.bf16.mxu0 %vm4802_vm0, %v12905_v18  ;;  %12487 = vmatprep.mubr.msk.bf16.mxu1 %vm4802_vm0, %v12906_v19 }
 0x146   : > { %12356 = vmatmul.mubr.msk.bf16.gmra.mrb[80].mxu0 %vm4802_vm0, %v12907_v20  ;;  %12488 = vmatmul.mubr.msk.bf16.gmra.mrb[80].mxu1 %vm4802_vm0, %v12908_v21  ;;  %v12943_v21 = vld [vmem:[%s13685_s6 + $0x1d8] sm:$0xff]  }
 0x147   : > { %12359 = vmatprep.mubr.msk.bf16.mxu0 %vm4802_vm0, %v12909_v22  ;;  %12491 = vmatprep.mubr.msk.bf16.mxu1 %vm4802_vm0, %v12910_v23  ;;  %v12944_v22 = vld [vmem:[%s13685_s6 + $0x3d8] sm:$0xff]  }
 0x148   : > { %v12959_v23 = vld [vmem:[%s13685_s6 + $0x418] sm:$0xff]  }
 0x14e   : > { %12360 = vmatmul.mubr.msk.bf16.gmra.mrb[84].mxu0 %vm4802_vm0, %v12911_v24  ;;  %12492 = vmatmul.mubr.msk.bf16.gmra.mrb[84].mxu1 %vm4802_vm0, %v12912_v25 }
 0x14f   : > { %12363 = vmatprep.mubr.msk.bf16.mxu0 %vm4802_vm0, %v12913_v26  ;;  %12495 = vmatprep.mubr.msk.bf16.mxu1 %vm4802_vm0, %v12914_v27  ;;  %v12945_v26 = vld [vmem:[%s13685_s6 + $0x1e0] sm:$0xff]  }
 0x150   : > { %v12946_v27 = vld [vmem:[%s13685_s6 + $0x3e0] sm:$0xff]  }
 0x156   : > { %12364 = vmatmul.mubr.msk.bf16.gmra.mrb[88].mxu0 %vm4802_vm0, %v12915_v28  ;;  %12496 = vmatmul.mubr.msk.bf16.gmra.mrb[88].mxu1 %vm4802_vm0, %v12916_v29 }
 0x157   : > { %12367 = vmatprep.mubr.msk.bf16.mxu0 %vm4802_vm0, %v12917_v30  ;;  %12499 = vmatprep.mubr.msk.bf16.mxu1 %vm4802_vm0, %v12918_v31 }
 0x15e   : > { %12368 = vmatmul.mubr.msk.bf16.gmra.mrb[92].mxu0 %vm4802_vm0, %v12919_v32  ;;  %12500 = vmatmul.mubr.msk.bf16.gmra.mrb[92].mxu1 %vm4802_vm0, %v12920_v33 }
 0x15f   : > { %12371 = vmatprep.mubr.msk.bf16.mxu0 %vm4802_vm0, %v12921_v34  ;;  %12503 = vmatprep.mubr.msk.bf16.mxu1 %vm4802_vm0, %v12922_v35  ;;  %v12958_v34 = vld [vmem:[%s13685_s6 + $0x610] sm:$0xff]  }
 0x166   : > { %12372 = vmatmul.mubr.msk.bf16.gmra.mrb[96].mxu0 %vm4802_vm0, %v12923_v36  ;;  %12504 = vmatmul.mubr.msk.bf16.gmra.mrb[96].mxu1 %vm4802_vm0, %v12924_v37  ;;  %v12947_v37 = vld [vmem:[%s13685_s6 + $0x1e8] sm:$0xff]  }
 0x167   : > { %12375 = vmatprep.mubr.msk.bf16.mxu0 %vm4802_vm0, %v12925_v38  ;;  %12507 = vmatprep.mubr.msk.bf16.mxu1 %vm4802_vm0, %v12926_v39  ;;  %v12948_v38 = vld [vmem:[%s13685_s6 + $0x3e8] sm:$0xff]  }
 0x168   : > { %v12956_v39 = vld [vmem:[%s13685_s6 + $0x608] sm:$0xff]  }
 0x16e   : > { %12376 = vmatmul.mubr.msk.bf16.gmra.mrb[100].mxu0 %vm4802_vm0, %v12927_v40  ;;  %12508 = vmatmul.mubr.msk.bf16.gmra.mrb[100].mxu1 %vm4802_vm0, %v12928_v41 }
 0x16f   : > { %12379 = vmatprep.mubr.msk.bf16.mxu0 %vm4802_vm0, %v12929_v42  ;;  %12511 = vmatprep.mubr.msk.bf16.mxu1 %vm4802_vm0, %v12930_v43  ;;  %v12949_v42 = vld [vmem:[%s13685_s6 + $0x1f0] sm:$0xff]  }
 0x170   : > { %v12950_v43 = vld [vmem:[%s13685_s6 + $0x3f0] sm:$0xff]  }
 0x176   : > { %12380 = vmatmul.mubr.msk.bf16.gmra.mrb[104].mxu0 %vm4802_vm0, %v12931_v44  ;;  %12512 = vmatmul.mubr.msk.bf16.gmra.mrb[104].mxu1 %vm4802_vm0, %v12932_v45 }
 0x177   : > { %12383 = vmatprep.mubr.msk.bf16.mxu0 %vm4802_vm0, %v12933_v46  ;;  %12515 = vmatprep.mubr.msk.bf16.mxu1 %vm4802_vm0, %v12934_v47 }
 0x179   : > { %v13909_v50 = vpop.f32.mrb[0].mxu0  ;;  %v13911_v51 = vpop.f32.mrb[0].mxu1 }
 0x17a   : > { %v13915_v53 = vpop.f32.mrb[1].mxu0  ;;  %v13917_v54 = vpop.f32.mrb[1].mxu1 }
 0x17b   : > { %v13921_v56 = vpop.f32.mrb[2].mxu0  ;;  %v13923_v57 = vpop.f32.mrb[2].mxu1 }
 0x17c   : > { %v13929_v61 = vpop.f32.mrb[3].mxu0  ;;  %v13931_v62 = vpop.f32.mrb[3].mxu1 }
 0x17e   : > { %12384 = vmatmul.mubr.msk.bf16.gmra.mrb[108].mxu0 %vm4802_vm0, %v12935_v48  ;;  %12516 = vmatmul.mubr.msk.bf16.gmra.mrb[108].mxu1 %vm4802_vm0, %v12936_v49 }
 0x17f   : > { %12387 = vmatprep.mubr.msk.bf16.mxu0 %vm4802_vm0, %v12937_v58  ;;  %12519 = vmatprep.mubr.msk.bf16.mxu1 %vm4802_vm0, %v12938_v59 }
 0x181   : > { %v13941_v2 = vpop.f32.mrb[4].mxu0  ;;  %v13943_v3 = vpop.f32.mrb[4].mxu1 }
 0x182   : > { %v13947_v5 = vpop.f32.mrb[5].mxu0  ;;  %v13949_v6 = vpop.f32.mrb[5].mxu1 }
 0x183   : > { %v13953_v8 = vpop.f32.mrb[6].mxu0  ;;  %v13955_v9 = vpop.f32.mrb[6].mxu1 }
 0x184   : > { %v13961_v13 = vpop.f32.mrb[7].mxu0  ;;  %v13963_v14 = vpop.f32.mrb[7].mxu1 }
 0x186   : > { %12388 = vmatmul.mubr.msk.bf16.gmra.mrb[112].mxu0 %vm4802_vm0, %v12939_v0  ;;  %12520 = vmatmul.mubr.msk.bf16.gmra.mrb[112].mxu1 %vm4802_vm0, %v12940_v1  ;;  %v12951_v1 = vld [vmem:[%s13685_s6 + $0x1f8] sm:$0xff]  }
 0x187   : > { %12391 = vmatprep.mubr.msk.bf16.mxu0 %vm4802_vm0, %v12941_v10  ;;  %12523 = vmatprep.mubr.msk.bf16.mxu1 %vm4802_vm0, %v12942_v11  ;;  %v12952_v10 = vld [vmem:[%s13685_s6 + $0x3f8] sm:$0xff]  }
 0x189   : > { %v13971_v16 = vpop.f32.mrb[8].mxu0  ;;  %v13973_v17 = vpop.f32.mrb[8].mxu1 }
 0x18a   : > { %v13977_v19 = vpop.f32.mrb[9].mxu0  ;;  %v13979_v20 = vpop.f32.mrb[9].mxu1 }
 0x18b   : > { %v13985_v24 = vpop.f32.mrb[10].mxu0  ;;  %v13987_v25 = vpop.f32.mrb[10].mxu1 }
 0x18c   : > { %v13993_v29 = vpop.f32.mrb[11].mxu0  ;;  %v13995_v30 = vpop.f32.mrb[11].mxu1 }
 0x18e   : > { %12392 = vmatmul.mubr.msk.bf16.gmra.mrb[116].mxu0 %vm4802_vm0, %v12943_v21  ;;  %12524 = vmatmul.mubr.msk.bf16.gmra.mrb[116].mxu1 %vm4802_vm0, %v12944_v22 }
 0x18f   : > { %12395 = vmatprep.mubr.msk.bf16.mxu0 %vm4802_vm0, %v12945_v26  ;;  %12527 = vmatprep.mubr.msk.bf16.mxu1 %vm4802_vm0, %v12946_v27  ;;  %v12953_v26 = vld [vmem:[%s13685_s6 + $0x400] sm:$0xff]  }
 0x190   : > { %v12954_v27 = vld [vmem:[%s13685_s6 + $0x600] sm:$0xff]  }
 0x191   : > { %v14003_v32 = vpop.f32.mrb[12].mxu0  ;;  %v14005_v33 = vpop.f32.mrb[12].mxu1 }
 0x192   : > { %v14009_v35 = vpop.f32.mrb[13].mxu0  ;;  %v14011_v36 = vpop.f32.mrb[13].mxu1 }
 0x193   : > { %v14017_v40 = vpop.f32.mrb[14].mxu0  ;;  %v14019_v41 = vpop.f32.mrb[14].mxu1 }
 0x194   : > { %v14025_v45 = vpop.f32.mrb[15].mxu0  ;;  %v14027_v46 = vpop.f32.mrb[15].mxu1 }
 0x196   : > { %12396 = vmatmul.mubr.msk.bf16.gmra.mrb[120].mxu0 %vm4802_vm0, %v12947_v37  ;;  %12528 = vmatmul.mubr.msk.bf16.gmra.mrb[120].mxu1 %vm4802_vm0, %v12948_v38 }
 0x197   : > { %12399 = vmatprep.mubr.msk.bf16.mxu0 %vm4802_vm0, %v12949_v42  ;;  %12531 = vmatprep.mubr.msk.bf16.mxu1 %vm4802_vm0, %v12950_v43  ;;  %v12955_v43 = vld [vmem:[%s13685_s6 + $0x408] sm:$0xff]  }
 0x199   : > { %v14035_v48 = vpop.f32.mrb[16].mxu0  ;;  %v14037_v49 = vpop.f32.mrb[16].mxu1 }
 0x19a   : > { %v14041_v59 = vpop.f32.mrb[17].mxu0  ;;  %v14043_v0 = vpop.f32.mrb[17].mxu1 }
 0x19b   : > { %v14049_v21 = vpop.f32.mrb[18].mxu0  ;;  %v14051_v22 = vpop.f32.mrb[18].mxu1 }
 0x19c   : > { %v14057_v38 = vpop.f32.mrb[19].mxu0  ;;  %v14059_v42 = vpop.f32.mrb[19].mxu1 }
 0x19e   : > { %12400 = vmatmul.mubr.msk.bf16.gmra.mrb[124].mxu0 %vm4802_vm0, %v12951_v1  ;;  %12532 = vmatmul.mubr.msk.bf16.gmra.mrb[124].mxu1 %vm4802_vm0, %v12952_v10 }
 0x19f   : > { %12539 = vmatprep.mubr.msk.bf16.mxu0 %vm4802_vm0, %v12953_v26  ;;  %12671 = vmatprep.mubr.msk.bf16.mxu1 %vm4802_vm0, %v12954_v27  ;;  %v12957_v27 = vld [vmem:[%s13685_s6 + $0x410] sm:$0xff]  }
 0x1a1   : > { %v14067_v11 = vpop.f32.mrb[20].mxu0  ;;  %v14069_v37 = vpop.f32.mrb[20].mxu1 }
 0x1a2   : > { %v14073_v47 = vpop.f32.mrb[21].mxu0  ;;  %v14075_v44 = vpop.f32.mrb[21].mxu1 }
 0x1a3   : > { %v14081_v10 = vpop.f32.mrb[22].mxu0  ;;  %v14083_v26 = vpop.f32.mrb[22].mxu1 }
 0x1a4   : > { %15786 = vst [vmem:[#allocation3_spill] sm:$0xff] %v14083_v26  ;;  %v14089_v31 = vpop.f32.mrb[23].mxu0  ;;  %v14091_v28 = vpop.f32.mrb[23].mxu1 }
 0x1a5   : > { %15787 = vst [vmem:[#allocation4_spill] sm:$0xff] %v14089_v31  ;;  %15788 = vst [vmem:[#allocation5_spill] sm:$0xff] %v14091_v28  ;;  %v16000_v31 = vmax.f32 %v13929_v61, %v13931_v62 }
 0x1a6   : > { %12540 = vmatmul.mubr.msk.bf16.vlgmr.msra.gmra.mrb[128].mxu0 %vm4802_vm0, %v12955_v43  ;;  %12672 = vmatmul.mubr.msk.bf16.vlgmr.msra.gmra.mrb[128].mxu1 %vm4802_vm0, %v12956_v39 }
 0x1a7   : > { %12543 = vmatprep.mubr.msk.bf16.mxu0 %vm4802_vm0, %v12957_v27  ;;  %12675 = vmatprep.mubr.msk.bf16.mxu1 %vm4802_vm0, %v12958_v34  ;;  %v12961_v34 = vld [vmem:[%s13685_s6 + $0x420] sm:$0xff]  }
 0x1a9   : > { %v14099_v1 = vpop.f32.mrb[24].mxu0  ;;  %v14101_v58 = vpop.f32.mrb[24].mxu1 }
 0x1aa   : > { %15789 = vst [vmem:[#allocation6_spill] sm:$0xff] %v14099_v1  ;;  %15790 = vst [vmem:[#allocation7_spill] sm:$0xff] %v14101_v58  ;;  %v14105_v15 = vpop.f32.mrb[25].mxu0  ;;  %v14107_v12 = vpop.f32.mrb[25].mxu1  ;;  %v13066_v58 = vld [vmem:[%s13685_s6 + $0x7c0] sm:$0xff]  }
 0x1ab   : > { %15791 = vst [vmem:[#allocation8_spill] sm:$0xff] %v14105_v15  ;;  %15792 = vst [vmem:[#allocation9_spill] sm:$0xff] %v14107_v12  ;;  %v14113_v43 = vpop.f32.mrb[26].mxu0  ;;  %v14115_v27 = vpop.f32.mrb[26].mxu1  ;;  %v12967_v12 = vld [vmem:[%s13685_s6 + $0x438] sm:$0xff]   ;;  %v13065_v15 = vld [vmem:[%s13685_s6 + $0x5c0] sm:$0xff]  }
 0x1ac   : > { %15793 = vst [vmem:[#allocation10_spill] sm:$0xff] %v14113_v43  ;;  %15794 = vst [vmem:[#allocation11_spill] sm:$0xff] %v14115_v27  ;;  %v14121_v63 = vpop.f32.mrb[27].mxu0  ;;  %v14123_v60 = vpop.f32.mrb[27].mxu1 }
 0x1ad   : > { %15795 = vst [vmem:[#allocation12_spill] sm:$0xff] %v14121_v63  ;;  %15796 = vst [vmem:[#allocation13_spill] sm:$0xff] %v14123_v60  ;;  %v12964_v60 = vld [vmem:[%s13685_s6 + $0x628] sm:$0xff]   ;;  %v12966_v63 = vld [vmem:[%s13685_s6 + $0x630] sm:$0xff]  }
 0x1ae   : > { %12544 = vmatmul.mubr.msk.bf16.gmra.mrb[132].mxu0 %vm4802_vm0, %v12959_v23  ;;  %12676 = vmatmul.mubr.msk.bf16.gmra.mrb[132].mxu1 %vm4802_vm0, %v12960_v7 }
 0x1af   : > { %12547 = vmatprep.mubr.msk.bf16.mxu0 %vm4802_vm0, %v12961_v34  ;;  %12679 = vmatprep.mubr.msk.bf16.mxu1 %vm4802_vm0, %v12962_v4  ;;  %v12965_v4 = vld [vmem:[%s13685_s6 + $0x430] sm:$0xff]  }
 0x1b1   : > { %v14131_v39 = vpop.f32.mrb[28].mxu0  ;;  %v14133_v18 = vpop.f32.mrb[28].mxu1 }
 0x1b2   : > { %15797 = vst [vmem:[#allocation14_spill] sm:$0xff] %v14131_v39  ;;  %15798 = vst [vmem:[#allocation15_spill] sm:$0xff] %v14133_v18  ;;  %v14137_v27 = vpop.f32.mrb[29].mxu0  ;;  %v14139_v43 = vpop.f32.mrb[29].mxu1 }
 0x1b3   : > { %15799 = vst [vmem:[#allocation16_spill] sm:$0xff] %v14137_v27  ;;  %15800 = vst [vmem:[#allocation17_spill] sm:$0xff] %v14139_v43  ;;  %v14145_v23 = vpop.f32.mrb[30].mxu0  ;;  %v14147_v34 = vpop.f32.mrb[30].mxu1  ;;  %v12971_v27 = vld [vmem:[%s13685_s6 + $0x448] sm:$0xff]  }
 0x1b4   : > { %15801 = vst [vmem:[#allocation18_spill] sm:$0xff] %v14145_v23  ;;  %15802 = vst [vmem:[#allocation19_spill] sm:$0xff] %v14147_v34  ;;  %v14153_v18 = vpop.f32.mrb[31].mxu0  ;;  %v14155_v39 = vpop.f32.mrb[31].mxu1 }
 0x1b5   : > { %15803 = vst [vmem:[#allocation20_spill] sm:$0xff] %v14153_v18  ;;  %15804 = vst [vmem:[#allocation21_spill] sm:$0xff] %v14155_v39  ;;  %v12968_v39 = vld [vmem:[%s13685_s6 + $0x638] sm:$0xff]   ;;  %v12970_v18 = vld [vmem:[%s13685_s6 + $0x640] sm:$0xff]  }
 0x1b6   : > { %12548 = vmatmul.mubr.msk.bf16.gmra.mrb[136].mxu0 %vm4802_vm0, %v12963_v55  ;;  %12680 = vmatmul.mubr.msk.bf16.gmra.mrb[136].mxu1 %vm4802_vm0, %v12964_v60 }
 0x1b7   : > { %12551 = vmatprep.mubr.msk.bf16.mxu0 %vm4802_vm0, %v12965_v4  ;;  %12683 = vmatprep.mubr.msk.bf16.mxu1 %vm4802_vm0, %v12966_v63  ;;  %v12969_v63 = vld [vmem:[%s13685_s6 + $0x440] sm:$0xff]  }
 0x1b9   : > { %v14163_v7 = vpop.f32.mrb[32].mxu0  ;;  %v14165_v52 = vpop.f32.mrb[32].mxu1 }
 0x1ba   : > { %15805 = vst [vmem:[#allocation22_spill] sm:$0xff] %v14163_v7  ;;  %15806 = vst [vmem:[#allocation23_spill] sm:$0xff] %v14165_v52  ;;  %v14169_v23 = vpop.f32.mrb[33].mxu0  ;;  %v14171_v43 = vpop.f32.mrb[33].mxu1 }
 0x1bb   : > { %15807 = vst [vmem:[#allocation24_spill] sm:$0xff] %v14169_v23  ;;  %15808 = vst [vmem:[#allocation25_spill] sm:$0xff] %v14171_v43  ;;  %v14177_v60 = vpop.f32.mrb[34].mxu0  ;;  %v14179_v4 = vpop.f32.mrb[34].mxu1  ;;  %v12975_v23 = vld [vmem:[%s13685_s6 + $0x458] sm:$0xff]  }
 0x1bc   : > { %15809 = vst [vmem:[#allocation26_spill] sm:$0xff] %v14177_v60  ;;  %15810 = vst [vmem:[#allocation27_spill] sm:$0xff] %v14179_v4  ;;  %v14185_v52 = vpop.f32.mrb[35].mxu0  ;;  %v14187_v7 = vpop.f32.mrb[35].mxu1 }
 0x1bd   : > { %15811 = vst [vmem:[#allocation28_spill] sm:$0xff] %v14185_v52  ;;  %15812 = vst [vmem:[#allocation29_spill] sm:$0xff] %v14187_v7  ;;  %v12972_v7 = vld [vmem:[%s13685_s6 + $0x648] sm:$0xff]   ;;  %v12974_v52 = vld [vmem:[%s13685_s6 + $0x650] sm:$0xff]  }
 0x1be   : > { %12552 = vmatmul.mubr.msk.bf16.gmra.mrb[140].mxu0 %vm4802_vm0, %v12967_v12  ;;  %12684 = vmatmul.mubr.msk.bf16.gmra.mrb[140].mxu1 %vm4802_vm0, %v12968_v39 }
 0x1bf   : > { %12555 = vmatprep.mubr.msk.bf16.mxu0 %vm4802_vm0, %v12969_v63  ;;  %12687 = vmatprep.mubr.msk.bf16.mxu1 %vm4802_vm0, %v12970_v18  ;;  %v12973_v18 = vld [vmem:[%s13685_s6 + $0x450] sm:$0xff]  }
 0x1c1   : > { %v14195_v55 = vpop.f32.mrb[36].mxu0  ;;  %v14197_v34 = vpop.f32.mrb[36].mxu1 }
 0x1c2   : > { %15813 = vst [vmem:[#allocation30_spill] sm:$0xff] %v14195_v55  ;;  %15814 = vst [vmem:[#allocation31_spill] sm:$0xff] %v14197_v34  ;;  %v14201_v60 = vpop.f32.mrb[37].mxu0  ;;  %v14203_v43 = vpop.f32.mrb[37].mxu1 }
 0x1c3   : > { %15815 = vst [vmem:[#allocation32_spill] sm:$0xff] %v14201_v60  ;;  %15816 = vst [vmem:[#allocation33_spill] sm:$0xff] %v14203_v43  ;;  %v14209_v39 = vpop.f32.mrb[38].mxu0  ;;  %v14211_v63 = vpop.f32.mrb[38].mxu1  ;;  %v12979_v60 = vld [vmem:[%s13685_s6 + $0x468] sm:$0xff]  }
 0x1c4   : > { %15817 = vst [vmem:[#allocation34_spill] sm:$0xff] %v14209_v39  ;;  %15818 = vst [vmem:[#allocation35_spill] sm:$0xff] %v14211_v63  ;;  %v14217_v34 = vpop.f32.mrb[39].mxu0  ;;  %v14219_v55 = vpop.f32.mrb[39].mxu1 }
 0x1c5   : > { %15819 = vst [vmem:[#allocation36_spill] sm:$0xff] %v14217_v34  ;;  %15820 = vst [vmem:[#allocation37_spill] sm:$0xff] %v14219_v55  ;;  %v12976_v55 = vld [vmem:[%s13685_s6 + $0x658] sm:$0xff]   ;;  %v12978_v34 = vld [vmem:[%s13685_s6 + $0x660] sm:$0xff]  }
 0x1c6   : > { %12556 = vmatmul.mubr.msk.bf16.gmra.mrb[144].mxu0 %vm4802_vm0, %v12971_v27  ;;  %12688 = vmatmul.mubr.msk.bf16.gmra.mrb[144].mxu1 %vm4802_vm0, %v12972_v7 }
 0x1c7   : > { %12559 = vmatprep.mubr.msk.bf16.mxu0 %vm4802_vm0, %v12973_v18  ;;  %12691 = vmatprep.mubr.msk.bf16.mxu1 %vm4802_vm0, %v12974_v52  ;;  %v12977_v52 = vld [vmem:[%s13685_s6 + $0x460] sm:$0xff]  }
 0x1c9   : > { %v14227_v12 = vpop.f32.mrb[40].mxu0  ;;  %v14229_v4 = vpop.f32.mrb[40].mxu1 }
 0x1ca   : > { %15821 = vst [vmem:[#allocation38_spill] sm:$0xff] %v14227_v12  ;;  %15822 = vst [vmem:[#allocation39_spill] sm:$0xff] %v14229_v4  ;;  %v14233_v39 = vpop.f32.mrb[41].mxu0  ;;  %v14235_v43 = vpop.f32.mrb[41].mxu1 }
 0x1cb   : > { %15823 = vst [vmem:[#allocation40_spill] sm:$0xff] %v14233_v39  ;;  %15824 = vst [vmem:[#allocation41_spill] sm:$0xff] %v14235_v43  ;;  %v14241_v7 = vpop.f32.mrb[42].mxu0  ;;  %v14243_v18 = vpop.f32.mrb[42].mxu1  ;;  %v12983_v39 = vld [vmem:[%s13685_s6 + $0x478] sm:$0xff]  }
 0x1cc   : > { %15825 = vst [vmem:[#allocation42_spill] sm:$0xff] %v14241_v7  ;;  %15826 = vst [vmem:[#allocation43_spill] sm:$0xff] %v14243_v18  ;;  %v14249_v4 = vpop.f32.mrb[43].mxu0  ;;  %v14251_v12 = vpop.f32.mrb[43].mxu1 }
 0x1cd   : > { %15827 = vst [vmem:[#allocation44_spill] sm:$0xff] %v14249_v4  ;;  %15828 = vst [vmem:[#allocation45_spill] sm:$0xff] %v14251_v12  ;;  %v12980_v12 = vld [vmem:[%s13685_s6 + $0x668] sm:$0xff]   ;;  %v12982_v4 = vld [vmem:[%s13685_s6 + $0x670] sm:$0xff]  }
 0x1ce   : > { %12560 = vmatmul.mubr.msk.bf16.gmra.mrb[148].mxu0 %vm4802_vm0, %v12975_v23  ;;  %12692 = vmatmul.mubr.msk.bf16.gmra.mrb[148].mxu1 %vm4802_vm0, %v12976_v55 }
 0x1cf   : > { %12563 = vmatprep.mubr.msk.bf16.mxu0 %vm4802_vm0, %v12977_v52  ;;  %12695 = vmatprep.mubr.msk.bf16.mxu1 %vm4802_vm0, %v12978_v34  ;;  %v12981_v34 = vld [vmem:[%s13685_s6 + $0x470] sm:$0xff]  }
 0x1d1   : > { %v14259_v27 = vpop.f32.mrb[44].mxu0  ;;  %v14261_v63 = vpop.f32.mrb[44].mxu1 }
 0x1d2   : > { %15829 = vst [vmem:[#allocation46_spill] sm:$0xff] %v14259_v27  ;;  %15830 = vst [vmem:[#allocation47_spill] sm:$0xff] %v14261_v63  ;;  %v14265_v7 = vpop.f32.mrb[45].mxu0  ;;  %v14267_v43 = vpop.f32.mrb[45].mxu1 }
 0x1d3   : > { %15831 = vst [vmem:[#allocation48_spill] sm:$0xff] %v14265_v7  ;;  %15832 = vst [vmem:[#allocation49_spill] sm:$0xff] %v14267_v43  ;;  %v14273_v55 = vpop.f32.mrb[46].mxu0  ;;  %v14275_v52 = vpop.f32.mrb[46].mxu1  ;;  %v12987_v7 = vld [vmem:[%s13685_s6 + $0x488] sm:$0xff]  }
 0x1d4   : > { %15833 = vst [vmem:[#allocation50_spill] sm:$0xff] %v14273_v55  ;;  %15834 = vst [vmem:[#allocation51_spill] sm:$0xff] %v14275_v52  ;;  %v14281_v63 = vpop.f32.mrb[47].mxu0  ;;  %v14283_v27 = vpop.f32.mrb[47].mxu1 }
 0x1d5   : > { %15835 = vst [vmem:[#allocation52_spill] sm:$0xff] %v14281_v63  ;;  %15836 = vst [vmem:[#allocation53_spill] sm:$0xff] %v14283_v27  ;;  %v12984_v27 = vld [vmem:[%s13685_s6 + $0x678] sm:$0xff]   ;;  %v12986_v63 = vld [vmem:[%s13685_s6 + $0x680] sm:$0xff]  }
 0x1d6   : > { %12564 = vmatmul.mubr.msk.bf16.gmra.mrb[152].mxu0 %vm4802_vm0, %v12979_v60  ;;  %12696 = vmatmul.mubr.msk.bf16.gmra.mrb[152].mxu1 %vm4802_vm0, %v12980_v12 }
 0x1d7   : > { %12567 = vmatprep.mubr.msk.bf16.mxu0 %vm4802_vm0, %v12981_v34  ;;  %12699 = vmatprep.mubr.msk.bf16.mxu1 %vm4802_vm0, %v12982_v4  ;;  %v12985_v4 = vld [vmem:[%s13685_s6 + $0x480] sm:$0xff]  }
 0x1d9   : > { %v14291_v23 = vpop.f32.mrb[48].mxu0  ;;  %v14293_v18 = vpop.f32.mrb[48].mxu1 }
 0x1da   : > { %15837 = vst [vmem:[#allocation54_spill] sm:$0xff] %v14291_v23  ;;  %15838 = vst [vmem:[#allocation55_spill] sm:$0xff] %v14293_v18  ;;  %v14297_v55 = vpop.f32.mrb[49].mxu0  ;;  %v14299_v43 = vpop.f32.mrb[49].mxu1 }
 0x1db   : > { %15839 = vst [vmem:[#allocation56_spill] sm:$0xff] %v14297_v55  ;;  %15840 = vst [vmem:[#allocation57_spill] sm:$0xff] %v14299_v43  ;;  %v14305_v12 = vpop.f32.mrb[50].mxu0  ;;  %v14307_v34 = vpop.f32.mrb[50].mxu1  ;;  %v12991_v55 = vld [vmem:[%s13685_s6 + $0x498] sm:$0xff]  }
 0x1dc   : > { %15841 = vst [vmem:[#allocation58_spill] sm:$0xff] %v14305_v12  ;;  %15842 = vst [vmem:[#allocation59_spill] sm:$0xff] %v14307_v34  ;;  %v14313_v18 = vpop.f32.mrb[51].mxu0  ;;  %v14315_v23 = vpop.f32.mrb[51].mxu1 }
 0x1dd   : > { %15843 = vst [vmem:[#allocation60_spill] sm:$0xff] %v14313_v18  ;;  %15844 = vst [vmem:[#allocation61_spill] sm:$0xff] %v14315_v23  ;;  %v12988_v23 = vld [vmem:[%s13685_s6 + $0x688] sm:$0xff]   ;;  %v12990_v18 = vld [vmem:[%s13685_s6 + $0x690] sm:$0xff]  }
 0x1de   : > { %12568 = vmatmul.mubr.msk.bf16.gmra.mrb[156].mxu0 %vm4802_vm0, %v12983_v39  ;;  %12700 = vmatmul.mubr.msk.bf16.gmra.mrb[156].mxu1 %vm4802_vm0, %v12984_v27 }
 0x1df   : > { %12571 = vmatprep.mubr.msk.bf16.mxu0 %vm4802_vm0, %v12985_v4  ;;  %12703 = vmatprep.mubr.msk.bf16.mxu1 %vm4802_vm0, %v12986_v63  ;;  %v12989_v63 = vld [vmem:[%s13685_s6 + $0x490] sm:$0xff]  }
 0x1e1   : > { %v14323_v60 = vpop.f32.mrb[52].mxu0  ;;  %v14325_v52 = vpop.f32.mrb[52].mxu1 }
 0x1e2   : > { %15845 = vst [vmem:[#allocation62_spill] sm:$0xff] %v14323_v60  ;;  %15846 = vst [vmem:[#allocation63_spill] sm:$0xff] %v14325_v52  ;;  %v14329_v12 = vpop.f32.mrb[53].mxu0  ;;  %v14331_v43 = vpop.f32.mrb[53].mxu1 }
 0x1e3   : > { %15847 = vst [vmem:[#allocation64_spill] sm:$0xff] %v14329_v12  ;;  %15848 = vst [vmem:[#allocation65_spill] sm:$0xff] %v14331_v43  ;;  %v14337_v27 = vpop.f32.mrb[54].mxu0  ;;  %v14339_v4 = vpop.f32.mrb[54].mxu1  ;;  %v12995_v12 = vld [vmem:[%s13685_s6 + $0x4a8] sm:$0xff]  }
 0x1e4   : > { %15849 = vst [vmem:[#allocation66_spill] sm:$0xff] %v14337_v27  ;;  %15850 = vst [vmem:[#allocation67_spill] sm:$0xff] %v14339_v4  ;;  %v14345_v52 = vpop.f32.mrb[55].mxu0  ;;  %v14347_v60 = vpop.f32.mrb[55].mxu1 }
 0x1e5   : > { %15851 = vst [vmem:[#allocation68_spill] sm:$0xff] %v14345_v52  ;;  %15852 = vst [vmem:[#allocation69_spill] sm:$0xff] %v14347_v60  ;;  %v12992_v60 = vld [vmem:[%s13685_s6 + $0x698] sm:$0xff]   ;;  %v12994_v52 = vld [vmem:[%s13685_s6 + $0x6a0] sm:$0xff]  }
 0x1e6   : > { %12572 = vmatmul.mubr.msk.bf16.gmra.mrb[160].mxu0 %vm4802_vm0, %v12987_v7  ;;  %12704 = vmatmul.mubr.msk.bf16.gmra.mrb[160].mxu1 %vm4802_vm0, %v12988_v23 }
 0x1e7   : > { %12575 = vmatprep.mubr.msk.bf16.mxu0 %vm4802_vm0, %v12989_v63  ;;  %12707 = vmatprep.mubr.msk.bf16.mxu1 %vm4802_vm0, %v12990_v18  ;;  %v12993_v18 = vld [vmem:[%s13685_s6 + $0x4a0] sm:$0xff]  }
 0x1e9   : > { %v14355_v39 = vpop.f32.mrb[56].mxu0  ;;  %v14357_v34 = vpop.f32.mrb[56].mxu1 }
 0x1ea   : > { %15853 = vst [vmem:[#allocation70_spill] sm:$0xff] %v14355_v39  ;;  %15854 = vst [vmem:[#allocation71_spill] sm:$0xff] %v14357_v34  ;;  %v14361_v27 = vpop.f32.mrb[57].mxu0  ;;  %v14363_v43 = vpop.f32.mrb[57].mxu1 }
 0x1eb   : > { %15855 = vst [vmem:[#allocation72_spill] sm:$0xff] %v14361_v27  ;;  %15856 = vst [vmem:[#allocation73_spill] sm:$0xff] %v14363_v43  ;;  %v14369_v23 = vpop.f32.mrb[58].mxu0  ;;  %v14371_v63 = vpop.f32.mrb[58].mxu1  ;;  %v12999_v27 = vld [vmem:[%s13685_s6 + $0x4b8] sm:$0xff]  }
 0x1ec   : > { %15857 = vst [vmem:[#allocation74_spill] sm:$0xff] %v14369_v23  ;;  %15858 = vst [vmem:[#allocation75_spill] sm:$0xff] %v14371_v63  ;;  %v14377_v34 = vpop.f32.mrb[59].mxu0  ;;  %v14379_v39 = vpop.f32.mrb[59].mxu1 }
 0x1ed   : > { %15859 = vst [vmem:[#allocation76_spill] sm:$0xff] %v14377_v34  ;;  %15860 = vst [vmem:[#allocation77_spill] sm:$0xff] %v14379_v39  ;;  %v12996_v39 = vld [vmem:[%s13685_s6 + $0x6a8] sm:$0xff]   ;;  %v12998_v34 = vld [vmem:[%s13685_s6 + $0x6b0] sm:$0xff]  }
 0x1ee   : > { %12576 = vmatmul.mubr.msk.bf16.gmra.mrb[164].mxu0 %vm4802_vm0, %v12991_v55  ;;  %12708 = vmatmul.mubr.msk.bf16.gmra.mrb[164].mxu1 %vm4802_vm0, %v12992_v60 }
 0x1ef   : > { %12579 = vmatprep.mubr.msk.bf16.mxu0 %vm4802_vm0, %v12993_v18  ;;  %12711 = vmatprep.mubr.msk.bf16.mxu1 %vm4802_vm0, %v12994_v52  ;;  %v12997_v52 = vld [vmem:[%s13685_s6 + $0x4b0] sm:$0xff]  }
 0x1f1   : > { %v14387_v7 = vpop.f32.mrb[60].mxu0  ;;  %v14389_v4 = vpop.f32.mrb[60].mxu1 }
 0x1f2   : > { %15861 = vst [vmem:[#allocation78_spill] sm:$0xff] %v14387_v7  ;;  %15862 = vst [vmem:[#allocation79_spill] sm:$0xff] %v14389_v4  ;;  %v14393_v23 = vpop.f32.mrb[61].mxu0  ;;  %v14395_v43 = vpop.f32.mrb[61].mxu1 }
 0x1f3   : > { %15863 = vst [vmem:[#allocation80_spill] sm:$0xff] %v14393_v23  ;;  %15864 = vst [vmem:[#allocation81_spill] sm:$0xff] %v14395_v43  ;;  %v14401_v60 = vpop.f32.mrb[62].mxu0  ;;  %v14403_v18 = vpop.f32.mrb[62].mxu1  ;;  %v13003_v23 = vld [vmem:[%s13685_s6 + $0x4c8] sm:$0xff]  }
 0x1f4   : > { %15865 = vst [vmem:[#allocation82_spill] sm:$0xff] %v14401_v60  ;;  %15866 = vst [vmem:[#allocation83_spill] sm:$0xff] %v14403_v18  ;;  %v14409_v4 = vpop.f32.mrb[63].mxu0  ;;  %v14411_v7 = vpop.f32.mrb[63].mxu1 }
 0x1f5   : > { %15867 = vst [vmem:[#allocation84_spill] sm:$0xff] %v14409_v4  ;;  %15868 = vst [vmem:[#allocation85_spill] sm:$0xff] %v14411_v7  ;;  %v13000_v7 = vld [vmem:[%s13685_s6 + $0x6b8] sm:$0xff]   ;;  %v13002_v4 = vld [vmem:[%s13685_s6 + $0x6c0] sm:$0xff]  }
 0x1f6   : > { %12580 = vmatmul.mubr.msk.bf16.gmra.mrb[168].mxu0 %vm4802_vm0, %v12995_v12  ;;  %12712 = vmatmul.mubr.msk.bf16.gmra.mrb[168].mxu1 %vm4802_vm0, %v12996_v39 }
 0x1f7   : > { %12583 = vmatprep.mubr.msk.bf16.mxu0 %vm4802_vm0, %v12997_v52  ;;  %12715 = vmatprep.mubr.msk.bf16.mxu1 %vm4802_vm0, %v12998_v34  ;;  %v13001_v34 = vld [vmem:[%s13685_s6 + $0x4c0] sm:$0xff]  }
 0x1f9   : > { %v14419_v55 = vpop.f32.mrb[64].mxu0  ;;  %v14421_v63 = vpop.f32.mrb[64].mxu1 }
 0x1fa   : > { %15869 = vst [vmem:[#allocation86_spill] sm:$0xff] %v14419_v55  ;;  %15870 = vst [vmem:[#allocation87_spill] sm:$0xff] %v14421_v63  ;;  %v14425_v60 = vpop.f32.mrb[65].mxu0  ;;  %v14427_v43 = vpop.f32.mrb[65].mxu1 }
 0x1fb   : > { %15871 = vst [vmem:[#allocation88_spill] sm:$0xff] %v14425_v60  ;;  %15872 = vst [vmem:[#allocation89_spill] sm:$0xff] %v14427_v43  ;;  %v14433_v39 = vpop.f32.mrb[66].mxu0  ;;  %v14435_v52 = vpop.f32.mrb[66].mxu1  ;;  %v13007_v60 = vld [vmem:[%s13685_s6 + $0x4d8] sm:$0xff]  }
 0x1fc   : > { %15873 = vst [vmem:[#allocation90_spill] sm:$0xff] %v14433_v39  ;;  %15874 = vst [vmem:[#allocation91_spill] sm:$0xff] %v14435_v52  ;;  %v14441_v63 = vpop.f32.mrb[67].mxu0  ;;  %v14443_v55 = vpop.f32.mrb[67].mxu1 }
 0x1fd   : > { %15875 = vst [vmem:[#allocation92_spill] sm:$0xff] %v14441_v63  ;;  %15876 = vst [vmem:[#allocation93_spill] sm:$0xff] %v14443_v55  ;;  %v13004_v55 = vld [vmem:[%s13685_s6 + $0x6c8] sm:$0xff]   ;;  %v13006_v63 = vld [vmem:[%s13685_s6 + $0x6d0] sm:$0xff]  }
 0x1fe   : > { %12584 = vmatmul.mubr.msk.bf16.gmra.mrb[172].mxu0 %vm4802_vm0, %v12999_v27  ;;  %12716 = vmatmul.mubr.msk.bf16.gmra.mrb[172].mxu1 %vm4802_vm0, %v13000_v7 }
 0x1ff   : > { %12587 = vmatprep.mubr.msk.bf16.mxu0 %vm4802_vm0, %v13001_v34  ;;  %12719 = vmatprep.mubr.msk.bf16.mxu1 %vm4802_vm0, %v13002_v4  ;;  %v13005_v4 = vld [vmem:[%s13685_s6 + $0x4d0] sm:$0xff]  }
 0x201   : > { %v14451_v12 = vpop.f32.mrb[68].mxu0  ;;  %v14453_v18 = vpop.f32.mrb[68].mxu1 }
 0x202   : > { %15877 = vst [vmem:[#allocation94_spill] sm:$0xff] %v14451_v12  ;;  %15878 = vst [vmem:[#allocation95_spill] sm:$0xff] %v14453_v18  ;;  %v14457_v39 = vpop.f32.mrb[69].mxu0  ;;  %v14459_v43 = vpop.f32.mrb[69].mxu1 }
 0x203   : > { %15879 = vst [vmem:[#allocation96_spill] sm:$0xff] %v14457_v39  ;;  %15880 = vst [vmem:[#allocation97_spill] sm:$0xff] %v14459_v43  ;;  %v14465_v7 = vpop.f32.mrb[70].mxu0  ;;  %v14467_v34 = vpop.f32.mrb[70].mxu1  ;;  %v13011_v39 = vld [vmem:[%s13685_s6 + $0x4e8] sm:$0xff]  }
 0x204   : > { %15881 = vst [vmem:[#allocation98_spill] sm:$0xff] %v14465_v7  ;;  %15882 = vst [vmem:[#allocation99_spill] sm:$0xff] %v14467_v34  ;;  %v14473_v18 = vpop.f32.mrb[71].mxu0  ;;  %v14475_v12 = vpop.f32.mrb[71].mxu1 }
 0x205   : > { %15883 = vst [vmem:[#allocation100_spill] sm:$0xff] %v14473_v18  ;;  %15884 = vst [vmem:[#allocation101_spill] sm:$0xff] %v14475_v12  ;;  %v13008_v12 = vld [vmem:[%s13685_s6 + $0x6d8] sm:$0xff]   ;;  %v13010_v18 = vld [vmem:[%s13685_s6 + $0x6e0] sm:$0xff]  }
 0x206   : > { %12588 = vmatmul.mubr.msk.bf16.gmra.mrb[176].mxu0 %vm4802_vm0, %v13003_v23  ;;  %12720 = vmatmul.mubr.msk.bf16.gmra.mrb[176].mxu1 %vm4802_vm0, %v13004_v55 }
 0x207   : > { %12591 = vmatprep.mubr.msk.bf16.mxu0 %vm4802_vm0, %v13005_v4  ;;  %12723 = vmatprep.mubr.msk.bf16.mxu1 %vm4802_vm0, %v13006_v63  ;;  %v13009_v63 = vld [vmem:[%s13685_s6 + $0x4e0] sm:$0xff]  }
 0x209   : > { %v14483_v27 = vpop.f32.mrb[72].mxu0  ;;  %v14485_v52 = vpop.f32.mrb[72].mxu1 }
 0x20a   : > { %15885 = vst [vmem:[#allocation102_spill] sm:$0xff] %v14483_v27  ;;  %15886 = vst [vmem:[#allocation103_spill] sm:$0xff] %v14485_v52  ;;  %v14489_v7 = vpop.f32.mrb[73].mxu0  ;;  %v14491_v43 = vpop.f32.mrb[73].mxu1 }
 0x20b   : > { %15887 = vst [vmem:[#allocation104_spill] sm:$0xff] %v14489_v7  ;;  %15888 = vst [vmem:[#allocation105_spill] sm:$0xff] %v14491_v43  ;;  %v14497_v55 = vpop.f32.mrb[74].mxu0  ;;  %v14499_v4 = vpop.f32.mrb[74].mxu1  ;;  %v13015_v7 = vld [vmem:[%s13685_s6 + $0x4f8] sm:$0xff]  }
 0x20c   : > { %15889 = vst [vmem:[#allocation106_spill] sm:$0xff] %v14497_v55  ;;  %15890 = vst [vmem:[#allocation107_spill] sm:$0xff] %v14499_v4  ;;  %v14505_v52 = vpop.f32.mrb[75].mxu0  ;;  %v14507_v27 = vpop.f32.mrb[75].mxu1 }
 0x20d   : > { %15891 = vst [vmem:[#allocation108_spill] sm:$0xff] %v14505_v52  ;;  %15892 = vst [vmem:[#allocation109_spill] sm:$0xff] %v14507_v27  ;;  %v13012_v27 = vld [vmem:[%s13685_s6 + $0x6e8] sm:$0xff]   ;;  %v13014_v52 = vld [vmem:[%s13685_s6 + $0x6f0] sm:$0xff]  }
 0x20e   : > { %12592 = vmatmul.mubr.msk.bf16.gmra.mrb[180].mxu0 %vm4802_vm0, %v13007_v60  ;;  %12724 = vmatmul.mubr.msk.bf16.gmra.mrb[180].mxu1 %vm4802_vm0, %v13008_v12 }
 0x20f   : > { %12595 = vmatprep.mubr.msk.bf16.mxu0 %vm4802_vm0, %v13009_v63  ;;  %12727 = vmatprep.mubr.msk.bf16.mxu1 %vm4802_vm0, %v13010_v18  ;;  %v13013_v18 = vld [vmem:[%s13685_s6 + $0x4f0] sm:$0xff]  }
 0x211   : > { %v14515_v23 = vpop.f32.mrb[76].mxu0  ;;  %v14517_v34 = vpop.f32.mrb[76].mxu1 }
 0x212   : > { %15893 = vst [vmem:[#allocation110_spill] sm:$0xff] %v14515_v23  ;;  %15894 = vst [vmem:[#allocation111_spill] sm:$0xff] %v14517_v34  ;;  %v14521_v55 = vpop.f32.mrb[77].mxu0  ;;  %v14523_v43 = vpop.f32.mrb[77].mxu1 }
 0x213   : > { %15895 = vst [vmem:[#allocation112_spill] sm:$0xff] %v14521_v55  ;;  %15896 = vst [vmem:[#allocation113_spill] sm:$0xff] %v14523_v43  ;;  %v14529_v12 = vpop.f32.mrb[78].mxu0  ;;  %v14531_v63 = vpop.f32.mrb[78].mxu1  ;;  %v13019_v55 = vld [vmem:[%s13685_s6 + $0x508] sm:$0xff]  }
 0x214   : > { %15897 = vst [vmem:[#allocation114_spill] sm:$0xff] %v14529_v12  ;;  %15898 = vst [vmem:[#allocation115_spill] sm:$0xff] %v14531_v63  ;;  %v14537_v34 = vpop.f32.mrb[79].mxu0  ;;  %v14539_v23 = vpop.f32.mrb[79].mxu1 }
 0x215   : > { %15899 = vst [vmem:[#allocation116_spill] sm:$0xff] %v14537_v34  ;;  %15900 = vst [vmem:[#allocation117_spill] sm:$0xff] %v14539_v23  ;;  %v13016_v23 = vld [vmem:[%s13685_s6 + $0x6f8] sm:$0xff]   ;;  %v13018_v34 = vld [vmem:[%s13685_s6 + $0x700] sm:$0xff]  }
 0x216   : > { %12596 = vmatmul.mubr.msk.bf16.gmra.mrb[184].mxu0 %vm4802_vm0, %v13011_v39  ;;  %12728 = vmatmul.mubr.msk.bf16.gmra.mrb[184].mxu1 %vm4802_vm0, %v13012_v27 }
 0x217   : > { %12599 = vmatprep.mubr.msk.bf16.mxu0 %vm4802_vm0, %v13013_v18  ;;  %12731 = vmatprep.mubr.msk.bf16.mxu1 %vm4802_vm0, %v13014_v52  ;;  %v13017_v52 = vld [vmem:[%s13685_s6 + $0x500] sm:$0xff]  }
 0x219   : > { %v14547_v60 = vpop.f32.mrb[80].mxu0  ;;  %v14549_v4 = vpop.f32.mrb[80].mxu1 }
 0x21a   : > { %15901 = vst [vmem:[#allocation118_spill] sm:$0xff] %v14547_v60  ;;  %15902 = vst [vmem:[#allocation119_spill] sm:$0xff] %v14549_v4  ;;  %v14553_v12 = vpop.f32.mrb[81].mxu0  ;;  %v14555_v43 = vpop.f32.mrb[81].mxu1 }
 0x21b   : > { %15903 = vst [vmem:[#allocation120_spill] sm:$0xff] %v14553_v12  ;;  %15904 = vst [vmem:[#allocation121_spill] sm:$0xff] %v14555_v43  ;;  %v14561_v27 = vpop.f32.mrb[82].mxu0  ;;  %v14563_v18 = vpop.f32.mrb[82].mxu1  ;;  %v13023_v12 = vld [vmem:[%s13685_s6 + $0x518] sm:$0xff]  }
 0x21c   : > { %15905 = vst [vmem:[#allocation122_spill] sm:$0xff] %v14561_v27  ;;  %15906 = vst [vmem:[#allocation123_spill] sm:$0xff] %v14563_v18  ;;  %v14569_v4 = vpop.f32.mrb[83].mxu0  ;;  %v14571_v60 = vpop.f32.mrb[83].mxu1 }
 0x21d   : > { %15907 = vst [vmem:[#allocation124_spill] sm:$0xff] %v14569_v4  ;;  %15908 = vst [vmem:[#allocation125_spill] sm:$0xff] %v14571_v60  ;;  %v13020_v60 = vld [vmem:[%s13685_s6 + $0x708] sm:$0xff]   ;;  %v13022_v4 = vld [vmem:[%s13685_s6 + $0x710] sm:$0xff]  }
 0x21e   : > { %12600 = vmatmul.mubr.msk.bf16.gmra.mrb[188].mxu0 %vm4802_vm0, %v13015_v7  ;;  %12732 = vmatmul.mubr.msk.bf16.gmra.mrb[188].mxu1 %vm4802_vm0, %v13016_v23 }
 0x21f   : > { %12603 = vmatprep.mubr.msk.bf16.mxu0 %vm4802_vm0, %v13017_v52  ;;  %12735 = vmatprep.mubr.msk.bf16.mxu1 %vm4802_vm0, %v13018_v34  ;;  %v13021_v34 = vld [vmem:[%s13685_s6 + $0x510] sm:$0xff]  }
 0x221   : > { %v14579_v39 = vpop.f32.mrb[84].mxu0  ;;  %v14581_v63 = vpop.f32.mrb[84].mxu1 }
 0x222   : > { %15909 = vst [vmem:[#allocation126_spill] sm:$0xff] %v14579_v39  ;;  %15910 = vst [vmem:[#allocation127_spill] sm:$0xff] %v14581_v63  ;;  %v14585_v27 = vpop.f32.mrb[85].mxu0  ;;  %v14587_v43 = vpop.f32.mrb[85].mxu1 }
 0x223   : > { %15911 = vst [vmem:[#allocation128_spill] sm:$0xff] %v14585_v27  ;;  %15912 = vst [vmem:[#allocation129_spill] sm:$0xff] %v14587_v43  ;;  %v14593_v23 = vpop.f32.mrb[86].mxu0  ;;  %v14595_v52 = vpop.f32.mrb[86].mxu1  ;;  %v13027_v27 = vld [vmem:[%s13685_s6 + $0x528] sm:$0xff]  }
 0x224   : > { %15913 = vst [vmem:[#allocation130_spill] sm:$0xff] %v14593_v23  ;;  %15914 = vst [vmem:[#allocation131_spill] sm:$0xff] %v14595_v52  ;;  %v14601_v63 = vpop.f32.mrb[87].mxu0  ;;  %v14603_v39 = vpop.f32.mrb[87].mxu1 }
 0x225   : > { %15915 = vst [vmem:[#allocation132_spill] sm:$0xff] %v14601_v63  ;;  %15916 = vst [vmem:[#allocation133_spill] sm:$0xff] %v14603_v39  ;;  %v13024_v39 = vld [vmem:[%s13685_s6 + $0x718] sm:$0xff]   ;;  %v13026_v63 = vld [vmem:[%s13685_s6 + $0x720] sm:$0xff]  }
 0x226   : > { %12604 = vmatmul.mubr.msk.bf16.gmra.mrb[192].mxu0 %vm4802_vm0, %v13019_v55  ;;  %12736 = vmatmul.mubr.msk.bf16.gmra.mrb[192].mxu1 %vm4802_vm0, %v13020_v60 }
 0x227   : > { %12607 = vmatprep.mubr.msk.bf16.mxu0 %vm4802_vm0, %v13021_v34  ;;  %12739 = vmatprep.mubr.msk.bf16.mxu1 %vm4802_vm0, %v13022_v4  ;;  %v13025_v4 = vld [vmem:[%s13685_s6 + $0x520] sm:$0xff]  }
 0x229   : > { %v14611_v7 = vpop.f32.mrb[88].mxu0  ;;  %v14613_v18 = vpop.f32.mrb[88].mxu1 }
 0x22a   : > { %15917 = vst [vmem:[#allocation134_spill] sm:$0xff] %v14611_v7  ;;  %15918 = vst [vmem:[#allocation135_spill] sm:$0xff] %v14613_v18  ;;  %v14617_v23 = vpop.f32.mrb[89].mxu0  ;;  %v14619_v43 = vpop.f32.mrb[89].mxu1 }
 0x22b   : > { %15919 = vst [vmem:[#allocation136_spill] sm:$0xff] %v14617_v23  ;;  %15920 = vst [vmem:[#allocation137_spill] sm:$0xff] %v14619_v43  ;;  %v14625_v60 = vpop.f32.mrb[90].mxu0  ;;  %v14627_v34 = vpop.f32.mrb[90].mxu1  ;;  %v13031_v23 = vld [vmem:[%s13685_s6 + $0x538] sm:$0xff]  }
 0x22c   : > { %15921 = vst [vmem:[#allocation138_spill] sm:$0xff] %v14625_v60  ;;  %15922 = vst [vmem:[#allocation139_spill] sm:$0xff] %v14627_v34  ;;  %v14633_v18 = vpop.f32.mrb[91].mxu0  ;;  %v14635_v7 = vpop.f32.mrb[91].mxu1 }
 0x22d   : > { %15923 = vst [vmem:[#allocation140_spill] sm:$0xff] %v14633_v18  ;;  %15924 = vst [vmem:[#allocation141_spill] sm:$0xff] %v14635_v7  ;;  %v13028_v7 = vld [vmem:[%s13685_s6 + $0x728] sm:$0xff]   ;;  %v13030_v18 = vld [vmem:[%s13685_s6 + $0x730] sm:$0xff]  }
 0x22e   : > { %12608 = vmatmul.mubr.msk.bf16.gmra.mrb[196].mxu0 %vm4802_vm0, %v13023_v12  ;;  %12740 = vmatmul.mubr.msk.bf16.gmra.mrb[196].mxu1 %vm4802_vm0, %v13024_v39 }
 0x22f   : > { %12611 = vmatprep.mubr.msk.bf16.mxu0 %vm4802_vm0, %v13025_v4  ;;  %12743 = vmatprep.mubr.msk.bf16.mxu1 %vm4802_vm0, %v13026_v63  ;;  %v13029_v63 = vld [vmem:[%s13685_s6 + $0x530] sm:$0xff]  }
 0x231   : > { %v14643_v55 = vpop.f32.mrb[92].mxu0  ;;  %v14645_v52 = vpop.f32.mrb[92].mxu1 }
 0x232   : > { %15925 = vst [vmem:[#allocation142_spill] sm:$0xff] %v14643_v55  ;;  %15926 = vst [vmem:[#allocation143_spill] sm:$0xff] %v14645_v52  ;;  %v14649_v60 = vpop.f32.mrb[93].mxu0  ;;  %v14651_v43 = vpop.f32.mrb[93].mxu1 }
 0x233   : > { %15927 = vst [vmem:[#allocation144_spill] sm:$0xff] %v14649_v60  ;;  %15928 = vst [vmem:[#allocation145_spill] sm:$0xff] %v14651_v43  ;;  %v14657_v39 = vpop.f32.mrb[94].mxu0  ;;  %v14659_v4 = vpop.f32.mrb[94].mxu1  ;;  %v13035_v60 = vld [vmem:[%s13685_s6 + $0x548] sm:$0xff]  }
 0x234   : > { %15929 = vst [vmem:[#allocation146_spill] sm:$0xff] %v14657_v39  ;;  %15930 = vst [vmem:[#allocation147_spill] sm:$0xff] %v14659_v4  ;;  %v14665_v52 = vpop.f32.mrb[95].mxu0  ;;  %v14667_v55 = vpop.f32.mrb[95].mxu1 }
 0x235   : > { %15931 = vst [vmem:[#allocation148_spill] sm:$0xff] %v14665_v52  ;;  %15932 = vst [vmem:[#allocation149_spill] sm:$0xff] %v14667_v55  ;;  %v13032_v55 = vld [vmem:[%s13685_s6 + $0x738] sm:$0xff]   ;;  %v13034_v52 = vld [vmem:[%s13685_s6 + $0x740] sm:$0xff]  }
 0x236   : > { %12612 = vmatmul.mubr.msk.bf16.gmra.mrb[200].mxu0 %vm4802_vm0, %v13027_v27  ;;  %12744 = vmatmul.mubr.msk.bf16.gmra.mrb[200].mxu1 %vm4802_vm0, %v13028_v7 }
 0x237   : > { %12615 = vmatprep.mubr.msk.bf16.mxu0 %vm4802_vm0, %v13029_v63  ;;  %12747 = vmatprep.mubr.msk.bf16.mxu1 %vm4802_vm0, %v13030_v18  ;;  %v13033_v18 = vld [vmem:[%s13685_s6 + $0x540] sm:$0xff]  }
 0x239   : > { %v14675_v12 = vpop.f32.mrb[96].mxu0  ;;  %v14677_v34 = vpop.f32.mrb[96].mxu1 }
 0x23a   : > { %15933 = vst [vmem:[#allocation150_spill] sm:$0xff] %v14675_v12  ;;  %15934 = vst [vmem:[#allocation151_spill] sm:$0xff] %v14677_v34  ;;  %v14681_v39 = vpop.f32.mrb[97].mxu0  ;;  %v14683_v43 = vpop.f32.mrb[97].mxu1 }
 0x23b   : > { %15935 = vst [vmem:[#allocation152_spill] sm:$0xff] %v14681_v39  ;;  %15936 = vst [vmem:[#allocation153_spill] sm:$0xff] %v14683_v43  ;;  %v14689_v7 = vpop.f32.mrb[98].mxu0  ;;  %v14691_v63 = vpop.f32.mrb[98].mxu1  ;;  %v13039_v39 = vld [vmem:[%s13685_s6 + $0x558] sm:$0xff]  }
 0x23c   : > { %15937 = vst [vmem:[#allocation154_spill] sm:$0xff] %v14689_v7  ;;  %15938 = vst [vmem:[#allocation155_spill] sm:$0xff] %v14691_v63  ;;  %v14697_v34 = vpop.f32.mrb[99].mxu0  ;;  %v14699_v12 = vpop.f32.mrb[99].mxu1 }
 0x23d   : > { %15939 = vst [vmem:[#allocation156_spill] sm:$0xff] %v14697_v34  ;;  %15940 = vst [vmem:[#allocation157_spill] sm:$0xff] %v14699_v12  ;;  %v13036_v12 = vld [vmem:[%s13685_s6 + $0x748] sm:$0xff]   ;;  %v13038_v34 = vld [vmem:[%s13685_s6 + $0x750] sm:$0xff]  }
 0x23e   : > { %12616 = vmatmul.mubr.msk.bf16.gmra.mrb[204].mxu0 %vm4802_vm0, %v13031_v23  ;;  %12748 = vmatmul.mubr.msk.bf16.gmra.mrb[204].mxu1 %vm4802_vm0, %v13032_v55 }
 0x23f   : > { %12619 = vmatprep.mubr.msk.bf16.mxu0 %vm4802_vm0, %v13033_v18  ;;  %12751 = vmatprep.mubr.msk.bf16.mxu1 %vm4802_vm0, %v13034_v52  ;;  %v13037_v52 = vld [vmem:[%s13685_s6 + $0x550] sm:$0xff]  }
 0x241   : > { %v14707_v27 = vpop.f32.mrb[100].mxu0  ;;  %v14709_v4 = vpop.f32.mrb[100].mxu1 }
 0x242   : > { %15941 = vst [vmem:[#allocation158_spill] sm:$0xff] %v14707_v27  ;;  %15942 = vst [vmem:[#allocation159_spill] sm:$0xff] %v14709_v4  ;;  %v14713_v7 = vpop.f32.mrb[101].mxu0  ;;  %v14715_v43 = vpop.f32.mrb[101].mxu1 }
 0x243   : > { %15943 = vst [vmem:[#allocation160_spill] sm:$0xff] %v14713_v7  ;;  %15944 = vst [vmem:[#allocation161_spill] sm:$0xff] %v14715_v43  ;;  %v14721_v55 = vpop.f32.mrb[102].mxu0  ;;  %v14723_v18 = vpop.f32.mrb[102].mxu1  ;;  %v13043_v7 = vld [vmem:[%s13685_s6 + $0x568] sm:$0xff]  }
 0x244   : > { %15945 = vst [vmem:[#allocation162_spill] sm:$0xff] %v14721_v55  ;;  %15946 = vst [vmem:[#allocation163_spill] sm:$0xff] %v14723_v18  ;;  %v14729_v4 = vpop.f32.mrb[103].mxu0  ;;  %v14731_v27 = vpop.f32.mrb[103].mxu1 }
 0x245   : > { %15947 = vst [vmem:[#allocation164_spill] sm:$0xff] %v14729_v4  ;;  %15948 = vst [vmem:[#allocation165_spill] sm:$0xff] %v14731_v27  ;;  %v13040_v27 = vld [vmem:[%s13685_s6 + $0x758] sm:$0xff]   ;;  %v13042_v4 = vld [vmem:[%s13685_s6 + $0x760] sm:$0xff]  }
 0x246   : > { %12620 = vmatmul.mubr.msk.bf16.gmra.mrb[208].mxu0 %vm4802_vm0, %v13035_v60  ;;  %12752 = vmatmul.mubr.msk.bf16.gmra.mrb[208].mxu1 %vm4802_vm0, %v13036_v12 }
 0x247   : > { %12623 = vmatprep.mubr.msk.bf16.mxu0 %vm4802_vm0, %v13037_v52  ;;  %12755 = vmatprep.mubr.msk.bf16.mxu1 %vm4802_vm0, %v13038_v34  ;;  %v13041_v34 = vld [vmem:[%s13685_s6 + $0x560] sm:$0xff]  }
 0x249   : > { %v14739_v23 = vpop.f32.mrb[104].mxu0  ;;  %v14741_v63 = vpop.f32.mrb[104].mxu1 }
 0x24a   : > { %15949 = vst [vmem:[#allocation166_spill] sm:$0xff] %v14739_v23  ;;  %15950 = vst [vmem:[#allocation167_spill] sm:$0xff] %v14741_v63  ;;  %v14745_v55 = vpop.f32.mrb[105].mxu0  ;;  %v14747_v43 = vpop.f32.mrb[105].mxu1 }
 0x24b   : > { %15951 = vst [vmem:[#allocation168_spill] sm:$0xff] %v14745_v55  ;;  %15952 = vst [vmem:[#allocation169_spill] sm:$0xff] %v14747_v43  ;;  %v14753_v12 = vpop.f32.mrb[106].mxu0  ;;  %v14755_v52 = vpop.f32.mrb[106].mxu1  ;;  %v13047_v55 = vld [vmem:[%s13685_s6 + $0x578] sm:$0xff]  }
 0x24c   : > { %15953 = vst [vmem:[#allocation170_spill] sm:$0xff] %v14753_v12  ;;  %15954 = vst [vmem:[#allocation171_spill] sm:$0xff] %v14755_v52  ;;  %v14761_v63 = vpop.f32.mrb[107].mxu0  ;;  %v14763_v23 = vpop.f32.mrb[107].mxu1 }
 0x24d   : > { %15955 = vst [vmem:[#allocation172_spill] sm:$0xff] %v14761_v63  ;;  %15956 = vst [vmem:[#allocation173_spill] sm:$0xff] %v14763_v23  ;;  %v13044_v23 = vld [vmem:[%s13685_s6 + $0x768] sm:$0xff]   ;;  %v13046_v63 = vld [vmem:[%s13685_s6 + $0x770] sm:$0xff]  }
 0x24e   : > { %12624 = vmatmul.mubr.msk.bf16.gmra.mrb[212].mxu0 %vm4802_vm0, %v13039_v39  ;;  %12756 = vmatmul.mubr.msk.bf16.gmra.mrb[212].mxu1 %vm4802_vm0, %v13040_v27 }
 0x24f   : > { %12627 = vmatprep.mubr.msk.bf16.mxu0 %vm4802_vm0, %v13041_v34  ;;  %12759 = vmatprep.mubr.msk.bf16.mxu1 %vm4802_vm0, %v13042_v4  ;;  %v13045_v4 = vld [vmem:[%s13685_s6 + $0x570] sm:$0xff]  }
 0x251   : > { %v14771_v60 = vpop.f32.mrb[108].mxu0  ;;  %v14773_v18 = vpop.f32.mrb[108].mxu1 }
 0x252   : > { %15957 = vst [vmem:[#allocation174_spill] sm:$0xff] %v14771_v60  ;;  %15958 = vst [vmem:[#allocation175_spill] sm:$0xff] %v14773_v18  ;;  %v14777_v12 = vpop.f32.mrb[109].mxu0  ;;  %v14779_v43 = vpop.f32.mrb[109].mxu1 }
 0x253   : > { %15959 = vst [vmem:[#allocation176_spill] sm:$0xff] %v14777_v12  ;;  %15960 = vst [vmem:[#allocation177_spill] sm:$0xff] %v14779_v43  ;;  %v14785_v27 = vpop.f32.mrb[110].mxu0  ;;  %v14787_v34 = vpop.f32.mrb[110].mxu1  ;;  %v13051_v12 = vld [vmem:[%s13685_s6 + $0x588] sm:$0xff]  }
 0x254   : > { %15961 = vst [vmem:[#allocation178_spill] sm:$0xff] %v14785_v27  ;;  %15962 = vst [vmem:[#allocation179_spill] sm:$0xff] %v14787_v34  ;;  %v14793_v18 = vpop.f32.mrb[111].mxu0  ;;  %v14795_v60 = vpop.f32.mrb[111].mxu1 }
 0x255   : > { %15963 = vst [vmem:[#allocation180_spill] sm:$0xff] %v14793_v18  ;;  %15964 = vst [vmem:[#allocation181_spill] sm:$0xff] %v14795_v60  ;;  %v13048_v60 = vld [vmem:[%s13685_s6 + $0x778] sm:$0xff]   ;;  %v13050_v18 = vld [vmem:[%s13685_s6 + $0x780] sm:$0xff]  }
 0x256   : > { %12628 = vmatmul.mubr.msk.bf16.gmra.mrb[216].mxu0 %vm4802_vm0, %v13043_v7  ;;  %12760 = vmatmul.mubr.msk.bf16.gmra.mrb[216].mxu1 %vm4802_vm0, %v13044_v23 }
 0x257   : > { %12631 = vmatprep.mubr.msk.bf16.mxu0 %vm4802_vm0, %v13045_v4  ;;  %12763 = vmatprep.mubr.msk.bf16.mxu1 %vm4802_vm0, %v13046_v63  ;;  %v13049_v63 = vld [vmem:[%s13685_s6 + $0x580] sm:$0xff]  }
 0x259   : > { %v14803_v39 = vpop.f32.mrb[112].mxu0  ;;  %v14805_v52 = vpop.f32.mrb[112].mxu1 }
 0x25a   : > { %15965 = vst [vmem:[#allocation182_spill] sm:$0xff] %v14803_v39  ;;  %15966 = vst [vmem:[#allocation183_spill] sm:$0xff] %v14805_v52  ;;  %v14809_v27 = vpop.f32.mrb[113].mxu0  ;;  %v14811_v43 = vpop.f32.mrb[113].mxu1 }
 0x25b   : > { %15967 = vst [vmem:[#allocation184_spill] sm:$0xff] %v14809_v27  ;;  %15968 = vst [vmem:[#allocation185_spill] sm:$0xff] %v14811_v43  ;;  %v14817_v23 = vpop.f32.mrb[114].mxu0  ;;  %v14819_v4 = vpop.f32.mrb[114].mxu1  ;;  %v13055_v27 = vld [vmem:[%s13685_s6 + $0x598] sm:$0xff]  }
 0x25c   : > { %15969 = vst [vmem:[#allocation186_spill] sm:$0xff] %v14817_v23  ;;  %15970 = vst [vmem:[#allocation187_spill] sm:$0xff] %v14819_v4  ;;  %v14825_v52 = vpop.f32.mrb[115].mxu0  ;;  %v14827_v39 = vpop.f32.mrb[115].mxu1 }
 0x25d   : > { %15971 = vst [vmem:[#allocation188_spill] sm:$0xff] %v14825_v52  ;;  %15972 = vst [vmem:[#allocation189_spill] sm:$0xff] %v14827_v39  ;;  %v13052_v39 = vld [vmem:[%s13685_s6 + $0x788] sm:$0xff]   ;;  %v13054_v52 = vld [vmem:[%s13685_s6 + $0x790] sm:$0xff]  }
 0x25e   : > { %12632 = vmatmul.mubr.msk.bf16.gmra.mrb[220].mxu0 %vm4802_vm0, %v13047_v55  ;;  %12764 = vmatmul.mubr.msk.bf16.gmra.mrb[220].mxu1 %vm4802_vm0, %v13048_v60 }
 0x25f   : > { %12635 = vmatprep.mubr.msk.bf16.mxu0 %vm4802_vm0, %v13049_v63  ;;  %12767 = vmatprep.mubr.msk.bf16.mxu1 %vm4802_vm0, %v13050_v18  ;;  %v13053_v18 = vld [vmem:[%s13685_s6 + $0x590] sm:$0xff]  }
 0x261   : > { %v14835_v7 = vpop.f32.mrb[116].mxu0  ;;  %v14837_v34 = vpop.f32.mrb[116].mxu1 }
 0x262   : > { %15973 = vst [vmem:[#allocation190_spill] sm:$0xff] %v14835_v7  ;;  %15974 = vst [vmem:[#allocation191_spill] sm:$0xff] %v14837_v34  ;;  %v14841_v23 = vpop.f32.mrb[117].mxu0  ;;  %v14843_v43 = vpop.f32.mrb[117].mxu1 }
 0x263   : > { %15975 = vst [vmem:[#allocation192_spill] sm:$0xff] %v14841_v23  ;;  %15976 = vst [vmem:[#allocation193_spill] sm:$0xff] %v14843_v43  ;;  %v14849_v60 = vpop.f32.mrb[118].mxu0  ;;  %v14851_v63 = vpop.f32.mrb[118].mxu1 }
 0x264   : > { %15977 = vst [vmem:[#allocation194_spill] sm:$0xff] %v14849_v60  ;;  %15978 = vst [vmem:[#allocation195_spill] sm:$0xff] %v14851_v63  ;;  %v14857_v34 = vpop.f32.mrb[119].mxu0  ;;  %v14859_v7 = vpop.f32.mrb[119].mxu1 }
 0x265   : > { %15979 = vst [vmem:[#allocation196_spill] sm:$0xff] %v14857_v34  ;;  %15980 = vst [vmem:[#allocation197_spill] sm:$0xff] %v14859_v7  ;;  %v13056_v7 = vld [vmem:[%s13685_s6 + $0x798] sm:$0xff]   ;;  %v13058_v34 = vld [vmem:[%s13685_s6 + $0x7a0] sm:$0xff]  }
 0x266   : > { %12636 = vmatmul.mubr.msk.bf16.gmra.mrb[224].mxu0 %vm4802_vm0, %v13051_v12  ;;  %12768 = vmatmul.mubr.msk.bf16.gmra.mrb[224].mxu1 %vm4802_vm0, %v13052_v39 }
 0x267   : > { %12639 = vmatprep.mubr.msk.bf16.mxu0 %vm4802_vm0, %v13053_v18  ;;  %12771 = vmatprep.mubr.msk.bf16.mxu1 %vm4802_vm0, %v13054_v52  ;;  %v13057_v52 = vld [vmem:[%s13685_s6 + $0x5a0] sm:$0xff]  }
 0x269   : > { %v14867_v55 = vpop.f32.mrb[120].mxu0  ;;  %v14869_v4 = vpop.f32.mrb[120].mxu1 }
 0x26a   : > { %15981 = vst [vmem:[#allocation198_spill] sm:$0xff] %v14867_v55  ;;  %15982 = vst [vmem:[#allocation199_spill] sm:$0xff] %v14869_v4  ;;  %v14873_v60 = vpop.f32.mrb[121].mxu0  ;;  %v14875_v43 = vpop.f32.mrb[121].mxu1 }
 0x26b   : > { %15983 = vst [vmem:[#allocation200_spill] sm:$0xff] %v14873_v60  ;;  %15984 = vst [vmem:[#allocation201_spill] sm:$0xff] %v14875_v43  ;;  %v14881_v39 = vpop.f32.mrb[122].mxu0  ;;  %v14883_v18 = vpop.f32.mrb[122].mxu1  ;;  %v13062_v43 = vld [vmem:[%s13685_s6 + $0x7b0] sm:$0xff]  }
 0x26c   : > { %15985 = vst [vmem:[#allocation202_spill] sm:$0xff] %v14881_v39  ;;  %15986 = vst [vmem:[#allocation203_spill] sm:$0xff] %v14883_v18  ;;  %v14889_v4 = vpop.f32.mrb[123].mxu0  ;;  %v14891_v55 = vpop.f32.mrb[123].mxu1 }
 0x26d   : > { %15987 = vst [vmem:[#allocation204_spill] sm:$0xff] %v14889_v4  ;;  %15988 = vst [vmem:[#allocation205_spill] sm:$0xff] %v14891_v55  ;;  %v13059_v55 = vld [vmem:[%s13685_s6 + $0x5a8] sm:$0xff]   ;;  %v13061_v4 = vld [vmem:[%s13685_s6 + $0x5b0] sm:$0xff]  }
 0x26e   : > { %12640 = vmatmul.mubr.msk.bf16.gmra.mrb[228].mxu0 %vm4802_vm0, %v13055_v27  ;;  %12772 = vmatmul.mubr.msk.bf16.gmra.mrb[228].mxu1 %vm4802_vm0, %v13056_v7  ;;  %v13060_v27 = vld [vmem:[%s13685_s6 + $0x7a8] sm:$0xff]  }
 0x26f   : > { %12643 = vmatprep.mubr.msk.bf16.mxu0 %vm4802_vm0, %v13057_v52  ;;  %12775 = vmatprep.mubr.msk.bf16.mxu1 %vm4802_vm0, %v13058_v34 }
 0x271   : > { %v14899_v12 = vpop.f32.mrb[124].mxu0  ;;  %v14901_v63 = vpop.f32.mrb[124].mxu1 }
 0x272   : > { %15989 = vst [vmem:[#allocation206_spill] sm:$0xff] %v14899_v12  ;;  %15990 = vst [vmem:[#allocation207_spill] sm:$0xff] %v14901_v63  ;;  %v14905_v39 = vpop.f32.mrb[125].mxu0  ;;  %v14907_v23 = vpop.f32.mrb[125].mxu1 }
 0x273   : > { %15991 = vst [vmem:[#allocation208_spill] sm:$0xff] %v14905_v39  ;;  %15992 = vst [vmem:[#allocation209_spill] sm:$0xff] %v14907_v23  ;;  %v14913_v52 = vpop.f32.mrb[126].mxu0  ;;  %v14915_v34 = vpop.f32.mrb[126].mxu1  ;;  %v13064_v23 = vld [vmem:[%s13685_s6 + $0x7b8] sm:$0xff]  }
 0x274   : > { %15993 = vst [vmem:[#allocation210_spill] sm:$0xff] %v14913_v52  ;;  %15994 = vst [vmem:[#allocation211_spill] sm:$0xff] %v14915_v34  ;;  %v14921_v18 = vpop.f32.mrb[127].mxu0  ;;  %v14923_v63 = vpop.f32.mrb[127].mxu1  ;;  %v15997_v34 = vmax.f32 %v13909_v50, %v13911_v51  ;;  %v15999_v50 = vmax.f32 %v13921_v56, %v13923_v57 }
 0x275   : > { %15995 = vst [vmem:[#allocation212_spill] sm:$0xff] %v14921_v18  ;;  %15996 = vst [vmem:[#allocation213_spill] sm:$0xff] %v14923_v63  ;;  %v13063_v18 = vld [vmem:[%s13685_s6 + $0x5b8] sm:$0xff]  }
 0x276   : > { %12644 = vmatmul.mubr.msk.bf16.gmra.mrb[232].mxu0 %vm4802_vm0, %v13059_v55  ;;  %12776 = vmatmul.mubr.msk.bf16.gmra.mrb[232].mxu1 %vm4802_vm0, %v13060_v27  ;;  %v14941_v55 = vld [vmem:[%s15573_s2] ss:$0 sm:$0xff] }
 0x277   : > { %12647 = vmatprep.mubr.msk.bf16.mxu0 %vm4802_vm0, %v13061_v4  ;;  %12779 = vmatprep.mubr.msk.bf16.mxu1 %vm4802_vm0, %v13062_v43  ;;  %v15998_v4 = vmax.f32 %v13915_v53, %v13917_v54 }
 0x279   : > { %v12541_v60 = vpop.f32.mrb[128].mxu0  ;;  %v12673_v7 = vpop.f32.mrb[128].mxu1 }
 0x27a   : > { %v8042_v52 = vmax.f32 %v15997_v34, %v12541_v60  ;;  %v7529_v12 = vpop.f32.mrb[129].mxu0  ;;  %v8843_v63 = vpop.f32.mrb[129].mxu1 }
 0x27b   : > { %v8040_v43 = vmax.f32 %v15998_v4, %v7529_v12  ;;  %v12542_v27 = vpop.f32.mrb[130].mxu0  ;;  %v12674_v39 = vpop.f32.mrb[130].mxu1 }
 0x27c   : > { %v9356_v1 = vmax.f32 %v8042_v52, %v12673_v7  ;;  %v8043_v51 = vmax.f32 %v15999_v50, %v12542_v27  ;;  %v7532_v60 = vpop.f32.mrb[131].mxu0  ;;  %v8846_v34 = vpop.f32.mrb[131].mxu1  ;;  %v16002_v52 = vmax.f32 %v13947_v5, %v13949_v6 }
 0x27d   : > { %v9354_v28 = vmax.f32 %v8040_v43, %v8843_v63  ;;  %v8041_v26 = vmax.f32 %v16000_v31, %v7532_v60  ;;  %v16003_v60 = vmax.f32 %v13953_v8, %v13955_v9 }
 0x27e   : > { %v9491_v53 = vadd.f32 %v14941_v55, %v9356_v1  ;;  %v9357_v54 = vmax.f32 %v8043_v51, %v12674_v39  ;;  %12648 = vmatmul.mubr.msk.bf16.gmra.mrb[236].mxu0 %vm4802_vm0, %v13063_v18  ;;  %12780 = vmatmul.mubr.msk.bf16.gmra.mrb[236].mxu1 %vm4802_vm0, %v13064_v23  ;;  %v16001_v23 = vmax.f32 %v13941_v2, %v13943_v3  ;;  %v13068_v18 = vld [vmem:[%s13685_s6 + $0x7c8] sm:$0xff]   ;;  %v13069_v2 = vld [vmem:[%s13685_s6 + $0x5d0] sm:$0xff]  }
 0x27f   : > { %v9489_v56 = vadd.f32 %v14941_v55, %v9354_v28  ;;  %v9355_v57 = vmax.f32 %v8041_v26, %v8846_v34  ;;  %12651 = vmatprep.mubr.msk.bf16.mxu0 %vm4802_vm0, %v13065_v15  ;;  %12783 = vmatprep.mubr.msk.bf16.mxu1 %vm4802_vm0, %v13066_v58  ;;  %v13067_v15 = vld [vmem:[%s13685_s6 + $0x5c8] sm:$0xff]   ;;  %v13070_v3 = vld [vmem:[%s13685_s6 + $0x7d0] sm:$0xff]  }
 0x280   : > { %v9492_v61 = vadd.f32 %v14941_v55, %v9357_v54  ;;  %v9619_v63 = vmax.f32 %v9491_v53, 0.0 }
 0x281   : > { %v9490_v62 = vadd.f32 %v14941_v55, %v9355_v57  ;;  %v12545_v31 = vpop.f32.mrb[132].mxu0  ;;  %v12677_v1 = vpop.f32.mrb[132].mxu1  ;;  %v9617_v58 = vmax.f32 %v9489_v56, 0.0 }
 0x282   : > { %v9620_v12 = vmax.f32 %v9492_v61, 0.0  ;;  %v8046_v28 = vmax.f32 %v16001_v23, %v12545_v31  ;;  %v7545_v26 = vpop.f32.mrb[133].mxu0  ;;  %v8859_v39 = vpop.f32.mrb[133].mxu1  ;;  %v16004_v61 = vmax.f32 %v13961_v13, %v13963_v14  ;;  %v16005_v23 = vmax.f32 %v13971_v16, %v13973_v17 }
 0x283   : > { %v9618_v7 = vmax.f32 %v9490_v62, 0.0  ;;  %v8044_v4 = vmax.f32 %v16002_v52, %v7545_v26  ;;  %v12546_v43 = vpop.f32.mrb[134].mxu0  ;;  %v12678_v27 = vpop.f32.mrb[134].mxu1  ;;  %v16006_v52 = vmax.f32 %v13977_v19, %v13979_v20  ;;  %v16007_v16 = vmax.f32 %v13985_v24, %v13987_v25 }
 0x284   : > { %v11632_v50 = vpack.c.bf16 %v9620_v12, %v9619_v63  ;;  %v9360_v51 = vmax.f32 %v8046_v28, %v12677_v1  ;;  %v8047_v34 = vmax.f32 %v16003_v60, %v12546_v43  ;;  %v7548_v53 = vpop.f32.mrb[135].mxu0  ;;  %v8862_v54 = vpop.f32.mrb[135].mxu1 }
 0x285   : > { %v11627_v56 = vpack.c.bf16 %v9618_v7, %v9617_v58  ;;  %v9358_v57 = vmax.f32 %v8044_v4, %v8859_v39  ;;  %v8045_v5 = vmax.f32 %v16004_v61, %v7548_v53 }
 0x286   : > { %11944 = vst [vmem:[%s14971_s14 + $0x8] sm:$0xff] %v11632_v50   ;;  %v9495_v6 = vadd.f32 %v14941_v55, %v9360_v51  ;;  %v9361_v62 = vmax.f32 %v8047_v34, %v12678_v27  ;;  %12652 = vmatmul.mubr.msk.bf16.gmra.mrb[240].mxu0 %vm4802_vm0, %v13067_v15  ;;  %12784 = vmatmul.mubr.msk.bf16.gmra.mrb[240].mxu1 %vm4802_vm0, %v13068_v18  ;;  %v13071_v15 = vld [vmem:[%s13685_s6 + $0x5d8] sm:$0xff]  }
 0x287   : > { %11628 = vst [vmem:[%s14971_s14] sm:$0xff] %v11627_v56   ;;  %v9493_v8 = vadd.f32 %v14941_v55, %v9358_v57  ;;  %v9359_v9 = vmax.f32 %v8045_v5, %v8862_v54  ;;  %12655 = vmatprep.mubr.msk.bf16.mxu0 %vm4802_vm0, %v13069_v2  ;;  %12787 = vmatprep.mubr.msk.bf16.mxu1 %vm4802_vm0, %v13070_v3  ;;  %v13072_v18 = vld [vmem:[%s13685_s6 + $0x7d8] sm:$0xff]   ;;  %v13073_v2 = vld [vmem:[%s13685_s6 + $0x5e0] sm:$0xff]  }
 0x288   : > { %v9496_v13 = vadd.f32 %v14941_v55, %v9361_v62  ;;  %v9623_v63 = vmax.f32 %v9495_v6, 0.0  ;;  %v13074_v3 = vld [vmem:[%s13685_s6 + $0x7e0] sm:$0xff]   ;;  %v16008_v56 = vmax.f32 %v13993_v29, %v13995_v30 }
 0x289   : > { %v9494_v14 = vadd.f32 %v14941_v55, %v9359_v9  ;;  %v12549_v31 = vpop.f32.mrb[136].mxu0  ;;  %v12681_v1 = vpop.f32.mrb[136].mxu1  ;;  %v9621_v58 = vmax.f32 %v9493_v8, 0.0  ;;  %v16009_v8 = vmax.f32 %v14003_v32, %v14005_v33  ;;  %v16011_v32 = vmax.f32 %v14017_v40, %v14019_v41 }
 0x28a   : > { %v9624_v12 = vmax.f32 %v9496_v13, 0.0  ;;  %v8050_v28 = vmax.f32 %v16005_v23, %v12549_v31  ;;  %v7561_v26 = vpop.f32.mrb[137].mxu0  ;;  %v8875_v39 = vpop.f32.mrb[137].mxu1  ;;  %v13075_v31 = vld [vmem:[%s13685_s6 + $0x5e8] sm:$0xff]   ;;  %v16010_v23 = vmax.f32 %v14009_v35, %v14011_v36 }
 0x28b   : > { %v9622_v7 = vmax.f32 %v9494_v14, 0.0  ;;  %v8048_v4 = vmax.f32 %v16006_v52, %v7561_v26  ;;  %v12550_v43 = vpop.f32.mrb[138].mxu0  ;;  %v12682_v27 = vpop.f32.mrb[138].mxu1 }
 0x28c   : > { %v11642_v50 = vpack.c.bf16 %v9624_v12, %v9623_v63  ;;  %v9364_v51 = vmax.f32 %v8050_v28, %v12681_v1  ;;  %v8051_v17 = vmax.f32 %v16007_v16, %v12550_v43  ;;  %v7564_v60 = vpop.f32.mrb[139].mxu0  ;;  %v8878_v34 = vpop.f32.mrb[139].mxu1  ;;  %v13076_v1 = vld [vmem:[%s13685_s6 + $0x7e8] sm:$0xff]  }
 0x28d   : > { %v11637_v53 = vpack.c.bf16 %v9622_v7, %v9621_v58  ;;  %v9362_v54 = vmax.f32 %v8048_v4, %v8875_v39  ;;  %v8049_v19 = vmax.f32 %v16008_v56, %v7564_v60  ;;  %v16013_v60 = vmax.f32 %v14035_v48, %v14037_v49  ;;  %v13079_v56 = vld [vmem:[%s13685_s6 + $0x5f8] sm:$0xff]  }
 0x28e   : > { %11946 = vst [vmem:[%s14971_s14 + $0x18] sm:$0xff] %v11642_v50   ;;  %v9499_v20 = vadd.f32 %v14941_v55, %v9364_v51  ;;  %v9365_v57 = vmax.f32 %v8051_v17, %v12682_v27  ;;  %12656 = vmatmul.mubr.msk.bf16.gmra.mrb[244].mxu0 %vm4802_vm0, %v13071_v15  ;;  %12788 = vmatmul.mubr.msk.bf16.gmra.mrb[244].mxu1 %vm4802_vm0, %v13072_v18  ;;  %v13077_v15 = vld [vmem:[%s13685_s6 + $0x5f0] sm:$0xff]  }
 0x28f   : > { %11945 = vst [vmem:[%s14971_s14 + $0x10] sm:$0xff] %v11637_v53   ;;  %v9497_v24 = vadd.f32 %v14941_v55, %v9362_v54  ;;  %v9363_v25 = vmax.f32 %v8049_v19, %v8878_v34  ;;  %12659 = vmatprep.mubr.msk.bf16.mxu0 %vm4802_vm0, %v13073_v2  ;;  %12791 = vmatprep.mubr.msk.bf16.mxu1 %vm4802_vm0, %v13074_v3  ;;  %v13078_v18 = vld [vmem:[%s13685_s6 + $0x7f0] sm:$0xff]   ;;  %v13080_v19 = vld [vmem:[%s13685_s6 + $0x7f8] sm:$0xff]  }
 0x290   : > { %v9500_v29 = vadd.f32 %v14941_v55, %v9365_v57  ;;  %v9627_v6 = vmax.f32 %v9499_v20, 0.0  ;;  %v16012_v2 = vmax.f32 %v14025_v45, %v14027_v46  ;;  %v16015_v48 = vmax.f32 %v14049_v21, %v14051_v22 }
 0x291   : > { %v9498_v30 = vadd.f32 %v14941_v55, %v9363_v25  ;;  %v12553_v61 = vpop.f32.mrb[140].mxu0  ;;  %v12685_v5 = vpop.f32.mrb[140].mxu1  ;;  %v9625_v63 = vmax.f32 %v9497_v24, 0.0  ;;  %v16014_v24 = vmax.f32 %v14041_v59, %v14043_v0 }
 0x292   : > { %v9628_v62 = vmax.f32 %v9500_v29, 0.0  ;;  %v8054_v9 = vmax.f32 %v16009_v8, %v12553_v61  ;;  %v7577_v13 = vpop.f32.mrb[141].mxu0  ;;  %v8891_v14 = vpop.f32.mrb[141].mxu1 }
 0x293   : > { %v9626_v12 = vmax.f32 %v9498_v30, 0.0  ;;  %v8052_v28 = vmax.f32 %v16010_v23, %v7577_v13  ;;  %v12554_v26 = vpop.f32.mrb[142].mxu0  ;;  %v12686_v39 = vpop.f32.mrb[142].mxu1  ;;  %v16016_v13 = vmax.f32 %v14057_v38, %v14059_v42  ;;  %v16017_v23 = vmax.f32 %v14067_v11, %v14069_v37 }
 0x294   : > { %v11652_v58 = vpack.c.bf16 %v9628_v62, %v9627_v6  ;;  %v9368_v7 = vmax.f32 %v8054_v9, %v12685_v5  ;;  %v8055_v33 = vmax.f32 %v16011_v32, %v12554_v26  ;;  %v7580_v52 = vpop.f32.mrb[143].mxu0  ;;  %v8894_v4 = vpop.f32.mrb[143].mxu1 }
 0x295   : > { %v11647_v43 = vpack.c.bf16 %v9626_v12, %v9625_v63  ;;  %v9366_v27 = vmax.f32 %v8052_v28, %v8891_v14  ;;  %v8053_v35 = vmax.f32 %v16012_v2, %v7580_v52 }
 0x296   : > { %11948 = vst [vmem:[%s14971_s14 + $0x28] sm:$0xff] %v11652_v58   ;;  %v9503_v36 = vadd.f32 %v14941_v55, %v9368_v7  ;;  %v9369_v3 = vmax.f32 %v8055_v33, %v12686_v39  ;;  %12660 = vmatmul.mubr.msk.bf16.gmra.mrb[248].mxu0 %vm4802_vm0, %v13075_v31  ;;  %12792 = vmatmul.mubr.msk.bf16.gmra.mrb[248].mxu1 %vm4802_vm0, %v13076_v1 }
 0x297   : > { %11947 = vst [vmem:[%s14971_s14 + $0x20] sm:$0xff] %v11647_v43   ;;  %v9501_v40 = vadd.f32 %v14941_v55, %v9366_v27  ;;  %v9367_v41 = vmax.f32 %v8053_v35, %v8894_v4  ;;  %12663 = vmatprep.mubr.msk.bf16.mxu0 %vm4802_vm0, %v13077_v15  ;;  %12795 = vmatprep.mubr.msk.bf16.mxu1 %vm4802_vm0, %v13078_v18  ;;  %v16019_v43 = vld [vmem:[#allocation3_spill] sm:$0xff] }
 0x298   : > { %v9504_v45 = vadd.f32 %v14941_v55, %v9369_v3  ;;  %v9631_v16 = vmax.f32 %v9503_v36, 0.0  ;;  %v16018_v58 = vmax.f32 %v14073_v47, %v14075_v44  ;;  %v16020_v27 = vmax.f32 %v14081_v10, %v16019_v43  ;;  %v16021_v3 = vld [vmem:[#allocation4_spill] sm:$0xff] }
 0x299   : > { %v9502_v46 = vadd.f32 %v14941_v55, %v9367_v41  ;;  %v12557_v50 = vpop.f32.mrb[144].mxu0  ;;  %v12689_v51 = vpop.f32.mrb[144].mxu1  ;;  %v9629_v20 = vmax.f32 %v9501_v40, 0.0  ;;  %v16022_v40 = vld [vmem:[#allocation5_spill] sm:$0xff] }
 0x29a   : > { %v9632_v17 = vmax.f32 %v9504_v45, 0.0  ;;  %v8058_v34 = vmax.f32 %v16013_v60, %v12557_v50  ;;  %v7593_v53 = vpop.f32.mrb[145].mxu0  ;;  %v8907_v54 = vpop.f32.mrb[145].mxu1  ;;  %v16023_v41 = vmax.f32 %v16021_v3, %v16022_v40 }
 0x29b   : > { %v9630_v57 = vmax.f32 %v9502_v46, 0.0  ;;  %v8056_v25 = vmax.f32 %v16014_v24, %v7593_v53  ;;  %v12558_v29 = vpop.f32.mrb[146].mxu0  ;;  %v12690_v30 = vpop.f32.mrb[146].mxu1  ;;  %v16024_v53 = vld [vmem:[#allocation6_spill] sm:$0xff] }
 0x29c   : > { %v11662_v61 = vpack.c.bf16 %v9632_v17, %v9631_v16  ;;  %v9372_v5 = vmax.f32 %v8058_v34, %v12689_v51  ;;  %v8059_v49 = vmax.f32 %v16015_v48, %v12558_v29  ;;  %v7596_v6 = vpop.f32.mrb[147].mxu0  ;;  %v8910_v62 = vpop.f32.mrb[147].mxu1  ;;  %v16027_v29 = vld [vmem:[#allocation8_spill] sm:$0xff] }
 0x29d   : > { %v11657_v8 = vpack.c.bf16 %v9630_v57, %v9629_v20  ;;  %v9370_v9 = vmax.f32 %v8056_v25, %v8907_v54  ;;  %v8057_v14 = vmax.f32 %v16016_v13, %v7596_v6  ;;  %v16025_v54 = vld [vmem:[#allocation7_spill] sm:$0xff] }
 0x29e   : > { %11950 = vst [vmem:[%s14971_s14 + $0x38] sm:$0xff] %v11662_v61   ;;  %v9507_v59 = vadd.f32 %v14941_v55, %v9372_v5  ;;  %v9373_v0 = vmax.f32 %v8059_v49, %v12690_v30  ;;  %12664 = vmatmul.mubr.msk.bf16.gmra.mrb[252].mxu0 %vm4802_vm0, %v13079_v56  ;;  %12796 = vmatmul.mubr.msk.bf16.gmra.mrb[252].mxu1 %vm4802_vm0, %v13080_v19  ;;  %v16028_v30 = vld [vmem:[#allocation9_spill] sm:$0xff] }
 0x29f   : > { %11949 = vst [vmem:[%s14971_s14 + $0x30] sm:$0xff] %v11657_v8   ;;  %v9505_v21 = vadd.f32 %v14941_v55, %v9370_v9  ;;  %v9371_v22 = vmax.f32 %v8057_v14, %v8910_v62  ;;  %v16026_v56 = vmax.f32 %v16024_v53, %v16025_v54  ;;  %v16029_v61 = vmax.f32 %v16027_v29, %v16028_v30  ;;  %v16030_v8 = vld [vmem:[#allocation10_spill] sm:$0xff]  ;;  %v16031_v9 = vld [vmem:[#allocation11_spill] sm:$0xff]  ;;  %v16046_v53 = vld [vmem:[#allocation21_spill] sm:$0xff] }
 0x2a0   : > { %v9508_v31 = vadd.f32 %v14941_v55, %v9373_v0  ;;  %v9635_v38 = vmax.f32 %v9507_v59, 0.0  ;;  %v16032_v13 = vmax.f32 %v16030_v8, %v16031_v9 }
 0x2a1   : > { %v9506_v1 = vadd.f32 %v14941_v55, %v9371_v22  ;;  %v12561_v63 = vpop.f32.mrb[148].mxu0  ;;  %v12693_v12 = vpop.f32.mrb[148].mxu1  ;;  %v9633_v15 = vmax.f32 %v9505_v21, 0.0 }
 0x2a2   : > { %v9636_v42 = vmax.f32 %v9508_v31, 0.0  ;;  %v8062_v28 = vmax.f32 %v16017_v23, %v12561_v63  ;;  %v7609_v26 = vpop.f32.mrb[149].mxu0  ;;  %v8923_v39 = vpop.f32.mrb[149].mxu1  ;;  %v16033_v31 = vld [vmem:[#allocation12_spill] sm:$0xff] }
 0x2a3   : > { %v9634_v18 = vmax.f32 %v9506_v1, 0.0  ;;  %v8060_v7 = vmax.f32 %v16018_v58, %v7609_v26  ;;  %v12562_v32 = vpop.f32.mrb[150].mxu0  ;;  %v12694_v33 = vpop.f32.mrb[150].mxu1  ;;  %v16034_v1 = vld [vmem:[#allocation13_spill] sm:$0xff] }
 0x2a4   : > { %v11672_v52 = vpack.c.bf16 %v9636_v42, %v9635_v38  ;;  %v9376_v4 = vmax.f32 %v8062_v28, %v12693_v12  ;;  %v8063_v2 = vmax.f32 %v16020_v27, %v12562_v32  ;;  %v7612_v11 = vpop.f32.mrb[151].mxu0  ;;  %v8926_v37 = vpop.f32.mrb[151].mxu1  ;;  %v16035_v63 = vmax.f32 %v16033_v31, %v16034_v1  ;;  %v16036_v32 = vld [vmem:[#allocation14_spill] sm:$0xff] }
 0x2a5   : > { %v11667_v35 = vpack.c.bf16 %v9634_v18, %v9633_v15  ;;  %v9374_v36 = vmax.f32 %v8060_v7, %v8923_v39  ;;  %v8061_v45 = vmax.f32 %v16023_v41, %v7612_v11 }
 0x2a6   : > { %11952 = vst [vmem:[%s14971_s14 + $0x48] sm:$0xff] %v11672_v52   ;;  %v9511_v44 = vadd.f32 %v14941_v55, %v9376_v4  ;;  %v9377_v47 = vmax.f32 %v8063_v2, %v12694_v33  ;;  %v16037_v33 = vld [vmem:[#allocation15_spill] sm:$0xff] }
 0x2a7   : > { %11951 = vst [vmem:[%s14971_s14 + $0x40] sm:$0xff] %v11667_v35   ;;  %v9509_v46 = vadd.f32 %v14941_v55, %v9374_v36  ;;  %v9375_v50 = vmax.f32 %v8061_v45, %v8926_v37  ;;  %v16038_v52 = vmax.f32 %v16036_v32, %v16037_v33  ;;  %v16039_v37 = vld [vmem:[#allocation16_spill] sm:$0xff]  ;;  %v16040_v35 = vld [vmem:[#allocation17_spill] sm:$0xff] }
 0x2a8   : > { %v9512_v51 = vadd.f32 %v14941_v55, %v9377_v47  ;;  %v9639_v60 = vmax.f32 %v9511_v44, 0.0  ;;  %v16041_v36 = vmax.f32 %v16039_v37, %v16040_v35  ;;  %v16042_v47 = vld [vmem:[#allocation18_spill] sm:$0xff]  ;;  %v16058_v32 = vld [vmem:[#allocation29_spill] sm:$0xff] }
 0x2a9   : > { %v9510_v10 = vadd.f32 %v14941_v55, %v9375_v50  ;;  %v12565_v16 = vpop.f32.mrb[152].mxu0  ;;  %v12697_v17 = vpop.f32.mrb[152].mxu1  ;;  %v9637_v24 = vmax.f32 %v9509_v46, 0.0  ;;  %v16043_v46 = vld [vmem:[#allocation19_spill] sm:$0xff] }
 0x2aa   : > { %v9640_v34 = vmax.f32 %v9512_v51, 0.0  ;;  %v8066_v19 = vmax.f32 %v16026_v56, %v12565_v16  ;;  %v7625_v20 = vpop.f32.mrb[153].mxu0  ;;  %v8939_v57 = vpop.f32.mrb[153].mxu1  ;;  %v16044_v50 = vmax.f32 %v16042_v47, %v16043_v46 }
 0x2ab   : > { %v9638_v25 = vmax.f32 %v9510_v10, 0.0  ;;  %v8064_v5 = vmax.f32 %v16029_v61, %v7625_v20  ;;  %v12566_v48 = vpop.f32.mrb[154].mxu0  ;;  %v12698_v49 = vpop.f32.mrb[154].mxu1 }
 0x2ac   : > { %v11682_v6 = vpack.c.bf16 %v9640_v34, %v9639_v60  ;;  %v9380_v62 = vmax.f32 %v8066_v19, %v12697_v17  ;;  %v8067_v14 = vmax.f32 %v16032_v13, %v12566_v48  ;;  %v7628_v59 = vpop.f32.mrb[155].mxu0  ;;  %v8942_v0 = vpop.f32.mrb[155].mxu1  ;;  %v16045_v34 = vld [vmem:[#allocation20_spill] sm:$0xff] }
 0x2ad   : > { %v11677_v21 = vpack.c.bf16 %v9638_v25, %v9637_v24  ;;  %v9378_v22 = vmax.f32 %v8064_v5, %v8939_v57  ;;  %v8065_v12 = vmax.f32 %v16035_v63, %v7628_v59  ;;  %v16047_v54 = vmax.f32 %v16045_v34, %v16046_v53 }
 0x2ae   : > { %11954 = vst [vmem:[%s14971_s14 + $0x58] sm:$0xff] %v11682_v6   ;;  %v9515_v38 = vadd.f32 %v14941_v55, %v9380_v62  ;;  %v9381_v42 = vmax.f32 %v8067_v14, %v12698_v49  ;;  %v16048_v49 = vld [vmem:[#allocation22_spill] sm:$0xff]  ;;  %v16049_v6 = vld [vmem:[#allocation23_spill] sm:$0xff] }
 0x2af   : > { %11953 = vst [vmem:[%s14971_s14 + $0x50] sm:$0xff] %v11677_v21   ;;  %v9513_v23 = vadd.f32 %v14941_v55, %v9378_v22  ;;  %v9379_v28 = vmax.f32 %v8065_v12, %v8942_v0  ;;  %v16050_v62 = vmax.f32 %v16048_v49, %v16049_v6  ;;  %v16051_v0 = vld [vmem:[#allocation24_spill] sm:$0xff]  ;;  %v16052_v21 = vld [vmem:[#allocation25_spill] sm:$0xff] }
 0x2b0   : > { %v9516_v26 = vadd.f32 %v14941_v55, %v9381_v42  ;;  %v9643_v58 = vmax.f32 %v9515_v38, 0.0  ;;  %v16053_v22 = vmax.f32 %v16051_v0, %v16052_v21  ;;  %v16054_v42 = vld [vmem:[#allocation26_spill] sm:$0xff]  ;;  %v16070_v49 = vld [vmem:[#allocation37_spill] sm:$0xff] }
 0x2b1   : > { %v9514_v39 = vadd.f32 %v14941_v55, %v9379_v28  ;;  %v12569_v15 = vpop.f32.mrb[156].mxu0  ;;  %v12701_v18 = vpop.f32.mrb[156].mxu1  ;;  %v9641_v2 = vmax.f32 %v9513_v23, 0.0  ;;  %v16055_v23 = vld [vmem:[#allocation27_spill] sm:$0xff] }
 0x2b2   : > { %v9644_v7 = vmax.f32 %v9516_v26, 0.0  ;;  %v8070_v4 = vmax.f32 %v16038_v52, %v12569_v15  ;;  %v7641_v43 = vpop.f32.mrb[157].mxu0  ;;  %v8955_v27 = vpop.f32.mrb[157].mxu1  ;;  %v16056_v28 = vmax.f32 %v16054_v42, %v16055_v23 }
 0x2b3   : > { %v9642_v11 = vmax.f32 %v9514_v39, 0.0  ;;  %v8068_v3 = vmax.f32 %v16041_v36, %v7641_v43  ;;  %v12570_v40 = vpop.f32.mrb[158].mxu0  ;;  %v12702_v41 = vpop.f32.mrb[158].mxu1 }
 0x2b4   : > { %v11692_v45 = vpack.c.bf16 %v9644_v7, %v9643_v58  ;;  %v9384_v44 = vmax.f32 %v8070_v4, %v12701_v18  ;;  %v8071_v51 = vmax.f32 %v16044_v50, %v12570_v40  ;;  %v7644_v10 = vpop.f32.mrb[159].mxu0  ;;  %v8958_v16 = vpop.f32.mrb[159].mxu1  ;;  %v16057_v7 = vld [vmem:[#allocation28_spill] sm:$0xff] }
 0x2b5   : > { %v11687_v17 = vpack.c.bf16 %v9642_v11, %v9641_v2  ;;  %v9382_v60 = vmax.f32 %v8068_v3, %v8955_v27  ;;  %v8069_v56 = vmax.f32 %v16047_v54, %v7644_v10  ;;  %v16059_v33 = vmax.f32 %v16057_v7, %v16058_v32 }
 0x2b6   : > { %11956 = vst [vmem:[%s14971_s14 + $0x68] sm:$0xff] %v11692_v45   ;;  %v9519_v19 = vadd.f32 %v14941_v55, %v9384_v44  ;;  %v9385_v20 = vmax.f32 %v8071_v51, %v12702_v41  ;;  %v16060_v41 = vld [vmem:[#allocation30_spill] sm:$0xff]  ;;  %v16061_v45 = vld [vmem:[#allocation31_spill] sm:$0xff] }
 0x2b7   : > { %11955 = vst [vmem:[%s14971_s14 + $0x60] sm:$0xff] %v11687_v17   ;;  %v9517_v57 = vadd.f32 %v14941_v55, %v9382_v60  ;;  %v9383_v24 = vmax.f32 %v8069_v56, %v8958_v16  ;;  %v16062_v44 = vmax.f32 %v16060_v41, %v16061_v45  ;;  %v16063_v16 = vld [vmem:[#allocation32_spill] sm:$0xff]  ;;  %v16064_v17 = vld [vmem:[#allocation33_spill] sm:$0xff] }
 0x2b8   : > { %v9520_v25 = vadd.f32 %v14941_v55, %v9385_v20  ;;  %v9647_v5 = vmax.f32 %v9519_v19, 0.0  ;;  %v16065_v60 = vmax.f32 %v16063_v16, %v16064_v17  ;;  %v16066_v20 = vld [vmem:[#allocation34_spill] sm:$0xff]  ;;  %v16082_v41 = vld [vmem:[#allocation45_spill] sm:$0xff] }
 0x2b9   : > { %v9518_v29 = vadd.f32 %v14941_v55, %v9383_v24  ;;  %v12573_v30 = vpop.f32.mrb[160].mxu0  ;;  %v12705_v61 = vpop.f32.mrb[160].mxu1  ;;  %v9645_v14 = vmax.f32 %v9517_v57, 0.0  ;;  %v16067_v57 = vld [vmem:[#allocation35_spill] sm:$0xff] }
 0x2ba   : > { %v9648_v48 = vmax.f32 %v9520_v25, 0.0  ;;  %v8074_v8 = vmax.f32 %v16050_v62, %v12573_v30  ;;  %v7657_v9 = vpop.f32.mrb[161].mxu0  ;;  %v8971_v13 = vpop.f32.mrb[161].mxu1  ;;  %v16068_v24 = vmax.f32 %v16066_v20, %v16067_v57 }
 0x2bb   : > { %v9646_v59 = vmax.f32 %v9518_v29, 0.0  ;;  %v8072_v31 = vmax.f32 %v16053_v22, %v7657_v9  ;;  %v12574_v1 = vpop.f32.mrb[162].mxu0  ;;  %v12706_v63 = vpop.f32.mrb[162].mxu1 }
 0x2bc   : > { %v11702_v12 = vpack.c.bf16 %v9648_v48, %v9647_v5  ;;  %v9388_v38 = vmax.f32 %v8074_v8, %v12705_v61  ;;  %v8075_v26 = vmax.f32 %v16056_v28, %v12574_v1  ;;  %v7660_v39 = vpop.f32.mrb[163].mxu0  ;;  %v8974_v15 = vpop.f32.mrb[163].mxu1  ;;  %v16069_v48 = vld [vmem:[#allocation36_spill] sm:$0xff] }
 0x2bd   : > { %v11697_v18 = vpack.c.bf16 %v9646_v59, %v9645_v14  ;;  %v9386_v58 = vmax.f32 %v8072_v31, %v8971_v13  ;;  %v8073_v52 = vmax.f32 %v16059_v33, %v7660_v39  ;;  %v16071_v6 = vmax.f32 %v16069_v48, %v16070_v49 }
 0x2be   : > { %11958 = vst [vmem:[%s14971_s14 + $0x78] sm:$0xff] %v11702_v12   ;;  %v9523_v4 = vadd.f32 %v14941_v55, %v9388_v38  ;;  %v9389_v43 = vmax.f32 %v8075_v26, %v12706_v63  ;;  %v16072_v63 = vld [vmem:[#allocation38_spill] sm:$0xff]  ;;  %v16073_v12 = vld [vmem:[#allocation39_spill] sm:$0xff] }
 0x2bf   : > { %11957 = vst [vmem:[%s14971_s14 + $0x70] sm:$0xff] %v11697_v18   ;;  %v9521_v27 = vadd.f32 %v14941_v55, %v9386_v58  ;;  %v9387_v2 = vmax.f32 %v8073_v52, %v8974_v15  ;;  %v16074_v38 = vmax.f32 %v16072_v63, %v16073_v12  ;;  %v16075_v15 = vld [vmem:[#allocation40_spill] sm:$0xff]  ;;  %v16076_v18 = vld [vmem:[#allocation41_spill] sm:$0xff] }
 0x2c0   : > { %v9524_v11 = vadd.f32 %v14941_v55, %v9389_v43  ;;  %v9651_v3 = vmax.f32 %v9523_v4, 0.0  ;;  %v16077_v58 = vmax.f32 %v16075_v15, %v16076_v18  ;;  %v16078_v43 = vld [vmem:[#allocation42_spill] sm:$0xff]  ;;  %v16094_v63 = vld [vmem:[#allocation53_spill] sm:$0xff] }
 0x2c1   : > { %v9522_v37 = vadd.f32 %v14941_v55, %v9387_v2  ;;  %v12577_v35 = vpop.f32.mrb[164].mxu0  ;;  %v12709_v36 = vpop.f32.mrb[164].mxu1  ;;  %v9649_v51 = vmax.f32 %v9521_v27, 0.0  ;;  %v16079_v27 = vld [vmem:[#allocation43_spill] sm:$0xff] }
 0x2c2   : > { %v9652_v40 = vmax.f32 %v9524_v11, 0.0  ;;  %v8078_v47 = vmax.f32 %v16062_v44, %v12577_v35  ;;  %v7673_v46 = vpop.f32.mrb[165].mxu0  ;;  %v8987_v50 = vpop.f32.mrb[165].mxu1  ;;  %v16080_v2 = vmax.f32 %v16078_v43, %v16079_v27 }
 0x2c3   : > { %v9650_v10 = vmax.f32 %v9522_v37, 0.0  ;;  %v8076_v34 = vmax.f32 %v16065_v60, %v7673_v46  ;;  %v12578_v53 = vpop.f32.mrb[166].mxu0  ;;  %v12710_v54 = vpop.f32.mrb[166].mxu1 }
 0x2c4   : > { %v11712_v56 = vpack.c.bf16 %v9652_v40, %v9651_v3  ;;  %v9392_v19 = vmax.f32 %v8078_v47, %v12709_v36  ;;  %v8079_v25 = vmax.f32 %v16068_v24, %v12578_v53  ;;  %v7676_v29 = vpop.f32.mrb[167].mxu0  ;;  %v8990_v30 = vpop.f32.mrb[167].mxu1  ;;  %v16081_v40 = vld [vmem:[#allocation44_spill] sm:$0xff] }
 0x2c5   : > { %v11707_v61 = vpack.c.bf16 %v9650_v10, %v9649_v51  ;;  %v9390_v5 = vmax.f32 %v8076_v34, %v8987_v50  ;;  %v8077_v62 = vmax.f32 %v16071_v6, %v7676_v29  ;;  %v16083_v45 = vmax.f32 %v16081_v40, %v16082_v41 }
 0x2c6   : > { %11960 = vst [vmem:[%s14971_s14 + $0x88] sm:$0xff] %v11712_v56   ;;  %v9527_v8 = vadd.f32 %v14941_v55, %v9392_v19  ;;  %v9393_v9 = vmax.f32 %v8079_v25, %v12710_v54  ;;  %v16084_v54 = vld [vmem:[#allocation46_spill] sm:$0xff]  ;;  %v16085_v56 = vld [vmem:[#allocation47_spill] sm:$0xff] }
 0x2c7   : > { %11959 = vst [vmem:[%s14971_s14 + $0x80] sm:$0xff] %v11707_v61   ;;  %v9525_v13 = vadd.f32 %v14941_v55, %v9390_v5  ;;  %v9391_v14 = vmax.f32 %v8077_v62, %v8990_v30  ;;  %v16086_v19 = vmax.f32 %v16084_v54, %v16085_v56  ;;  %v16087_v30 = vld [vmem:[#allocation48_spill] sm:$0xff]  ;;  %v16088_v61 = vld [vmem:[#allocation49_spill] sm:$0xff] }
 0x2c8   : > { %v9528_v59 = vadd.f32 %v14941_v55, %v9393_v9  ;;  %v9655_v31 = vmax.f32 %v9527_v8, 0.0  ;;  %v16089_v5 = vmax.f32 %v16087_v30, %v16088_v61  ;;  %v16090_v9 = vld [vmem:[#allocation50_spill] sm:$0xff]  ;;  %v16106_v54 = vld [vmem:[#allocation61_spill] sm:$0xff] }
 0x2c9   : > { %v9526_v0 = vadd.f32 %v14941_v55, %v9391_v14  ;;  %v12581_v21 = vpop.f32.mrb[168].mxu0  ;;  %v12713_v22 = vpop.f32.mrb[168].mxu1  ;;  %v9653_v26 = vmax.f32 %v9525_v13, 0.0  ;;  %v16091_v13 = vld [vmem:[#allocation51_spill] sm:$0xff] }
 0x2ca   : > { %v9656_v1 = vmax.f32 %v9528_v59, 0.0  ;;  %v8082_v42 = vmax.f32 %v16074_v38, %v12581_v21  ;;  %v7689_v23 = vpop.f32.mrb[169].mxu0  ;;  %v9003_v28 = vpop.f32.mrb[169].mxu1  ;;  %v16092_v14 = vmax.f32 %v16090_v9, %v16091_v13 }
 0x2cb   : > { %v9654_v39 = vmax.f32 %v9526_v0, 0.0  ;;  %v8080_v7 = vmax.f32 %v16077_v58, %v7689_v23  ;;  %v12582_v32 = vpop.f32.mrb[170].mxu0  ;;  %v12714_v33 = vpop.f32.mrb[170].mxu1 }
 0x2cc   : > { %v11722_v52 = vpack.c.bf16 %v9656_v1, %v9655_v31  ;;  %v9396_v4 = vmax.f32 %v8082_v42, %v12713_v22  ;;  %v8083_v11 = vmax.f32 %v16080_v2, %v12582_v32  ;;  %v7692_v37 = vpop.f32.mrb[171].mxu0  ;;  %v9006_v35 = vpop.f32.mrb[171].mxu1  ;;  %v16093_v1 = vld [vmem:[#allocation52_spill] sm:$0xff] }
 0x2cd   : > { %v11717_v36 = vpack.c.bf16 %v9654_v39, %v9653_v26  ;;  %v9394_v3 = vmax.f32 %v8080_v7, %v9003_v28  ;;  %v8081_v44 = vmax.f32 %v16083_v45, %v7692_v37  ;;  %v16095_v12 = vmax.f32 %v16093_v1, %v16094_v63 }
 0x2ce   : > { %11962 = vst [vmem:[%s14971_s14 + $0x98] sm:$0xff] %v11722_v52   ;;  %v9531_v47 = vadd.f32 %v14941_v55, %v9396_v4  ;;  %v9397_v46 = vmax.f32 %v8083_v11, %v12714_v33  ;;  %v16096_v33 = vld [vmem:[#allocation54_spill] sm:$0xff]  ;;  %v16097_v52 = vld [vmem:[#allocation55_spill] sm:$0xff] }
 0x2cf   : > { %11961 = vst [vmem:[%s14971_s14 + $0x90] sm:$0xff] %v11717_v36   ;;  %v9529_v50 = vadd.f32 %v14941_v55, %v9394_v3  ;;  %v9395_v51 = vmax.f32 %v8081_v44, %v9006_v35  ;;  %v16098_v4 = vmax.f32 %v16096_v33, %v16097_v52  ;;  %v16099_v35 = vld [vmem:[#allocation56_spill] sm:$0xff]  ;;  %v16100_v36 = vld [vmem:[#allocation57_spill] sm:$0xff] }
 0x2d0   : > { %v9532_v10 = vadd.f32 %v14941_v55, %v9397_v46  ;;  %v9659_v34 = vmax.f32 %v9531_v47, 0.0  ;;  %v16101_v3 = vmax.f32 %v16099_v35, %v16100_v36  ;;  %v16102_v46 = vld [vmem:[#allocation58_spill] sm:$0xff]  ;;  %v16118_v33 = vld [vmem:[#allocation69_spill] sm:$0xff] }
 0x2d1   : > { %v9530_v16 = vadd.f32 %v14941_v55, %v9395_v51  ;;  %v12585_v17 = vpop.f32.mrb[172].mxu0  ;;  %v12717_v60 = vpop.f32.mrb[172].mxu1  ;;  %v9657_v25 = vmax.f32 %v9529_v50, 0.0  ;;  %v16103_v50 = vld [vmem:[#allocation59_spill] sm:$0xff] }
 0x2d2   : > { %v9660_v53 = vmax.f32 %v9532_v10, 0.0  ;;  %v8086_v20 = vmax.f32 %v16086_v19, %v12585_v17  ;;  %v7705_v57 = vpop.f32.mrb[173].mxu0  ;;  %v9019_v24 = vpop.f32.mrb[173].mxu1  ;;  %v16104_v51 = vmax.f32 %v16102_v46, %v16103_v50 }
 0x2d3   : > { %v9658_v29 = vmax.f32 %v9530_v16, 0.0  ;;  %v8084_v48 = vmax.f32 %v16089_v5, %v7705_v57  ;;  %v12586_v49 = vpop.f32.mrb[174].mxu0  ;;  %v12718_v6 = vpop.f32.mrb[174].mxu1 }
 0x2d4   : > { %v11732_v62 = vpack.c.bf16 %v9660_v53, %v9659_v34  ;;  %v9400_v8 = vmax.f32 %v8086_v20, %v12717_v60  ;;  %v8087_v59 = vmax.f32 %v16092_v14, %v12586_v49  ;;  %v7708_v0 = vpop.f32.mrb[175].mxu0  ;;  %v9022_v21 = vpop.f32.mrb[175].mxu1  ;;  %v16105_v53 = vld [vmem:[#allocation60_spill] sm:$0xff] }
 0x2d5   : > { %v11727_v22 = vpack.c.bf16 %v9658_v29, %v9657_v25  ;;  %v9398_v31 = vmax.f32 %v8084_v48, %v9019_v24  ;;  %v8085_v38 = vmax.f32 %v16095_v12, %v7708_v0  ;;  %v16107_v56 = vmax.f32 %v16105_v53, %v16106_v54 }
 0x2d6   : > { %11964 = vst [vmem:[%s14971_s14 + $0xa8] sm:$0xff] %v11732_v62   ;;  %v9535_v42 = vadd.f32 %v14941_v55, %v9400_v8  ;;  %v9401_v23 = vmax.f32 %v8087_v59, %v12718_v6  ;;  %v16108_v6 = vld [vmem:[#allocation62_spill] sm:$0xff]  ;;  %v16109_v62 = vld [vmem:[#allocation63_spill] sm:$0xff] }
 0x2d7   : > { %11963 = vst [vmem:[%s14971_s14 + $0xa0] sm:$0xff] %v11727_v22   ;;  %v9533_v28 = vadd.f32 %v14941_v55, %v9398_v31  ;;  %v9399_v26 = vmax.f32 %v8085_v38, %v9022_v21  ;;  %v16110_v8 = vmax.f32 %v16108_v6, %v16109_v62  ;;  %v16111_v21 = vld [vmem:[#allocation64_spill] sm:$0xff]  ;;  %v16112_v22 = vld [vmem:[#allocation65_spill] sm:$0xff] }
 0x2d8   : > { %v9536_v39 = vadd.f32 %v14941_v55, %v9401_v23  ;;  %v9663_v7 = vmax.f32 %v9535_v42, 0.0  ;;  %v16113_v31 = vmax.f32 %v16111_v21, %v16112_v22  ;;  %v16114_v23 = vld [vmem:[#allocation66_spill] sm:$0xff]  ;;  %v16130_v6 = vld [vmem:[#allocation77_spill] sm:$0xff] }
 0x2d9   : > { %v9534_v15 = vadd.f32 %v14941_v55, %v9399_v26  ;;  %v12589_v18 = vpop.f32.mrb[176].mxu0  ;;  %v12721_v58 = vpop.f32.mrb[176].mxu1  ;;  %v9661_v11 = vmax.f32 %v9533_v28, 0.0  ;;  %v16115_v28 = vld [vmem:[#allocation67_spill] sm:$0xff] }
 0x2da   : > { %v9664_v32 = vmax.f32 %v9536_v39, 0.0  ;;  %v8090_v43 = vmax.f32 %v16098_v4, %v12589_v18  ;;  %v7721_v27 = vpop.f32.mrb[177].mxu0  ;;  %v9035_v2 = vpop.f32.mrb[177].mxu1  ;;  %v16116_v26 = vmax.f32 %v16114_v23, %v16115_v28 }
 0x2db   : > { %v9662_v37 = vmax.f32 %v9534_v15, 0.0  ;;  %v8088_v40 = vmax.f32 %v16101_v3, %v7721_v27  ;;  %v12590_v41 = vpop.f32.mrb[178].mxu0  ;;  %v12722_v45 = vpop.f32.mrb[178].mxu1 }
 0x2dc   : > { %v11742_v44 = vpack.c.bf16 %v9664_v32, %v9663_v7  ;;  %v9404_v47 = vmax.f32 %v8090_v43, %v12721_v58  ;;  %v8091_v10 = vmax.f32 %v16104_v51, %v12590_v41  ;;  %v7724_v16 = vpop.f32.mrb[179].mxu0  ;;  %v9038_v17 = vpop.f32.mrb[179].mxu1  ;;  %v16117_v32 = vld [vmem:[#allocation68_spill] sm:$0xff] }
 0x2dd   : > { %v11737_v60 = vpack.c.bf16 %v9662_v37, %v9661_v11  ;;  %v9402_v34 = vmax.f32 %v8088_v40, %v9035_v2  ;;  %v8089_v19 = vmax.f32 %v16107_v56, %v7724_v16  ;;  %v16119_v52 = vmax.f32 %v16117_v32, %v16118_v33 }
 0x2de   : > { %11966 = vst [vmem:[%s14971_s14 + $0xb8] sm:$0xff] %v11742_v44   ;;  %v9539_v20 = vadd.f32 %v14941_v55, %v9404_v47  ;;  %v9405_v57 = vmax.f32 %v8091_v10, %v12722_v45  ;;  %v16120_v45 = vld [vmem:[#allocation70_spill] sm:$0xff]  ;;  %v16121_v44 = vld [vmem:[#allocation71_spill] sm:$0xff] }
 0x2df   : > { %11965 = vst [vmem:[%s14971_s14 + $0xb0] sm:$0xff] %v11737_v60   ;;  %v9537_v24 = vadd.f32 %v14941_v55, %v9402_v34  ;;  %v9403_v25 = vmax.f32 %v8089_v19, %v9038_v17  ;;  %v16122_v47 = vmax.f32 %v16120_v45, %v16121_v44  ;;  %v16123_v17 = vld [vmem:[#allocation72_spill] sm:$0xff]  ;;  %v16124_v60 = vld [vmem:[#allocation73_spill] sm:$0xff] }
 0x2e0   : > { %v9540_v29 = vadd.f32 %v14941_v55, %v9405_v57  ;;  %v9667_v48 = vmax.f32 %v9539_v20, 0.0  ;;  %v16125_v34 = vmax.f32 %v16123_v17, %v16124_v60  ;;  %v16126_v57 = vld [vmem:[#allocation74_spill] sm:$0xff]  ;;  %v16142_v45 = vld [vmem:[#allocation85_spill] sm:$0xff] }
 0x2e1   : > { %v9538_v30 = vadd.f32 %v14941_v55, %v9403_v25  ;;  %v12593_v61 = vpop.f32.mrb[180].mxu0  ;;  %v12725_v5 = vpop.f32.mrb[180].mxu1  ;;  %v9665_v59 = vmax.f32 %v9537_v24, 0.0  ;;  %v16127_v24 = vld [vmem:[#allocation75_spill] sm:$0xff] }
 0x2e2   : > { %v9668_v49 = vmax.f32 %v9540_v29, 0.0  ;;  %v8094_v9 = vmax.f32 %v16110_v8, %v12593_v61  ;;  %v7737_v13 = vpop.f32.mrb[181].mxu0  ;;  %v9051_v14 = vpop.f32.mrb[181].mxu1  ;;  %v16128_v25 = vmax.f32 %v16126_v57, %v16127_v24 }
 0x2e3   : > { %v9666_v0 = vmax.f32 %v9538_v30, 0.0  ;;  %v8092_v1 = vmax.f32 %v16113_v31, %v7737_v13  ;;  %v12594_v63 = vpop.f32.mrb[182].mxu0  ;;  %v12726_v12 = vpop.f32.mrb[182].mxu1 }
 0x2e4   : > { %v11752_v38 = vpack.c.bf16 %v9668_v49, %v9667_v48  ;;  %v9408_v42 = vmax.f32 %v8094_v9, %v12725_v5  ;;  %v8095_v39 = vmax.f32 %v16116_v26, %v12594_v63  ;;  %v7740_v15 = vpop.f32.mrb[183].mxu0  ;;  %v9054_v18 = vpop.f32.mrb[183].mxu1  ;;  %v16129_v49 = vld [vmem:[#allocation76_spill] sm:$0xff] }
 0x2e5   : > { %v11747_v58 = vpack.c.bf16 %v9666_v0, %v9665_v59  ;;  %v9406_v7 = vmax.f32 %v8092_v1, %v9051_v14  ;;  %v8093_v4 = vmax.f32 %v16119_v52, %v7740_v15  ;;  %v16131_v62 = vmax.f32 %v16129_v49, %v16130_v6 }
 0x2e6   : > { %11968 = vst [vmem:[%s14971_s14 + $0xc8] sm:$0xff] %v11752_v38   ;;  %v9543_v43 = vadd.f32 %v14941_v55, %v9408_v42  ;;  %v9409_v27 = vmax.f32 %v8095_v39, %v12726_v12  ;;  %v16132_v12 = vld [vmem:[#allocation78_spill] sm:$0xff]  ;;  %v16133_v38 = vld [vmem:[#allocation79_spill] sm:$0xff] }
 0x2e7   : > { %11967 = vst [vmem:[%s14971_s14 + $0xc0] sm:$0xff] %v11747_v58   ;;  %v9541_v2 = vadd.f32 %v14941_v55, %v9406_v7  ;;  %v9407_v11 = vmax.f32 %v8093_v4, %v9054_v18  ;;  %v16134_v42 = vmax.f32 %v16132_v12, %v16133_v38  ;;  %v16135_v18 = vld [vmem:[#allocation80_spill] sm:$0xff]  ;;  %v16136_v58 = vld [vmem:[#allocation81_spill] sm:$0xff] }
 0x2e8   : > { %v9544_v37 = vadd.f32 %v14941_v55, %v9409_v27  ;;  %v9671_v40 = vmax.f32 %v9543_v43, 0.0  ;;  %v16137_v7 = vmax.f32 %v16135_v18, %v16136_v58  ;;  %v16138_v27 = vld [vmem:[#allocation82_spill] sm:$0xff]  ;;  %v16154_v12 = vld [vmem:[#allocation93_spill] sm:$0xff] }
 0x2e9   : > { %v9542_v35 = vadd.f32 %v14941_v55, %v9407_v11  ;;  %v12597_v36 = vpop.f32.mrb[184].mxu0  ;;  %v12729_v3 = vpop.f32.mrb[184].mxu1  ;;  %v9669_v10 = vmax.f32 %v9541_v2, 0.0  ;;  %v16139_v2 = vld [vmem:[#allocation83_spill] sm:$0xff] }
 0x2ea   : > { %v9672_v41 = vmax.f32 %v9544_v37, 0.0  ;;  %v8098_v46 = vmax.f32 %v16122_v47, %v12597_v36  ;;  %v7753_v50 = vpop.f32.mrb[185].mxu0  ;;  %v9067_v51 = vpop.f32.mrb[185].mxu1  ;;  %v16140_v11 = vmax.f32 %v16138_v27, %v16139_v2 }
 0x2eb   : > { %v9670_v16 = vmax.f32 %v9542_v35, 0.0  ;;  %v8096_v53 = vmax.f32 %v16125_v34, %v7753_v50  ;;  %v12598_v54 = vpop.f32.mrb[186].mxu0  ;;  %v12730_v56 = vpop.f32.mrb[186].mxu1 }
 0x2ec   : > { %v11762_v19 = vpack.c.bf16 %v9672_v41, %v9671_v40  ;;  %v9412_v20 = vmax.f32 %v8098_v46, %v12729_v3  ;;  %v8099_v29 = vmax.f32 %v16128_v25, %v12598_v54  ;;  %v7756_v30 = vpop.f32.mrb[187].mxu0  ;;  %v9070_v61 = vpop.f32.mrb[187].mxu1  ;;  %v16141_v41 = vld [vmem:[#allocation84_spill] sm:$0xff] }
 0x2ed   : > { %v11757_v5 = vpack.c.bf16 %v9670_v16, %v9669_v10  ;;  %v9410_v48 = vmax.f32 %v8096_v53, %v9067_v51  ;;  %v8097_v8 = vmax.f32 %v16131_v62, %v7756_v30  ;;  %v16143_v44 = vmax.f32 %v16141_v41, %v16142_v45 }
 0x2ee   : > { %11970 = vst [vmem:[%s14971_s14 + $0xd8] sm:$0xff] %v11762_v19   ;;  %v9547_v9 = vadd.f32 %v14941_v55, %v9412_v20  ;;  %v9413_v13 = vmax.f32 %v8099_v29, %v12730_v56  ;;  %v16144_v56 = vld [vmem:[#allocation86_spill] sm:$0xff]  ;;  %v16145_v19 = vld [vmem:[#allocation87_spill] sm:$0xff] }
 0x2ef   : > { %11969 = vst [vmem:[%s14971_s14 + $0xd0] sm:$0xff] %v11757_v5   ;;  %v9545_v14 = vadd.f32 %v14941_v55, %v9410_v48  ;;  %v9411_v59 = vmax.f32 %v8097_v8, %v9070_v61  ;;  %v16146_v20 = vmax.f32 %v16144_v56, %v16145_v19  ;;  %v16147_v61 = vld [vmem:[#allocation88_spill] sm:$0xff]  ;;  %v16148_v5 = vld [vmem:[#allocation89_spill] sm:$0xff] }
 0x2f0   : > { %v9548_v0 = vadd.f32 %v14941_v55, %v9413_v13  ;;  %v9675_v1 = vmax.f32 %v9547_v9, 0.0  ;;  %v16149_v48 = vmax.f32 %v16147_v61, %v16148_v5  ;;  %v16150_v13 = vld [vmem:[#allocation90_spill] sm:$0xff] }
 0x2f1   : > { %v9546_v21 = vadd.f32 %v14941_v55, %v9411_v59  ;;  %v12601_v22 = vpop.f32.mrb[188].mxu0  ;;  %v12733_v31 = vpop.f32.mrb[188].mxu1  ;;  %v9673_v39 = vmax.f32 %v9545_v14, 0.0  ;;  %v16151_v14 = vld [vmem:[#allocation91_spill] sm:$0xff] }
 0x2f2   : > { %v9676_v63 = vmax.f32 %v9548_v0, 0.0  ;;  %v8102_v23 = vmax.f32 %v16134_v42, %v12601_v22  ;;  %v7769_v28 = vpop.f32.mrb[189].mxu0  ;;  %v9083_v26 = vpop.f32.mrb[189].mxu1  ;;  %v16152_v59 = vmax.f32 %v16150_v13, %v16151_v14 }
 0x2f3   : > { %v9674_v15 = vmax.f32 %v9546_v21, 0.0  ;;  %v8100_v32 = vmax.f32 %v16137_v7, %v7769_v28  ;;  %v12602_v33 = vpop.f32.mrb[190].mxu0  ;;  %v12734_v52 = vpop.f32.mrb[190].mxu1 }
 0x2f4   : > { %v11772_v4 = vpack.c.bf16 %v9676_v63, %v9675_v1  ;;  %v9416_v43 = vmax.f32 %v8102_v23, %v12733_v31  ;;  %v8103_v37 = vmax.f32 %v16140_v11, %v12602_v33  ;;  %v7772_v35 = vpop.f32.mrb[191].mxu0  ;;  %v9086_v36 = vpop.f32.mrb[191].mxu1  ;;  %v16153_v63 = vld [vmem:[#allocation92_spill] sm:$0xff] }
 0x2f5   : > { %v11767_v3 = vpack.c.bf16 %v9674_v15, %v9673_v39  ;;  %v9414_v40 = vmax.f32 %v8100_v32, %v9083_v26  ;;  %v8101_v47 = vmax.f32 %v16143_v44, %v7772_v35  ;;  %v16155_v38 = vmax.f32 %v16153_v63, %v16154_v12 }
 0x2f6   : > { %11972 = vst [vmem:[%s14971_s14 + $0xe8] sm:$0xff] %v11772_v4   ;;  %v9551_v46 = vadd.f32 %v14941_v55, %v9416_v43  ;;  %v9417_v50 = vmax.f32 %v8103_v37, %v12734_v52  ;;  %v16156_v52 = vld [vmem:[#allocation94_spill] sm:$0xff]  ;;  %v16157_v4 = vld [vmem:[#allocation95_spill] sm:$0xff] }
 0x2f7   : > { %11971 = vst [vmem:[%s14971_s14 + $0xe0] sm:$0xff] %v11767_v3   ;;  %v9549_v51 = vadd.f32 %v14941_v55, %v9414_v40  ;;  %v9415_v10 = vmax.f32 %v8101_v47, %v9086_v36  ;;  %v16158_v43 = vmax.f32 %v16156_v52, %v16157_v4  ;;  %v16159_v36 = vld [vmem:[#allocation96_spill] sm:$0xff]  ;;  %v16160_v3 = vld [vmem:[#allocation97_spill] sm:$0xff] }
 0x2f8   : > { %v9552_v16 = vadd.f32 %v14941_v55, %v9417_v50  ;;  %v9679_v53 = vmax.f32 %v9551_v46, 0.0  ;;  %v16161_v40 = vmax.f32 %v16159_v36, %v16160_v3  ;;  %v16162_v46 = vld [vmem:[#allocation98_spill] sm:$0xff]  ;;  %v16163_v50 = vld [vmem:[#allocation99_spill] sm:$0xff]  ;;  %v16178_v52 = vld [vmem:[#allocation109_spill] sm:$0xff] }
 0x2f9   : > { %v9550_v17 = vadd.f32 %v14941_v55, %v9415_v10  ;;  %v12605_v60 = vpop.f32.mrb[192].mxu0  ;;  %v12737_v34 = vpop.f32.mrb[192].mxu1  ;;  %v9677_v29 = vmax.f32 %v9549_v51, 0.0  ;;  %v16164_v51 = vmax.f32 %v16162_v46, %v16163_v50 }
 0x2fa   : > { %v9680_v54 = vmax.f32 %v9552_v16, 0.0  ;;  %v8106_v57 = vmax.f32 %v16146_v20, %v12605_v60  ;;  %v7785_v24 = vpop.f32.mrb[193].mxu0  ;;  %v9099_v25 = vpop.f32.mrb[193].mxu1  ;;  %v15300_v20 = vld [vmem:[%s15573_s2] ss:$0 sm:$0xff] }
 0x2fb   : > { %v9678_v30 = vmax.f32 %v9550_v17, 0.0  ;;  %v8104_v49 = vmax.f32 %v16149_v48, %v7785_v24  ;;  %v12606_v6 = vpop.f32.mrb[194].mxu0  ;;  %v12738_v62 = vpop.f32.mrb[194].mxu1 }
 0x2fc   : > { %v11782_v8 = vpack.c.bf16 %v9680_v54, %v9679_v53  ;;  %v9420_v9 = vmax.f32 %v8106_v57, %v12737_v34  ;;  %v8107_v0 = vmax.f32 %v16152_v59, %v12606_v6  ;;  %v7788_v21 = vpop.f32.mrb[195].mxu0  ;;  %v9102_v22 = vpop.f32.mrb[195].mxu1  ;;  %v16165_v53 = vld [vmem:[#allocation100_spill] sm:$0xff]  ;;  %v16166_v54 = vld [vmem:[#allocation101_spill] sm:$0xff] }
 0x2fd   : > { %v11777_v31 = vpack.c.bf16 %v9678_v30, %v9677_v29  ;;  %v9418_v1 = vmax.f32 %v8104_v49, %v9099_v25  ;;  %v8105_v42 = vmax.f32 %v16155_v38, %v7788_v21  ;;  %v16167_v56 = vmax.f32 %v16165_v53, %v16166_v54 }
 0x2fe   : > { %11974 = vst [vmem:[%s14971_s14 + $0xf8] sm:$0xff] %v11782_v8   ;;  %v9555_v23 = vadd.f32 %v14941_v55, %v9420_v9  ;;  %v9421_v28 = vmax.f32 %v8107_v0, %v12738_v62  ;;  %v16168_v62 = vld [vmem:[#allocation102_spill] sm:$0xff]  ;;  %v16169_v8 = vld [vmem:[#allocation103_spill] sm:$0xff] }
 0x2ff   : > { %11973 = vst [vmem:[%s14971_s14 + $0xf0] sm:$0xff] %v11777_v31   ;;  %v9553_v26 = vadd.f32 %v14941_v55, %v9418_v1  ;;  %v9419_v39 = vmax.f32 %v8105_v42, %v9102_v22  ;;  %v16170_v9 = vmax.f32 %v16168_v62, %v16169_v8  ;;  %v16171_v22 = vld [vmem:[#allocation104_spill] sm:$0xff]  ;;  %v16172_v31 = vld [vmem:[#allocation105_spill] sm:$0xff] }
 0x300   : > { %v9556_v15 = vadd.f32 %v14941_v55, %v9421_v28  ;;  %v9683_v32 = vmax.f32 %v9555_v23, 0.0  ;;  %v16173_v1 = vmax.f32 %v16171_v22, %v16172_v31  ;;  %v16174_v28 = vld [vmem:[#allocation106_spill] sm:$0xff]  ;;  %v16190_v62 = vld [vmem:[#allocation117_spill] sm:$0xff] }
 0x301   : > { %v9554_v18 = vadd.f32 %v14941_v55, %v9419_v39  ;;  %v12609_v58 = vpop.f32.mrb[196].mxu0  ;;  %v12741_v7 = vpop.f32.mrb[196].mxu1  ;;  %v9681_v37 = vmax.f32 %v9553_v26, 0.0  ;;  %v16175_v26 = vld [vmem:[#allocation107_spill] sm:$0xff] }
 0x302   : > { %v9684_v33 = vmax.f32 %v9556_v15, 0.0  ;;  %v8110_v27 = vmax.f32 %v16158_v43, %v12609_v58  ;;  %v7801_v2 = vpop.f32.mrb[197].mxu0  ;;  %v9115_v11 = vpop.f32.mrb[197].mxu1  ;;  %v16176_v39 = vmax.f32 %v16174_v28, %v16175_v26 }
 0x303   : > { %v9682_v35 = vmax.f32 %v9554_v18, 0.0  ;;  %v8108_v41 = vmax.f32 %v16161_v40, %v7801_v2  ;;  %v12610_v45 = vpop.f32.mrb[198].mxu0  ;;  %v12742_v55 = vpop.f32.mrb[198].mxu1 }
 0x304   : > { %v11792_v44 = vpack.c.bf16 %v9684_v33, %v9683_v32  ;;  %v9424_v47 = vmax.f32 %v8110_v27, %v12741_v7  ;;  %v8111_v10 = vmax.f32 %v16164_v51, %v12610_v45  ;;  %v7804_v16 = vpop.f32.mrb[199].mxu0  ;;  %v9118_v17 = vpop.f32.mrb[199].mxu1  ;;  %v16177_v33 = vld [vmem:[#allocation108_spill] sm:$0xff] }
 0x305   : > { %v11787_v60 = vpack.c.bf16 %v9682_v35, %v9681_v37  ;;  %v9422_v34 = vmax.f32 %v8108_v41, %v9115_v11  ;;  %v8109_v19 = vmax.f32 %v16167_v56, %v7804_v16  ;;  %v16179_v4 = vmax.f32 %v16177_v33, %v16178_v52 }
 0x306   : > { %11976 = vst [vmem:[%s14971_s14 + $0x108] sm:$0xff] %v11792_v44   ;;  %v9559_v57 = vadd.f32 %v15300_v20, %v9424_v47  ;;  %v9425_v24 = vmax.f32 %v8111_v10, %v12742_v55  ;;  %v16180_v55 = vld [vmem:[#allocation110_spill] sm:$0xff]  ;;  %v16181_v44 = vld [vmem:[#allocation111_spill] sm:$0xff] }
 0x307   : > { %11975 = vst [vmem:[%s14971_s14 + $0x100] sm:$0xff] %v11787_v60   ;;  %v9557_v25 = vadd.f32 %v15300_v20, %v9422_v34  ;;  %v9423_v29 = vmax.f32 %v8109_v19, %v9118_v17  ;;  %v16182_v47 = vmax.f32 %v16180_v55, %v16181_v44  ;;  %v16183_v17 = vld [vmem:[#allocation112_spill] sm:$0xff]  ;;  %v16184_v60 = vld [vmem:[#allocation113_spill] sm:$0xff] }
 0x308   : > { %v9560_v30 = vadd.f32 %v15300_v20, %v9425_v24  ;;  %v9687_v49 = vmax.f32 %v9559_v57, 0.0  ;;  %v16185_v34 = vmax.f32 %v16183_v17, %v16184_v60  ;;  %v16186_v24 = vld [vmem:[#allocation114_spill] sm:$0xff]  ;;  %v16202_v55 = vld [vmem:[#allocation125_spill] sm:$0xff] }
 0x309   : > { %v9558_v61 = vadd.f32 %v15300_v20, %v9423_v29  ;;  %v12613_v5 = vpop.f32.mrb[200].mxu0  ;;  %v12745_v48 = vpop.f32.mrb[200].mxu1  ;;  %v9685_v0 = vmax.f32 %v9557_v25, 0.0  ;;  %v16187_v25 = vld [vmem:[#allocation115_spill] sm:$0xff] }
 0x30a   : > { %v9688_v6 = vmax.f32 %v9560_v30, 0.0  ;;  %v8114_v13 = vmax.f32 %v16170_v9, %v12613_v5  ;;  %v7817_v14 = vpop.f32.mrb[201].mxu0  ;;  %v9131_v59 = vpop.f32.mrb[201].mxu1  ;;  %v16188_v29 = vmax.f32 %v16186_v24, %v16187_v25 }
 0x30b   : > { %v9686_v21 = vmax.f32 %v9558_v61, 0.0  ;;  %v8112_v63 = vmax.f32 %v16173_v1, %v7817_v14  ;;  %v12614_v12 = vpop.f32.mrb[202].mxu0  ;;  %v12746_v38 = vpop.f32.mrb[202].mxu1 }
 0x30c   : > { %v11802_v42 = vpack.c.bf16 %v9688_v6, %v9687_v49  ;;  %v9428_v23 = vmax.f32 %v8114_v13, %v12745_v48  ;;  %v8115_v15 = vmax.f32 %v16176_v39, %v12614_v12  ;;  %v7820_v18 = vpop.f32.mrb[203].mxu0  ;;  %v9134_v58 = vpop.f32.mrb[203].mxu1  ;;  %v16189_v6 = vld [vmem:[#allocation116_spill] sm:$0xff] }
 0x30d   : > { %v11797_v7 = vpack.c.bf16 %v9686_v21, %v9685_v0  ;;  %v9426_v32 = vmax.f32 %v8112_v63, %v9131_v59  ;;  %v8113_v43 = vmax.f32 %v16179_v4, %v7820_v18  ;;  %v16191_v8 = vmax.f32 %v16189_v6, %v16190_v62 }
 0x30e   : > { %11978 = vst [vmem:[%s14971_s14 + $0x118] sm:$0xff] %v11802_v42   ;;  %v9563_v27 = vadd.f32 %v15300_v20, %v9428_v23  ;;  %v9429_v2 = vmax.f32 %v8115_v15, %v12746_v38  ;;  %v16192_v38 = vld [vmem:[#allocation118_spill] sm:$0xff]  ;;  %v16193_v42 = vld [vmem:[#allocation119_spill] sm:$0xff] }
 0x30f   : > { %11977 = vst [vmem:[%s14971_s14 + $0x110] sm:$0xff] %v11797_v7   ;;  %v9561_v11 = vadd.f32 %v15300_v20, %v9426_v32  ;;  %v9427_v37 = vmax.f32 %v8113_v43, %v9134_v58  ;;  %v16194_v23 = vmax.f32 %v16192_v38, %v16193_v42  ;;  %v16195_v58 = vld [vmem:[#allocation120_spill] sm:$0xff]  ;;  %v16196_v7 = vld [vmem:[#allocation121_spill] sm:$0xff] }
 0x310   : > { %v9564_v35 = vadd.f32 %v15300_v20, %v9429_v2  ;;  %v9691_v41 = vmax.f32 %v9563_v27, 0.0  ;;  %v16197_v32 = vmax.f32 %v16195_v58, %v16196_v7  ;;  %v16198_v2 = vld [vmem:[#allocation122_spill] sm:$0xff]  ;;  %v16214_v38 = vld [vmem:[#allocation133_spill] sm:$0xff] }
 0x311   : > { %v9562_v36 = vadd.f32 %v15300_v20, %v9427_v37  ;;  %v12617_v3 = vpop.f32.mrb[204].mxu0  ;;  %v12749_v40 = vpop.f32.mrb[204].mxu1  ;;  %v9689_v10 = vmax.f32 %v9561_v11, 0.0  ;;  %v16199_v11 = vld [vmem:[#allocation123_spill] sm:$0xff] }
 0x312   : > { %v9692_v45 = vmax.f32 %v9564_v35, 0.0  ;;  %v8118_v46 = vmax.f32 %v16182_v47, %v12617_v3  ;;  %v7833_v50 = vpop.f32.mrb[205].mxu0  ;;  %v9147_v51 = vpop.f32.mrb[205].mxu1  ;;  %v16200_v37 = vmax.f32 %v16198_v2, %v16199_v11 }
 0x313   : > { %v9690_v16 = vmax.f32 %v9562_v36, 0.0  ;;  %v8116_v53 = vmax.f32 %v16185_v34, %v7833_v50  ;;  %v12618_v54 = vpop.f32.mrb[206].mxu0  ;;  %v12750_v56 = vpop.f32.mrb[206].mxu1 }
 0x314   : > { %v11812_v19 = vpack.c.bf16 %v9692_v45, %v9691_v41  ;;  %v9432_v57 = vmax.f32 %v8118_v46, %v12749_v40  ;;  %v8119_v30 = vmax.f32 %v16188_v29, %v12618_v54  ;;  %v7836_v61 = vpop.f32.mrb[207].mxu0  ;;  %v9150_v5 = vpop.f32.mrb[207].mxu1  ;;  %v16201_v45 = vld [vmem:[#allocation124_spill] sm:$0xff] }
 0x315   : > { %v11807_v48 = vpack.c.bf16 %v9690_v16, %v9689_v10  ;;  %v9430_v49 = vmax.f32 %v8116_v53, %v9147_v51  ;;  %v8117_v9 = vmax.f32 %v16191_v8, %v7836_v61  ;;  %v16203_v44 = vmax.f32 %v16201_v45, %v16202_v55 }
 0x316   : > { %11980 = vst [vmem:[%s14971_s14 + $0x128] sm:$0xff] %v11812_v19   ;;  %v9567_v13 = vadd.f32 %v15300_v20, %v9432_v57  ;;  %v9433_v14 = vmax.f32 %v8119_v30, %v12750_v56  ;;  %v16204_v56 = vld [vmem:[#allocation126_spill] sm:$0xff]  ;;  %v16205_v19 = vld [vmem:[#allocation127_spill] sm:$0xff] }
 0x317   : > { %11979 = vst [vmem:[%s14971_s14 + $0x120] sm:$0xff] %v11807_v48   ;;  %v9565_v59 = vadd.f32 %v15300_v20, %v9430_v49  ;;  %v9431_v0 = vmax.f32 %v8117_v9, %v9150_v5  ;;  %v16206_v57 = vmax.f32 %v16204_v56, %v16205_v19  ;;  %v16207_v5 = vld [vmem:[#allocation128_spill] sm:$0xff]  ;;  %v16208_v48 = vld [vmem:[#allocation129_spill] sm:$0xff] }
 0x318   : > { %v9568_v21 = vadd.f32 %v15300_v20, %v9433_v14  ;;  %v9695_v63 = vmax.f32 %v9567_v13, 0.0  ;;  %v16209_v49 = vmax.f32 %v16207_v5, %v16208_v48  ;;  %v16210_v14 = vld [vmem:[#allocation130_spill] sm:$0xff]  ;;  %v16226_v56 = vld [vmem:[#allocation141_spill] sm:$0xff] }
 0x319   : > { %v9566_v22 = vadd.f32 %v15300_v20, %v9431_v0  ;;  %v12621_v31 = vpop.f32.mrb[208].mxu0  ;;  %v12753_v1 = vpop.f32.mrb[208].mxu1  ;;  %v9693_v15 = vmax.f32 %v9565_v59, 0.0  ;;  %v16211_v59 = vld [vmem:[#allocation131_spill] sm:$0xff] }
 0x31a   : > { %v9696_v12 = vmax.f32 %v9568_v21, 0.0  ;;  %v8122_v28 = vmax.f32 %v16194_v23, %v12621_v31  ;;  %v7849_v26 = vpop.f32.mrb[209].mxu0  ;;  %v9163_v39 = vpop.f32.mrb[209].mxu1  ;;  %v16212_v0 = vmax.f32 %v16210_v14, %v16211_v59 }
 0x31b   : > { %v9694_v18 = vmax.f32 %v9566_v22, 0.0  ;;  %v8120_v33 = vmax.f32 %v16197_v32, %v7849_v26  ;;  %v12622_v52 = vpop.f32.mrb[210].mxu0  ;;  %v12754_v4 = vpop.f32.mrb[210].mxu1 }
 0x31c   : > { %v11822_v43 = vpack.c.bf16 %v9696_v12, %v9695_v63  ;;  %v9436_v27 = vmax.f32 %v8122_v28, %v12753_v1  ;;  %v8123_v35 = vmax.f32 %v16200_v37, %v12622_v52  ;;  %v7852_v36 = vpop.f32.mrb[211].mxu0  ;;  %v9166_v3 = vpop.f32.mrb[211].mxu1  ;;  %v16213_v12 = vld [vmem:[#allocation132_spill] sm:$0xff] }
 0x31d   : > { %v11817_v40 = vpack.c.bf16 %v9694_v18, %v9693_v15  ;;  %v9434_v41 = vmax.f32 %v8120_v33, %v9163_v39  ;;  %v8121_v47 = vmax.f32 %v16203_v44, %v7852_v36  ;;  %v16215_v42 = vmax.f32 %v16213_v12, %v16214_v38 }
 0x31e   : > { %11982 = vst [vmem:[%s14971_s14 + $0x138] sm:$0xff] %v11822_v43   ;;  %v9571_v46 = vadd.f32 %v15300_v20, %v9436_v27  ;;  %v9437_v50 = vmax.f32 %v8123_v35, %v12754_v4  ;;  %v16216_v4 = vld [vmem:[#allocation134_spill] sm:$0xff]  ;;  %v16217_v43 = vld [vmem:[#allocation135_spill] sm:$0xff] }
 0x31f   : > { %11981 = vst [vmem:[%s14971_s14 + $0x130] sm:$0xff] %v11817_v40   ;;  %v9569_v51 = vadd.f32 %v15300_v20, %v9434_v41  ;;  %v9435_v10 = vmax.f32 %v8121_v47, %v9166_v3  ;;  %v16218_v27 = vmax.f32 %v16216_v4, %v16217_v43  ;;  %v16219_v3 = vld [vmem:[#allocation136_spill] sm:$0xff]  ;;  %v16220_v40 = vld [vmem:[#allocation137_spill] sm:$0xff] }
 0x320   : > { %v9572_v16 = vadd.f32 %v15300_v20, %v9437_v50  ;;  %v9699_v53 = vmax.f32 %v9571_v46, 0.0  ;;  %v16221_v41 = vmax.f32 %v16219_v3, %v16220_v40  ;;  %v16222_v50 = vld [vmem:[#allocation138_spill] sm:$0xff]  ;;  %v16238_v4 = vld [vmem:[#allocation149_spill] sm:$0xff] }
 0x321   : > { %v9570_v17 = vadd.f32 %v15300_v20, %v9435_v10  ;;  %v12625_v60 = vpop.f32.mrb[212].mxu0  ;;  %v12757_v34 = vpop.f32.mrb[212].mxu1  ;;  %v9697_v30 = vmax.f32 %v9569_v51, 0.0  ;;  %v16223_v51 = vld [vmem:[#allocation139_spill] sm:$0xff] }
 0x322   : > { %v9700_v54 = vmax.f32 %v9572_v16, 0.0  ;;  %v8126_v24 = vmax.f32 %v16206_v57, %v12625_v60  ;;  %v7865_v25 = vpop.f32.mrb[213].mxu0  ;;  %v9179_v29 = vpop.f32.mrb[213].mxu1  ;;  %v16224_v10 = vmax.f32 %v16222_v50, %v16223_v51 }
 0x323   : > { %v9698_v61 = vmax.f32 %v9570_v17, 0.0  ;;  %v8124_v6 = vmax.f32 %v16209_v49, %v7865_v25  ;;  %v12626_v62 = vpop.f32.mrb[214].mxu0  ;;  %v12758_v8 = vpop.f32.mrb[214].mxu1 }
 0x324   : > { %v11832_v9 = vpack.c.bf16 %v9700_v54, %v9699_v53  ;;  %v9440_v13 = vmax.f32 %v8126_v24, %v12757_v34  ;;  %v8127_v21 = vmax.f32 %v16212_v0, %v12626_v62  ;;  %v7868_v22 = vpop.f32.mrb[215].mxu0  ;;  %v9182_v31 = vpop.f32.mrb[215].mxu1  ;;  %v16225_v54 = vld [vmem:[#allocation140_spill] sm:$0xff] }
 0x325   : > { %v11827_v1 = vpack.c.bf16 %v9698_v61, %v9697_v30  ;;  %v9438_v63 = vmax.f32 %v8124_v6, %v9179_v29  ;;  %v8125_v23 = vmax.f32 %v16215_v42, %v7868_v22  ;;  %v16227_v19 = vmax.f32 %v16225_v54, %v16226_v56 }
 0x326   : > { %11984 = vst [vmem:[%s14971_s14 + $0x148] sm:$0xff] %v11832_v9   ;;  %v9575_v28 = vadd.f32 %v15300_v20, %v9440_v13  ;;  %v9441_v26 = vmax.f32 %v8127_v21, %v12758_v8  ;;  %v16228_v8 = vld [vmem:[#allocation142_spill] sm:$0xff]  ;;  %v16229_v9 = vld [vmem:[#allocation143_spill] sm:$0xff] }
 0x327   : > { %11983 = vst [vmem:[%s14971_s14 + $0x140] sm:$0xff] %v11827_v1   ;;  %v9573_v39 = vadd.f32 %v15300_v20, %v9438_v63  ;;  %v9439_v15 = vmax.f32 %v8125_v23, %v9182_v31  ;;  %v16230_v13 = vmax.f32 %v16228_v8, %v16229_v9  ;;  %v16231_v31 = vld [vmem:[#allocation144_spill] sm:$0xff]  ;;  %v16232_v1 = vld [vmem:[#allocation145_spill] sm:$0xff] }
 0x328   : > { %v9576_v18 = vadd.f32 %v15300_v20, %v9441_v26  ;;  %v9703_v33 = vmax.f32 %v9575_v28, 0.0  ;;  %v16233_v63 = vmax.f32 %v16231_v31, %v16232_v1  ;;  %v16234_v26 = vld [vmem:[#allocation146_spill] sm:$0xff]  ;;  %v16250_v8 = vld [vmem:[#allocation157_spill] sm:$0xff] }
 0x329   : > { %v9574_v58 = vadd.f32 %v15300_v20, %v9439_v15  ;;  %v12629_v7 = vpop.f32.mrb[216].mxu0  ;;  %v12761_v32 = vpop.f32.mrb[216].mxu1  ;;  %v9701_v35 = vmax.f32 %v9573_v39, 0.0  ;;  %v16235_v39 = vld [vmem:[#allocation147_spill] sm:$0xff] }
 0x32a   : > { %v9704_v52 = vmax.f32 %v9576_v18, 0.0  ;;  %v8130_v2 = vmax.f32 %v16218_v27, %v12629_v7  ;;  %v7881_v11 = vpop.f32.mrb[217].mxu0  ;;  %v9195_v37 = vpop.f32.mrb[217].mxu1  ;;  %v16236_v15 = vmax.f32 %v16234_v26, %v16235_v39 }
 0x32b   : > { %v9702_v36 = vmax.f32 %v9574_v58, 0.0  ;;  %v8128_v45 = vmax.f32 %v16221_v41, %v7881_v11  ;;  %v12630_v55 = vpop.f32.mrb[218].mxu0  ;;  %v12762_v44 = vpop.f32.mrb[218].mxu1 }
 0x32c   : > { %v11842_v47 = vpack.c.bf16 %v9704_v52, %v9703_v33  ;;  %v9444_v46 = vmax.f32 %v8130_v2, %v12761_v32  ;;  %v8131_v16 = vmax.f32 %v16224_v10, %v12630_v55  ;;  %v7884_v17 = vpop.f32.mrb[219].mxu0  ;;  %v9198_v60 = vpop.f32.mrb[219].mxu1  ;;  %v16237_v52 = vld [vmem:[#allocation148_spill] sm:$0xff] }
 0x32d   : > { %v11837_v34 = vpack.c.bf16 %v9702_v36, %v9701_v35  ;;  %v9442_v53 = vmax.f32 %v8128_v45, %v9195_v37  ;;  %v8129_v57 = vmax.f32 %v16227_v19, %v7884_v17  ;;  %v16239_v43 = vmax.f32 %v16237_v52, %v16238_v4 }
 0x32e   : > { %11986 = vst [vmem:[%s14971_s14 + $0x158] sm:$0xff] %v11842_v47   ;;  %v9579_v24 = vadd.f32 %v15300_v20, %v9444_v46  ;;  %v9445_v25 = vmax.f32 %v8131_v16, %v12762_v44  ;;  %v16240_v44 = vld [vmem:[#allocation150_spill] sm:$0xff]  ;;  %v16241_v47 = vld [vmem:[#allocation151_spill] sm:$0xff] }
 0x32f   : > { %11985 = vst [vmem:[%s14971_s14 + $0x150] sm:$0xff] %v11837_v34   ;;  %v9577_v29 = vadd.f32 %v15300_v20, %v9442_v53  ;;  %v9443_v30 = vmax.f32 %v8129_v57, %v9198_v60  ;;  %v16242_v46 = vmax.f32 %v16240_v44, %v16241_v47  ;;  %v16243_v60 = vld [vmem:[#allocation152_spill] sm:$0xff]  ;;  %v16244_v34 = vld [vmem:[#allocation153_spill] sm:$0xff] }
 0x330   : > { %v9580_v61 = vadd.f32 %v15300_v20, %v9445_v25  ;;  %v9707_v6 = vmax.f32 %v9579_v24, 0.0  ;;  %v16245_v53 = vmax.f32 %v16243_v60, %v16244_v34  ;;  %v16246_v25 = vld [vmem:[#allocation154_spill] sm:$0xff]  ;;  %v16262_v44 = vld [vmem:[#allocation165_spill] sm:$0xff] }
 0x331   : > { %v9578_v5 = vadd.f32 %v15300_v20, %v9443_v30  ;;  %v12633_v48 = vpop.f32.mrb[220].mxu0  ;;  %v12765_v49 = vpop.f32.mrb[220].mxu1  ;;  %v9705_v21 = vmax.f32 %v9577_v29, 0.0  ;;  %v16247_v29 = vld [vmem:[#allocation155_spill] sm:$0xff] }
 0x332   : > { %v9708_v62 = vmax.f32 %v9580_v61, 0.0  ;;  %v8134_v14 = vmax.f32 %v16230_v13, %v12633_v48  ;;  %v7897_v59 = vpop.f32.mrb[221].mxu0  ;;  %v9211_v0 = vpop.f32.mrb[221].mxu1  ;;  %v16248_v30 = vmax.f32 %v16246_v25, %v16247_v29 }
 0x333   : > { %v9706_v22 = vmax.f32 %v9578_v5, 0.0  ;;  %v8132_v12 = vmax.f32 %v16233_v63, %v7897_v59  ;;  %v12634_v38 = vpop.f32.mrb[222].mxu0  ;;  %v12766_v42 = vpop.f32.mrb[222].mxu1 }
 0x334   : > { %v11852_v23 = vpack.c.bf16 %v9708_v62, %v9707_v6  ;;  %v9448_v28 = vmax.f32 %v8134_v14, %v12765_v49  ;;  %v8135_v18 = vmax.f32 %v16236_v15, %v12634_v38  ;;  %v7900_v58 = vpop.f32.mrb[223].mxu0  ;;  %v9214_v7 = vpop.f32.mrb[223].mxu1  ;;  %v16249_v62 = vld [vmem:[#allocation156_spill] sm:$0xff] }
 0x335   : > { %v11847_v32 = vpack.c.bf16 %v9706_v22, %v9705_v21  ;;  %v9446_v33 = vmax.f32 %v8132_v12, %v9211_v0  ;;  %v8133_v27 = vmax.f32 %v16239_v43, %v7900_v58  ;;  %v16251_v9 = vmax.f32 %v16249_v62, %v16250_v8 }
 0x336   : > { %11988 = vst [vmem:[%s14971_s14 + $0x168] sm:$0xff] %v11852_v23   ;;  %v9583_v2 = vadd.f32 %v15300_v20, %v9448_v28  ;;  %v9449_v11 = vmax.f32 %v8135_v18, %v12766_v42  ;;  %v16252_v42 = vld [vmem:[#allocation158_spill] sm:$0xff]  ;;  %v16253_v23 = vld [vmem:[#allocation159_spill] sm:$0xff] }
 0x337   : > { %11987 = vst [vmem:[%s14971_s14 + $0x160] sm:$0xff] %v11847_v32   ;;  %v9581_v37 = vadd.f32 %v15300_v20, %v9446_v33  ;;  %v9447_v35 = vmax.f32 %v8133_v27, %v9214_v7  ;;  %v16254_v28 = vmax.f32 %v16252_v42, %v16253_v23  ;;  %v16255_v7 = vld [vmem:[#allocation160_spill] sm:$0xff]  ;;  %v16256_v32 = vld [vmem:[#allocation161_spill] sm:$0xff] }
 0x338   : > { %v9584_v36 = vadd.f32 %v15300_v20, %v9449_v11  ;;  %v9711_v45 = vmax.f32 %v9583_v2, 0.0  ;;  %v16257_v33 = vmax.f32 %v16255_v7, %v16256_v32  ;;  %v16258_v11 = vld [vmem:[#allocation162_spill] sm:$0xff]  ;;  %v16274_v42 = vld [vmem:[#allocation173_spill] sm:$0xff] }
 0x339   : > { %v9582_v3 = vadd.f32 %v15300_v20, %v9447_v35  ;;  %v12637_v40 = vpop.f32.mrb[224].mxu0  ;;  %v12769_v41 = vpop.f32.mrb[224].mxu1  ;;  %v9709_v16 = vmax.f32 %v9581_v37, 0.0  ;;  %v16259_v37 = vld [vmem:[#allocation163_spill] sm:$0xff] }
 0x33a   : > { %v9712_v55 = vmax.f32 %v9584_v36, 0.0  ;;  %v8138_v50 = vmax.f32 %v16242_v46, %v12637_v40  ;;  %v7913_v51 = vpop.f32.mrb[225].mxu0  ;;  %v9227_v10 = vpop.f32.mrb[225].mxu1  ;;  %v16260_v35 = vmax.f32 %v16258_v11, %v16259_v37 }
 0x33b   : > { %v9710_v17 = vmax.f32 %v9582_v3, 0.0  ;;  %v8136_v54 = vmax.f32 %v16245_v53, %v7913_v51  ;;  %v12638_v56 = vpop.f32.mrb[226].mxu0  ;;  %v12770_v19 = vpop.f32.mrb[226].mxu1 }
 0x33c   : > { %v11862_v57 = vpack.c.bf16 %v9712_v55, %v9711_v45  ;;  %v9452_v24 = vmax.f32 %v8138_v50, %v12769_v41  ;;  %v8139_v61 = vmax.f32 %v16248_v30, %v12638_v56  ;;  %v7916_v5 = vpop.f32.mrb[227].mxu0  ;;  %v9230_v48 = vpop.f32.mrb[227].mxu1  ;;  %v16261_v55 = vld [vmem:[#allocation164_spill] sm:$0xff] }
 0x33d   : > { %v11857_v49 = vpack.c.bf16 %v9710_v17, %v9709_v16  ;;  %v9450_v6 = vmax.f32 %v8136_v54, %v9227_v10  ;;  %v8137_v13 = vmax.f32 %v16251_v9, %v7916_v5  ;;  %v16263_v47 = vmax.f32 %v16261_v55, %v16262_v44 }
 0x33e   : > { %11990 = vst [vmem:[%s14971_s14 + $0x178] sm:$0xff] %v11862_v57   ;;  %v9587_v14 = vadd.f32 %v15300_v20, %v9452_v24  ;;  %v9453_v59 = vmax.f32 %v8139_v61, %v12770_v19  ;;  %v16264_v19 = vld [vmem:[#allocation166_spill] sm:$0xff]  ;;  %v16265_v57 = vld [vmem:[#allocation167_spill] sm:$0xff] }
 0x33f   : > { %11989 = vst [vmem:[%s14971_s14 + $0x170] sm:$0xff] %v11857_v49   ;;  %v9585_v0 = vadd.f32 %v15300_v20, %v9450_v6  ;;  %v9451_v21 = vmax.f32 %v8137_v13, %v9230_v48  ;;  %v16266_v24 = vmax.f32 %v16264_v19, %v16265_v57  ;;  %v16267_v48 = vld [vmem:[#allocation168_spill] sm:$0xff]  ;;  %v16268_v49 = vld [vmem:[#allocation169_spill] sm:$0xff] }
 0x340   : > { %v9588_v22 = vadd.f32 %v15300_v20, %v9453_v59  ;;  %v9715_v12 = vmax.f32 %v9587_v14, 0.0  ;;  %v16269_v6 = vmax.f32 %v16267_v48, %v16268_v49  ;;  %v16270_v59 = vld [vmem:[#allocation170_spill] sm:$0xff]  ;;  %v16286_v19 = vld [vmem:[#allocation181_spill] sm:$0xff] }
 0x341   : > { %v9586_v31 = vadd.f32 %v15300_v20, %v9451_v21  ;;  %v12641_v1 = vpop.f32.mrb[228].mxu0  ;;  %v12773_v63 = vpop.f32.mrb[228].mxu1  ;;  %v9713_v18 = vmax.f32 %v9585_v0, 0.0  ;;  %v16271_v0 = vld [vmem:[#allocation171_spill] sm:$0xff] }
 0x342   : > { %v9716_v38 = vmax.f32 %v9588_v22, 0.0  ;;  %v8142_v26 = vmax.f32 %v16254_v28, %v12641_v1  ;;  %v7929_v39 = vpop.f32.mrb[229].mxu0  ;;  %v9243_v15 = vpop.f32.mrb[229].mxu1  ;;  %v16272_v21 = vmax.f32 %v16270_v59, %v16271_v0 }
 0x343   : > { %v9714_v58 = vmax.f32 %v9586_v31, 0.0  ;;  %v8140_v52 = vmax.f32 %v16257_v33, %v7929_v39  ;;  %v12642_v4 = vpop.f32.mrb[230].mxu0  ;;  %v12774_v43 = vpop.f32.mrb[230].mxu1 }
 0x344   : > { %v11872_v27 = vpack.c.bf16 %v9716_v38, %v9715_v12  ;;  %v9456_v2 = vmax.f32 %v8142_v26, %v12773_v63  ;;  %v8143_v36 = vmax.f32 %v16260_v35, %v12642_v4  ;;  %v7932_v3 = vpop.f32.mrb[231].mxu0  ;;  %v9246_v40 = vpop.f32.mrb[231].mxu1  ;;  %v16273_v38 = vld [vmem:[#allocation172_spill] sm:$0xff] }
 0x345   : > { %v11867_v41 = vpack.c.bf16 %v9714_v58, %v9713_v18  ;;  %v9454_v45 = vmax.f32 %v8140_v52, %v9243_v15  ;;  %v8141_v46 = vmax.f32 %v16263_v47, %v7932_v3  ;;  %v16275_v23 = vmax.f32 %v16273_v38, %v16274_v42 }
 0x346   : > { %11992 = vst [vmem:[%s14971_s14 + $0x188] sm:$0xff] %v11872_v27   ;;  %v9591_v50 = vadd.f32 %v15300_v20, %v9456_v2  ;;  %v9457_v51 = vmax.f32 %v8143_v36, %v12774_v43  ;;  %v16276_v43 = vld [vmem:[#allocation174_spill] sm:$0xff]  ;;  %v16277_v27 = vld [vmem:[#allocation175_spill] sm:$0xff] }
 0x347   : > { %11991 = vst [vmem:[%s14971_s14 + $0x180] sm:$0xff] %v11867_v41   ;;  %v9589_v10 = vadd.f32 %v15300_v20, %v9454_v45  ;;  %v9455_v16 = vmax.f32 %v8141_v46, %v9246_v40  ;;  %v16278_v2 = vmax.f32 %v16276_v43, %v16277_v27  ;;  %v16279_v40 = vld [vmem:[#allocation176_spill] sm:$0xff]  ;;  %v16280_v41 = vld [vmem:[#allocation177_spill] sm:$0xff] }
 0x348   : > { %v9592_v17 = vadd.f32 %v15300_v20, %v9457_v51  ;;  %v9719_v54 = vmax.f32 %v9591_v50, 0.0  ;;  %v16281_v45 = vmax.f32 %v16279_v40, %v16280_v41  ;;  %v16282_v51 = vld [vmem:[#allocation178_spill] sm:$0xff]  ;;  %v16298_v43 = vld [vmem:[#allocation189_spill] sm:$0xff] }
 0x349   : > { %v9590_v60 = vadd.f32 %v15300_v20, %v9455_v16  ;;  %v12645_v34 = vpop.f32.mrb[232].mxu0  ;;  %v12777_v53 = vpop.f32.mrb[232].mxu1  ;;  %v9717_v61 = vmax.f32 %v9589_v10, 0.0  ;;  %v16283_v10 = vld [vmem:[#allocation179_spill] sm:$0xff] }
 0x34a   : > { %v9720_v56 = vmax.f32 %v9592_v17, 0.0  ;;  %v8146_v25 = vmax.f32 %v16266_v24, %v12645_v34  ;;  %v7945_v29 = vpop.f32.mrb[233].mxu0  ;;  %v9259_v30 = vpop.f32.mrb[233].mxu1  ;;  %v16284_v16 = vmax.f32 %v16282_v51, %v16283_v10 }
 0x34b   : > { %v9718_v5 = vmax.f32 %v9590_v60, 0.0  ;;  %v8144_v62 = vmax.f32 %v16269_v6, %v7945_v29  ;;  %v12646_v8 = vpop.f32.mrb[234].mxu0  ;;  %v12778_v9 = vpop.f32.mrb[234].mxu1 }
 0x34c   : > { %v11882_v13 = vpack.c.bf16 %v9720_v56, %v9719_v54  ;;  %v9460_v14 = vmax.f32 %v8146_v25, %v12777_v53  ;;  %v8147_v22 = vmax.f32 %v16272_v21, %v12646_v8  ;;  %v7948_v31 = vpop.f32.mrb[235].mxu0  ;;  %v9262_v1 = vpop.f32.mrb[235].mxu1  ;;  %v16285_v56 = vld [vmem:[#allocation180_spill] sm:$0xff] }
 0x34d   : > { %v11877_v63 = vpack.c.bf16 %v9718_v5, %v9717_v61  ;;  %v9458_v12 = vmax.f32 %v8144_v62, %v9259_v30  ;;  %v8145_v28 = vmax.f32 %v16275_v23, %v7948_v31  ;;  %v16287_v57 = vmax.f32 %v16285_v56, %v16286_v19 }
 0x34e   : > { %11994 = vst [vmem:[%s14971_s14 + $0x198] sm:$0xff] %v11882_v13   ;;  %v9595_v26 = vadd.f32 %v15300_v20, %v9460_v14  ;;  %v9461_v39 = vmax.f32 %v8147_v22, %v12778_v9  ;;  %v16288_v9 = vld [vmem:[#allocation182_spill] sm:$0xff]  ;;  %v16289_v13 = vld [vmem:[#allocation183_spill] sm:$0xff] }
 0x34f   : > { %11993 = vst [vmem:[%s14971_s14 + $0x190] sm:$0xff] %v11877_v63   ;;  %v9593_v15 = vadd.f32 %v15300_v20, %v9458_v12  ;;  %v9459_v18 = vmax.f32 %v8145_v28, %v9262_v1  ;;  %v16290_v14 = vmax.f32 %v16288_v9, %v16289_v13  ;;  %v16291_v1 = vld [vmem:[#allocation184_spill] sm:$0xff]  ;;  %v16292_v63 = vld [vmem:[#allocation185_spill] sm:$0xff] }
 0x350   : > { %v9596_v58 = vadd.f32 %v15300_v20, %v9461_v39  ;;  %v9723_v52 = vmax.f32 %v9595_v26, 0.0  ;;  %v16293_v12 = vmax.f32 %v16291_v1, %v16292_v63  ;;  %v16294_v39 = vld [vmem:[#allocation186_spill] sm:$0xff]  ;;  %v16310_v9 = vld [vmem:[#allocation197_spill] sm:$0xff] }
 0x351   : > { %v9594_v7 = vadd.f32 %v15300_v20, %v9459_v18  ;;  %v12649_v32 = vpop.f32.mrb[236].mxu0  ;;  %v12781_v33 = vpop.f32.mrb[236].mxu1  ;;  %v9721_v36 = vmax.f32 %v9593_v15, 0.0  ;;  %v16295_v15 = vld [vmem:[#allocation187_spill] sm:$0xff] }
 0x352   : > { %v9724_v4 = vmax.f32 %v9596_v58, 0.0  ;;  %v8150_v11 = vmax.f32 %v16278_v2, %v12649_v32  ;;  %v7961_v37 = vpop.f32.mrb[237].mxu0  ;;  %v9275_v35 = vpop.f32.mrb[237].mxu1  ;;  %v16296_v18 = vmax.f32 %v16294_v39, %v16295_v15 }
 0x353   : > { %v9722_v3 = vmax.f32 %v9594_v7, 0.0  ;;  %v8148_v55 = vmax.f32 %v16281_v45, %v7961_v37  ;;  %v12650_v44 = vpop.f32.mrb[238].mxu0  ;;  %v12782_v47 = vpop.f32.mrb[238].mxu1 }
 0x354   : > { %v11892_v46 = vpack.c.bf16 %v9724_v4, %v9723_v52  ;;  %v9464_v50 = vmax.f32 %v8150_v11, %v12781_v33  ;;  %v8151_v17 = vmax.f32 %v16284_v16, %v12650_v44  ;;  %v7964_v60 = vpop.f32.mrb[239].mxu0  ;;  %v9278_v34 = vpop.f32.mrb[239].mxu1  ;;  %v16297_v4 = vld [vmem:[#allocation188_spill] sm:$0xff] }
 0x355   : > { %v11887_v53 = vpack.c.bf16 %v9722_v3, %v9721_v36  ;;  %v9462_v54 = vmax.f32 %v8148_v55, %v9275_v35  ;;  %v8149_v24 = vmax.f32 %v16287_v57, %v7964_v60  ;;  %v16299_v27 = vmax.f32 %v16297_v4, %v16298_v43 }
 0x356   : > { %11996 = vst [vmem:[%s14971_s14 + $0x1a8] sm:$0xff] %v11892_v46   ;;  %v9599_v25 = vadd.f32 %v15300_v20, %v9464_v50  ;;  %v9465_v29 = vmax.f32 %v8151_v17, %v12782_v47  ;;  %v16300_v47 = vld [vmem:[#allocation190_spill] sm:$0xff]  ;;  %v16301_v46 = vld [vmem:[#allocation191_spill] sm:$0xff] }
 0x357   : > { %11995 = vst [vmem:[%s14971_s14 + $0x1a0] sm:$0xff] %v11887_v53   ;;  %v9597_v30 = vadd.f32 %v15300_v20, %v9462_v54  ;;  %v9463_v61 = vmax.f32 %v8149_v24, %v9278_v34  ;;  %v16302_v50 = vmax.f32 %v16300_v47, %v16301_v46  ;;  %v16303_v34 = vld [vmem:[#allocation192_spill] sm:$0xff]  ;;  %v16304_v53 = vld [vmem:[#allocation193_spill] sm:$0xff] }
 0x358   : > { %v9600_v5 = vadd.f32 %v15300_v20, %v9465_v29  ;;  %v9727_v62 = vmax.f32 %v9599_v25, 0.0  ;;  %v16305_v54 = vmax.f32 %v16303_v34, %v16304_v53  ;;  %v16306_v29 = vld [vmem:[#allocation194_spill] sm:$0xff]  ;;  %v16322_v47 = vld [vmem:[#allocation205_spill] sm:$0xff] }
 0x359   : > { %v9598_v48 = vadd.f32 %v15300_v20, %v9463_v61  ;;  %v12653_v49 = vpop.f32.mrb[240].mxu0  ;;  %v12785_v6 = vpop.f32.mrb[240].mxu1  ;;  %v9725_v22 = vmax.f32 %v9597_v30, 0.0  ;;  %v16307_v30 = vld [vmem:[#allocation195_spill] sm:$0xff] }
 0x35a   : > { %v9728_v8 = vmax.f32 %v9600_v5, 0.0  ;;  %v8154_v59 = vmax.f32 %v16290_v14, %v12653_v49  ;;  %v7977_v0 = vpop.f32.mrb[241].mxu0  ;;  %v9291_v21 = vpop.f32.mrb[241].mxu1  ;;  %v16308_v61 = vmax.f32 %v16306_v29, %v16307_v30 }
 0x35b   : > { %v9726_v31 = vmax.f32 %v9598_v48, 0.0  ;;  %v8152_v38 = vmax.f32 %v16293_v12, %v7977_v0  ;;  %v12654_v42 = vpop.f32.mrb[242].mxu0  ;;  %v12786_v23 = vpop.f32.mrb[242].mxu1 }
 0x35c   : > { %v11902_v28 = vpack.c.bf16 %v9728_v8, %v9727_v62  ;;  %v9468_v26 = vmax.f32 %v8154_v59, %v12785_v6  ;;  %v8155_v58 = vmax.f32 %v16296_v18, %v12654_v42  ;;  %v7980_v7 = vpop.f32.mrb[243].mxu0  ;;  %v9294_v32 = vpop.f32.mrb[243].mxu1  ;;  %v16309_v8 = vld [vmem:[#allocation196_spill] sm:$0xff] }
 0x35d   : > { %v11897_v33 = vpack.c.bf16 %v9726_v31, %v9725_v22  ;;  %v9466_v52 = vmax.f32 %v8152_v38, %v9291_v21  ;;  %v8153_v2 = vmax.f32 %v16299_v27, %v7980_v7  ;;  %v16311_v13 = vmax.f32 %v16309_v8, %v16310_v9 }
 0x35e   : > { %11998 = vst [vmem:[%s14971_s14 + $0x1b8] sm:$0xff] %v11902_v28   ;;  %v9603_v11 = vadd.f32 %v15300_v20, %v9468_v26  ;;  %v9469_v37 = vmax.f32 %v8155_v58, %v12786_v23  ;;  %v16312_v23 = vld [vmem:[#allocation198_spill] sm:$0xff]  ;;  %v16313_v28 = vld [vmem:[#allocation199_spill] sm:$0xff] }
 0x35f   : > { %11997 = vst [vmem:[%s14971_s14 + $0x1b0] sm:$0xff] %v11897_v33   ;;  %v9601_v35 = vadd.f32 %v15300_v20, %v9466_v52  ;;  %v9467_v36 = vmax.f32 %v8153_v2, %v9294_v32  ;;  %v16314_v26 = vmax.f32 %v16312_v23, %v16313_v28  ;;  %v16315_v32 = vld [vmem:[#allocation200_spill] sm:$0xff]  ;;  %v16316_v33 = vld [vmem:[#allocation201_spill] sm:$0xff] }
 0x360   : > { %v9604_v3 = vadd.f32 %v15300_v20, %v9469_v37  ;;  %v9731_v55 = vmax.f32 %v9603_v11, 0.0  ;;  %v16317_v52 = vmax.f32 %v16315_v32, %v16316_v33  ;;  %v16318_v37 = vld [vmem:[#allocation202_spill] sm:$0xff]  ;;  %v16334_v23 = vld [vmem:[#allocation213_spill] sm:$0xff] }
 0x361   : > { %v9602_v40 = vadd.f32 %v15300_v20, %v9467_v36  ;;  %v12657_v41 = vpop.f32.mrb[244].mxu0  ;;  %v12789_v45 = vpop.f32.mrb[244].mxu1  ;;  %v9729_v17 = vmax.f32 %v9601_v35, 0.0  ;;  %v16319_v35 = vld [vmem:[#allocation203_spill] sm:$0xff] }
 0x362   : > { %v9732_v44 = vmax.f32 %v9604_v3, 0.0  ;;  %v8158_v51 = vmax.f32 %v16302_v50, %v12657_v41  ;;  %v7993_v10 = vpop.f32.mrb[245].mxu0  ;;  %v9307_v16 = vpop.f32.mrb[245].mxu1  ;;  %v16320_v36 = vmax.f32 %v16318_v37, %v16319_v35 }
 0x363   : > { %v9730_v60 = vmax.f32 %v9602_v40, 0.0  ;;  %v8156_v56 = vmax.f32 %v16305_v54, %v7993_v10  ;;  %v12658_v19 = vpop.f32.mrb[246].mxu0  ;;  %v12790_v57 = vpop.f32.mrb[246].mxu1 }
 0x364   : > { %v11912_v24 = vpack.c.bf16 %v9732_v44, %v9731_v55  ;;  %v9472_v25 = vmax.f32 %v8158_v51, %v12789_v45  ;;  %v8159_v5 = vmax.f32 %v16308_v61, %v12658_v19  ;;  %v7996_v48 = vpop.f32.mrb[247].mxu0  ;;  %v9310_v49 = vpop.f32.mrb[247].mxu1  ;;  %v16321_v44 = vld [vmem:[#allocation204_spill] sm:$0xff] }
 0x365   : > { %v11907_v6 = vpack.c.bf16 %v9730_v60, %v9729_v17  ;;  %v9470_v62 = vmax.f32 %v8156_v56, %v9307_v16  ;;  %v8157_v14 = vmax.f32 %v16311_v13, %v7996_v48  ;;  %v16323_v46 = vmax.f32 %v16321_v44, %v16322_v47 }
 0x366   : > { %12000 = vst [vmem:[%s14971_s14 + $0x1c8] sm:$0xff] %v11912_v24   ;;  %v9607_v59 = vadd.f32 %v15300_v20, %v9472_v25  ;;  %v9473_v0 = vmax.f32 %v8159_v5, %v12790_v57  ;;  %v16324_v57 = vld [vmem:[#allocation206_spill] sm:$0xff]  ;;  %v16325_v24 = vld [vmem:[#allocation207_spill] sm:$0xff] }
 0x367   : > { %11999 = vst [vmem:[%s14971_s14 + $0x1c0] sm:$0xff] %v11907_v6   ;;  %v9605_v21 = vadd.f32 %v15300_v20, %v9470_v62  ;;  %v9471_v22 = vmax.f32 %v8157_v14, %v9310_v49  ;;  %v16326_v25 = vmax.f32 %v16324_v57, %v16325_v24  ;;  %v16327_v49 = vld [vmem:[#allocation208_spill] sm:$0xff]  ;;  %v16328_v6 = vld [vmem:[#allocation209_spill] sm:$0xff] }
 0x368   : > { %v9608_v31 = vadd.f32 %v15300_v20, %v9473_v0  ;;  %v9735_v38 = vmax.f32 %v9607_v59, 0.0  ;;  %v16329_v62 = vmax.f32 %v16327_v49, %v16328_v6  ;;  %v16330_v0 = vld [vmem:[#allocation210_spill] sm:$0xff] }
 0x369   : > { %v9606_v1 = vadd.f32 %v15300_v20, %v9471_v22  ;;  %v12661_v63 = vpop.f32.mrb[248].mxu0  ;;  %v12793_v12 = vpop.f32.mrb[248].mxu1  ;;  %v9733_v58 = vmax.f32 %v9605_v21, 0.0  ;;  %v16331_v21 = vld [vmem:[#allocation211_spill] sm:$0xff] }
 0x36a   : > { %v9736_v42 = vmax.f32 %v9608_v31, 0.0  ;;  %v8162_v39 = vmax.f32 %v16314_v26, %v12661_v63  ;;  %v8009_v15 = vpop.f32.mrb[249].mxu0  ;;  %v9323_v18 = vpop.f32.mrb[249].mxu1  ;;  %v16332_v22 = vmax.f32 %v16330_v0, %v16331_v21 }
 0x36b   : > { %v9734_v7 = vmax.f32 %v9606_v1, 0.0  ;;  %v8160_v4 = vmax.f32 %v16317_v52, %v8009_v15  ;;  %v12662_v43 = vpop.f32.mrb[250].mxu0  ;;  %v12794_v27 = vpop.f32.mrb[250].mxu1 }
 0x36c   : > { %v11922_v2 = vpack.c.bf16 %v9736_v42, %v9735_v38  ;;  %v9476_v11 = vmax.f32 %v8162_v39, %v12793_v12  ;;  %v8163_v3 = vmax.f32 %v16320_v36, %v12662_v43  ;;  %v8012_v40 = vpop.f32.mrb[251].mxu0  ;;  %v9326_v41 = vpop.f32.mrb[251].mxu1  ;;  %v16333_v42 = vld [vmem:[#allocation212_spill] sm:$0xff] }
 0x36d   : > { %v11917_v45 = vpack.c.bf16 %v9734_v7, %v9733_v58  ;;  %v9474_v55 = vmax.f32 %v8160_v4, %v9323_v18  ;;  %v8161_v50 = vmax.f32 %v16323_v46, %v8012_v40  ;;  %v16335_v28 = vmax.f32 %v16333_v42, %v16334_v23 }
 0x36e   : > { %12002 = vst [vmem:[%s14971_s14 + $0x1d8] sm:$0xff] %v11922_v2   ;;  %v9611_v51 = vadd.f32 %v15300_v20, %v9476_v11  ;;  %v9477_v10 = vmax.f32 %v8163_v3, %v12794_v27 }
 0x36f   : > { %12001 = vst [vmem:[%s14971_s14 + $0x1d0] sm:$0xff] %v11917_v45   ;;  %v9609_v16 = vadd.f32 %v15300_v20, %v9474_v55  ;;  %v9475_v17 = vmax.f32 %v8161_v50, %v9326_v41 }
 0x370   : > { %v9612_v60 = vadd.f32 %v15300_v20, %v9477_v10  ;;  %v9739_v56 = vmax.f32 %v9611_v51, 0.0 }
 0x371   : > { %v9610_v34 = vadd.f32 %v15300_v20, %v9475_v17  ;;  %v12665_v53 = vpop.f32.mrb[252].mxu0  ;;  %v12797_v54 = vpop.f32.mrb[252].mxu1  ;;  %v9737_v5 = vmax.f32 %v9609_v16, 0.0 }
 0x372   : > { %v9740_v19 = vmax.f32 %v9612_v60, 0.0  ;;  %v8166_v29 = vmax.f32 %v16326_v25, %v12665_v53  ;;  %v8025_v30 = vpop.f32.mrb[253].mxu0  ;;  %v9339_v61 = vpop.f32.mrb[253].mxu1 }
 0x373   : > { %v9738_v48 = vmax.f32 %v9610_v34, 0.0  ;;  %v8164_v8 = vmax.f32 %v16329_v62, %v8025_v30  ;;  %v12666_v9 = vpop.f32.mrb[254].mxu0  ;;  %v12798_v13 = vpop.f32.mrb[254].mxu1 }
 0x374   : > { %v11932_v14 = vpack.c.bf16 %v9740_v19, %v9739_v56  ;;  %v9480_v59 = vmax.f32 %v8166_v29, %v12797_v54  ;;  %v8167_v31 = vmax.f32 %v16332_v22, %v12666_v9  ;;  %v8028_v1 = vpop.f32.mrb[255].mxu0  ;;  %v9342_v63 = vpop.f32.mrb[255].mxu1 }
 0x375   : > { %v11927_v12 = vpack.c.bf16 %v9738_v48, %v9737_v5  ;;  %v9478_v38 = vmax.f32 %v8164_v8, %v9339_v61  ;;  %v8165_v26 = vmax.f32 %v16335_v28, %v8028_v1 }
 0x376   : > { %12004 = vst [vmem:[%s14971_s14 + $0x1e8] sm:$0xff] %v11932_v14   ;;  %v9615_v39 = vadd.f32 %v15300_v20, %v9480_v59  ;;  %v9481_v15 = vmax.f32 %v8167_v31, %v12798_v13 }
 0x377   : > { %12003 = vst [vmem:[%s14971_s14 + $0x1e0] sm:$0xff] %v11927_v12   ;;  %v9613_v18 = vadd.f32 %v15300_v20, %v9478_v38  ;;  %v9479_v58 = vmax.f32 %v8165_v26, %v9342_v63 }
 0x378   : > { %v9616_v7 = vadd.f32 %v15300_v20, %v9481_v15  ;;  %v9743_v33 = vmax.f32 %v9615_v39, 0.0 }
 0x379   : > { %v9614_v32 = vadd.f32 %v15300_v20, %v9479_v58  ;;  %v9741_v4 = vmax.f32 %v9613_v18, 0.0 }
 0x37a   : > { %v9744_v52 = vmax.f32 %v9616_v7, 0.0 }
 0x37b   : > { %v9742_v43 = vmax.f32 %v9614_v32, 0.0 }
 0x37c   : > { %v11942_v27 = vpack.c.bf16 %v9744_v52, %v9743_v33 }
 0x37d   : > { %v11937_v2 = vpack.c.bf16 %v9742_v43, %v9741_v4 }
 0x37e   : > { %12006 = vst [vmem:[%s14971_s14 + $0x1f8] sm:$0xff] %v11942_v27  }
 0x37f   : > { %12005 = vst [vmem:[%s14971_s14 + $0x1f0] sm:$0xff] %v11937_v2  }
 0x380 PF: > { %p10_p9 = scmp.ge.s32.totalorder %s13143_s16, 4   ;;  %s16336_s12 = smov %s13100_s13 }
 0x381   : > { %s16337_s13 = smov %s13152_s19  ;;  %s16338_s14 = smov %s13143_s16 }
 0x382   :  { %12 = sbr.rel (!%p10_p9) target bundleno = 2 (0x2), region = 126 }

// kernel: cifar_part1_forward.5
= control target key start
LH: loop header
LB: loop body
LE: loop exit
PB: predicated region body
PF: predicated region fallthrough
CT: control target
= control target key end

     0   :  { %s4678_s0 = inlined_call_operand.vmem [shape: bf16[8,4096], index: 0, kind: input, shape index: {}]   ;;  %s4679_s1 = inlined_call_operand.vmem [shape: bf16[4096,128], index: 1, kind: input, shape index: {}]   ;;  %s4680_s2 = inlined_call_operand.vmem [shape: f32[1,128], index: 2, kind: input, shape index: {}]   ;;  %s4681_s3 = inlined_call_operand.hbm [shape: f32[8,128], index: 3, kind: output, shape index: {}]  }
   0x1   :  { %v3510_v0 = vld [vmem:[%s4679_s1 + $0x40] sm:$0xff]   ;;  %v3514_v4 = vld [vmem:[%s4679_s1 + $0x48] sm:$0xff]   ;;  %v3518_v8 = vld [vmem:[%s4679_s1 + $0x50] sm:$0xff]  }
   0x2   :  { %v3511_v1 = vld [vmem:[%s4679_s1 + $0xc0] sm:$0xff]   ;;  %3157 = vmatprep.subr.bf16.mxu0 %v3510_v0  ;;  %v3515_v5 = vld [vmem:[%s4679_s1 + $0xc8] sm:$0xff]   ;;  %v3519_v9 = vld [vmem:[%s4679_s1 + $0xd0] sm:$0xff]  }
   0x3   :  { %v3512_v2 = vld [vmem:[%s4679_s1] sm:$0xff]   ;;  %3179 = vmatprep.subr.bf16.mxu1 %v3511_v1  ;;  %v3516_v6 = vld [vmem:[%s4679_s1 + $0x8] sm:$0xff]   ;;  %v3520_v10 = vld [vmem:[%s4679_s1 + $0x10] sm:$0xff]  }
   0x4   :  { %v3513_v3 = vld [vmem:[%s4679_s1 + $0x80] sm:$0xff]   ;;  %3158 = vmatpush3.bf16.msra.mxu0 %v3512_v2  ;;  %v3517_v7 = vld [vmem:[%s4679_s1 + $0x88] sm:$0xff]   ;;  %v3521_v11 = vld [vmem:[%s4679_s1 + $0x90] sm:$0xff]  }
   0x5   :  { %3180 = vmatpush3.bf16.msra.mxu1 %v3513_v3  ;;  %3159 = vmatprep.subr.bf16.mxu0 %v3514_v4  ;;  %v3522_v12 = vld [vmem:[%s4679_s1 + $0x58] sm:$0xff]   ;;  %v3526_v16 = vld [vmem:[%s4679_s1 + $0x60] sm:$0xff]   ;;  %v3530_v20 = vld [vmem:[%s4679_s1 + $0x68] sm:$0xff]  }
   0x6   :  { %3181 = vmatprep.subr.bf16.mxu1 %v3515_v5  ;;  %v3523_v13 = vld [vmem:[%s4679_s1 + $0xd8] sm:$0xff]   ;;  %v3527_v17 = vld [vmem:[%s4679_s1 + $0xe0] sm:$0xff]   ;;  %v3531_v21 = vld [vmem:[%s4679_s1 + $0xe8] sm:$0xff]  }
   0x7   :  { %v3524_v14 = vld [vmem:[%s4679_s1 + $0x18] sm:$0xff]   ;;  %v3528_v18 = vld [vmem:[%s4679_s1 + $0x20] sm:$0xff]   ;;  %v3532_v22 = vld [vmem:[%s4679_s1 + $0x28] sm:$0xff]  }
   0x8   :  { %3160 = vmatpush3.bf16.msra.mxu0 %v3516_v6  ;;  %v3525_v15 = vld [vmem:[%s4679_s1 + $0x98] sm:$0xff]   ;;  %v3529_v19 = vld [vmem:[%s4679_s1 + $0xa0] sm:$0xff]   ;;  %v3533_v23 = vld [vmem:[%s4679_s1 + $0xa8] sm:$0xff]  }
   0x9   :  { %3182 = vmatpush3.bf16.msra.mxu1 %v3517_v7  ;;  %3161 = vmatprep.subr.bf16.mxu0 %v3518_v8  ;;  %v3534_v24 = vld [vmem:[%s4679_s1 + $0x70] sm:$0xff]   ;;  %v3538_v28 = vld [vmem:[%s4679_s1 + $0x78] sm:$0xff]   ;;  %v16_v32 = vld [vmem:[%s4678_s0] sm:$0xff] }
   0xa   :  { %3183 = vmatprep.subr.bf16.mxu1 %v3519_v9  ;;  %v3535_v25 = vld [vmem:[%s4679_s1 + $0xf0] sm:$0xff]   ;;  %v3539_v29 = vld [vmem:[%s4679_s1 + $0xf8] sm:$0xff]   ;;  %v17_v33 = vld [vmem:[%s4678_s0 + $0x8] sm:$0xff]  ;;  %v2869_v34 = vcombine.low %v16_v32, %v16_v32  ;;  %v2870_v35 = vcombine.high %v16_v32, %v16_v32 }
   0xb   :  { %v3536_v26 = vld [vmem:[%s4679_s1 + $0x30] sm:$0xff]   ;;  %v3540_v30 = vld [vmem:[%s4679_s1 + $0x38] sm:$0xff]   ;;  %v2871_v36 = vcombine.low %v17_v33, %v17_v33  ;;  %v2872_v37 = vcombine.high %v17_v33, %v17_v33  ;;  %v3546_v38 = vld [vmem:[%s4679_s1 + $0x140] sm:$0xff]  }
   0xc   :  { %3162 = vmatpush3.bf16.msra.mxu0 %v3520_v10  ;;  %v3537_v27 = vld [vmem:[%s4679_s1 + $0xb0] sm:$0xff]   ;;  %v3541_v31 = vld [vmem:[%s4679_s1 + $0xb8] sm:$0xff]   ;;  %v3547_v39 = vld [vmem:[%s4679_s1 + $0x1c0] sm:$0xff]   ;;  %2231 = vmatprep.mubr.bf16.mxu0 %v2870_v35 }
   0xd   :  { %3184 = vmatpush3.bf16.msra.mxu1 %v3521_v11  ;;  %3163 = vmatprep.subr.bf16.mxu0 %v3522_v12  ;;  %v3548_v40 = vld [vmem:[%s4679_s1 + $0x100] sm:$0xff]   ;;  %v3550_v42 = vld [vmem:[%s4679_s1 + $0x148] sm:$0xff]   ;;  %v3554_v46 = vld [vmem:[%s4679_s1 + $0x150] sm:$0xff]  }
   0xe   :  { %3185 = vmatprep.subr.bf16.mxu1 %v3523_v13  ;;  %2271 = vmatprep.mubr.bf16.mxu1 %v2872_v37  ;;  %v3549_v41 = vld [vmem:[%s4679_s1 + $0x180] sm:$0xff]   ;;  %v3551_v43 = vld [vmem:[%s4679_s1 + $0x1c8] sm:$0xff]   ;;  %v3555_v47 = vld [vmem:[%s4679_s1 + $0x1d0] sm:$0xff]  }
   0xf   :  { %v3552_v44 = vld [vmem:[%s4679_s1 + $0x108] sm:$0xff]   ;;  %v3556_v48 = vld [vmem:[%s4679_s1 + $0x110] sm:$0xff]   ;;  %v3558_v50 = vld [vmem:[%s4679_s1 + $0x158] sm:$0xff]  }
  0x10   :  { %3164 = vmatpush3.bf16.msra.mxu0 %v3524_v14  ;;  %v3553_v45 = vld [vmem:[%s4679_s1 + $0x188] sm:$0xff]   ;;  %v3557_v49 = vld [vmem:[%s4679_s1 + $0x190] sm:$0xff]   ;;  %v3559_v51 = vld [vmem:[%s4679_s1 + $0x1d8] sm:$0xff]  }
  0x11   :  { %3186 = vmatpush3.bf16.msra.mxu1 %v3525_v15  ;;  %3165 = vmatprep.subr.bf16.mxu0 %v3526_v16  ;;  %v3560_v52 = vld [vmem:[%s4679_s1 + $0x118] sm:$0xff]   ;;  %v3562_v54 = vld [vmem:[%s4679_s1 + $0x160] sm:$0xff]   ;;  %v3566_v58 = vld [vmem:[%s4679_s1 + $0x168] sm:$0xff]  }
  0x12   :  { %3187 = vmatprep.subr.bf16.mxu1 %v3527_v17  ;;  %v3561_v53 = vld [vmem:[%s4679_s1 + $0x198] sm:$0xff]   ;;  %v3563_v55 = vld [vmem:[%s4679_s1 + $0x1e0] sm:$0xff]   ;;  %v3567_v59 = vld [vmem:[%s4679_s1 + $0x1e8] sm:$0xff]  }
  0x13   :  { %v3564_v56 = vld [vmem:[%s4679_s1 + $0x120] sm:$0xff]   ;;  %v3568_v60 = vld [vmem:[%s4679_s1 + $0x128] sm:$0xff]   ;;  %v3570_v62 = vld [vmem:[%s4679_s1 + $0x170] sm:$0xff]  }
  0x14   :  { %3166 = vmatpush3.bf16.msra.mxu0 %v3528_v18  ;;  %v3565_v57 = vld [vmem:[%s4679_s1 + $0x1a0] sm:$0xff]   ;;  %v3569_v61 = vld [vmem:[%s4679_s1 + $0x1a8] sm:$0xff]   ;;  %v3571_v63 = vld [vmem:[%s4679_s1 + $0x1f0] sm:$0xff]  }
  0x15   :  { %3188 = vmatpush3.bf16.msra.mxu1 %v3529_v19  ;;  %3167 = vmatprep.subr.bf16.mxu0 %v3530_v20  ;;  %v3572_v0 = vld [vmem:[%s4679_s1 + $0x130] sm:$0xff]   ;;  %v3574_v2 = vld [vmem:[%s4679_s1 + $0x178] sm:$0xff]   ;;  %v3582_v12 = vld [vmem:[%s4679_s1 + $0x240] sm:$0xff]  }
  0x16   :  { %3189 = vmatprep.subr.bf16.mxu1 %v3531_v21  ;;  %v3573_v1 = vld [vmem:[%s4679_s1 + $0x1b0] sm:$0xff]   ;;  %v3575_v3 = vld [vmem:[%s4679_s1 + $0x1f8] sm:$0xff]   ;;  %v3583_v13 = vld [vmem:[%s4679_s1 + $0x2c0] sm:$0xff]  }
  0x17   :  { %v3576_v4 = vld [vmem:[%s4679_s1 + $0x138] sm:$0xff]   ;;  %v18_v6 = vld [vmem:[%s4678_s0 + $0x10] sm:$0xff]  ;;  %v3584_v14 = vld [vmem:[%s4679_s1 + $0x200] sm:$0xff]  }
  0x18   :  { %3168 = vmatpush3.bf16.msra.mxu0 %v3532_v22  ;;  %v3577_v5 = vld [vmem:[%s4679_s1 + $0x1b8] sm:$0xff]   ;;  %v2873_v7 = vcombine.low %v18_v6, %v18_v6  ;;  %v2874_v8 = vcombine.high %v18_v6, %v18_v6  ;;  %v3585_v15 = vld [vmem:[%s4679_s1 + $0x280] sm:$0xff]   ;;  %v3586_v16 = vld [vmem:[%s4679_s1 + $0x248] sm:$0xff]  }
  0x19   :  { %3190 = vmatpush3.bf16.msra.mxu1 %v3533_v23  ;;  %3169 = vmatprep.subr.bf16.mxu0 %v3534_v24  ;;  %v19_v9 = vld [vmem:[%s4678_s0 + $0x18] sm:$0xff]  ;;  %v3587_v17 = vld [vmem:[%s4679_s1 + $0x2c8] sm:$0xff]   ;;  %v3590_v20 = vld [vmem:[%s4679_s1 + $0x250] sm:$0xff]  }
  0x1a   :  { %3191 = vmatprep.subr.bf16.mxu1 %v3535_v25  ;;  %v2875_v10 = vcombine.low %v19_v9, %v19_v9  ;;  %v2876_v11 = vcombine.high %v19_v9, %v19_v9  ;;  %v3588_v18 = vld [vmem:[%s4679_s1 + $0x208] sm:$0xff]   ;;  %v3591_v21 = vld [vmem:[%s4679_s1 + $0x2d0] sm:$0xff]   ;;  %v3594_v24 = vld [vmem:[%s4679_s1 + $0x258] sm:$0xff]  }
  0x1b   :  { %v3589_v19 = vld [vmem:[%s4679_s1 + $0x288] sm:$0xff]   ;;  %v3592_v22 = vld [vmem:[%s4679_s1 + $0x210] sm:$0xff]   ;;  %v3595_v25 = vld [vmem:[%s4679_s1 + $0x2d8] sm:$0xff]  }
  0x1c   :  { %3170 = vmatpush3.bf16.msra.mxu0 %v3536_v26  ;;  %v3593_v23 = vld [vmem:[%s4679_s1 + $0x290] sm:$0xff]   ;;  %v3596_v26 = vld [vmem:[%s4679_s1 + $0x218] sm:$0xff]   ;;  %v3602_v32 = vld [vmem:[%s4679_s1 + $0x268] sm:$0xff]  }
  0x1d   :  { %3192 = vmatpush3.bf16.msra.mxu1 %v3537_v27  ;;  %3171 = vmatprep.subr.bf16.mxu0 %v3538_v28  ;;  %v3597_v27 = vld [vmem:[%s4679_s1 + $0x298] sm:$0xff]   ;;  %v3598_v28 = vld [vmem:[%s4679_s1 + $0x260] sm:$0xff]   ;;  %v3603_v33 = vld [vmem:[%s4679_s1 + $0x2e8] sm:$0xff]  }
  0x1e   :  { %3193 = vmatprep.subr.bf16.mxu1 %v3539_v29  ;;  %v3599_v29 = vld [vmem:[%s4679_s1 + $0x2e0] sm:$0xff]   ;;  %v3605_v35 = vld [vmem:[%s4679_s1 + $0x2a8] sm:$0xff]   ;;  %v3607_v37 = vld [vmem:[%s4679_s1 + $0x2f0] sm:$0xff]  }
  0x1f   :  { %v3638_v6 = vld [vmem:[%s4679_s1 + $0x368] sm:$0xff]  }
  0x20   :  { %3172 = vmatpush3.bf16.msra.mxu0 %v3540_v30  ;;  %v3600_v30 = vld [vmem:[%s4679_s1 + $0x220] sm:$0xff]   ;;  %v3641_v9 = vld [vmem:[%s4679_s1 + $0x3a8] sm:$0xff]  }
  0x21   :  { %3194 = vmatpush3.bf16.msra.mxu1 %v3541_v31  ;;  %3201 = vmatprep.subr.bf16.mxu0 %v3546_v38  ;;  %v3601_v31 = vld [vmem:[%s4679_s1 + $0x2a0] sm:$0xff]   ;;  %v3608_v38 = vld [vmem:[%s4679_s1 + $0x230] sm:$0xff]  }
  0x22   :  { %3223 = vmatprep.subr.bf16.mxu1 %v3547_v39  ;;  %v3609_v39 = vld [vmem:[%s4679_s1 + $0x2b0] sm:$0xff]  }
  0x23   :  { %2232 = vmatmul.mubr.bf16.vlgmr.msra.gmra.mrb[0].mxu0 %v2869_v34  ;;  %v3604_v34 = vld [vmem:[%s4679_s1 + $0x228] sm:$0xff]  }
  0x24   :  { %2272 = vmatmul.mubr.bf16.vlgmr.msra.gmra.mrb[0].mxu1 %v2871_v36  ;;  %3202 = vmatpush3.bf16.msra.mxu0 %v3548_v40  ;;  %v3606_v36 = vld [vmem:[%s4679_s1 + $0x270] sm:$0xff]   ;;  %v3610_v40 = vld [vmem:[%s4679_s1 + $0x278] sm:$0xff]  }
  0x25   :  { %3224 = vmatpush3.bf16.msra.mxu1 %v3549_v41  ;;  %3203 = vmatprep.subr.bf16.mxu0 %v3550_v42  ;;  %v3611_v41 = vld [vmem:[%s4679_s1 + $0x2f8] sm:$0xff]  }
  0x26   :  { %3225 = vmatprep.subr.bf16.mxu1 %v3551_v43  ;;  %2311 = vmatprep.mubr.bf16.mxu0 %v2874_v8  ;;  %v3612_v42 = vld [vmem:[%s4679_s1 + $0x238] sm:$0xff]   ;;  %v3640_v8 = vld [vmem:[%s4679_s1 + $0x328] sm:$0xff]  }
  0x27   :  { %2351 = vmatprep.mubr.bf16.mxu1 %v2876_v11  ;;  %v3613_v43 = vld [vmem:[%s4679_s1 + $0x2b8] sm:$0xff]   ;;  %v3643_v11 = vld [vmem:[%s4679_s1 + $0x3f0] sm:$0xff]  }
  0x28   :  { %3204 = vmatpush3.bf16.msra.mxu0 %v3552_v44  ;;  %v20_v44 = vld [vmem:[%s4678_s0 + $0x20] sm:$0xff] }
  0x29   :  { %3226 = vmatpush3.bf16.msra.mxu1 %v3553_v45  ;;  %3205 = vmatprep.subr.bf16.mxu0 %v3554_v46  ;;  %v21_v45 = vld [vmem:[%s4678_s0 + $0x28] sm:$0xff]  ;;  %v2877_v46 = vcombine.low %v20_v44, %v20_v44 }
  0x2a   :  { %3227 = vmatprep.subr.bf16.mxu1 %v3555_v47  ;;  %v2878_v47 = vcombine.high %v20_v44, %v20_v44  ;;  %v3674_v44 = vld [vmem:[%s4679_s1 + $0x468] sm:$0xff]  }
  0x2c   :  { %3206 = vmatpush3.bf16.msra.mxu0 %v3556_v48  ;;  %v2879_v48 = vcombine.low %v21_v45, %v21_v45 }
  0x2d   :  { %3228 = vmatpush3.bf16.msra.mxu1 %v3557_v49  ;;  %3207 = vmatprep.subr.bf16.mxu0 %v3558_v50  ;;  %v2880_v49 = vcombine.high %v21_v45, %v21_v45  ;;  %v3618_v50 = vld [vmem:[%s4679_s1 + $0x340] sm:$0xff]   ;;  %v3675_v45 = vld [vmem:[%s4679_s1 + $0x4e8] sm:$0xff]  }
  0x2e   :  { %3229 = vmatprep.subr.bf16.mxu1 %v3559_v51  ;;  %v3619_v51 = vld [vmem:[%s4679_s1 + $0x3c0] sm:$0xff]  }
  0x30   :  { %3208 = vmatpush3.bf16.msra.mxu0 %v3560_v52  ;;  %v3620_v52 = vld [vmem:[%s4679_s1 + $0x300] sm:$0xff]  }
  0x31   :  { %3230 = vmatpush3.bf16.msra.mxu1 %v3561_v53  ;;  %3209 = vmatprep.subr.bf16.mxu0 %v3562_v54  ;;  %v3621_v53 = vld [vmem:[%s4679_s1 + $0x380] sm:$0xff]   ;;  %v3622_v54 = vld [vmem:[%s4679_s1 + $0x348] sm:$0xff]  }
  0x32   :  { %3231 = vmatprep.subr.bf16.mxu1 %v3563_v55  ;;  %v3623_v55 = vld [vmem:[%s4679_s1 + $0x3c8] sm:$0xff]  }
  0x34   :  { %3210 = vmatpush3.bf16.msra.mxu0 %v3564_v56  ;;  %v3624_v56 = vld [vmem:[%s4679_s1 + $0x308] sm:$0xff]  }
  0x35   :  { %3232 = vmatpush3.bf16.msra.mxu1 %v3565_v57  ;;  %3211 = vmatprep.subr.bf16.mxu0 %v3566_v58  ;;  %v3625_v57 = vld [vmem:[%s4679_s1 + $0x388] sm:$0xff]   ;;  %v3626_v58 = vld [vmem:[%s4679_s1 + $0x350] sm:$0xff]  }
  0x36   :  { %3233 = vmatprep.subr.bf16.mxu1 %v3567_v59  ;;  %v3627_v59 = vld [vmem:[%s4679_s1 + $0x3d0] sm:$0xff]  }
  0x38   :  { %3212 = vmatpush3.bf16.msra.mxu0 %v3568_v60  ;;  %v3628_v60 = vld [vmem:[%s4679_s1 + $0x310] sm:$0xff]  }
  0x39   :  { %3234 = vmatpush3.bf16.msra.mxu1 %v3569_v61  ;;  %3213 = vmatprep.subr.bf16.mxu0 %v3570_v62  ;;  %v3629_v61 = vld [vmem:[%s4679_s1 + $0x390] sm:$0xff]   ;;  %v3630_v62 = vld [vmem:[%s4679_s1 + $0x358] sm:$0xff]  }
  0x3a   :  { %3235 = vmatprep.subr.bf16.mxu1 %v3571_v63  ;;  %v3631_v63 = vld [vmem:[%s4679_s1 + $0x3d8] sm:$0xff]  }
  0x3c   :  { %3214 = vmatpush3.bf16.msra.mxu0 %v3572_v0  ;;  %v3632_v0 = vld [vmem:[%s4679_s1 + $0x318] sm:$0xff]  }
  0x3d   :  { %3236 = vmatpush3.bf16.msra.mxu1 %v3573_v1  ;;  %3215 = vmatprep.subr.bf16.mxu0 %v3574_v2  ;;  %v3633_v1 = vld [vmem:[%s4679_s1 + $0x398] sm:$0xff]   ;;  %v3634_v2 = vld [vmem:[%s4679_s1 + $0x360] sm:$0xff]  }
  0x3e   :  { %3237 = vmatprep.subr.bf16.mxu1 %v3575_v3  ;;  %v3635_v3 = vld [vmem:[%s4679_s1 + $0x3e0] sm:$0xff]  }
  0x40   :  { %3216 = vmatpush3.bf16.msra.mxu0 %v3576_v4  ;;  %v3636_v4 = vld [vmem:[%s4679_s1 + $0x320] sm:$0xff]  }
  0x41   :  { %3238 = vmatpush3.bf16.msra.mxu1 %v3577_v5  ;;  %3245 = vmatprep.subr.bf16.mxu0 %v3582_v12  ;;  %v3637_v5 = vld [vmem:[%s4679_s1 + $0x3a0] sm:$0xff]   ;;  %v3644_v12 = vld [vmem:[%s4679_s1 + $0x330] sm:$0xff]  }
  0x42   :  { %3267 = vmatprep.subr.bf16.mxu1 %v3583_v13  ;;  %v3645_v13 = vld [vmem:[%s4679_s1 + $0x3b0] sm:$0xff]  }
  0x43   :  { %2312 = vmatmul.mubr.bf16.vlgmr.msra.gmra.mrb[4].mxu0 %v2873_v7  ;;  %v3639_v7 = vld [vmem:[%s4679_s1 + $0x3e8] sm:$0xff]  }
  0x44   :  { %2352 = vmatmul.mubr.bf16.vlgmr.msra.gmra.mrb[4].mxu1 %v2875_v10  ;;  %3246 = vmatpush3.bf16.msra.mxu0 %v3584_v14  ;;  %v3642_v10 = vld [vmem:[%s4679_s1 + $0x370] sm:$0xff]   ;;  %v3646_v14 = vld [vmem:[%s4679_s1 + $0x378] sm:$0xff]  }
  0x45   :  { %3268 = vmatpush3.bf16.msra.mxu1 %v3585_v15  ;;  %3247 = vmatprep.subr.bf16.mxu0 %v3586_v16  ;;  %v3647_v15 = vld [vmem:[%s4679_s1 + $0x3f8] sm:$0xff]  }
  0x46   :  { %3269 = vmatprep.subr.bf16.mxu1 %v3587_v17  ;;  %2391 = vmatprep.mubr.bf16.mxu0 %v2878_v47  ;;  %v3648_v16 = vld [vmem:[%s4679_s1 + $0x338] sm:$0xff]   ;;  %v3677_v47 = vld [vmem:[%s4679_s1 + $0x4a8] sm:$0xff]  }
  0x47   :  { %2431 = vmatprep.mubr.bf16.mxu1 %v2880_v49  ;;  %v3649_v17 = vld [vmem:[%s4679_s1 + $0x3b8] sm:$0xff]   ;;  %v3679_v49 = vld [vmem:[%s4679_s1 + $0x4f0] sm:$0xff]  }
  0x48   :  { %3248 = vmatpush3.bf16.msra.mxu0 %v3588_v18  ;;  %v22_v18 = vld [vmem:[%s4678_s0 + $0x30] sm:$0xff] }
  0x49   :  { %3270 = vmatpush3.bf16.msra.mxu1 %v3589_v19  ;;  %3249 = vmatprep.subr.bf16.mxu0 %v3590_v20  ;;  %v23_v19 = vld [vmem:[%s4678_s0 + $0x38] sm:$0xff]  ;;  %v2881_v20 = vcombine.low %v22_v18, %v22_v18 }
  0x4a   :  { %3271 = vmatprep.subr.bf16.mxu1 %v3591_v21  ;;  %v2882_v21 = vcombine.high %v22_v18, %v22_v18  ;;  %v3710_v18 = vld [vmem:[%s4679_s1 + $0x568] sm:$0xff]  }
  0x4c   :  { %3250 = vmatpush3.bf16.msra.mxu0 %v3592_v22  ;;  %v2883_v22 = vcombine.low %v23_v19, %v23_v19 }
  0x4d   :  { %3272 = vmatpush3.bf16.msra.mxu1 %v3593_v23  ;;  %3251 = vmatprep.subr.bf16.mxu0 %v3594_v24  ;;  %v3654_v23 = vld [vmem:[%s4679_s1 + $0x440] sm:$0xff]   ;;  %v2884_v24 = vcombine.high %v23_v19, %v23_v19  ;;  %v3711_v19 = vld [vmem:[%s4679_s1 + $0x5e8] sm:$0xff]  }
  0x4e   :  { %3273 = vmatprep.subr.bf16.mxu1 %v3595_v25  ;;  %v3655_v25 = vld [vmem:[%s4679_s1 + $0x4c0] sm:$0xff]  }
  0x50   :  { %3252 = vmatpush3.bf16.msra.mxu0 %v3596_v26  ;;  %v3656_v26 = vld [vmem:[%s4679_s1 + $0x400] sm:$0xff]  }
  0x51   :  { %3274 = vmatpush3.bf16.msra.mxu1 %v3597_v27  ;;  %3253 = vmatprep.subr.bf16.mxu0 %v3598_v28  ;;  %v3657_v27 = vld [vmem:[%s4679_s1 + $0x480] sm:$0xff]   ;;  %v3658_v28 = vld [vmem:[%s4679_s1 + $0x448] sm:$0xff]  }
  0x52   :  { %3275 = vmatprep.subr.bf16.mxu1 %v3599_v29  ;;  %v3659_v29 = vld [vmem:[%s4679_s1 + $0x4c8] sm:$0xff]  }
  0x54   :  { %3254 = vmatpush3.bf16.msra.mxu0 %v3600_v30  ;;  %v3660_v30 = vld [vmem:[%s4679_s1 + $0x408] sm:$0xff]  }
  0x55   :  { %3276 = vmatpush3.bf16.msra.mxu1 %v3601_v31  ;;  %3255 = vmatprep.subr.bf16.mxu0 %v3602_v32  ;;  %v3661_v31 = vld [vmem:[%s4679_s1 + $0x488] sm:$0xff]   ;;  %v3662_v32 = vld [vmem:[%s4679_s1 + $0x450] sm:$0xff]  }
  0x56   :  { %3277 = vmatprep.subr.bf16.mxu1 %v3603_v33  ;;  %v3663_v33 = vld [vmem:[%s4679_s1 + $0x4d0] sm:$0xff]  }
  0x58   :  { %3256 = vmatpush3.bf16.msra.mxu0 %v3604_v34  ;;  %v3664_v34 = vld [vmem:[%s4679_s1 + $0x410] sm:$0xff]  }
  0x59   :  { %3278 = vmatpush3.bf16.msra.mxu1 %v3605_v35  ;;  %3257 = vmatprep.subr.bf16.mxu0 %v3606_v36  ;;  %v3665_v35 = vld [vmem:[%s4679_s1 + $0x490] sm:$0xff]   ;;  %v3666_v36 = vld [vmem:[%s4679_s1 + $0x458] sm:$0xff]  }
  0x5a   :  { %3279 = vmatprep.subr.bf16.mxu1 %v3607_v37  ;;  %v3667_v37 = vld [vmem:[%s4679_s1 + $0x4d8] sm:$0xff]  }
  0x5c   :  { %3258 = vmatpush3.bf16.msra.mxu0 %v3608_v38  ;;  %v3668_v38 = vld [vmem:[%s4679_s1 + $0x418] sm:$0xff]  }
  0x5d   :  { %3280 = vmatpush3.bf16.msra.mxu1 %v3609_v39  ;;  %3259 = vmatprep.subr.bf16.mxu0 %v3610_v40  ;;  %v3669_v39 = vld [vmem:[%s4679_s1 + $0x498] sm:$0xff]   ;;  %v3670_v40 = vld [vmem:[%s4679_s1 + $0x460] sm:$0xff]  }
  0x5e   :  { %3281 = vmatprep.subr.bf16.mxu1 %v3611_v41  ;;  %v3671_v41 = vld [vmem:[%s4679_s1 + $0x4e0] sm:$0xff]  }
  0x60   :  { %3260 = vmatpush3.bf16.msra.mxu0 %v3612_v42  ;;  %v3672_v42 = vld [vmem:[%s4679_s1 + $0x420] sm:$0xff]  }
  0x61   :  { %3282 = vmatpush3.bf16.msra.mxu1 %v3613_v43  ;;  %3289 = vmatprep.subr.bf16.mxu0 %v3618_v50  ;;  %v3673_v43 = vld [vmem:[%s4679_s1 + $0x4a0] sm:$0xff]   ;;  %v3680_v50 = vld [vmem:[%s4679_s1 + $0x430] sm:$0xff]  }
  0x62   :  { %3311 = vmatprep.subr.bf16.mxu1 %v3619_v51  ;;  %v3681_v51 = vld [vmem:[%s4679_s1 + $0x4b0] sm:$0xff]  }
  0x63   :  { %2392 = vmatmul.mubr.bf16.vlgmr.msra.gmra.mrb[8].mxu0 %v2877_v46  ;;  %v3676_v46 = vld [vmem:[%s4679_s1 + $0x428] sm:$0xff]  }
  0x64   :  { %2432 = vmatmul.mubr.bf16.vlgmr.msra.gmra.mrb[8].mxu1 %v2879_v48  ;;  %3290 = vmatpush3.bf16.msra.mxu0 %v3620_v52  ;;  %v3678_v48 = vld [vmem:[%s4679_s1 + $0x470] sm:$0xff]   ;;  %v3682_v52 = vld [vmem:[%s4679_s1 + $0x478] sm:$0xff]  }
  0x65   :  { %3312 = vmatpush3.bf16.msra.mxu1 %v3621_v53  ;;  %3291 = vmatprep.subr.bf16.mxu0 %v3622_v54  ;;  %v3683_v53 = vld [vmem:[%s4679_s1 + $0x4f8] sm:$0xff]  }
  0x66   :  { %3313 = vmatprep.subr.bf16.mxu1 %v3623_v55  ;;  %2471 = vmatprep.mubr.bf16.mxu0 %v2882_v21  ;;  %v3684_v54 = vld [vmem:[%s4679_s1 + $0x438] sm:$0xff]   ;;  %v3713_v21 = vld [vmem:[%s4679_s1 + $0x5a8] sm:$0xff]  }
  0x67   :  { %2511 = vmatprep.mubr.bf16.mxu1 %v2884_v24  ;;  %v3685_v55 = vld [vmem:[%s4679_s1 + $0x4b8] sm:$0xff]   ;;  %v3716_v24 = vld [vmem:[%s4679_s1 + $0x530] sm:$0xff]  }
  0x68   :  { %3292 = vmatpush3.bf16.msra.mxu0 %v3624_v56  ;;  %v24_v56 = vld [vmem:[%s4678_s0 + $0x40] sm:$0xff] }
  0x69   :  { %3314 = vmatpush3.bf16.msra.mxu1 %v3625_v57  ;;  %3293 = vmatprep.subr.bf16.mxu0 %v3626_v58  ;;  %v2885_v57 = vcombine.low %v24_v56, %v24_v56  ;;  %v2886_v58 = vcombine.high %v24_v56, %v24_v56  ;;  %v3746_v56 = vld [vmem:[%s4679_s1 + $0x668] sm:$0xff]  }
  0x6a   :  { %3315 = vmatprep.subr.bf16.mxu1 %v3627_v59  ;;  %v25_v59 = vld [vmem:[%s4678_s0 + $0x48] sm:$0xff] }
  0x6c   :  { %3294 = vmatpush3.bf16.msra.mxu0 %v3628_v60  ;;  %v2887_v60 = vcombine.low %v25_v59, %v25_v59 }
  0x6d   :  { %3316 = vmatpush3.bf16.msra.mxu1 %v3629_v61  ;;  %3295 = vmatprep.subr.bf16.mxu0 %v3630_v62  ;;  %v2888_v61 = vcombine.high %v25_v59, %v25_v59  ;;  %v3690_v62 = vld [vmem:[%s4679_s1 + $0x540] sm:$0xff]   ;;  %v3749_v59 = vld [vmem:[%s4679_s1 + $0x6a8] sm:$0xff]  }
  0x6e   :  { %3317 = vmatprep.subr.bf16.mxu1 %v3631_v63  ;;  %v3691_v63 = vld [vmem:[%s4679_s1 + $0x5c0] sm:$0xff]  }
  0x70   :  { %3296 = vmatpush3.bf16.msra.mxu0 %v3632_v0  ;;  %v3692_v0 = vld [vmem:[%s4679_s1 + $0x500] sm:$0xff]  }
  0x71   :  { %3318 = vmatpush3.bf16.msra.mxu1 %v3633_v1  ;;  %3297 = vmatprep.subr.bf16.mxu0 %v3634_v2  ;;  %v3693_v1 = vld [vmem:[%s4679_s1 + $0x580] sm:$0xff]   ;;  %v3694_v2 = vld [vmem:[%s4679_s1 + $0x548] sm:$0xff]  }
  0x72   :  { %3319 = vmatprep.subr.bf16.mxu1 %v3635_v3  ;;  %v3695_v3 = vld [vmem:[%s4679_s1 + $0x5c8] sm:$0xff]  }
  0x74   :  { %3298 = vmatpush3.bf16.msra.mxu0 %v3636_v4  ;;  %v3696_v4 = vld [vmem:[%s4679_s1 + $0x508] sm:$0xff]  }
  0x75   :  { %3320 = vmatpush3.bf16.msra.mxu1 %v3637_v5  ;;  %3299 = vmatprep.subr.bf16.mxu0 %v3638_v6  ;;  %v3697_v5 = vld [vmem:[%s4679_s1 + $0x588] sm:$0xff]   ;;  %v3698_v6 = vld [vmem:[%s4679_s1 + $0x550] sm:$0xff]  }
  0x76   :  { %3321 = vmatprep.subr.bf16.mxu1 %v3639_v7  ;;  %v3699_v7 = vld [vmem:[%s4679_s1 + $0x5d0] sm:$0xff]  }
  0x78   :  { %3300 = vmatpush3.bf16.msra.mxu0 %v3640_v8  ;;  %v3700_v8 = vld [vmem:[%s4679_s1 + $0x510] sm:$0xff]  }
  0x79   :  { %3322 = vmatpush3.bf16.msra.mxu1 %v3641_v9  ;;  %3301 = vmatprep.subr.bf16.mxu0 %v3642_v10  ;;  %v3701_v9 = vld [vmem:[%s4679_s1 + $0x590] sm:$0xff]   ;;  %v3702_v10 = vld [vmem:[%s4679_s1 + $0x558] sm:$0xff]  }
  0x7a   :  { %3323 = vmatprep.subr.bf16.mxu1 %v3643_v11  ;;  %v3703_v11 = vld [vmem:[%s4679_s1 + $0x5d8] sm:$0xff]  }
  0x7c   :  { %3302 = vmatpush3.bf16.msra.mxu0 %v3644_v12  ;;  %v3704_v12 = vld [vmem:[%s4679_s1 + $0x518] sm:$0xff]  }
  0x7d   :  { %3324 = vmatpush3.bf16.msra.mxu1 %v3645_v13  ;;  %3303 = vmatprep.subr.bf16.mxu0 %v3646_v14  ;;  %v3705_v13 = vld [vmem:[%s4679_s1 + $0x598] sm:$0xff]   ;;  %v3706_v14 = vld [vmem:[%s4679_s1 + $0x560] sm:$0xff]  }
  0x7e   :  { %3325 = vmatprep.subr.bf16.mxu1 %v3647_v15  ;;  %v3707_v15 = vld [vmem:[%s4679_s1 + $0x5e0] sm:$0xff]  }
  0x80   :  { %3304 = vmatpush3.bf16.msra.mxu0 %v3648_v16  ;;  %v3708_v16 = vld [vmem:[%s4679_s1 + $0x520] sm:$0xff]  }
  0x81   :  { %3326 = vmatpush3.bf16.msra.mxu1 %v3649_v17  ;;  %3333 = vmatprep.subr.bf16.mxu0 %v3654_v23  ;;  %v3709_v17 = vld [vmem:[%s4679_s1 + $0x5a0] sm:$0xff]   ;;  %v3715_v23 = vld [vmem:[%s4679_s1 + $0x5f0] sm:$0xff]  }
  0x82   :  { %3355 = vmatprep.subr.bf16.mxu1 %v3655_v25  ;;  %v3717_v25 = vld [vmem:[%s4679_s1 + $0x5b0] sm:$0xff]  }
  0x83   :  { %2472 = vmatmul.mubr.bf16.vlgmr.msra.gmra.mrb[12].mxu0 %v2881_v20  ;;  %v3712_v20 = vld [vmem:[%s4679_s1 + $0x528] sm:$0xff]  }
  0x84   :  { %2512 = vmatmul.mubr.bf16.vlgmr.msra.gmra.mrb[12].mxu1 %v2883_v22  ;;  %3334 = vmatpush3.bf16.msra.mxu0 %v3656_v26  ;;  %v3714_v22 = vld [vmem:[%s4679_s1 + $0x570] sm:$0xff]   ;;  %v3718_v26 = vld [vmem:[%s4679_s1 + $0x578] sm:$0xff]  }
  0x85   :  { %3356 = vmatpush3.bf16.msra.mxu1 %v3657_v27  ;;  %3335 = vmatprep.subr.bf16.mxu0 %v3658_v28  ;;  %v3719_v27 = vld [vmem:[%s4679_s1 + $0x5f8] sm:$0xff]  }
  0x86   :  { %3357 = vmatprep.subr.bf16.mxu1 %v3659_v29  ;;  %2551 = vmatprep.mubr.bf16.mxu0 %v2886_v58  ;;  %v3720_v28 = vld [vmem:[%s4679_s1 + $0x538] sm:$0xff]   ;;  %v3748_v58 = vld [vmem:[%s4679_s1 + $0x628] sm:$0xff]  }
  0x87   :  { %2591 = vmatprep.mubr.bf16.mxu1 %v2888_v61  ;;  %v3721_v29 = vld [vmem:[%s4679_s1 + $0x5b8] sm:$0xff]   ;;  %v3751_v61 = vld [vmem:[%s4679_s1 + $0x6f0] sm:$0xff]  }
  0x88   :  { %3336 = vmatpush3.bf16.msra.mxu0 %v3660_v30  ;;  %v26_v30 = vld [vmem:[%s4678_s0 + $0x50] sm:$0xff] }
  0x89   :  { %3358 = vmatpush3.bf16.msra.mxu1 %v3661_v31  ;;  %3337 = vmatprep.subr.bf16.mxu0 %v3662_v32  ;;  %v27_v31 = vld [vmem:[%s4678_s0 + $0x58] sm:$0xff]  ;;  %v2889_v32 = vcombine.low %v26_v30, %v26_v30 }
  0x8a   :  { %3359 = vmatprep.subr.bf16.mxu1 %v3663_v33  ;;  %v2890_v33 = vcombine.high %v26_v30, %v26_v30  ;;  %v3781_v30 = vld [vmem:[%s4679_s1 + $0x7a0] sm:$0xff]  }
  0x8c   :  { %3338 = vmatpush3.bf16.msra.mxu0 %v3664_v34  ;;  %v2891_v34 = vcombine.low %v27_v31, %v27_v31 }
  0x8d   :  { %3360 = vmatpush3.bf16.msra.mxu1 %v3665_v35  ;;  %3339 = vmatprep.subr.bf16.mxu0 %v3666_v36  ;;  %v2892_v35 = vcombine.high %v27_v31, %v27_v31  ;;  %v3726_v36 = vld [vmem:[%s4679_s1 + $0x640] sm:$0xff]  }
  0x8e   :  { %3361 = vmatprep.subr.bf16.mxu1 %v3667_v37  ;;  %v3727_v37 = vld [vmem:[%s4679_s1 + $0x6c0] sm:$0xff]  }
  0x90   :  { %3340 = vmatpush3.bf16.msra.mxu0 %v3668_v38  ;;  %v3728_v38 = vld [vmem:[%s4679_s1 + $0x600] sm:$0xff]  }
  0x91   :  { %3362 = vmatpush3.bf16.msra.mxu1 %v3669_v39  ;;  %3341 = vmatprep.subr.bf16.mxu0 %v3670_v40  ;;  %v3729_v39 = vld [vmem:[%s4679_s1 + $0x680] sm:$0xff]   ;;  %v3730_v40 = vld [vmem:[%s4679_s1 + $0x648] sm:$0xff]  }
  0x92   :  { %3363 = vmatprep.subr.bf16.mxu1 %v3671_v41  ;;  %v3731_v41 = vld [vmem:[%s4679_s1 + $0x6c8] sm:$0xff]  }
  0x94   :  { %3342 = vmatpush3.bf16.msra.mxu0 %v3672_v42  ;;  %v3732_v42 = vld [vmem:[%s4679_s1 + $0x608] sm:$0xff]  }
  0x95   :  { %3364 = vmatpush3.bf16.msra.mxu1 %v3673_v43  ;;  %3343 = vmatprep.subr.bf16.mxu0 %v3674_v44  ;;  %v3733_v43 = vld [vmem:[%s4679_s1 + $0x688] sm:$0xff]   ;;  %v3734_v44 = vld [vmem:[%s4679_s1 + $0x650] sm:$0xff]  }
  0x96   :  { %3365 = vmatprep.subr.bf16.mxu1 %v3675_v45  ;;  %v3735_v45 = vld [vmem:[%s4679_s1 + $0x6d0] sm:$0xff]  }
  0x98   :  { %3344 = vmatpush3.bf16.msra.mxu0 %v3676_v46  ;;  %v3736_v46 = vld [vmem:[%s4679_s1 + $0x610] sm:$0xff]  }
  0x99   :  { %3366 = vmatpush3.bf16.msra.mxu1 %v3677_v47  ;;  %3345 = vmatprep.subr.bf16.mxu0 %v3678_v48  ;;  %v3737_v47 = vld [vmem:[%s4679_s1 + $0x690] sm:$0xff]   ;;  %v3738_v48 = vld [vmem:[%s4679_s1 + $0x658] sm:$0xff]  }
  0x9a   :  { %3367 = vmatprep.subr.bf16.mxu1 %v3679_v49  ;;  %v3739_v49 = vld [vmem:[%s4679_s1 + $0x6d8] sm:$0xff]  }
  0x9c   :  { %3346 = vmatpush3.bf16.msra.mxu0 %v3680_v50  ;;  %v3740_v50 = vld [vmem:[%s4679_s1 + $0x618] sm:$0xff]  }
  0x9d   :  { %3368 = vmatpush3.bf16.msra.mxu1 %v3681_v51  ;;  %3347 = vmatprep.subr.bf16.mxu0 %v3682_v52  ;;  %v3741_v51 = vld [vmem:[%s4679_s1 + $0x698] sm:$0xff]   ;;  %v3742_v52 = vld [vmem:[%s4679_s1 + $0x660] sm:$0xff]  }
  0x9e   :  { %3369 = vmatprep.subr.bf16.mxu1 %v3683_v53  ;;  %v3743_v53 = vld [vmem:[%s4679_s1 + $0x6e0] sm:$0xff]  }
  0xa0   :  { %3348 = vmatpush3.bf16.msra.mxu0 %v3684_v54  ;;  %v3744_v54 = vld [vmem:[%s4679_s1 + $0x620] sm:$0xff]  }
  0xa1   :  { %3370 = vmatpush3.bf16.msra.mxu1 %v3685_v55  ;;  %3377 = vmatprep.subr.bf16.mxu0 %v3690_v62  ;;  %v3745_v55 = vld [vmem:[%s4679_s1 + $0x6a0] sm:$0xff]   ;;  %v3752_v62 = vld [vmem:[%s4679_s1 + $0x630] sm:$0xff]  }
  0xa2   :  { %3399 = vmatprep.subr.bf16.mxu1 %v3691_v63  ;;  %v3753_v63 = vld [vmem:[%s4679_s1 + $0x6b0] sm:$0xff]  }
  0xa3   :  { %2552 = vmatmul.mubr.bf16.vlgmr.msra.gmra.mrb[16].mxu0 %v2885_v57  ;;  %v3747_v57 = vld [vmem:[%s4679_s1 + $0x6e8] sm:$0xff]  }
  0xa4   :  { %2592 = vmatmul.mubr.bf16.vlgmr.msra.gmra.mrb[16].mxu1 %v2887_v60  ;;  %3378 = vmatpush3.bf16.msra.mxu0 %v3692_v0  ;;  %v3750_v60 = vld [vmem:[%s4679_s1 + $0x670] sm:$0xff]   ;;  %v3754_v0 = vld [vmem:[%s4679_s1 + $0x678] sm:$0xff]  }
  0xa5   :  { %3400 = vmatpush3.bf16.msra.mxu1 %v3693_v1  ;;  %3379 = vmatprep.subr.bf16.mxu0 %v3694_v2  ;;  %v3755_v1 = vld [vmem:[%s4679_s1 + $0x6f8] sm:$0xff]  }
  0xa6   :  { %3401 = vmatprep.subr.bf16.mxu1 %v3695_v3  ;;  %2631 = vmatprep.mubr.bf16.mxu0 %v2890_v33  ;;  %v3756_v2 = vld [vmem:[%s4679_s1 + $0x638] sm:$0xff]  }
  0xa7   :  { %2671 = vmatprep.mubr.bf16.mxu1 %v2892_v35  ;;  %v3757_v3 = vld [vmem:[%s4679_s1 + $0x6b8] sm:$0xff]  }
  0xa8   :  { %3380 = vmatpush3.bf16.msra.mxu0 %v3696_v4  ;;  %v28_v4 = vld [vmem:[%s4678_s0 + $0x60] sm:$0xff] }
  0xa9   :  { %3402 = vmatpush3.bf16.msra.mxu1 %v3697_v5  ;;  %3381 = vmatprep.subr.bf16.mxu0 %v3698_v6  ;;  %v29_v5 = vld [vmem:[%s4678_s0 + $0x68] sm:$0xff]  ;;  %v2893_v6 = vcombine.low %v28_v4, %v28_v4 }
  0xaa   :  { %3403 = vmatprep.subr.bf16.mxu1 %v3699_v7  ;;  %v2894_v7 = vcombine.high %v28_v4, %v28_v4 }
  0xac   :  { %3382 = vmatpush3.bf16.msra.mxu0 %v3700_v8  ;;  %v2895_v8 = vcombine.low %v29_v5, %v29_v5 }
  0xad   :  { %3404 = vmatpush3.bf16.msra.mxu1 %v3701_v9  ;;  %3383 = vmatprep.subr.bf16.mxu0 %v3702_v10  ;;  %v3762_v9 = vld [vmem:[%s4679_s1 + $0x740] sm:$0xff]   ;;  %v2896_v10 = vcombine.high %v29_v5, %v29_v5 }
  0xae   :  { %3405 = vmatprep.subr.bf16.mxu1 %v3703_v11  ;;  %v3763_v11 = vld [vmem:[%s4679_s1 + $0x7c0] sm:$0xff]  }
  0xb0   :  { %3384 = vmatpush3.bf16.msra.mxu0 %v3704_v12  ;;  %v3764_v12 = vld [vmem:[%s4679_s1 + $0x700] sm:$0xff]  }
  0xb1   :  { %3406 = vmatpush3.bf16.msra.mxu1 %v3705_v13  ;;  %3385 = vmatprep.subr.bf16.mxu0 %v3706_v14  ;;  %v3765_v13 = vld [vmem:[%s4679_s1 + $0x780] sm:$0xff]   ;;  %v3766_v14 = vld [vmem:[%s4679_s1 + $0x748] sm:$0xff]  }
  0xb2   :  { %3407 = vmatprep.subr.bf16.mxu1 %v3707_v15  ;;  %v3767_v15 = vld [vmem:[%s4679_s1 + $0x7c8] sm:$0xff]  }
  0xb4   :  { %3386 = vmatpush3.bf16.msra.mxu0 %v3708_v16  ;;  %v3768_v16 = vld [vmem:[%s4679_s1 + $0x708] sm:$0xff]  }
  0xb5   :  { %3408 = vmatpush3.bf16.msra.mxu1 %v3709_v17  ;;  %3387 = vmatprep.subr.bf16.mxu0 %v3710_v18  ;;  %v3769_v17 = vld [vmem:[%s4679_s1 + $0x788] sm:$0xff]   ;;  %v3770_v18 = vld [vmem:[%s4679_s1 + $0x750] sm:$0xff]  }
  0xb6   :  { %3409 = vmatprep.subr.bf16.mxu1 %v3711_v19  ;;  %v3771_v19 = vld [vmem:[%s4679_s1 + $0x7d0] sm:$0xff]  }
  0xb8   :  { %3388 = vmatpush3.bf16.msra.mxu0 %v3712_v20  ;;  %v3772_v20 = vld [vmem:[%s4679_s1 + $0x710] sm:$0xff]  }
  0xb9   :  { %3410 = vmatpush3.bf16.msra.mxu1 %v3713_v21  ;;  %3389 = vmatprep.subr.bf16.mxu0 %v3714_v22  ;;  %v3773_v21 = vld [vmem:[%s4679_s1 + $0x790] sm:$0xff]   ;;  %v3774_v22 = vld [vmem:[%s4679_s1 + $0x758] sm:$0xff]  }
  0xba   :  { %3411 = vmatprep.subr.bf16.mxu1 %v3715_v23  ;;  %v3775_v23 = vld [vmem:[%s4679_s1 + $0x7d8] sm:$0xff]  }
  0xbc   :  { %3390 = vmatpush3.bf16.msra.mxu0 %v3716_v24  ;;  %v3776_v24 = vld [vmem:[%s4679_s1 + $0x718] sm:$0xff]  }
  0xbd   :  { %3412 = vmatpush3.bf16.msra.mxu1 %v3717_v25  ;;  %3391 = vmatprep.subr.bf16.mxu0 %v3718_v26  ;;  %v3777_v25 = vld [vmem:[%s4679_s1 + $0x798] sm:$0xff]   ;;  %v3778_v26 = vld [vmem:[%s4679_s1 + $0x760] sm:$0xff]  }
  0xbe   :  { %3413 = vmatprep.subr.bf16.mxu1 %v3719_v27  ;;  %v3779_v27 = vld [vmem:[%s4679_s1 + $0x7e0] sm:$0xff]  }
  0xc0   :  { %3392 = vmatpush3.bf16.msra.mxu0 %v3720_v28  ;;  %v3780_v28 = vld [vmem:[%s4679_s1 + $0x720] sm:$0xff]  }
  0xc1   :  { %3414 = vmatpush3.bf16.msra.mxu1 %v3721_v29  ;;  %3421 = vmatprep.subr.bf16.mxu0 %v3726_v36 }
  0xc2   :  { %3443 = vmatprep.subr.bf16.mxu1 %v3727_v37  ;;  %v3782_v37 = vld [vmem:[%s4679_s1 + $0x768] sm:$0xff]  }
  0xc3   :  { %2632 = vmatmul.mubr.bf16.vlgmr.msra.gmra.mrb[20].mxu0 %v2889_v32  ;;  %v2868_v32 = vld [vmem:[%s4680_s2] ss:$0 sm:$0xff] }
  0xc4   :  { %2672 = vmatmul.mubr.bf16.vlgmr.msra.gmra.mrb[20].mxu1 %v2891_v34  ;;  %3422 = vmatpush3.bf16.msra.mxu0 %v3728_v38 }
  0xc5   :  { %3444 = vmatpush3.bf16.msra.mxu1 %v3729_v39  ;;  %3423 = vmatprep.subr.bf16.mxu0 %v3730_v40  ;;  %v3783_v39 = vld [vmem:[%s4679_s1 + $0x7e8] sm:$0xff]  }
  0xc6   :  { %3445 = vmatprep.subr.bf16.mxu1 %v3731_v41  ;;  %2711 = vmatprep.mubr.bf16.mxu0 %v2894_v7 }
  0xc7   :  { %2751 = vmatprep.mubr.bf16.mxu1 %v2896_v10 }
  0xc8   :  { %3424 = vmatpush3.bf16.msra.mxu0 %v3732_v42  ;;  %v3784_v42 = vld [vmem:[%s4679_s1 + $0x728] sm:$0xff]  }
  0xc9   :  { %3446 = vmatpush3.bf16.msra.mxu1 %v3733_v43  ;;  %3425 = vmatprep.subr.bf16.mxu0 %v3734_v44  ;;  %v3785_v44 = vld [vmem:[%s4679_s1 + $0x7a8] sm:$0xff]  }
  0xca   :  { %3447 = vmatprep.subr.bf16.mxu1 %v3735_v45 }
  0xcc   :  { %3426 = vmatpush3.bf16.msra.mxu0 %v3736_v46 }
  0xcd   :  { %3448 = vmatpush3.bf16.msra.mxu1 %v3737_v47  ;;  %3427 = vmatprep.subr.bf16.mxu0 %v3738_v48  ;;  %v3786_v47 = vld [vmem:[%s4679_s1 + $0x770] sm:$0xff]  }
  0xce   :  { %3449 = vmatprep.subr.bf16.mxu1 %v3739_v49  ;;  %v3787_v48 = vld [vmem:[%s4679_s1 + $0x7f0] sm:$0xff]  }
  0xcf   :  { %v3788_v49 = vld [vmem:[%s4679_s1 + $0x730] sm:$0xff]  }
  0xd0   :  { %3428 = vmatpush3.bf16.msra.mxu0 %v3740_v50  ;;  %v3789_v50 = vld [vmem:[%s4679_s1 + $0x7b0] sm:$0xff]  }
  0xd1   :  { %3450 = vmatpush3.bf16.msra.mxu1 %v3741_v51  ;;  %3429 = vmatprep.subr.bf16.mxu0 %v3742_v52  ;;  %v3790_v51 = vld [vmem:[%s4679_s1 + $0x778] sm:$0xff]  }
  0xd2   :  { %3451 = vmatprep.subr.bf16.mxu1 %v3743_v53  ;;  %v3791_v52 = vld [vmem:[%s4679_s1 + $0x7f8] sm:$0xff]  }
  0xd3   :  { %v3792_v53 = vld [vmem:[%s4679_s1 + $0x738] sm:$0xff]  }
  0xd4   :  { %3430 = vmatpush3.bf16.msra.mxu0 %v3744_v54  ;;  %v3793_v54 = vld [vmem:[%s4679_s1 + $0x7b8] sm:$0xff]  }
  0xd5   :  { %3452 = vmatpush3.bf16.msra.mxu1 %v3745_v55  ;;  %3431 = vmatprep.subr.bf16.mxu0 %v3746_v56  ;;  %v30_v55 = vld [vmem:[%s4678_s0 + $0x70] sm:$0xff]  ;;  %v31_v56 = vld [vmem:[%s4678_s0 + $0x78] sm:$0xff] }
  0xd6   :  { %3453 = vmatprep.subr.bf16.mxu1 %v3747_v57  ;;  %v2897_v57 = vcombine.low %v30_v55, %v30_v55 }
  0xd8   :  { %3432 = vmatpush3.bf16.msra.mxu0 %v3748_v58  ;;  %v2898_v58 = vcombine.high %v30_v55, %v30_v55 }
  0xd9   :  { %3454 = vmatpush3.bf16.msra.mxu1 %v3749_v59  ;;  %3433 = vmatprep.subr.bf16.mxu0 %v3750_v60  ;;  %v2899_v59 = vcombine.low %v31_v56, %v31_v56  ;;  %v2900_v60 = vcombine.high %v31_v56, %v31_v56 }
  0xda   :  { %3455 = vmatprep.subr.bf16.mxu1 %v3751_v61 }
  0xdc   :  { %3434 = vmatpush3.bf16.msra.mxu0 %v3752_v62 }
  0xdd   :  { %3456 = vmatpush3.bf16.msra.mxu1 %v3753_v63  ;;  %3435 = vmatprep.subr.bf16.mxu0 %v3754_v0 }
  0xde   :  { %3457 = vmatprep.subr.bf16.mxu1 %v3755_v1 }
  0xe0   :  { %3436 = vmatpush3.bf16.msra.mxu0 %v3756_v2 }
  0xe1   :  { %3458 = vmatpush3.bf16.msra.mxu1 %v3757_v3  ;;  %3465 = vmatprep.subr.bf16.mxu0 %v3762_v9 }
  0xe2   :  { %3487 = vmatprep.subr.bf16.mxu1 %v3763_v11 }
  0xe3   :  { %2712 = vmatmul.mubr.bf16.vlgmr.msra.gmra.mrb[24].mxu0 %v2893_v6 }
  0xe4   :  { %2752 = vmatmul.mubr.bf16.vlgmr.msra.gmra.mrb[24].mxu1 %v2895_v8  ;;  %3466 = vmatpush3.bf16.msra.mxu0 %v3764_v12 }
  0xe5   :  { %3488 = vmatpush3.bf16.msra.mxu1 %v3765_v13  ;;  %3467 = vmatprep.subr.bf16.mxu0 %v3766_v14 }
  0xe6   :  { %3489 = vmatprep.subr.bf16.mxu1 %v3767_v15 }
  0xe8   :  { %3468 = vmatpush3.bf16.msra.mxu0 %v3768_v16 }
  0xe9   :  { %3490 = vmatpush3.bf16.msra.mxu1 %v3769_v17  ;;  %3469 = vmatprep.subr.bf16.mxu0 %v3770_v18 }
  0xea   :  { %3491 = vmatprep.subr.bf16.mxu1 %v3771_v19 }
  0xec   :  { %3470 = vmatpush3.bf16.msra.mxu0 %v3772_v20 }
  0xed   :  { %3492 = vmatpush3.bf16.msra.mxu1 %v3773_v21  ;;  %3471 = vmatprep.subr.bf16.mxu0 %v3774_v22 }
  0xee   :  { %3493 = vmatprep.subr.bf16.mxu1 %v3775_v23 }
  0xf0   :  { %3472 = vmatpush3.bf16.msra.mxu0 %v3776_v24 }
  0xf1   :  { %3494 = vmatpush3.bf16.msra.mxu1 %v3777_v25  ;;  %3473 = vmatprep.subr.bf16.mxu0 %v3778_v26 }
  0xf2   :  { %3495 = vmatprep.subr.bf16.mxu1 %v3779_v27 }
  0xf4   :  { %3474 = vmatpush3.bf16.msra.mxu0 %v3780_v28 }
  0xf5   :  { %3496 = vmatpush3.bf16.msra.mxu1 %v3781_v30  ;;  %3475 = vmatprep.subr.bf16.mxu0 %v3782_v37 }
  0xf6   :  { %v3173_v29 = vpop.f32.mrb[0].mxu0  ;;  %3497 = vmatprep.subr.bf16.mxu1 %v3783_v39 }
  0xf7   :  { %v3195_v31 = vpop.f32.mrb[0].mxu1  ;;  %v3174_v33 = vpop.f32.mrb[1].mxu0 }
  0xf8   :  { %v3196_v34 = vpop.f32.mrb[1].mxu1  ;;  %v3175_v35 = vadd.f32 %v3174_v33, %v3173_v29  ;;  %v3176_v38 = vpop.f32.mrb[2].mxu0  ;;  %3476 = vmatpush3.bf16.msra.mxu0 %v3784_v42 }
  0xf9   :  { %v3197_v36 = vadd.f32 %v3196_v34, %v3195_v31  ;;  %v3198_v40 = vpop.f32.mrb[2].mxu1  ;;  %v3177_v43 = vpop.f32.mrb[3].mxu0  ;;  %3498 = vmatpush3.bf16.msra.mxu1 %v3785_v44  ;;  %3477 = vmatprep.subr.bf16.mxu0 %v3786_v47 }
  0xfa   :  { %v2234_v41 = vadd.f32 %v3175_v35, %v2868_v32  ;;  %v3199_v45 = vpop.f32.mrb[3].mxu1  ;;  %3499 = vmatprep.subr.bf16.mxu1 %v3787_v48 }
  0xfc   :  { %v2274_v46 = vadd.f32 %v3197_v36, %v2234_v41  ;;  %3478 = vmatpush3.bf16.msra.mxu0 %v3788_v49 }
  0xfd   :  { %3500 = vmatpush3.bf16.msra.mxu1 %v3789_v50  ;;  %3479 = vmatprep.subr.bf16.mxu0 %v3790_v51 }
  0xfe   :  { %3501 = vmatprep.subr.bf16.mxu1 %v3791_v52 }
 0x100   :  { %3480 = vmatpush3.bf16.msra.mxu0 %v3792_v53 }
 0x101   :  { %8 = vsyncpa [#allocation3], 0  ;;  %3502 = vmatpush3.bf16.msra.mxu1 %v3793_v54  ;;  %2791 = vmatprep.mubr.bf16.mxu0 %v2898_v58  ;;  %s3826_s0 = smov [#allocation2]  }
 0x102   :  { %2831 = vmatprep.mubr.bf16.mxu1 %v2900_v60  ;;  %s2860_s1 = sshll.u32 %s3826_s0, 4  ;;  %s2861_s1 = int_to_ptr.vmem [resolvable:$true] %s2860_s1 }
 0x103   :  { %2792 = vmatmul.mubr.bf16.vlgmr.msra.gmra.mrb[28].mxu0 %v2897_v57  ;;  %s3802_s17 = scalar_lea.vmem %s2861_s1, 128  ;;  %p3807_p1 = scmp.lt.s32.totalorder %s2861_s1, %s2861_s1 }
 0x104   :  { %2832 = vmatmul.mubr.bf16.vlgmr.msra.gmra.mrb[28].mxu1 %v2899_v59  ;;  %p3803_p0 = scmp.ne.s32.totalorder %s2861_s1, %s3802_s17  ;;  %p3808_p2 = scmp.lt.s32.totalorder %s3802_s17, %s3802_s17 }
 0x106   :  { %p3809_p3 = por %p3808_p2, %p3807_p1 }
 0x108   :  { %p3810_p4 = pnand %p3809_p3, %p3803_p0 }
 0x116   :  { %v3217_v61 = vpop.f32.mrb[4].mxu0 }
 0x117   :  { %v3239_v62 = vpop.f32.mrb[4].mxu1  ;;  %v3218_v63 = vpop.f32.mrb[5].mxu0 }
 0x118   :  { %v3240_v0 = vpop.f32.mrb[5].mxu1  ;;  %v3219_v1 = vadd.f32 %v3218_v63, %v3217_v61  ;;  %v3220_v3 = vpop.f32.mrb[6].mxu0 }
 0x119   :  { %v3241_v2 = vadd.f32 %v3240_v0, %v3239_v62  ;;  %v3242_v4 = vpop.f32.mrb[6].mxu1  ;;  %v3221_v5 = vpop.f32.mrb[7].mxu0 }
 0x11a   :  { %v3243_v6 = vpop.f32.mrb[7].mxu1  ;;  %v2314_v7 = vadd.f32 %v3219_v1, %v2274_v46  ;;  %v2840_v5 = vlaneseq }
 0x11c   :  { %v2354_v8 = vadd.f32 %v3241_v2, %v2314_v7 }
 0x136   :  { %v3261_v9 = vpop.f32.mrb[8].mxu0 }
 0x137   :  { %v3283_v10 = vpop.f32.mrb[8].mxu1  ;;  %v3262_v11 = vpop.f32.mrb[9].mxu0 }
 0x138   :  { %v3263_v12 = vadd.f32 %v3262_v11, %v3261_v9  ;;  %v3284_v13 = vpop.f32.mrb[9].mxu1  ;;  %v3264_v14 = vpop.f32.mrb[10].mxu0 }
 0x139   :  { %v3285_v15 = vadd.f32 %v3284_v13, %v3283_v10  ;;  %v3286_v16 = vpop.f32.mrb[10].mxu1  ;;  %v3265_v17 = vpop.f32.mrb[11].mxu0 }
 0x13a   :  { %v2394_v18 = vadd.f32 %v3263_v12, %v2354_v8  ;;  %v3287_v19 = vpop.f32.mrb[11].mxu1 }
 0x13c   :  { %v2434_v20 = vadd.f32 %v3285_v15, %v2394_v18  ;;  %v2841_v15 = vand.u32 127, %v2840_v5 }
 0x13e   :  { %vm2842_vm0 = vcmp.lt.s32.totalorder %v2841_v15, 10 }
 0x156   :  { %v3305_v21 = vpop.f32.mrb[12].mxu0 }
 0x157   :  { %v3327_v22 = vpop.f32.mrb[12].mxu1  ;;  %v3306_v23 = vpop.f32.mrb[13].mxu0 }
 0x158   :  { %v3307_v24 = vadd.f32 %v3306_v23, %v3305_v21  ;;  %v3328_v25 = vpop.f32.mrb[13].mxu1  ;;  %v3308_v26 = vpop.f32.mrb[14].mxu0 }
 0x159   :  { %v3329_v27 = vadd.f32 %v3328_v25, %v3327_v22  ;;  %v3330_v28 = vpop.f32.mrb[14].mxu1  ;;  %v3309_v29 = vpop.f32.mrb[15].mxu0 }
 0x15a   :  { %v2474_v30 = vadd.f32 %v3307_v24, %v2434_v20  ;;  %v3331_v31 = vpop.f32.mrb[15].mxu1 }
 0x15c   :  { %v2514_v32 = vadd.f32 %v3329_v27, %v2474_v30 }
 0x176   :  { %v3349_v33 = vpop.f32.mrb[16].mxu0 }
 0x177   :  { %v3371_v34 = vpop.f32.mrb[16].mxu1  ;;  %v3350_v35 = vpop.f32.mrb[17].mxu0 }
 0x178   :  { %v3372_v36 = vpop.f32.mrb[17].mxu1  ;;  %v3351_v37 = vadd.f32 %v3350_v35, %v3349_v33  ;;  %v3352_v39 = vpop.f32.mrb[18].mxu0 }
 0x179   :  { %v3373_v38 = vadd.f32 %v3372_v36, %v3371_v34  ;;  %v3374_v40 = vpop.f32.mrb[18].mxu1  ;;  %v3353_v41 = vpop.f32.mrb[19].mxu0 }
 0x17a   :  { %v3375_v42 = vpop.f32.mrb[19].mxu1  ;;  %v2554_v43 = vadd.f32 %v3351_v37, %v2514_v32 }
 0x17c   :  { %v2594_v44 = vadd.f32 %v3373_v38, %v2554_v43 }
 0x196   :  { %v3393_v45 = vpop.f32.mrb[20].mxu0 }
 0x197   :  { %v3415_v46 = vpop.f32.mrb[20].mxu1  ;;  %v3394_v47 = vpop.f32.mrb[21].mxu0 }
 0x198   :  { %v3395_v48 = vadd.f32 %v3394_v47, %v3393_v45  ;;  %v3416_v49 = vpop.f32.mrb[21].mxu1  ;;  %v3396_v50 = vpop.f32.mrb[22].mxu0 }
 0x199   :  { %v3417_v51 = vadd.f32 %v3416_v49, %v3415_v46  ;;  %v3418_v52 = vpop.f32.mrb[22].mxu1  ;;  %v3397_v53 = vpop.f32.mrb[23].mxu0 }
 0x19a   :  { %v2634_v54 = vadd.f32 %v3395_v48, %v2594_v44  ;;  %v3419_v55 = vpop.f32.mrb[23].mxu1 }
 0x19c   :  { %v2674_v56 = vadd.f32 %v3417_v51, %v2634_v54 }
 0x1b6   :  { %v3437_v57 = vpop.f32.mrb[24].mxu0 }
 0x1b7   :  { %v3459_v58 = vpop.f32.mrb[24].mxu1  ;;  %v3438_v59 = vpop.f32.mrb[25].mxu0 }
 0x1b8   :  { %v3439_v60 = vadd.f32 %v3438_v59, %v3437_v57  ;;  %v3460_v61 = vpop.f32.mrb[25].mxu1  ;;  %v3440_v62 = vpop.f32.mrb[26].mxu0 }
 0x1b9   :  { %v3461_v63 = vadd.f32 %v3460_v61, %v3459_v58  ;;  %v3462_v0 = vpop.f32.mrb[26].mxu1  ;;  %v3441_v1 = vpop.f32.mrb[27].mxu0 }
 0x1ba   :  { %v2714_v2 = vadd.f32 %v3439_v60, %v2674_v56  ;;  %v3463_v3 = vpop.f32.mrb[27].mxu1 }
 0x1bc   :  { %v2754_v4 = vadd.f32 %v3461_v63, %v2714_v2 }
 0x1d6   :  { %v3481_v6 = vpop.f32.mrb[28].mxu0 }
 0x1d7   :  { %v3503_v7 = vpop.f32.mrb[28].mxu1  ;;  %v3482_v8 = vpop.f32.mrb[29].mxu0 }
 0x1d8   :  { %v3483_v9 = vadd.f32 %v3482_v8, %v3481_v6  ;;  %v3504_v10 = vpop.f32.mrb[29].mxu1  ;;  %v3484_v11 = vpop.f32.mrb[30].mxu0 }
 0x1d9   :  { %v3505_v12 = vadd.f32 %v3504_v10, %v3503_v7  ;;  %v3506_v13 = vpop.f32.mrb[30].mxu1  ;;  %v3485_v14 = vpop.f32.mrb[31].mxu0 }
 0x1da   :  { %v2794_v16 = vadd.f32 %v3483_v9, %v2754_v4  ;;  %v3507_v17 = vpop.f32.mrb[31].mxu1 }
 0x1dc   :  { %v2834_v18 = vadd.f32 %v3505_v12, %v2794_v16 }
 0x1de   :  { %v2839_v19 = vmax.f32 %v2834_v18, 0.0 }
 0x1e0   :  { %v2843_v20 = vsel %vm2842_vm0, %v2839_v19, -inf }
 0x1e1   :  { %2844 = vmax.xlane.f32.xlu0 %v2843_v20 }
 0x26e   :  { %v2845_v21 = vpop.xlane.xlu0 %2844 }
 0x26f   :  { %v2846_v22 = vsub.f32 %v2843_v20, %v2845_v21 }
 0x271   :  { %v2847_v23 = vmul.f32 1.442695, %v2846_v22 }
 0x273   :  { %3798 = vpow2.f32 %v2847_v23 }
 0x27d   :  { %v3799_v24 = vpop.eup %3798 }
 0x27e   :  { %2849 = vadd.xlane.f32.xlu0 %v3799_v24 }
 0x30b   :  { %v2850_v25 = vpop.xlane.xlu0 %2849 }
 0x30c   :  { %3800 = vrcp.f32 %v2850_v25 }
 0x316   :  { %v3801_v26 = vpop.eup %3800 }
 0x317   :  { %v2852_v27 = vmul.f32 %v3801_v26, %v3799_v24 }
 0x319   :  { %2853 = vst [vmem:[#allocation2] sm:$0xff] %v2852_v27 }
 0x31a   :  { %3813 = shalt.err (!%p3810_p4)
}
 0x31b   :  { %s3814_s20 = scalar_lea.hbm %s4681_s3, 128 }
 0x31c   :  { %p3815_p5 = scmp.ne.s32.totalorder %s4681_s3, %s3814_s20  ;;  %p3818_p6 = scmp.lt.u32.totalorder %s3814_s20, %s4681_s3 }
 0x31e   :  { %p3820_p7 = pnand %p3818_p6, %p3815_p5 }
 0x320   :  { %3823 = shalt.err (!%p3820_p7)
}
 0x321   :  { %2863 = dma.vmem_to_hbm [thread:$0]  %s2861_s1, 128, %s4681_s3, [#allocation3]  }
 0x322   :  { %3824 = dma.done.wait [#allocation3], 128  }
 0x323   :  { %3825 = vsyncadd [#allocation3], 4294967168 }
 0x324   :  { %2867 = vsyncpa [#allocation3], 1 }

// kernel: cifar_part1_forward.4
= control target key start
LH: loop header
LB: loop body
LE: loop exit
PB: predicated region body
PF: predicated region fallthrough
CT: control target
= control target key end

     0   :  { %s8643_s12 = smov 0   ;;  %s8645_s13 = smov 0   ;;  %s11314_s0 = inlined_call_operand.vmem [shape: bf16[4,512,576], index: 0, kind: input, shape index: {}]   ;;  %s11315_s1 = inlined_call_operand.vmem [shape: bf16[576,128], index: 1, kind: input, shape index: {}]   ;;  %s11316_s2 = inlined_call_operand.vmem [shape: f32[1,128], index: 2, kind: input, shape index: {}]   ;;  %s11317_s3 = inlined_call_operand.vmem [shape: bf16[512,128], index: 3, kind: output, shape index: {}]  }
   0x1   :  { %s8647_s14 = smov 0  }
   0x2 LB: > { %s5763_s15 = sadd.s32 4294967295, %s8621_s14   ;;  %s8660_s16 = sadd.s32 1, %s8621_s14   ;;  %s8621_s14 = sphi %s8647_s14, %s11540_s14   ;;  %s8617_s13 = sphi %s8645_s13, %s11539_s13   ;;  %s8613_s12 = sphi %s8643_s12, %s11538_s12  }
   0x3   : > { %s17_s17 = ssub.s32 %s8621_s14, %s8660_s16  ;;  %s20_s18 = sadd.s32 1, %s8617_s13 }
   0x4   : > { %p18_p0 = scmp.eq.s32.totalorder %s17_s17, 0  ;;  %p27_p1 = scmp.ne.s32.totalorder %s8617_s13, %s8613_s12 }
   0x5   : > { %p28_p2 = scmp.eq.s32.totalorder %s8621_s14, 0  ;;  %p5766_p4 = scmp.ge.s32.totalorder %s8621_s14, 2 }
   0x6   : > { %s8669_s19 = scalar_select %p18_p0, %s8617_s13, %s20_s18  }
   0x7   : > { %p29_p3 = por %p28_p2, %p27_p1  ;;  %127 = sbr.rel (%p5766_p4) target bundleno = 232 (0xe8), region = 24 }
   0xe   : > { %130 = sbr.rel (!%p29_p3) target bundleno = 232 (0xe8), region = 28  ;;  %s132_s20 = sand.u32 (%p29_p3), 1, %s8617_s13  }
   0xf   : > { %s8036_s21 = smul.u32 (%p29_p3), 640, %s8621_s14 }
  0x10   : > { %s8035_s22 = smul.u32 (%p29_p3), 2560, %s132_s20 }
  0x11   : > { %s8677_s25 = scalar_lea.vmem (%p29_p3), %s11314_s0, %s8036_s21 }
  0x12   : > { %v153_v0 = vld [vmem:[%s8677_s25] sm:$0xff] (%p29_p3)  ;;  %v155_v1 = vld [vmem:[%s8677_s25 + $0x8] sm:$0xff] (%p29_p3)  ;;  %v157_v2 = vld [vmem:[%s8677_s25 + $0x14] sm:$0xff] (%p29_p3)  ;;  %s8682_s26 = scalar_lea.vmem (%p29_p3), [#allocation2], %s8035_s22 }
  0x13   : > { %154 = vst [vmem:[%s8682_s26] sm:$0xff] (%p29_p3), %v153_v0  ;;  %156 = vst [vmem:[%s8682_s26 + $0x8] sm:$0xff] (%p29_p3), %v155_v1  ;;  %v159_v3 = vld [vmem:[%s8677_s25 + $0x1c] sm:$0xff] (%p29_p3)  ;;  %v161_v4 = vld [vmem:[%s8677_s25 + $0x28] sm:$0xff] (%p29_p3) }
  0x14   : > { %158 = vst [vmem:[%s8682_s26 + $0x14] sm:$0xff] (%p29_p3), %v157_v2  ;;  %v163_v5 = vld [vmem:[%s8677_s25 + $0x30] sm:$0xff] (%p29_p3)  ;;  %160 = vst [vmem:[%s8682_s26 + $0x1c] sm:$0xff] (%p29_p3), %v159_v3  ;;  %v165_v6 = vld [vmem:[%s8677_s25 + $0x3c] sm:$0xff] (%p29_p3) }
  0x15   : > { %162 = vst [vmem:[%s8682_s26 + $0x28] sm:$0xff] %v161_v4  ;;  %164 = vst [vmem:[%s8682_s26 + $0x30] sm:$0xff] %v163_v5  ;;  %v167_v7 = vld [vmem:[%s8677_s25 + $0x44] sm:$0xff]  ;;  %v169_v8 = vld [vmem:[%s8677_s25 + $0x50] sm:$0xff] }
  0x16   : > { %166 = vst [vmem:[%s8682_s26 + $0x3c] sm:$0xff] %v165_v6  ;;  %168 = vst [vmem:[%s8682_s26 + $0x44] sm:$0xff] %v167_v7  ;;  %v171_v9 = vld [vmem:[%s8677_s25 + $0x58] sm:$0xff]  ;;  %v173_v10 = vld [vmem:[%s8677_s25 + $0x64] sm:$0xff] }
  0x17   : > { %170 = vst [vmem:[%s8682_s26 + $0x50] sm:$0xff] %v169_v8  ;;  %v175_v11 = vld [vmem:[%s8677_s25 + $0x6c] sm:$0xff]  ;;  %172 = vst [vmem:[%s8682_s26 + $0x58] sm:$0xff] %v171_v9  ;;  %v177_v12 = vld [vmem:[%s8677_s25 + $0x78] sm:$0xff] }
  0x18   : > { %174 = vst [vmem:[%s8682_s26 + $0x64] sm:$0xff] %v173_v10  ;;  %176 = vst [vmem:[%s8682_s26 + $0x6c] sm:$0xff] %v175_v11  ;;  %v179_v13 = vld [vmem:[%s8677_s25 + $0x80] sm:$0xff]  ;;  %v181_v14 = vld [vmem:[%s8677_s25 + $0x8c] sm:$0xff] }
  0x19   : > { %178 = vst [vmem:[%s8682_s26 + $0x78] sm:$0xff] %v177_v12  ;;  %180 = vst [vmem:[%s8682_s26 + $0x80] sm:$0xff] %v179_v13  ;;  %v183_v15 = vld [vmem:[%s8677_s25 + $0x94] sm:$0xff]  ;;  %v185_v16 = vld [vmem:[%s8677_s25 + $0xa0] sm:$0xff] }
  0x1a   : > { %182 = vst [vmem:[%s8682_s26 + $0x8c] sm:$0xff] %v181_v14  ;;  %v187_v17 = vld [vmem:[%s8677_s25 + $0xa8] sm:$0xff]  ;;  %184 = vst [vmem:[%s8682_s26 + $0x94] sm:$0xff] %v183_v15  ;;  %v189_v18 = vld [vmem:[%s8677_s25 + $0xb4] sm:$0xff] }
  0x1b   : > { %186 = vst [vmem:[%s8682_s26 + $0xa0] sm:$0xff] %v185_v16  ;;  %188 = vst [vmem:[%s8682_s26 + $0xa8] sm:$0xff] %v187_v17  ;;  %v191_v19 = vld [vmem:[%s8677_s25 + $0xbc] sm:$0xff]  ;;  %v193_v20 = vld [vmem:[%s8677_s25 + $0xc8] sm:$0xff] }
  0x1c   : > { %190 = vst [vmem:[%s8682_s26 + $0xb4] sm:$0xff] %v189_v18  ;;  %192 = vst [vmem:[%s8682_s26 + $0xbc] sm:$0xff] %v191_v19  ;;  %v195_v21 = vld [vmem:[%s8677_s25 + $0xd0] sm:$0xff]  ;;  %v197_v22 = vld [vmem:[%s8677_s25 + $0xdc] sm:$0xff] }
  0x1d   : > { %194 = vst [vmem:[%s8682_s26 + $0xc8] sm:$0xff] %v193_v20  ;;  %v199_v23 = vld [vmem:[%s8677_s25 + $0xe4] sm:$0xff]  ;;  %196 = vst [vmem:[%s8682_s26 + $0xd0] sm:$0xff] %v195_v21  ;;  %v201_v24 = vld [vmem:[%s8677_s25 + $0xf0] sm:$0xff] }
  0x1e   : > { %198 = vst [vmem:[%s8682_s26 + $0xdc] sm:$0xff] %v197_v22  ;;  %200 = vst [vmem:[%s8682_s26 + $0xe4] sm:$0xff] %v199_v23  ;;  %v203_v25 = vld [vmem:[%s8677_s25 + $0xf8] sm:$0xff]  ;;  %v205_v26 = vld [vmem:[%s8677_s25 + $0x104] sm:$0xff] }
  0x1f   : > { %202 = vst [vmem:[%s8682_s26 + $0xf0] sm:$0xff] %v201_v24  ;;  %204 = vst [vmem:[%s8682_s26 + $0xf8] sm:$0xff] %v203_v25  ;;  %v207_v27 = vld [vmem:[%s8677_s25 + $0x10c] sm:$0xff]  ;;  %v209_v28 = vld [vmem:[%s8677_s25 + $0x118] sm:$0xff] }
  0x20   : > { %206 = vst [vmem:[%s8682_s26 + $0x104] sm:$0xff] %v205_v26  ;;  %v211_v29 = vld [vmem:[%s8677_s25 + $0x120] sm:$0xff]  ;;  %208 = vst [vmem:[%s8682_s26 + $0x10c] sm:$0xff] %v207_v27  ;;  %v213_v30 = vld [vmem:[%s8677_s25 + $0x12c] sm:$0xff] }
  0x21   : > { %210 = vst [vmem:[%s8682_s26 + $0x118] sm:$0xff] %v209_v28  ;;  %212 = vst [vmem:[%s8682_s26 + $0x120] sm:$0xff] %v211_v29  ;;  %v215_v31 = vld [vmem:[%s8677_s25 + $0x134] sm:$0xff]  ;;  %v217_v32 = vld [vmem:[%s8677_s25 + $0x140] sm:$0xff] }
  0x22   : > { %214 = vst [vmem:[%s8682_s26 + $0x12c] sm:$0xff] %v213_v30  ;;  %216 = vst [vmem:[%s8682_s26 + $0x134] sm:$0xff] %v215_v31  ;;  %v219_v33 = vld [vmem:[%s8677_s25 + $0x148] sm:$0xff]  ;;  %v221_v34 = vld [vmem:[%s8677_s25 + $0x154] sm:$0xff] }
  0x23   : > { %218 = vst [vmem:[%s8682_s26 + $0x140] sm:$0xff] %v217_v32  ;;  %v223_v35 = vld [vmem:[%s8677_s25 + $0x15c] sm:$0xff]  ;;  %220 = vst [vmem:[%s8682_s26 + $0x148] sm:$0xff] %v219_v33  ;;  %v225_v36 = vld [vmem:[%s8677_s25 + $0x168] sm:$0xff] }
  0x24   : > { %222 = vst [vmem:[%s8682_s26 + $0x154] sm:$0xff] %v221_v34  ;;  %224 = vst [vmem:[%s8682_s26 + $0x15c] sm:$0xff] %v223_v35  ;;  %v227_v37 = vld [vmem:[%s8677_s25 + $0x170] sm:$0xff]  ;;  %v229_v38 = vld [vmem:[%s8677_s25 + $0x17c] sm:$0xff] }
  0x25   : > { %226 = vst [vmem:[%s8682_s26 + $0x168] sm:$0xff] %v225_v36  ;;  %228 = vst [vmem:[%s8682_s26 + $0x170] sm:$0xff] %v227_v37  ;;  %v231_v39 = vld [vmem:[%s8677_s25 + $0x184] sm:$0xff]  ;;  %v233_v40 = vld [vmem:[%s8677_s25 + $0x190] sm:$0xff] }
  0x26   : > { %230 = vst [vmem:[%s8682_s26 + $0x17c] sm:$0xff] %v229_v38  ;;  %v235_v41 = vld [vmem:[%s8677_s25 + $0x198] sm:$0xff]  ;;  %232 = vst [vmem:[%s8682_s26 + $0x184] sm:$0xff] %v231_v39  ;;  %v237_v42 = vld [vmem:[%s8677_s25 + $0x1a4] sm:$0xff] }
  0x27   : > { %234 = vst [vmem:[%s8682_s26 + $0x190] sm:$0xff] %v233_v40  ;;  %236 = vst [vmem:[%s8682_s26 + $0x198] sm:$0xff] %v235_v41  ;;  %v239_v43 = vld [vmem:[%s8677_s25 + $0x1ac] sm:$0xff]  ;;  %v241_v44 = vld [vmem:[%s8677_s25 + $0x1b8] sm:$0xff] }
  0x28   : > { %238 = vst [vmem:[%s8682_s26 + $0x1a4] sm:$0xff] %v237_v42  ;;  %240 = vst [vmem:[%s8682_s26 + $0x1ac] sm:$0xff] %v239_v43  ;;  %v243_v45 = vld [vmem:[%s8677_s25 + $0x1c0] sm:$0xff]  ;;  %v245_v46 = vld [vmem:[%s8677_s25 + $0x1cc] sm:$0xff] }
  0x29   : > { %242 = vst [vmem:[%s8682_s26 + $0x1b8] sm:$0xff] %v241_v44  ;;  %v247_v47 = vld [vmem:[%s8677_s25 + $0x1d4] sm:$0xff]  ;;  %244 = vst [vmem:[%s8682_s26 + $0x1c0] sm:$0xff] %v243_v45  ;;  %v249_v48 = vld [vmem:[%s8677_s25 + $0x1e0] sm:$0xff] }
  0x2a   : > { %246 = vst [vmem:[%s8682_s26 + $0x1cc] sm:$0xff] %v245_v46  ;;  %248 = vst [vmem:[%s8682_s26 + $0x1d4] sm:$0xff] %v247_v47  ;;  %v251_v49 = vld [vmem:[%s8677_s25 + $0x1e8] sm:$0xff]  ;;  %v253_v50 = vld [vmem:[%s8677_s25 + $0x1f4] sm:$0xff] }
  0x2b   : > { %250 = vst [vmem:[%s8682_s26 + $0x1e0] sm:$0xff] %v249_v48  ;;  %252 = vst [vmem:[%s8682_s26 + $0x1e8] sm:$0xff] %v251_v49  ;;  %v255_v51 = vld [vmem:[%s8677_s25 + $0x1fc] sm:$0xff]  ;;  %v257_v52 = vld [vmem:[%s8677_s25 + $0x208] sm:$0xff] }
  0x2c   : > { %254 = vst [vmem:[%s8682_s26 + $0x1f4] sm:$0xff] %v253_v50  ;;  %v259_v53 = vld [vmem:[%s8677_s25 + $0x210] sm:$0xff]  ;;  %256 = vst [vmem:[%s8682_s26 + $0x1fc] sm:$0xff] %v255_v51  ;;  %v261_v54 = vld [vmem:[%s8677_s25 + $0x21c] sm:$0xff] }
  0x2d   : > { %258 = vst [vmem:[%s8682_s26 + $0x208] sm:$0xff] %v257_v52  ;;  %260 = vst [vmem:[%s8682_s26 + $0x210] sm:$0xff] %v259_v53  ;;  %v263_v55 = vld [vmem:[%s8677_s25 + $0x224] sm:$0xff]  ;;  %v265_v56 = vld [vmem:[%s8677_s25 + $0x230] sm:$0xff] }
  0x2e   : > { %262 = vst [vmem:[%s8682_s26 + $0x21c] sm:$0xff] %v261_v54  ;;  %264 = vst [vmem:[%s8682_s26 + $0x224] sm:$0xff] %v263_v55  ;;  %v267_v57 = vld [vmem:[%s8677_s25 + $0x238] sm:$0xff]  ;;  %v269_v58 = vld [vmem:[%s8677_s25 + $0x244] sm:$0xff] }
  0x2f   : > { %266 = vst [vmem:[%s8682_s26 + $0x230] sm:$0xff] %v265_v56  ;;  %v271_v59 = vld [vmem:[%s8677_s25 + $0x24c] sm:$0xff]  ;;  %268 = vst [vmem:[%s8682_s26 + $0x238] sm:$0xff] %v267_v57  ;;  %v273_v60 = vld [vmem:[%s8677_s25 + $0x258] sm:$0xff] }
  0x30   : > { %270 = vst [vmem:[%s8682_s26 + $0x244] sm:$0xff] %v269_v58  ;;  %272 = vst [vmem:[%s8682_s26 + $0x24c] sm:$0xff] %v271_v59  ;;  %v275_v61 = vld [vmem:[%s8677_s25 + $0x260] sm:$0xff]  ;;  %v277_v62 = vld [vmem:[%s8677_s25 + $0x26c] sm:$0xff] }
  0x31   : > { %274 = vst [vmem:[%s8682_s26 + $0x258] sm:$0xff] %v273_v60  ;;  %276 = vst [vmem:[%s8682_s26 + $0x260] sm:$0xff] %v275_v61  ;;  %v279_v63 = vld [vmem:[%s8677_s25 + $0x274] sm:$0xff]  ;;  %v281_v0 = vld [vmem:[%s8677_s25 + $0x500] sm:$0xff] }
  0x32   : > { %278 = vst [vmem:[%s8682_s26 + $0x26c] sm:$0xff] %v277_v62  ;;  %v283_v1 = vld [vmem:[%s8677_s25 + $0x508] sm:$0xff]  ;;  %280 = vst [vmem:[%s8682_s26 + $0x274] sm:$0xff] %v279_v63  ;;  %v285_v2 = vld [vmem:[%s8677_s25 + $0x514] sm:$0xff] }
  0x33   : > { %282 = vst [vmem:[%s8682_s26 + $0x280] sm:$0xff] %v281_v0  ;;  %284 = vst [vmem:[%s8682_s26 + $0x288] sm:$0xff] %v283_v1  ;;  %v287_v3 = vld [vmem:[%s8677_s25 + $0x51c] sm:$0xff]  ;;  %v289_v4 = vld [vmem:[%s8677_s25 + $0x528] sm:$0xff] }
  0x34   : > { %286 = vst [vmem:[%s8682_s26 + $0x294] sm:$0xff] %v285_v2  ;;  %288 = vst [vmem:[%s8682_s26 + $0x29c] sm:$0xff] %v287_v3  ;;  %v291_v5 = vld [vmem:[%s8677_s25 + $0x530] sm:$0xff]  ;;  %v293_v6 = vld [vmem:[%s8677_s25 + $0x53c] sm:$0xff] }
  0x35   : > { %290 = vst [vmem:[%s8682_s26 + $0x2a8] sm:$0xff] %v289_v4  ;;  %v295_v7 = vld [vmem:[%s8677_s25 + $0x544] sm:$0xff]  ;;  %292 = vst [vmem:[%s8682_s26 + $0x2b0] sm:$0xff] %v291_v5  ;;  %v297_v8 = vld [vmem:[%s8677_s25 + $0x550] sm:$0xff] }
  0x36   : > { %294 = vst [vmem:[%s8682_s26 + $0x2bc] sm:$0xff] %v293_v6  ;;  %296 = vst [vmem:[%s8682_s26 + $0x2c4] sm:$0xff] %v295_v7  ;;  %v299_v9 = vld [vmem:[%s8677_s25 + $0x558] sm:$0xff]  ;;  %v301_v10 = vld [vmem:[%s8677_s25 + $0x564] sm:$0xff] }
  0x37   : > { %298 = vst [vmem:[%s8682_s26 + $0x2d0] sm:$0xff] %v297_v8  ;;  %300 = vst [vmem:[%s8682_s26 + $0x2d8] sm:$0xff] %v299_v9  ;;  %v303_v11 = vld [vmem:[%s8677_s25 + $0x56c] sm:$0xff]  ;;  %v305_v12 = vld [vmem:[%s8677_s25 + $0x578] sm:$0xff] }
  0x38   : > { %302 = vst [vmem:[%s8682_s26 + $0x2e4] sm:$0xff] %v301_v10  ;;  %v307_v13 = vld [vmem:[%s8677_s25 + $0x580] sm:$0xff]  ;;  %304 = vst [vmem:[%s8682_s26 + $0x2ec] sm:$0xff] %v303_v11  ;;  %v309_v14 = vld [vmem:[%s8677_s25 + $0x58c] sm:$0xff] }
  0x39   : > { %306 = vst [vmem:[%s8682_s26 + $0x2f8] sm:$0xff] %v305_v12  ;;  %308 = vst [vmem:[%s8682_s26 + $0x300] sm:$0xff] %v307_v13  ;;  %v311_v15 = vld [vmem:[%s8677_s25 + $0x594] sm:$0xff]  ;;  %v313_v16 = vld [vmem:[%s8677_s25 + $0x5a0] sm:$0xff] }
  0x3a   : > { %310 = vst [vmem:[%s8682_s26 + $0x30c] sm:$0xff] %v309_v14  ;;  %312 = vst [vmem:[%s8682_s26 + $0x314] sm:$0xff] %v311_v15  ;;  %v315_v17 = vld [vmem:[%s8677_s25 + $0x5a8] sm:$0xff]  ;;  %v317_v18 = vld [vmem:[%s8677_s25 + $0x5b4] sm:$0xff] }
  0x3b   : > { %314 = vst [vmem:[%s8682_s26 + $0x320] sm:$0xff] %v313_v16  ;;  %v319_v19 = vld [vmem:[%s8677_s25 + $0x5bc] sm:$0xff]  ;;  %316 = vst [vmem:[%s8682_s26 + $0x328] sm:$0xff] %v315_v17  ;;  %v321_v20 = vld [vmem:[%s8677_s25 + $0x5c8] sm:$0xff] }
  0x3c   : > { %318 = vst [vmem:[%s8682_s26 + $0x334] sm:$0xff] %v317_v18  ;;  %320 = vst [vmem:[%s8682_s26 + $0x33c] sm:$0xff] %v319_v19  ;;  %v323_v21 = vld [vmem:[%s8677_s25 + $0x5d0] sm:$0xff]  ;;  %v325_v22 = vld [vmem:[%s8677_s25 + $0x5dc] sm:$0xff] }
  0x3d   : > { %322 = vst [vmem:[%s8682_s26 + $0x348] sm:$0xff] %v321_v20  ;;  %324 = vst [vmem:[%s8682_s26 + $0x350] sm:$0xff] %v323_v21  ;;  %v327_v23 = vld [vmem:[%s8677_s25 + $0x5e4] sm:$0xff]  ;;  %v329_v24 = vld [vmem:[%s8677_s25 + $0x5f0] sm:$0xff] }
  0x3e   : > { %326 = vst [vmem:[%s8682_s26 + $0x35c] sm:$0xff] %v325_v22  ;;  %v331_v25 = vld [vmem:[%s8677_s25 + $0x5f8] sm:$0xff]  ;;  %328 = vst [vmem:[%s8682_s26 + $0x364] sm:$0xff] %v327_v23  ;;  %v333_v26 = vld [vmem:[%s8677_s25 + $0x604] sm:$0xff] }
  0x3f   : > { %330 = vst [vmem:[%s8682_s26 + $0x370] sm:$0xff] %v329_v24  ;;  %332 = vst [vmem:[%s8682_s26 + $0x378] sm:$0xff] %v331_v25  ;;  %v335_v27 = vld [vmem:[%s8677_s25 + $0x60c] sm:$0xff]  ;;  %v337_v28 = vld [vmem:[%s8677_s25 + $0x618] sm:$0xff] }
  0x40   : > { %334 = vst [vmem:[%s8682_s26 + $0x384] sm:$0xff] %v333_v26  ;;  %336 = vst [vmem:[%s8682_s26 + $0x38c] sm:$0xff] %v335_v27  ;;  %v339_v29 = vld [vmem:[%s8677_s25 + $0x620] sm:$0xff]  ;;  %v341_v30 = vld [vmem:[%s8677_s25 + $0x62c] sm:$0xff] }
  0x41   : > { %338 = vst [vmem:[%s8682_s26 + $0x398] sm:$0xff] %v337_v28  ;;  %v343_v31 = vld [vmem:[%s8677_s25 + $0x634] sm:$0xff]  ;;  %340 = vst [vmem:[%s8682_s26 + $0x3a0] sm:$0xff] %v339_v29  ;;  %v345_v32 = vld [vmem:[%s8677_s25 + $0x640] sm:$0xff] }
  0x42   : > { %342 = vst [vmem:[%s8682_s26 + $0x3ac] sm:$0xff] %v341_v30  ;;  %344 = vst [vmem:[%s8682_s26 + $0x3b4] sm:$0xff] %v343_v31  ;;  %v347_v33 = vld [vmem:[%s8677_s25 + $0x648] sm:$0xff]  ;;  %v349_v34 = vld [vmem:[%s8677_s25 + $0x654] sm:$0xff] }
  0x43   : > { %346 = vst [vmem:[%s8682_s26 + $0x3c0] sm:$0xff] %v345_v32  ;;  %348 = vst [vmem:[%s8682_s26 + $0x3c8] sm:$0xff] %v347_v33  ;;  %v351_v35 = vld [vmem:[%s8677_s25 + $0x65c] sm:$0xff]  ;;  %v353_v36 = vld [vmem:[%s8677_s25 + $0x668] sm:$0xff] }
  0x44   : > { %350 = vst [vmem:[%s8682_s26 + $0x3d4] sm:$0xff] %v349_v34  ;;  %v355_v37 = vld [vmem:[%s8677_s25 + $0x670] sm:$0xff]  ;;  %352 = vst [vmem:[%s8682_s26 + $0x3dc] sm:$0xff] %v351_v35  ;;  %v357_v38 = vld [vmem:[%s8677_s25 + $0x67c] sm:$0xff] }
  0x45   : > { %354 = vst [vmem:[%s8682_s26 + $0x3e8] sm:$0xff] %v353_v36  ;;  %356 = vst [vmem:[%s8682_s26 + $0x3f0] sm:$0xff] %v355_v37  ;;  %v359_v39 = vld [vmem:[%s8677_s25 + $0x684] sm:$0xff]  ;;  %v361_v40 = vld [vmem:[%s8677_s25 + $0x690] sm:$0xff] }
  0x46   : > { %358 = vst [vmem:[%s8682_s26 + $0x3fc] sm:$0xff] %v357_v38  ;;  %360 = vst [vmem:[%s8682_s26 + $0x404] sm:$0xff] %v359_v39  ;;  %v363_v41 = vld [vmem:[%s8677_s25 + $0x698] sm:$0xff]  ;;  %v365_v42 = vld [vmem:[%s8677_s25 + $0x6a4] sm:$0xff] }
  0x47   : > { %362 = vst [vmem:[%s8682_s26 + $0x410] sm:$0xff] %v361_v40  ;;  %v367_v43 = vld [vmem:[%s8677_s25 + $0x6ac] sm:$0xff]  ;;  %364 = vst [vmem:[%s8682_s26 + $0x418] sm:$0xff] %v363_v41  ;;  %v369_v44 = vld [vmem:[%s8677_s25 + $0x6b8] sm:$0xff] }
  0x48   : > { %366 = vst [vmem:[%s8682_s26 + $0x424] sm:$0xff] %v365_v42  ;;  %368 = vst [vmem:[%s8682_s26 + $0x42c] sm:$0xff] %v367_v43  ;;  %v371_v45 = vld [vmem:[%s8677_s25 + $0x6c0] sm:$0xff]  ;;  %v373_v46 = vld [vmem:[%s8677_s25 + $0x6cc] sm:$0xff] }
  0x49   : > { %370 = vst [vmem:[%s8682_s26 + $0x438] sm:$0xff] %v369_v44  ;;  %372 = vst [vmem:[%s8682_s26 + $0x440] sm:$0xff] %v371_v45  ;;  %v375_v47 = vld [vmem:[%s8677_s25 + $0x6d4] sm:$0xff]  ;;  %v377_v48 = vld [vmem:[%s8677_s25 + $0x6e0] sm:$0xff] }
  0x4a   : > { %374 = vst [vmem:[%s8682_s26 + $0x44c] sm:$0xff] %v373_v46  ;;  %v379_v49 = vld [vmem:[%s8677_s25 + $0x6e8] sm:$0xff]  ;;  %376 = vst [vmem:[%s8682_s26 + $0x454] sm:$0xff] %v375_v47  ;;  %v381_v50 = vld [vmem:[%s8677_s25 + $0x6f4] sm:$0xff] }
  0x4b   : > { %378 = vst [vmem:[%s8682_s26 + $0x460] sm:$0xff] %v377_v48  ;;  %380 = vst [vmem:[%s8682_s26 + $0x468] sm:$0xff] %v379_v49  ;;  %v383_v51 = vld [vmem:[%s8677_s25 + $0x6fc] sm:$0xff]  ;;  %v385_v52 = vld [vmem:[%s8677_s25 + $0x708] sm:$0xff] }
  0x4c   : > { %382 = vst [vmem:[%s8682_s26 + $0x474] sm:$0xff] %v381_v50  ;;  %384 = vst [vmem:[%s8682_s26 + $0x47c] sm:$0xff] %v383_v51  ;;  %v387_v53 = vld [vmem:[%s8677_s25 + $0x710] sm:$0xff]  ;;  %v389_v54 = vld [vmem:[%s8677_s25 + $0x71c] sm:$0xff] }
  0x4d   : > { %386 = vst [vmem:[%s8682_s26 + $0x488] sm:$0xff] %v385_v52  ;;  %v391_v55 = vld [vmem:[%s8677_s25 + $0x724] sm:$0xff]  ;;  %388 = vst [vmem:[%s8682_s26 + $0x490] sm:$0xff] %v387_v53  ;;  %v393_v56 = vld [vmem:[%s8677_s25 + $0x730] sm:$0xff] }
  0x4e   : > { %390 = vst [vmem:[%s8682_s26 + $0x49c] sm:$0xff] %v389_v54  ;;  %392 = vst [vmem:[%s8682_s26 + $0x4a4] sm:$0xff] %v391_v55  ;;  %v395_v57 = vld [vmem:[%s8677_s25 + $0x738] sm:$0xff]  ;;  %v397_v58 = vld [vmem:[%s8677_s25 + $0x744] sm:$0xff] }
  0x4f   : > { %394 = vst [vmem:[%s8682_s26 + $0x4b0] sm:$0xff] %v393_v56  ;;  %396 = vst [vmem:[%s8682_s26 + $0x4b8] sm:$0xff] %v395_v57  ;;  %v399_v59 = vld [vmem:[%s8677_s25 + $0x74c] sm:$0xff]  ;;  %v401_v60 = vld [vmem:[%s8677_s25 + $0x758] sm:$0xff] }
  0x50   : > { %398 = vst [vmem:[%s8682_s26 + $0x4c4] sm:$0xff] %v397_v58  ;;  %v403_v61 = vld [vmem:[%s8677_s25 + $0x760] sm:$0xff]  ;;  %400 = vst [vmem:[%s8682_s26 + $0x4cc] sm:$0xff] %v399_v59  ;;  %v405_v62 = vld [vmem:[%s8677_s25 + $0x76c] sm:$0xff] }
  0x51   : > { %402 = vst [vmem:[%s8682_s26 + $0x4d8] sm:$0xff] %v401_v60  ;;  %404 = vst [vmem:[%s8682_s26 + $0x4e0] sm:$0xff] %v403_v61  ;;  %v407_v63 = vld [vmem:[%s8677_s25 + $0x774] sm:$0xff]  ;;  %v409_v0 = vld [vmem:[%s8677_s25 + $0xa00] sm:$0xff] }
  0x52   : > { %406 = vst [vmem:[%s8682_s26 + $0x4ec] sm:$0xff] %v405_v62  ;;  %408 = vst [vmem:[%s8682_s26 + $0x4f4] sm:$0xff] %v407_v63  ;;  %v411_v1 = vld [vmem:[%s8677_s25 + $0xa08] sm:$0xff]  ;;  %v413_v2 = vld [vmem:[%s8677_s25 + $0xa14] sm:$0xff] }
  0x53   : > { %410 = vst [vmem:[%s8682_s26 + $0x500] sm:$0xff] %v409_v0  ;;  %v415_v3 = vld [vmem:[%s8677_s25 + $0xa1c] sm:$0xff]  ;;  %412 = vst [vmem:[%s8682_s26 + $0x508] sm:$0xff] %v411_v1  ;;  %v417_v4 = vld [vmem:[%s8677_s25 + $0xa28] sm:$0xff] }
  0x54   : > { %414 = vst [vmem:[%s8682_s26 + $0x514] sm:$0xff] %v413_v2  ;;  %416 = vst [vmem:[%s8682_s26 + $0x51c] sm:$0xff] %v415_v3  ;;  %v419_v5 = vld [vmem:[%s8677_s25 + $0xa30] sm:$0xff]  ;;  %v421_v6 = vld [vmem:[%s8677_s25 + $0xa3c] sm:$0xff] }
  0x55   : > { %418 = vst [vmem:[%s8682_s26 + $0x528] sm:$0xff] %v417_v4  ;;  %420 = vst [vmem:[%s8682_s26 + $0x530] sm:$0xff] %v419_v5  ;;  %v423_v7 = vld [vmem:[%s8677_s25 + $0xa44] sm:$0xff]  ;;  %v425_v8 = vld [vmem:[%s8677_s25 + $0xa50] sm:$0xff] }
  0x56   : > { %422 = vst [vmem:[%s8682_s26 + $0x53c] sm:$0xff] %v421_v6  ;;  %v427_v9 = vld [vmem:[%s8677_s25 + $0xa58] sm:$0xff]  ;;  %424 = vst [vmem:[%s8682_s26 + $0x544] sm:$0xff] %v423_v7  ;;  %v429_v10 = vld [vmem:[%s8677_s25 + $0xa64] sm:$0xff] }
  0x57   : > { %426 = vst [vmem:[%s8682_s26 + $0x550] sm:$0xff] %v425_v8  ;;  %428 = vst [vmem:[%s8682_s26 + $0x558] sm:$0xff] %v427_v9  ;;  %v431_v11 = vld [vmem:[%s8677_s25 + $0xa6c] sm:$0xff]  ;;  %v433_v12 = vld [vmem:[%s8677_s25 + $0xa78] sm:$0xff] }
  0x58   : > { %430 = vst [vmem:[%s8682_s26 + $0x564] sm:$0xff] %v429_v10  ;;  %432 = vst [vmem:[%s8682_s26 + $0x56c] sm:$0xff] %v431_v11  ;;  %v435_v13 = vld [vmem:[%s8677_s25 + $0xa80] sm:$0xff]  ;;  %v437_v14 = vld [vmem:[%s8677_s25 + $0xa8c] sm:$0xff] }
  0x59   : > { %434 = vst [vmem:[%s8682_s26 + $0x578] sm:$0xff] %v433_v12  ;;  %v439_v15 = vld [vmem:[%s8677_s25 + $0xa94] sm:$0xff]  ;;  %436 = vst [vmem:[%s8682_s26 + $0x580] sm:$0xff] %v435_v13  ;;  %v441_v16 = vld [vmem:[%s8677_s25 + $0xaa0] sm:$0xff] }
  0x5a   : > { %438 = vst [vmem:[%s8682_s26 + $0x58c] sm:$0xff] %v437_v14  ;;  %440 = vst [vmem:[%s8682_s26 + $0x594] sm:$0xff] %v439_v15  ;;  %v443_v17 = vld [vmem:[%s8677_s25 + $0xaa8] sm:$0xff]  ;;  %v445_v18 = vld [vmem:[%s8677_s25 + $0xab4] sm:$0xff] }
  0x5b   : > { %442 = vst [vmem:[%s8682_s26 + $0x5a0] sm:$0xff] %v441_v16  ;;  %444 = vst [vmem:[%s8682_s26 + $0x5a8] sm:$0xff] %v443_v17  ;;  %v447_v19 = vld [vmem:[%s8677_s25 + $0xabc] sm:$0xff]  ;;  %v449_v20 = vld [vmem:[%s8677_s25 + $0xac8] sm:$0xff] }
  0x5c   : > { %446 = vst [vmem:[%s8682_s26 + $0x5b4] sm:$0xff] %v445_v18  ;;  %v451_v21 = vld [vmem:[%s8677_s25 + $0xad0] sm:$0xff]  ;;  %448 = vst [vmem:[%s8682_s26 + $0x5bc] sm:$0xff] %v447_v19  ;;  %v453_v22 = vld [vmem:[%s8677_s25 + $0xadc] sm:$0xff] }
  0x5d   : > { %450 = vst [vmem:[%s8682_s26 + $0x5c8] sm:$0xff] %v449_v20  ;;  %452 = vst [vmem:[%s8682_s26 + $0x5d0] sm:$0xff] %v451_v21  ;;  %v455_v23 = vld [vmem:[%s8677_s25 + $0xae4] sm:$0xff]  ;;  %v457_v24 = vld [vmem:[%s8677_s25 + $0xaf0] sm:$0xff] }
  0x5e   : > { %454 = vst [vmem:[%s8682_s26 + $0x5dc] sm:$0xff] %v453_v22  ;;  %456 = vst [vmem:[%s8682_s26 + $0x5e4] sm:$0xff] %v455_v23  ;;  %v459_v25 = vld [vmem:[%s8677_s25 + $0xaf8] sm:$0xff]  ;;  %v461_v26 = vld [vmem:[%s8677_s25 + $0xb04] sm:$0xff] }
  0x5f   : > { %458 = vst [vmem:[%s8682_s26 + $0x5f0] sm:$0xff] %v457_v24  ;;  %v463_v27 = vld [vmem:[%s8677_s25 + $0xb0c] sm:$0xff]  ;;  %460 = vst [vmem:[%s8682_s26 + $0x5f8] sm:$0xff] %v459_v25  ;;  %v465_v28 = vld [vmem:[%s8677_s25 + $0xb18] sm:$0xff] }
  0x60   : > { %462 = vst [vmem:[%s8682_s26 + $0x604] sm:$0xff] %v461_v26  ;;  %464 = vst [vmem:[%s8682_s26 + $0x60c] sm:$0xff] %v463_v27  ;;  %v467_v29 = vld [vmem:[%s8677_s25 + $0xb20] sm:$0xff]  ;;  %v469_v30 = vld [vmem:[%s8677_s25 + $0xb2c] sm:$0xff] }
  0x61   : > { %466 = vst [vmem:[%s8682_s26 + $0x618] sm:$0xff] %v465_v28  ;;  %468 = vst [vmem:[%s8682_s26 + $0x620] sm:$0xff] %v467_v29  ;;  %v471_v31 = vld [vmem:[%s8677_s25 + $0xb34] sm:$0xff]  ;;  %v473_v32 = vld [vmem:[%s8677_s25 + $0xb40] sm:$0xff] }
  0x62   : > { %470 = vst [vmem:[%s8682_s26 + $0x62c] sm:$0xff] %v469_v30  ;;  %v475_v33 = vld [vmem:[%s8677_s25 + $0xb48] sm:$0xff]  ;;  %472 = vst [vmem:[%s8682_s26 + $0x634] sm:$0xff] %v471_v31  ;;  %v477_v34 = vld [vmem:[%s8677_s25 + $0xb54] sm:$0xff] }
  0x63   : > { %474 = vst [vmem:[%s8682_s26 + $0x640] sm:$0xff] %v473_v32  ;;  %476 = vst [vmem:[%s8682_s26 + $0x648] sm:$0xff] %v475_v33  ;;  %v479_v35 = vld [vmem:[%s8677_s25 + $0xb5c] sm:$0xff]  ;;  %v481_v36 = vld [vmem:[%s8677_s25 + $0xb68] sm:$0xff] }
  0x64   : > { %478 = vst [vmem:[%s8682_s26 + $0x654] sm:$0xff] %v477_v34  ;;  %480 = vst [vmem:[%s8682_s26 + $0x65c] sm:$0xff] %v479_v35  ;;  %v483_v37 = vld [vmem:[%s8677_s25 + $0xb70] sm:$0xff]  ;;  %v485_v38 = vld [vmem:[%s8677_s25 + $0xb7c] sm:$0xff] }
  0x65   : > { %482 = vst [vmem:[%s8682_s26 + $0x668] sm:$0xff] %v481_v36  ;;  %v487_v39 = vld [vmem:[%s8677_s25 + $0xb84] sm:$0xff]  ;;  %484 = vst [vmem:[%s8682_s26 + $0x670] sm:$0xff] %v483_v37  ;;  %v489_v40 = vld [vmem:[%s8677_s25 + $0xb90] sm:$0xff] }
  0x66   : > { %486 = vst [vmem:[%s8682_s26 + $0x67c] sm:$0xff] %v485_v38  ;;  %488 = vst [vmem:[%s8682_s26 + $0x684] sm:$0xff] %v487_v39  ;;  %v491_v41 = vld [vmem:[%s8677_s25 + $0xb98] sm:$0xff]  ;;  %v493_v42 = vld [vmem:[%s8677_s25 + $0xba4] sm:$0xff] }
  0x67   : > { %490 = vst [vmem:[%s8682_s26 + $0x690] sm:$0xff] %v489_v40  ;;  %492 = vst [vmem:[%s8682_s26 + $0x698] sm:$0xff] %v491_v41  ;;  %v495_v43 = vld [vmem:[%s8677_s25 + $0xbac] sm:$0xff]  ;;  %v497_v44 = vld [vmem:[%s8677_s25 + $0xbb8] sm:$0xff] }
  0x68   : > { %494 = vst [vmem:[%s8682_s26 + $0x6a4] sm:$0xff] %v493_v42  ;;  %v499_v45 = vld [vmem:[%s8677_s25 + $0xbc0] sm:$0xff]  ;;  %496 = vst [vmem:[%s8682_s26 + $0x6ac] sm:$0xff] %v495_v43  ;;  %v501_v46 = vld [vmem:[%s8677_s25 + $0xbcc] sm:$0xff] }
  0x69   : > { %498 = vst [vmem:[%s8682_s26 + $0x6b8] sm:$0xff] %v497_v44  ;;  %500 = vst [vmem:[%s8682_s26 + $0x6c0] sm:$0xff] %v499_v45  ;;  %v503_v47 = vld [vmem:[%s8677_s25 + $0xbd4] sm:$0xff]  ;;  %v505_v48 = vld [vmem:[%s8677_s25 + $0xbe0] sm:$0xff] }
  0x6a   : > { %502 = vst [vmem:[%s8682_s26 + $0x6cc] sm:$0xff] %v501_v46  ;;  %504 = vst [vmem:[%s8682_s26 + $0x6d4] sm:$0xff] %v503_v47  ;;  %v507_v49 = vld [vmem:[%s8677_s25 + $0xbe8] sm:$0xff]  ;;  %v509_v50 = vld [vmem:[%s8677_s25 + $0xbf4] sm:$0xff] }
  0x6b   : > { %506 = vst [vmem:[%s8682_s26 + $0x6e0] sm:$0xff] %v505_v48  ;;  %v511_v51 = vld [vmem:[%s8677_s25 + $0xbfc] sm:$0xff]  ;;  %508 = vst [vmem:[%s8682_s26 + $0x6e8] sm:$0xff] %v507_v49  ;;  %v513_v52 = vld [vmem:[%s8677_s25 + $0xc08] sm:$0xff] }
  0x6c   : > { %510 = vst [vmem:[%s8682_s26 + $0x6f4] sm:$0xff] %v509_v50  ;;  %512 = vst [vmem:[%s8682_s26 + $0x6fc] sm:$0xff] %v511_v51  ;;  %v515_v53 = vld [vmem:[%s8677_s25 + $0xc10] sm:$0xff]  ;;  %v517_v54 = vld [vmem:[%s8677_s25 + $0xc1c] sm:$0xff] }
  0x6d   : > { %514 = vst [vmem:[%s8682_s26 + $0x708] sm:$0xff] %v513_v52  ;;  %516 = vst [vmem:[%s8682_s26 + $0x710] sm:$0xff] %v515_v53  ;;  %v519_v55 = vld [vmem:[%s8677_s25 + $0xc24] sm:$0xff]  ;;  %v521_v56 = vld [vmem:[%s8677_s25 + $0xc30] sm:$0xff] }
  0x6e   : > { %518 = vst [vmem:[%s8682_s26 + $0x71c] sm:$0xff] %v517_v54  ;;  %v523_v57 = vld [vmem:[%s8677_s25 + $0xc38] sm:$0xff]  ;;  %520 = vst [vmem:[%s8682_s26 + $0x724] sm:$0xff] %v519_v55  ;;  %v525_v58 = vld [vmem:[%s8677_s25 + $0xc44] sm:$0xff] }
  0x6f   : > { %522 = vst [vmem:[%s8682_s26 + $0x730] sm:$0xff] %v521_v56  ;;  %524 = vst [vmem:[%s8682_s26 + $0x738] sm:$0xff] %v523_v57  ;;  %v527_v59 = vld [vmem:[%s8677_s25 + $0xc4c] sm:$0xff]  ;;  %v529_v60 = vld [vmem:[%s8677_s25 + $0xc58] sm:$0xff] }
  0x70   : > { %526 = vst [vmem:[%s8682_s26 + $0x744] sm:$0xff] %v525_v58  ;;  %528 = vst [vmem:[%s8682_s26 + $0x74c] sm:$0xff] %v527_v59  ;;  %v531_v61 = vld [vmem:[%s8677_s25 + $0xc60] sm:$0xff]  ;;  %v533_v62 = vld [vmem:[%s8677_s25 + $0xc6c] sm:$0xff] }
  0x71   : > { %530 = vst [vmem:[%s8682_s26 + $0x758] sm:$0xff] %v529_v60  ;;  %v535_v63 = vld [vmem:[%s8677_s25 + $0xc74] sm:$0xff]  ;;  %532 = vst [vmem:[%s8682_s26 + $0x760] sm:$0xff] %v531_v61  ;;  %v537_v0 = vld [vmem:[%s8677_s25 + $0xf00] sm:$0xff] }
  0x72   : > { %534 = vst [vmem:[%s8682_s26 + $0x76c] sm:$0xff] %v533_v62  ;;  %536 = vst [vmem:[%s8682_s26 + $0x774] sm:$0xff] %v535_v63  ;;  %v539_v1 = vld [vmem:[%s8677_s25 + $0xf08] sm:$0xff]  ;;  %v541_v2 = vld [vmem:[%s8677_s25 + $0xf14] sm:$0xff] }
  0x73   : > { %538 = vst [vmem:[%s8682_s26 + $0x780] sm:$0xff] %v537_v0  ;;  %540 = vst [vmem:[%s8682_s26 + $0x788] sm:$0xff] %v539_v1  ;;  %v543_v3 = vld [vmem:[%s8677_s25 + $0xf1c] sm:$0xff]  ;;  %v545_v4 = vld [vmem:[%s8677_s25 + $0xf28] sm:$0xff] }
  0x74   : > { %542 = vst [vmem:[%s8682_s26 + $0x794] sm:$0xff] %v541_v2  ;;  %v547_v5 = vld [vmem:[%s8677_s25 + $0xf30] sm:$0xff]  ;;  %544 = vst [vmem:[%s8682_s26 + $0x79c] sm:$0xff] %v543_v3  ;;  %v549_v6 = vld [vmem:[%s8677_s25 + $0xf3c] sm:$0xff] }
  0x75   : > { %546 = vst [vmem:[%s8682_s26 + $0x7a8] sm:$0xff] %v545_v4  ;;  %548 = vst [vmem:[%s8682_s26 + $0x7b0] sm:$0xff] %v547_v5  ;;  %v551_v7 = vld [vmem:[%s8677_s25 + $0xf44] sm:$0xff]  ;;  %v553_v8 = vld [vmem:[%s8677_s25 + $0xf50] sm:$0xff] }
  0x76   : > { %550 = vst [vmem:[%s8682_s26 + $0x7bc] sm:$0xff] %v549_v6  ;;  %552 = vst [vmem:[%s8682_s26 + $0x7c4] sm:$0xff] %v551_v7  ;;  %v555_v9 = vld [vmem:[%s8677_s25 + $0xf58] sm:$0xff]  ;;  %v557_v10 = vld [vmem:[%s8677_s25 + $0xf64] sm:$0xff] }
  0x77   : > { %554 = vst [vmem:[%s8682_s26 + $0x7d0] sm:$0xff] %v553_v8  ;;  %v559_v11 = vld [vmem:[%s8677_s25 + $0xf6c] sm:$0xff]  ;;  %556 = vst [vmem:[%s8682_s26 + $0x7d8] sm:$0xff] %v555_v9  ;;  %v561_v12 = vld [vmem:[%s8677_s25 + $0xf78] sm:$0xff] }
  0x78   : > { %558 = vst [vmem:[%s8682_s26 + $0x7e4] sm:$0xff] %v557_v10  ;;  %560 = vst [vmem:[%s8682_s26 + $0x7ec] sm:$0xff] %v559_v11  ;;  %v563_v13 = vld [vmem:[%s8677_s25 + $0xf80] sm:$0xff]  ;;  %v565_v14 = vld [vmem:[%s8677_s25 + $0xf8c] sm:$0xff] }
  0x79   : > { %562 = vst [vmem:[%s8682_s26 + $0x7f8] sm:$0xff] %v561_v12  ;;  %564 = vst [vmem:[%s8682_s26 + $0x800] sm:$0xff] %v563_v13  ;;  %v567_v15 = vld [vmem:[%s8677_s25 + $0xf94] sm:$0xff]  ;;  %v569_v16 = vld [vmem:[%s8677_s25 + $0xfa0] sm:$0xff] }
  0x7a   : > { %566 = vst [vmem:[%s8682_s26 + $0x80c] sm:$0xff] %v565_v14  ;;  %v571_v17 = vld [vmem:[%s8677_s25 + $0xfa8] sm:$0xff]  ;;  %568 = vst [vmem:[%s8682_s26 + $0x814] sm:$0xff] %v567_v15  ;;  %v573_v18 = vld [vmem:[%s8677_s25 + $0xfb4] sm:$0xff] }
  0x7b   : > { %570 = vst [vmem:[%s8682_s26 + $0x820] sm:$0xff] %v569_v16  ;;  %572 = vst [vmem:[%s8682_s26 + $0x828] sm:$0xff] %v571_v17  ;;  %v575_v19 = vld [vmem:[%s8677_s25 + $0xfbc] sm:$0xff]  ;;  %v577_v20 = vld [vmem:[%s8677_s25 + $0xfc8] sm:$0xff] }
  0x7c   : > { %574 = vst [vmem:[%s8682_s26 + $0x834] sm:$0xff] %v573_v18  ;;  %576 = vst [vmem:[%s8682_s26 + $0x83c] sm:$0xff] %v575_v19  ;;  %v579_v21 = vld [vmem:[%s8677_s25 + $0xfd0] sm:$0xff]  ;;  %v581_v22 = vld [vmem:[%s8677_s25 + $0xfdc] sm:$0xff] }
  0x7d   : > { %578 = vst [vmem:[%s8682_s26 + $0x848] sm:$0xff] %v577_v20  ;;  %v583_v23 = vld [vmem:[%s8677_s25 + $0xfe4] sm:$0xff]  ;;  %580 = vst [vmem:[%s8682_s26 + $0x850] sm:$0xff] %v579_v21  ;;  %v585_v24 = vld [vmem:[%s8677_s25 + $0xff0] sm:$0xff] }
  0x7e   : > { %582 = vst [vmem:[%s8682_s26 + $0x85c] sm:$0xff] %v581_v22  ;;  %584 = vst [vmem:[%s8682_s26 + $0x864] sm:$0xff] %v583_v23  ;;  %v587_v25 = vld [vmem:[%s8677_s25 + $0xff8] sm:$0xff]  ;;  %v589_v26 = vld [vmem:[%s8677_s25 + $0x1004] sm:$0xff] }
  0x7f   : > { %586 = vst [vmem:[%s8682_s26 + $0x870] sm:$0xff] %v585_v24  ;;  %588 = vst [vmem:[%s8682_s26 + $0x878] sm:$0xff] %v587_v25  ;;  %v591_v27 = vld [vmem:[%s8677_s25 + $0x100c] sm:$0xff]  ;;  %v593_v28 = vld [vmem:[%s8677_s25 + $0x1018] sm:$0xff] }
  0x80   : > { %590 = vst [vmem:[%s8682_s26 + $0x884] sm:$0xff] %v589_v26  ;;  %v595_v29 = vld [vmem:[%s8677_s25 + $0x1020] sm:$0xff]  ;;  %592 = vst [vmem:[%s8682_s26 + $0x88c] sm:$0xff] %v591_v27  ;;  %v597_v30 = vld [vmem:[%s8677_s25 + $0x102c] sm:$0xff] }
  0x81   : > { %594 = vst [vmem:[%s8682_s26 + $0x898] sm:$0xff] %v593_v28  ;;  %596 = vst [vmem:[%s8682_s26 + $0x8a0] sm:$0xff] %v595_v29  ;;  %v599_v31 = vld [vmem:[%s8677_s25 + $0x1034] sm:$0xff]  ;;  %v601_v32 = vld [vmem:[%s8677_s25 + $0x1040] sm:$0xff] }
  0x82   : > { %598 = vst [vmem:[%s8682_s26 + $0x8ac] sm:$0xff] %v597_v30  ;;  %600 = vst [vmem:[%s8682_s26 + $0x8b4] sm:$0xff] %v599_v31  ;;  %v603_v33 = vld [vmem:[%s8677_s25 + $0x1048] sm:$0xff]  ;;  %v605_v34 = vld [vmem:[%s8677_s25 + $0x1054] sm:$0xff] }
  0x83   : > { %602 = vst [vmem:[%s8682_s26 + $0x8c0] sm:$0xff] %v601_v32  ;;  %v607_v35 = vld [vmem:[%s8677_s25 + $0x105c] sm:$0xff]  ;;  %604 = vst [vmem:[%s8682_s26 + $0x8c8] sm:$0xff] %v603_v33  ;;  %v609_v36 = vld [vmem:[%s8677_s25 + $0x1068] sm:$0xff] }
  0x84   : > { %606 = vst [vmem:[%s8682_s26 + $0x8d4] sm:$0xff] %v605_v34  ;;  %608 = vst [vmem:[%s8682_s26 + $0x8dc] sm:$0xff] %v607_v35  ;;  %v611_v37 = vld [vmem:[%s8677_s25 + $0x1070] sm:$0xff]  ;;  %v613_v38 = vld [vmem:[%s8677_s25 + $0x107c] sm:$0xff] }
  0x85   : > { %610 = vst [vmem:[%s8682_s26 + $0x8e8] sm:$0xff] %v609_v36  ;;  %612 = vst [vmem:[%s8682_s26 + $0x8f0] sm:$0xff] %v611_v37  ;;  %v615_v39 = vld [vmem:[%s8677_s25 + $0x1084] sm:$0xff]  ;;  %v617_v40 = vld [vmem:[%s8677_s25 + $0x1090] sm:$0xff] }
  0x86   : > { %614 = vst [vmem:[%s8682_s26 + $0x8fc] sm:$0xff] %v613_v38  ;;  %v619_v41 = vld [vmem:[%s8677_s25 + $0x1098] sm:$0xff]  ;;  %616 = vst [vmem:[%s8682_s26 + $0x904] sm:$0xff] %v615_v39  ;;  %v621_v42 = vld [vmem:[%s8677_s25 + $0x10a4] sm:$0xff] }
  0x87   : > { %618 = vst [vmem:[%s8682_s26 + $0x910] sm:$0xff] %v617_v40  ;;  %620 = vst [vmem:[%s8682_s26 + $0x918] sm:$0xff] %v619_v41  ;;  %v623_v43 = vld [vmem:[%s8677_s25 + $0x10ac] sm:$0xff]  ;;  %v625_v44 = vld [vmem:[%s8677_s25 + $0x10b8] sm:$0xff] }
  0x88   : > { %622 = vst [vmem:[%s8682_s26 + $0x924] sm:$0xff] %v621_v42  ;;  %624 = vst [vmem:[%s8682_s26 + $0x92c] sm:$0xff] %v623_v43  ;;  %v627_v45 = vld [vmem:[%s8677_s25 + $0x10c0] sm:$0xff]  ;;  %v629_v46 = vld [vmem:[%s8677_s25 + $0x10cc] sm:$0xff] }
  0x89   : > { %626 = vst [vmem:[%s8682_s26 + $0x938] sm:$0xff] %v625_v44  ;;  %v631_v47 = vld [vmem:[%s8677_s25 + $0x10d4] sm:$0xff]  ;;  %628 = vst [vmem:[%s8682_s26 + $0x940] sm:$0xff] %v627_v45  ;;  %v633_v48 = vld [vmem:[%s8677_s25 + $0x10e0] sm:$0xff] }
  0x8a   : > { %630 = vst [vmem:[%s8682_s26 + $0x94c] sm:$0xff] %v629_v46  ;;  %632 = vst [vmem:[%s8682_s26 + $0x954] sm:$0xff] %v631_v47  ;;  %v635_v49 = vld [vmem:[%s8677_s25 + $0x10e8] sm:$0xff]  ;;  %v637_v50 = vld [vmem:[%s8677_s25 + $0x10f4] sm:$0xff] }
  0x8b   : > { %634 = vst [vmem:[%s8682_s26 + $0x960] sm:$0xff] %v633_v48  ;;  %636 = vst [vmem:[%s8682_s26 + $0x968] sm:$0xff] %v635_v49  ;;  %v639_v51 = vld [vmem:[%s8677_s25 + $0x10fc] sm:$0xff]  ;;  %v641_v52 = vld [vmem:[%s8677_s25 + $0x1108] sm:$0xff] }
  0x8c   : > { %638 = vst [vmem:[%s8682_s26 + $0x974] sm:$0xff] %v637_v50  ;;  %v643_v53 = vld [vmem:[%s8677_s25 + $0x1110] sm:$0xff]  ;;  %640 = vst [vmem:[%s8682_s26 + $0x97c] sm:$0xff] %v639_v51  ;;  %v645_v54 = vld [vmem:[%s8677_s25 + $0x111c] sm:$0xff] }
  0x8d   : > { %642 = vst [vmem:[%s8682_s26 + $0x988] sm:$0xff] %v641_v52  ;;  %644 = vst [vmem:[%s8682_s26 + $0x990] sm:$0xff] %v643_v53  ;;  %v647_v55 = vld [vmem:[%s8677_s25 + $0x1124] sm:$0xff]  ;;  %v649_v56 = vld [vmem:[%s8677_s25 + $0x1130] sm:$0xff] }
  0x8e   : > { %646 = vst [vmem:[%s8682_s26 + $0x99c] sm:$0xff] %v645_v54  ;;  %648 = vst [vmem:[%s8682_s26 + $0x9a4] sm:$0xff] %v647_v55  ;;  %v651_v57 = vld [vmem:[%s8677_s25 + $0x1138] sm:$0xff]  ;;  %v653_v58 = vld [vmem:[%s8677_s25 + $0x1144] sm:$0xff] }
  0x8f   : > { %650 = vst [vmem:[%s8682_s26 + $0x9b0] sm:$0xff] %v649_v56  ;;  %v655_v59 = vld [vmem:[%s8677_s25 + $0x114c] sm:$0xff]  ;;  %652 = vst [vmem:[%s8682_s26 + $0x9b8] sm:$0xff] %v651_v57  ;;  %v657_v60 = vld [vmem:[%s8677_s25 + $0x1158] sm:$0xff] }
  0x90   : > { %654 = vst [vmem:[%s8682_s26 + $0x9c4] sm:$0xff] %v653_v58  ;;  %656 = vst [vmem:[%s8682_s26 + $0x9cc] sm:$0xff] %v655_v59  ;;  %v659_v61 = vld [vmem:[%s8677_s25 + $0x1160] sm:$0xff]  ;;  %v661_v62 = vld [vmem:[%s8677_s25 + $0x116c] sm:$0xff] }
  0x91   : > { %658 = vst [vmem:[%s8682_s26 + $0x9d8] sm:$0xff] %v657_v60  ;;  %660 = vst [vmem:[%s8682_s26 + $0x9e0] sm:$0xff] %v659_v61  ;;  %v663_v63 = vld [vmem:[%s8677_s25 + $0x1174] sm:$0xff]  ;;  %v5770_v0 = vld [vmem:[%s8677_s25 + $0x10] sm:$0xf] }
  0x92   : > { %662 = vst [vmem:[%s8682_s26 + $0x9ec] sm:$0xff] %v661_v62  ;;  %v5772_v1 = vld [vmem:[%s8677_s25 + $0x24] sm:$0xf]  ;;  %664 = vst [vmem:[%s8682_s26 + $0x9f4] sm:$0xff] %v663_v63  ;;  %v5774_v2 = vld [vmem:[%s8677_s25 + $0x38] sm:$0xf] }
  0x93   : > { %5771 = vst [vmem:[%s8682_s26 + $0x10] sm:$0xf] %v5770_v0  ;;  %5773 = vst [vmem:[%s8682_s26 + $0x24] sm:$0xf] %v5772_v1  ;;  %v5776_v3 = vld [vmem:[%s8677_s25 + $0x4c] sm:$0xf] }
  0x94   : > { %v5778_v4 = vld [vmem:[%s8677_s25 + $0x60] sm:$0xf]  ;;  %5775 = vst [vmem:[%s8682_s26 + $0x38] sm:$0xf] %v5774_v2  ;;  %5777 = vst [vmem:[%s8682_s26 + $0x4c] sm:$0xf] %v5776_v3 }
  0x95   : > { %5779 = vst [vmem:[%s8682_s26 + $0x60] sm:$0xf] %v5778_v4  ;;  %v5780_v5 = vld [vmem:[%s8677_s25 + $0x74] sm:$0xf]  ;;  %v5782_v6 = vld [vmem:[%s8677_s25 + $0x88] sm:$0xf] }
  0x96   : > { %v5784_v7 = vld [vmem:[%s8677_s25 + $0x9c] sm:$0xf]  ;;  %5781 = vst [vmem:[%s8682_s26 + $0x74] sm:$0xf] %v5780_v5  ;;  %5783 = vst [vmem:[%s8682_s26 + $0x88] sm:$0xf] %v5782_v6 }
  0x97   : > { %5785 = vst [vmem:[%s8682_s26 + $0x9c] sm:$0xf] %v5784_v7  ;;  %v5786_v8 = vld [vmem:[%s8677_s25 + $0xb0] sm:$0xf]  ;;  %v5788_v9 = vld [vmem:[%s8677_s25 + $0xc4] sm:$0xf] }
  0x98   : > { %v5790_v10 = vld [vmem:[%s8677_s25 + $0xd8] sm:$0xf]  ;;  %5787 = vst [vmem:[%s8682_s26 + $0xb0] sm:$0xf] %v5786_v8  ;;  %5789 = vst [vmem:[%s8682_s26 + $0xc4] sm:$0xf] %v5788_v9 }
  0x99   : > { %5791 = vst [vmem:[%s8682_s26 + $0xd8] sm:$0xf] %v5790_v10  ;;  %v5792_v11 = vld [vmem:[%s8677_s25 + $0xec] sm:$0xf]  ;;  %v5794_v12 = vld [vmem:[%s8677_s25 + $0x100] sm:$0xf] }
  0x9a   : > { %v5796_v13 = vld [vmem:[%s8677_s25 + $0x114] sm:$0xf]  ;;  %5793 = vst [vmem:[%s8682_s26 + $0xec] sm:$0xf] %v5792_v11  ;;  %5795 = vst [vmem:[%s8682_s26 + $0x100] sm:$0xf] %v5794_v12 }
  0x9b   : > { %5797 = vst [vmem:[%s8682_s26 + $0x114] sm:$0xf] %v5796_v13  ;;  %v5798_v14 = vld [vmem:[%s8677_s25 + $0x128] sm:$0xf]  ;;  %v5800_v15 = vld [vmem:[%s8677_s25 + $0x13c] sm:$0xf] }
  0x9c   : > { %v5802_v16 = vld [vmem:[%s8677_s25 + $0x150] sm:$0xf]  ;;  %5799 = vst [vmem:[%s8682_s26 + $0x128] sm:$0xf] %v5798_v14  ;;  %5801 = vst [vmem:[%s8682_s26 + $0x13c] sm:$0xf] %v5800_v15 }
  0x9d   : > { %5803 = vst [vmem:[%s8682_s26 + $0x150] sm:$0xf] %v5802_v16  ;;  %v5804_v17 = vld [vmem:[%s8677_s25 + $0x164] sm:$0xf]  ;;  %v5806_v18 = vld [vmem:[%s8677_s25 + $0x178] sm:$0xf] }
  0x9e   : > { %v5808_v19 = vld [vmem:[%s8677_s25 + $0x18c] sm:$0xf]  ;;  %5805 = vst [vmem:[%s8682_s26 + $0x164] sm:$0xf] %v5804_v17  ;;  %5807 = vst [vmem:[%s8682_s26 + $0x178] sm:$0xf] %v5806_v18 }
  0x9f   : > { %5809 = vst [vmem:[%s8682_s26 + $0x18c] sm:$0xf] %v5808_v19  ;;  %v5810_v20 = vld [vmem:[%s8677_s25 + $0x1a0] sm:$0xf]  ;;  %v5812_v21 = vld [vmem:[%s8677_s25 + $0x1b4] sm:$0xf] }
  0xa0   : > { %v5814_v22 = vld [vmem:[%s8677_s25 + $0x1c8] sm:$0xf]  ;;  %5811 = vst [vmem:[%s8682_s26 + $0x1a0] sm:$0xf] %v5810_v20  ;;  %5813 = vst [vmem:[%s8682_s26 + $0x1b4] sm:$0xf] %v5812_v21 }
  0xa1   : > { %5815 = vst [vmem:[%s8682_s26 + $0x1c8] sm:$0xf] %v5814_v22  ;;  %v5816_v23 = vld [vmem:[%s8677_s25 + $0x1dc] sm:$0xf]  ;;  %v5818_v24 = vld [vmem:[%s8677_s25 + $0x1f0] sm:$0xf] }
  0xa2   : > { %v5820_v25 = vld [vmem:[%s8677_s25 + $0x204] sm:$0xf]  ;;  %5817 = vst [vmem:[%s8682_s26 + $0x1dc] sm:$0xf] %v5816_v23  ;;  %5819 = vst [vmem:[%s8682_s26 + $0x1f0] sm:$0xf] %v5818_v24 }
  0xa3   : > { %5821 = vst [vmem:[%s8682_s26 + $0x204] sm:$0xf] %v5820_v25  ;;  %v5822_v26 = vld [vmem:[%s8677_s25 + $0x218] sm:$0xf]  ;;  %v5824_v27 = vld [vmem:[%s8677_s25 + $0x22c] sm:$0xf] }
  0xa4   : > { %v5826_v28 = vld [vmem:[%s8677_s25 + $0x240] sm:$0xf]  ;;  %5823 = vst [vmem:[%s8682_s26 + $0x218] sm:$0xf] %v5822_v26  ;;  %5825 = vst [vmem:[%s8682_s26 + $0x22c] sm:$0xf] %v5824_v27 }
  0xa5   : > { %5827 = vst [vmem:[%s8682_s26 + $0x240] sm:$0xf] %v5826_v28  ;;  %v5828_v29 = vld [vmem:[%s8677_s25 + $0x254] sm:$0xf]  ;;  %v5830_v30 = vld [vmem:[%s8677_s25 + $0x268] sm:$0xf] }
  0xa6   : > { %v5832_v31 = vld [vmem:[%s8677_s25 + $0x27c] sm:$0xf]  ;;  %5829 = vst [vmem:[%s8682_s26 + $0x254] sm:$0xf] %v5828_v29  ;;  %5831 = vst [vmem:[%s8682_s26 + $0x268] sm:$0xf] %v5830_v30 }
  0xa7   : > { %5833 = vst [vmem:[%s8682_s26 + $0x27c] sm:$0xf] %v5832_v31  ;;  %v5834_v32 = vld [vmem:[%s8677_s25 + $0x510] sm:$0xf]  ;;  %v5836_v33 = vld [vmem:[%s8677_s25 + $0x524] sm:$0xf] }
  0xa8   : > { %v5838_v34 = vld [vmem:[%s8677_s25 + $0x538] sm:$0xf]  ;;  %5835 = vst [vmem:[%s8682_s26 + $0x290] sm:$0xf] %v5834_v32  ;;  %5837 = vst [vmem:[%s8682_s26 + $0x2a4] sm:$0xf] %v5836_v33 }
  0xa9   : > { %5839 = vst [vmem:[%s8682_s26 + $0x2b8] sm:$0xf] %v5838_v34  ;;  %v5840_v35 = vld [vmem:[%s8677_s25 + $0x54c] sm:$0xf]  ;;  %v5842_v36 = vld [vmem:[%s8677_s25 + $0x560] sm:$0xf] }
  0xaa   : > { %v5844_v37 = vld [vmem:[%s8677_s25 + $0x574] sm:$0xf]  ;;  %5841 = vst [vmem:[%s8682_s26 + $0x2cc] sm:$0xf] %v5840_v35  ;;  %5843 = vst [vmem:[%s8682_s26 + $0x2e0] sm:$0xf] %v5842_v36 }
  0xab   : > { %5845 = vst [vmem:[%s8682_s26 + $0x2f4] sm:$0xf] %v5844_v37  ;;  %v5846_v38 = vld [vmem:[%s8677_s25 + $0x588] sm:$0xf]  ;;  %v5848_v39 = vld [vmem:[%s8677_s25 + $0x59c] sm:$0xf] }
  0xac   : > { %v5850_v40 = vld [vmem:[%s8677_s25 + $0x5b0] sm:$0xf]  ;;  %5847 = vst [vmem:[%s8682_s26 + $0x308] sm:$0xf] %v5846_v38  ;;  %5849 = vst [vmem:[%s8682_s26 + $0x31c] sm:$0xf] %v5848_v39 }
  0xad   : > { %5851 = vst [vmem:[%s8682_s26 + $0x330] sm:$0xf] %v5850_v40  ;;  %v5852_v41 = vld [vmem:[%s8677_s25 + $0x5c4] sm:$0xf]  ;;  %v5854_v42 = vld [vmem:[%s8677_s25 + $0x5d8] sm:$0xf] }
  0xae   : > { %v5856_v43 = vld [vmem:[%s8677_s25 + $0x5ec] sm:$0xf]  ;;  %5853 = vst [vmem:[%s8682_s26 + $0x344] sm:$0xf] %v5852_v41  ;;  %5855 = vst [vmem:[%s8682_s26 + $0x358] sm:$0xf] %v5854_v42 }
  0xaf   : > { %5857 = vst [vmem:[%s8682_s26 + $0x36c] sm:$0xf] %v5856_v43  ;;  %v5858_v44 = vld [vmem:[%s8677_s25 + $0x600] sm:$0xf]  ;;  %v5860_v45 = vld [vmem:[%s8677_s25 + $0x614] sm:$0xf] }
  0xb0   : > { %v5862_v46 = vld [vmem:[%s8677_s25 + $0x628] sm:$0xf]  ;;  %5859 = vst [vmem:[%s8682_s26 + $0x380] sm:$0xf] %v5858_v44  ;;  %5861 = vst [vmem:[%s8682_s26 + $0x394] sm:$0xf] %v5860_v45 }
  0xb1   : > { %5863 = vst [vmem:[%s8682_s26 + $0x3a8] sm:$0xf] %v5862_v46  ;;  %v5864_v47 = vld [vmem:[%s8677_s25 + $0x63c] sm:$0xf]  ;;  %v5866_v48 = vld [vmem:[%s8677_s25 + $0x650] sm:$0xf] }
  0xb2   : > { %v5868_v49 = vld [vmem:[%s8677_s25 + $0x664] sm:$0xf]  ;;  %5865 = vst [vmem:[%s8682_s26 + $0x3bc] sm:$0xf] %v5864_v47  ;;  %5867 = vst [vmem:[%s8682_s26 + $0x3d0] sm:$0xf] %v5866_v48 }
  0xb3   : > { %5869 = vst [vmem:[%s8682_s26 + $0x3e4] sm:$0xf] %v5868_v49  ;;  %v5870_v50 = vld [vmem:[%s8677_s25 + $0x678] sm:$0xf]  ;;  %v5872_v51 = vld [vmem:[%s8677_s25 + $0x68c] sm:$0xf] }
  0xb4   : > { %v5874_v52 = vld [vmem:[%s8677_s25 + $0x6a0] sm:$0xf]  ;;  %5871 = vst [vmem:[%s8682_s26 + $0x3f8] sm:$0xf] %v5870_v50  ;;  %5873 = vst [vmem:[%s8682_s26 + $0x40c] sm:$0xf] %v5872_v51 }
  0xb5   : > { %5875 = vst [vmem:[%s8682_s26 + $0x420] sm:$0xf] %v5874_v52  ;;  %v5876_v53 = vld [vmem:[%s8677_s25 + $0x6b4] sm:$0xf]  ;;  %v5878_v54 = vld [vmem:[%s8677_s25 + $0x6c8] sm:$0xf] }
  0xb6   : > { %v5880_v55 = vld [vmem:[%s8677_s25 + $0x6dc] sm:$0xf]  ;;  %5877 = vst [vmem:[%s8682_s26 + $0x434] sm:$0xf] %v5876_v53  ;;  %5879 = vst [vmem:[%s8682_s26 + $0x448] sm:$0xf] %v5878_v54 }
  0xb7   : > { %5881 = vst [vmem:[%s8682_s26 + $0x45c] sm:$0xf] %v5880_v55  ;;  %v5882_v56 = vld [vmem:[%s8677_s25 + $0x6f0] sm:$0xf]  ;;  %v5884_v57 = vld [vmem:[%s8677_s25 + $0x704] sm:$0xf] }
  0xb8   : > { %v5886_v58 = vld [vmem:[%s8677_s25 + $0x718] sm:$0xf]  ;;  %5883 = vst [vmem:[%s8682_s26 + $0x470] sm:$0xf] %v5882_v56  ;;  %5885 = vst [vmem:[%s8682_s26 + $0x484] sm:$0xf] %v5884_v57 }
  0xb9   : > { %5887 = vst [vmem:[%s8682_s26 + $0x498] sm:$0xf] %v5886_v58  ;;  %v5888_v59 = vld [vmem:[%s8677_s25 + $0x72c] sm:$0xf]  ;;  %v5890_v60 = vld [vmem:[%s8677_s25 + $0x740] sm:$0xf] }
  0xba   : > { %v5892_v61 = vld [vmem:[%s8677_s25 + $0x754] sm:$0xf]  ;;  %5889 = vst [vmem:[%s8682_s26 + $0x4ac] sm:$0xf] %v5888_v59  ;;  %5891 = vst [vmem:[%s8682_s26 + $0x4c0] sm:$0xf] %v5890_v60 }
  0xbb   : > { %5893 = vst [vmem:[%s8682_s26 + $0x4d4] sm:$0xf] %v5892_v61  ;;  %v5894_v62 = vld [vmem:[%s8677_s25 + $0x768] sm:$0xf]  ;;  %v5896_v63 = vld [vmem:[%s8677_s25 + $0x77c] sm:$0xf] }
  0xbc   : > { %v5898_v0 = vld [vmem:[%s8677_s25 + $0xa10] sm:$0xf]  ;;  %5895 = vst [vmem:[%s8682_s26 + $0x4e8] sm:$0xf] %v5894_v62  ;;  %5897 = vst [vmem:[%s8682_s26 + $0x4fc] sm:$0xf] %v5896_v63 }
  0xbd   : > { %5899 = vst [vmem:[%s8682_s26 + $0x510] sm:$0xf] %v5898_v0  ;;  %v5900_v1 = vld [vmem:[%s8677_s25 + $0xa24] sm:$0xf]  ;;  %v5902_v2 = vld [vmem:[%s8677_s25 + $0xa38] sm:$0xf] }
  0xbe   : > { %v5904_v3 = vld [vmem:[%s8677_s25 + $0xa4c] sm:$0xf]  ;;  %5901 = vst [vmem:[%s8682_s26 + $0x524] sm:$0xf] %v5900_v1  ;;  %5903 = vst [vmem:[%s8682_s26 + $0x538] sm:$0xf] %v5902_v2 }
  0xbf   : > { %5905 = vst [vmem:[%s8682_s26 + $0x54c] sm:$0xf] %v5904_v3  ;;  %v5906_v4 = vld [vmem:[%s8677_s25 + $0xa60] sm:$0xf]  ;;  %v5908_v5 = vld [vmem:[%s8677_s25 + $0xa74] sm:$0xf] }
  0xc0   : > { %v5910_v6 = vld [vmem:[%s8677_s25 + $0xa88] sm:$0xf]  ;;  %5907 = vst [vmem:[%s8682_s26 + $0x560] sm:$0xf] %v5906_v4  ;;  %5909 = vst [vmem:[%s8682_s26 + $0x574] sm:$0xf] %v5908_v5 }
  0xc1   : > { %5911 = vst [vmem:[%s8682_s26 + $0x588] sm:$0xf] %v5910_v6  ;;  %v5912_v7 = vld [vmem:[%s8677_s25 + $0xa9c] sm:$0xf]  ;;  %v5914_v8 = vld [vmem:[%s8677_s25 + $0xab0] sm:$0xf] }
  0xc2   : > { %v5916_v9 = vld [vmem:[%s8677_s25 + $0xac4] sm:$0xf]  ;;  %5913 = vst [vmem:[%s8682_s26 + $0x59c] sm:$0xf] %v5912_v7  ;;  %5915 = vst [vmem:[%s8682_s26 + $0x5b0] sm:$0xf] %v5914_v8 }
  0xc3   : > { %5917 = vst [vmem:[%s8682_s26 + $0x5c4] sm:$0xf] %v5916_v9  ;;  %v5918_v10 = vld [vmem:[%s8677_s25 + $0xad8] sm:$0xf]  ;;  %v5920_v11 = vld [vmem:[%s8677_s25 + $0xaec] sm:$0xf] }
  0xc4   : > { %v5922_v12 = vld [vmem:[%s8677_s25 + $0xb00] sm:$0xf]  ;;  %5919 = vst [vmem:[%s8682_s26 + $0x5d8] sm:$0xf] %v5918_v10  ;;  %5921 = vst [vmem:[%s8682_s26 + $0x5ec] sm:$0xf] %v5920_v11 }
  0xc5   : > { %5923 = vst [vmem:[%s8682_s26 + $0x600] sm:$0xf] %v5922_v12  ;;  %v5924_v13 = vld [vmem:[%s8677_s25 + $0xb14] sm:$0xf]  ;;  %v5926_v14 = vld [vmem:[%s8677_s25 + $0xb28] sm:$0xf] }
  0xc6   : > { %v5928_v15 = vld [vmem:[%s8677_s25 + $0xb3c] sm:$0xf]  ;;  %5925 = vst [vmem:[%s8682_s26 + $0x614] sm:$0xf] %v5924_v13  ;;  %5927 = vst [vmem:[%s8682_s26 + $0x628] sm:$0xf] %v5926_v14 }
  0xc7   : > { %5929 = vst [vmem:[%s8682_s26 + $0x63c] sm:$0xf] %v5928_v15  ;;  %v5930_v16 = vld [vmem:[%s8677_s25 + $0xb50] sm:$0xf]  ;;  %v5932_v17 = vld [vmem:[%s8677_s25 + $0xb64] sm:$0xf] }
  0xc8   : > { %v5934_v18 = vld [vmem:[%s8677_s25 + $0xb78] sm:$0xf]  ;;  %5931 = vst [vmem:[%s8682_s26 + $0x650] sm:$0xf] %v5930_v16  ;;  %5933 = vst [vmem:[%s8682_s26 + $0x664] sm:$0xf] %v5932_v17 }
  0xc9   : > { %5935 = vst [vmem:[%s8682_s26 + $0x678] sm:$0xf] %v5934_v18  ;;  %v5936_v19 = vld [vmem:[%s8677_s25 + $0xb8c] sm:$0xf]  ;;  %v5938_v20 = vld [vmem:[%s8677_s25 + $0xba0] sm:$0xf] }
  0xca   : > { %v5940_v21 = vld [vmem:[%s8677_s25 + $0xbb4] sm:$0xf]  ;;  %5937 = vst [vmem:[%s8682_s26 + $0x68c] sm:$0xf] %v5936_v19  ;;  %5939 = vst [vmem:[%s8682_s26 + $0x6a0] sm:$0xf] %v5938_v20 }
  0xcb   : > { %5941 = vst [vmem:[%s8682_s26 + $0x6b4] sm:$0xf] %v5940_v21  ;;  %v5942_v22 = vld [vmem:[%s8677_s25 + $0xbc8] sm:$0xf]  ;;  %v5944_v23 = vld [vmem:[%s8677_s25 + $0xbdc] sm:$0xf] }
  0xcc   : > { %v5946_v24 = vld [vmem:[%s8677_s25 + $0xbf0] sm:$0xf]  ;;  %5943 = vst [vmem:[%s8682_s26 + $0x6c8] sm:$0xf] %v5942_v22  ;;  %5945 = vst [vmem:[%s8682_s26 + $0x6dc] sm:$0xf] %v5944_v23 }
  0xcd   : > { %5947 = vst [vmem:[%s8682_s26 + $0x6f0] sm:$0xf] %v5946_v24  ;;  %v5948_v25 = vld [vmem:[%s8677_s25 + $0xc04] sm:$0xf]  ;;  %v5950_v26 = vld [vmem:[%s8677_s25 + $0xc18] sm:$0xf] }
  0xce   : > { %v5952_v27 = vld [vmem:[%s8677_s25 + $0xc2c] sm:$0xf]  ;;  %5949 = vst [vmem:[%s8682_s26 + $0x704] sm:$0xf] %v5948_v25  ;;  %5951 = vst [vmem:[%s8682_s26 + $0x718] sm:$0xf] %v5950_v26 }
  0xcf   : > { %5953 = vst [vmem:[%s8682_s26 + $0x72c] sm:$0xf] %v5952_v27  ;;  %v5954_v28 = vld [vmem:[%s8677_s25 + $0xc40] sm:$0xf]  ;;  %v5956_v29 = vld [vmem:[%s8677_s25 + $0xc54] sm:$0xf] }
  0xd0   : > { %v5958_v30 = vld [vmem:[%s8677_s25 + $0xc68] sm:$0xf]  ;;  %5955 = vst [vmem:[%s8682_s26 + $0x740] sm:$0xf] %v5954_v28  ;;  %5957 = vst [vmem:[%s8682_s26 + $0x754] sm:$0xf] %v5956_v29 }
  0xd1   : > { %5959 = vst [vmem:[%s8682_s26 + $0x768] sm:$0xf] %v5958_v30  ;;  %v5960_v31 = vld [vmem:[%s8677_s25 + $0xc7c] sm:$0xf]  ;;  %v5962_v32 = vld [vmem:[%s8677_s25 + $0xf10] sm:$0xf] }
  0xd2   : > { %v5964_v33 = vld [vmem:[%s8677_s25 + $0xf24] sm:$0xf]  ;;  %5961 = vst [vmem:[%s8682_s26 + $0x77c] sm:$0xf] %v5960_v31  ;;  %5963 = vst [vmem:[%s8682_s26 + $0x790] sm:$0xf] %v5962_v32 }
  0xd3   : > { %5965 = vst [vmem:[%s8682_s26 + $0x7a4] sm:$0xf] %v5964_v33  ;;  %v5966_v34 = vld [vmem:[%s8677_s25 + $0xf38] sm:$0xf]  ;;  %v5968_v35 = vld [vmem:[%s8677_s25 + $0xf4c] sm:$0xf] }
  0xd4   : > { %v5970_v36 = vld [vmem:[%s8677_s25 + $0xf60] sm:$0xf]  ;;  %5967 = vst [vmem:[%s8682_s26 + $0x7b8] sm:$0xf] %v5966_v34  ;;  %5969 = vst [vmem:[%s8682_s26 + $0x7cc] sm:$0xf] %v5968_v35 }
  0xd5   : > { %5971 = vst [vmem:[%s8682_s26 + $0x7e0] sm:$0xf] %v5970_v36  ;;  %v5972_v37 = vld [vmem:[%s8677_s25 + $0xf74] sm:$0xf]  ;;  %v5974_v38 = vld [vmem:[%s8677_s25 + $0xf88] sm:$0xf] }
  0xd6   : > { %v5976_v39 = vld [vmem:[%s8677_s25 + $0xf9c] sm:$0xf]  ;;  %5973 = vst [vmem:[%s8682_s26 + $0x7f4] sm:$0xf] %v5972_v37  ;;  %5975 = vst [vmem:[%s8682_s26 + $0x808] sm:$0xf] %v5974_v38 }
  0xd7   : > { %5977 = vst [vmem:[%s8682_s26 + $0x81c] sm:$0xf] %v5976_v39  ;;  %v5978_v40 = vld [vmem:[%s8677_s25 + $0xfb0] sm:$0xf]  ;;  %v5980_v41 = vld [vmem:[%s8677_s25 + $0xfc4] sm:$0xf] }
  0xd8   : > { %v5982_v42 = vld [vmem:[%s8677_s25 + $0xfd8] sm:$0xf]  ;;  %5979 = vst [vmem:[%s8682_s26 + $0x830] sm:$0xf] %v5978_v40  ;;  %5981 = vst [vmem:[%s8682_s26 + $0x844] sm:$0xf] %v5980_v41 }
  0xd9   : > { %5983 = vst [vmem:[%s8682_s26 + $0x858] sm:$0xf] %v5982_v42  ;;  %v5984_v43 = vld [vmem:[%s8677_s25 + $0xfec] sm:$0xf]  ;;  %v5986_v44 = vld [vmem:[%s8677_s25 + $0x1000] sm:$0xf] }
  0xda   : > { %v5988_v45 = vld [vmem:[%s8677_s25 + $0x1014] sm:$0xf]  ;;  %5985 = vst [vmem:[%s8682_s26 + $0x86c] sm:$0xf] %v5984_v43  ;;  %5987 = vst [vmem:[%s8682_s26 + $0x880] sm:$0xf] %v5986_v44 }
  0xdb   : > { %5989 = vst [vmem:[%s8682_s26 + $0x894] sm:$0xf] %v5988_v45  ;;  %v5990_v46 = vld [vmem:[%s8677_s25 + $0x1028] sm:$0xf]  ;;  %v5992_v47 = vld [vmem:[%s8677_s25 + $0x103c] sm:$0xf] }
  0xdc   : > { %v5994_v48 = vld [vmem:[%s8677_s25 + $0x1050] sm:$0xf]  ;;  %5991 = vst [vmem:[%s8682_s26 + $0x8a8] sm:$0xf] %v5990_v46  ;;  %5993 = vst [vmem:[%s8682_s26 + $0x8bc] sm:$0xf] %v5992_v47 }
  0xdd   : > { %5995 = vst [vmem:[%s8682_s26 + $0x8d0] sm:$0xf] %v5994_v48  ;;  %v5996_v49 = vld [vmem:[%s8677_s25 + $0x1064] sm:$0xf]  ;;  %v5998_v50 = vld [vmem:[%s8677_s25 + $0x1078] sm:$0xf] }
  0xde   : > { %v6000_v51 = vld [vmem:[%s8677_s25 + $0x108c] sm:$0xf]  ;;  %5997 = vst [vmem:[%s8682_s26 + $0x8e4] sm:$0xf] %v5996_v49  ;;  %5999 = vst [vmem:[%s8682_s26 + $0x8f8] sm:$0xf] %v5998_v50 }
  0xdf   : > { %6001 = vst [vmem:[%s8682_s26 + $0x90c] sm:$0xf] %v6000_v51  ;;  %v6002_v52 = vld [vmem:[%s8677_s25 + $0x10a0] sm:$0xf]  ;;  %v6004_v53 = vld [vmem:[%s8677_s25 + $0x10b4] sm:$0xf] }
  0xe0   : > { %v6006_v54 = vld [vmem:[%s8677_s25 + $0x10c8] sm:$0xf]  ;;  %6003 = vst [vmem:[%s8682_s26 + $0x920] sm:$0xf] %v6002_v52  ;;  %6005 = vst [vmem:[%s8682_s26 + $0x934] sm:$0xf] %v6004_v53 }
  0xe1   : > { %6007 = vst [vmem:[%s8682_s26 + $0x948] sm:$0xf] %v6006_v54  ;;  %v6008_v55 = vld [vmem:[%s8677_s25 + $0x10dc] sm:$0xf]  ;;  %v6010_v56 = vld [vmem:[%s8677_s25 + $0x10f0] sm:$0xf] }
  0xe2   : > { %v6012_v57 = vld [vmem:[%s8677_s25 + $0x1104] sm:$0xf]  ;;  %6009 = vst [vmem:[%s8682_s26 + $0x95c] sm:$0xf] %v6008_v55  ;;  %6011 = vst [vmem:[%s8682_s26 + $0x970] sm:$0xf] %v6010_v56 }
  0xe3   : > { %6013 = vst [vmem:[%s8682_s26 + $0x984] sm:$0xf] %v6012_v57  ;;  %v6014_v58 = vld [vmem:[%s8677_s25 + $0x1118] sm:$0xf]  ;;  %v6016_v59 = vld [vmem:[%s8677_s25 + $0x112c] sm:$0xf] }
  0xe4   : > { %v6018_v60 = vld [vmem:[%s8677_s25 + $0x1140] sm:$0xf]  ;;  %6015 = vst [vmem:[%s8682_s26 + $0x998] sm:$0xf] %v6014_v58  ;;  %6017 = vst [vmem:[%s8682_s26 + $0x9ac] sm:$0xf] %v6016_v59 }
  0xe5   : > { %6019 = vst [vmem:[%s8682_s26 + $0x9c0] sm:$0xf] %v6018_v60  ;;  %v6020_v61 = vld [vmem:[%s8677_s25 + $0x1154] sm:$0xf]  ;;  %v6022_v62 = vld [vmem:[%s8677_s25 + $0x1168] sm:$0xf] }
  0xe6   : > { %v6024_v63 = vld [vmem:[%s8677_s25 + $0x117c] sm:$0xf]  ;;  %6021 = vst [vmem:[%s8682_s26 + $0x9d4] sm:$0xf] %v6020_v61  ;;  %6023 = vst [vmem:[%s8682_s26 + $0x9e8] sm:$0xf] %v6022_v62 }
  0xe7   : > { %6025 = vst [vmem:[%s8682_s26 + $0x9fc] sm:$0xf] %v6024_v63 }
  0xe8 PF: > { %p6026_p5 = scmp.ge.s32.totalorder %s8621_s14, 1  ;;  %p932_p6 = scmp.lt.s32.totalorder %s8621_s14, 3 }
  0xea   : > { %p933_p7 = pnand %p6026_p5, %p932_p6 }
  0xec   : > { %936 = sbr.rel (%p933_p7) target bundleno = 1139 (0x473), region = 54 }
  0xf3   : > { %v9454_v0 = vld [vmem:[%s11315_s1 + $0x40] sm:$0xff]   ;;  %v9475_v4 = vld [vmem:[%s11315_s1 + $0x48] sm:$0xff]   ;;  %v9493_v8 = vld [vmem:[%s11315_s1 + $0x50] sm:$0xff]   ;;  %s939_s4 = sand.u32 1, %s8613_s12   ;;  %vm1754_vm0 = vcmask 523264  }
  0xf4   : > { %v9459_v1 = vld [vmem:[%s11315_s1 + $0xc0] sm:$0xff]   ;;  %6899 = vmatprep.subr.bf16.mxu0 %v9454_v0  ;;  %v8067_v5 = vld [vmem:[%s11315_s1 + $0xc8] sm:$0xff]   ;;  %v8071_v9 = vld [vmem:[%s11315_s1 + $0xd0] sm:$0xff]   ;;  %s8037_s11 = smul.u32 2560, %s939_s4 }
  0xf5   : > { %v9465_v2 = vld [vmem:[%s11315_s1] sm:$0xff]   ;;  %7011 = vmatprep.subr.bf16.mxu1 %v9459_v1  ;;  %v9484_v6 = vld [vmem:[%s11315_s1 + $0x8] sm:$0xff]   ;;  %v9502_v10 = vld [vmem:[%s11315_s1 + $0x10] sm:$0xff]  }
  0xf6   : > { %v8065_v3 = vld [vmem:[%s11315_s1 + $0x80] sm:$0xff]   ;;  %6900 = vmatpush3.bf16.msra.mxu0 %v9465_v2  ;;  %v8069_v7 = vld [vmem:[%s11315_s1 + $0x88] sm:$0xff]   ;;  %v8073_v11 = vld [vmem:[%s11315_s1 + $0x90] sm:$0xff]   ;;  %s9599_s29 = scalar_lea.vmem [#allocation2], %s8037_s11 }
  0xf7   : > { %7012 = vmatpush3.bf16.msra.mxu1 %v8065_v3  ;;  %6901 = vmatprep.subr.bf16.mxu0 %v9475_v4  ;;  %v9511_v12 = vld [vmem:[%s11315_s1 + $0x58] sm:$0xff]   ;;  %v9529_v16 = vld [vmem:[%s11315_s1 + $0x60] sm:$0xff]   ;;  %v9547_v20 = vld [vmem:[%s11315_s1 + $0x68] sm:$0xff]  }
  0xf8   : > { %7013 = vmatprep.subr.bf16.mxu1 %v8067_v5  ;;  %v8075_v13 = vld [vmem:[%s11315_s1 + $0xd8] sm:$0xff]   ;;  %v8079_v17 = vld [vmem:[%s11315_s1 + $0xe0] sm:$0xff]   ;;  %v8083_v21 = vld [vmem:[%s11315_s1 + $0xe8] sm:$0xff]  }
  0xf9   : > { %v9520_v14 = vld [vmem:[%s11315_s1 + $0x18] sm:$0xff]   ;;  %v9538_v18 = vld [vmem:[%s11315_s1 + $0x20] sm:$0xff]   ;;  %v9556_v22 = vld [vmem:[%s11315_s1 + $0x28] sm:$0xff]  }
  0xfa   : > { %6902 = vmatpush3.bf16.msra.mxu0 %v9484_v6  ;;  %v8077_v15 = vld [vmem:[%s11315_s1 + $0x98] sm:$0xff]   ;;  %v8081_v19 = vld [vmem:[%s11315_s1 + $0xa0] sm:$0xff]   ;;  %v8085_v23 = vld [vmem:[%s11315_s1 + $0xa8] sm:$0xff]  }
  0xfb   : > { %7014 = vmatpush3.bf16.msra.mxu1 %v8069_v7  ;;  %6903 = vmatprep.subr.bf16.mxu0 %v9493_v8  ;;  %v9566_v24 = vld [vmem:[%s11315_s1 + $0x70] sm:$0xff]   ;;  %v9584_v28 = vld [vmem:[%s11315_s1 + $0x78] sm:$0xff]   ;;  %v8099_v35 = vld [vmem:[%s9599_s29 + $0xc] ss:$20 sps:$4 sm:$0xff]  }
  0xfc   : > { %7015 = vmatprep.subr.bf16.mxu1 %v8071_v9  ;;  %v8087_v25 = vld [vmem:[%s11315_s1 + $0xf0] sm:$0xff]   ;;  %v8091_v29 = vld [vmem:[%s11315_s1 + $0xf8] sm:$0xff]   ;;  %v9609_v36 = vld [vmem:[%s11315_s1 + $0x100] sm:$0xff]   ;;  %1996 = vmatprep.mubr.bf16.mxu1 %v8099_v35 }
  0xfd   : > { %v9575_v26 = vld [vmem:[%s11315_s1 + $0x30] sm:$0xff]   ;;  %v9593_v30 = vld [vmem:[%s11315_s1 + $0x38] sm:$0xff]   ;;  %v8101_v37 = vld [vmem:[%s9599_s29 + $0x2c] ss:$20 sps:$4 sm:$0xff]  }
  0xfe   : > { %6904 = vmatpush3.bf16.msra.mxu0 %v9502_v10  ;;  %v8089_v27 = vld [vmem:[%s11315_s1 + $0xb0] sm:$0xff]   ;;  %v8093_v31 = vld [vmem:[%s11315_s1 + $0xb8] sm:$0xff]   ;;  %v9627_v43 = vld [vmem:[%s11315_s1 + $0x108] sm:$0xff]  }
  0xff   : > { %7016 = vmatpush3.bf16.msra.mxu1 %v8073_v11  ;;  %6905 = vmatprep.subr.bf16.mxu0 %v9511_v12  ;;  %v8094_v32 = vld [vmem:[%s9599_s29] ss:$20 sps:$4 sm:$0xff]   ;;  %v8096_v33 = vld [vmem:[%s9599_s29 + $0x4] ss:$20 sps:$4 sm:$0xff]   ;;  %v8097_v34 = vld [vmem:[%s9599_s29 + $0x8] ss:$20 sps:$4 sm:$0xff]  }
 0x100   : > { %7017 = vmatprep.subr.bf16.mxu1 %v8075_v13  ;;  %1835 = vmatprep.mubr.bf16.mxu0 %v8096_v33  ;;  %v8103_v38 = vld [vmem:[%s9599_s29 + $0x34] ss:$20 sps:$4 sm:$0xff]   ;;  %v8106_v40 = vld [vmem:[%s9599_s29 + $0x30] ss:$20 sps:$4 sm:$0xff]   ;;  %v8112_v45 = vld [vmem:[%s9599_s29 + $0x58] ss:$20 sps:$4 sm:$0xff]  }
 0x101   : > { %v8105_v39 = vld [vmem:[%s9599_s29 + $0x28] ss:$20 sps:$4 sm:$0xff]   ;;  %v8111_v44 = vld [vmem:[%s9599_s29 + $0x50] ss:$20 sps:$4 sm:$0xff]   ;;  %v8117_v48 = vld [vmem:[%s9599_s29 + $0x78] ss:$20 sps:$4 sm:$0xff]  }
 0x102   : > { %6906 = vmatpush3.bf16.msra.mxu0 %v9520_v14  ;;  %v8107_v41 = vld [vmem:[%s9599_s29 + $0x54] ss:$20 sps:$4 sm:$0xff]   ;;  %v8109_v42 = vld [vmem:[%s9599_s29 + $0x5c] ss:$20 sps:$4 sm:$0xff]   ;;  %v8115_v47 = vld [vmem:[%s9599_s29 + $0x84] ss:$20 sps:$4 sm:$0xff]  }
 0x103   : > { %7018 = vmatpush3.bf16.msra.mxu1 %v8077_v15  ;;  %6907 = vmatprep.subr.bf16.mxu0 %v9529_v16  ;;  %v8113_v46 = vld [vmem:[%s9599_s29 + $0x7c] ss:$20 sps:$4 sm:$0xff]   ;;  %v8118_v49 = vld [vmem:[%s9599_s29 + $0x80] ss:$20 sps:$4 sm:$0xff]   ;;  %v8119_v50 = vld [vmem:[%s9599_s29 + $0xa4] ss:$20 sps:$4 sm:$0xff]  }
 0x104   : > { %7019 = vmatprep.subr.bf16.mxu1 %v8079_v17  ;;  %v8121_v51 = vld [vmem:[%s9599_s29 + $0xac] ss:$20 sps:$4 sm:$0xff]   ;;  %v9647_v52 = vld [vmem:[%s11315_s1 + $0x110] sm:$0xff]   ;;  %v8124_v54 = vld [vmem:[%s9599_s29 + $0xa8] ss:$20 sps:$4 sm:$0xff]  }
 0x105   : > { %v8123_v53 = vld [vmem:[%s9599_s29 + $0xa0] ss:$20 sps:$4 sm:$0xff]   ;;  %v9664_v57 = vld [vmem:[%s11315_s1 + $0x118] sm:$0xff]   ;;  %v8131_v59 = vld [vmem:[%s9599_s29 + $0xd0] ss:$20 sps:$4 sm:$0xff]  }
 0x106   : > { %6908 = vmatpush3.bf16.msra.mxu0 %v9538_v18  ;;  %v8126_v55 = vld [vmem:[%s9599_s29 + $0xcc] ss:$20 sps:$4 sm:$0xff]   ;;  %v8128_v56 = vld [vmem:[%s9599_s29 + $0xd4] ss:$20 sps:$4 sm:$0xff]   ;;  %v8134_v61 = vld [vmem:[%s9599_s29 + $0xfc] ss:$20 sps:$4 sm:$0xff]  }
 0x107   : > { %7020 = vmatpush3.bf16.msra.mxu1 %v8081_v19  ;;  %6909 = vmatprep.subr.bf16.mxu0 %v9547_v20  ;;  %v8130_v58 = vld [vmem:[%s9599_s29 + $0xc8] ss:$20 sps:$4 sm:$0xff]   ;;  %v8136_v62 = vld [vmem:[%s9599_s29 + $0xf0] ss:$20 sps:$4 sm:$0xff]   ;;  %v8137_v63 = vld [vmem:[%s9599_s29 + $0xf8] ss:$20 sps:$4 sm:$0xff]  }
 0x108   : > { %7021 = vmatprep.subr.bf16.mxu1 %v8083_v21  ;;  %v8132_v60 = vld [vmem:[%s9599_s29 + $0xf4] ss:$20 sps:$4 sm:$0xff]   ;;  %v8142_v3 = vld [vmem:[%s9599_s29 + $0x118] ss:$20 sps:$4 sm:$0xff]   ;;  %v8156_v11 = vld [vmem:[%s9599_s29 + $0x170] ss:$20 sps:$4 sm:$0xff]  }
 0x109   : > { %v8146_v5 = vld [vmem:[%s9599_s29 + $0x14c] ss:$20 sps:$4 sm:$0xff]   ;;  %v8149_v7 = vld [vmem:[%s9599_s29 + $0x148] ss:$20 sps:$4 sm:$0xff]   ;;  %v8165_v17 = vld [vmem:[%s9599_s29 + $0x1c4] ss:$20 sps:$4 sm:$0xff]  }
 0x10a   : > { %6910 = vmatpush3.bf16.msra.mxu0 %v9556_v22  ;;  %v8153_v9 = vld [vmem:[%s9599_s29 + $0x174] ss:$20 sps:$4 sm:$0xff]   ;;  %v8159_v13 = vld [vmem:[%s9599_s29 + $0x19c] ss:$20 sps:$4 sm:$0xff]   ;;  %v8162_v15 = vld [vmem:[%s9599_s29 + $0x198] ss:$20 sps:$4 sm:$0xff]  }
 0x10b   : > { %7022 = vmatpush3.bf16.msra.mxu1 %v8085_v23  ;;  %6911 = vmatprep.subr.bf16.mxu0 %v9566_v24  ;;  %v8168_v19 = vld [vmem:[%s9599_s29 + $0x1c0] ss:$20 sps:$4 sm:$0xff]   ;;  %v8174_v23 = vld [vmem:[%s9599_s29 + $0x1e8] ss:$20 sps:$4 sm:$0xff]   ;;  %v8190_v33 = vld [vmem:[%s9599_s29 + $0x264] ss:$20 sps:$4 sm:$0xff]  }
 0x10c   : > { %7023 = vmatprep.subr.bf16.mxu1 %v8087_v25  ;;  %v8171_v21 = vld [vmem:[%s9599_s29 + $0x1ec] ss:$20 sps:$4 sm:$0xff]   ;;  %v8178_v25 = vld [vmem:[%s9599_s29 + $0x214] ss:$20 sps:$4 sm:$0xff]  }
 0x10d   : > { %v8193_v35 = vld [vmem:[%s9599_s29 + $0x260] ss:$20 sps:$4 sm:$0xff]  }
 0x10e   : > { %6912 = vmatpush3.bf16.msra.mxu0 %v9575_v26 }
 0x10f   : > { %7024 = vmatpush3.bf16.msra.mxu1 %v8089_v27  ;;  %6913 = vmatprep.subr.bf16.mxu0 %v9584_v28  ;;  %v8181_v27 = vld [vmem:[%s9599_s29 + $0x210] ss:$20 sps:$4 sm:$0xff]  }
 0x110   : > { %7025 = vmatprep.subr.bf16.mxu1 %v8091_v29  ;;  %v8184_v29 = vld [vmem:[%s9599_s29 + $0x23c] ss:$20 sps:$4 sm:$0xff]  }
 0x112   : > { %6914 = vmatpush3.bf16.msra.mxu0 %v9593_v30 }
 0x113   : > { %7026 = vmatpush3.bf16.msra.mxu1 %v8093_v31  ;;  %7875 = vmatprep.subr.bf16.mxu0 %v9609_v36  ;;  %v8187_v31 = vld [vmem:[%s9599_s29 + $0x238] ss:$20 sps:$4 sm:$0xff]  }
 0x114   : > { %7143 = vmatprep.subr.bf16.mxu1 %v9454_v0  ;;  %v8138_v0 = vld [vmem:[%s9599_s29 + $0x11c] ss:$20 sps:$4 sm:$0xff]  }
 0x115   : > { %1836 = vmatmul.mubr.bf16.vlgmr.msra.gmra.mrb[0].mxu0 %v8094_v32  ;;  %v8188_v32 = vld [vmem:[%s9599_s29 + $0x25c] ss:$20 sps:$4 sm:$0xff]  }
 0x116   : > { %1997 = vmatmul.mubr.bf16.vlgmr.msra.gmra.mrb[0].mxu1 %v8097_v34  ;;  %7876 = vmatpush3.bf16.msra.mxu0 %v9609_v36  ;;  %v8192_v34 = vld [vmem:[%s9599_s29 + $0x258] ss:$20 sps:$4 sm:$0xff]  }
 0x117   : > { %7144 = vmatpush3.bf16.msra.mxu1 %v9465_v2  ;;  %1843 = vmatprep.mubr.bf16.mxu0 %v8101_v37  ;;  %v8140_v2 = vld [vmem:[%s9599_s29 + $0x124] ss:$20 sps:$4 sm:$0xff]  }
 0x118   : > { %2004 = vmatprep.mubr.bf16.mxu1 %v8103_v38  ;;  %7145 = vmatprep.subr.bf16.mxu1 %v9475_v4  ;;  %v8144_v4 = vld [vmem:[%s9599_s29 + $0x144] ss:$20 sps:$4 sm:$0xff]  }
 0x119   : > { %7877 = vmatprep.subr.bf16.mxu0 %v9627_v43  ;;  %v8194_v37 = vld [vmem:[%s9599_s29 + $0x10] ss:$20 sps:$4 sm:$0xff]  }
 0x11a   : > { %7878 = vmatpush3.bf16.msra.mxu0 %v9627_v43  ;;  %v8197_v38 = vld [vmem:[%s9599_s29 + $0x284] ss:$20 sps:$4 sm:$0xff]  }
 0x11b   : > { %7146 = vmatpush3.bf16.msra.mxu1 %v9484_v6  ;;  %7879 = vmatprep.subr.bf16.mxu0 %v9647_v52  ;;  %v8148_v6 = vld [vmem:[%s9599_s29 + $0x140] ss:$20 sps:$4 sm:$0xff]  }
 0x11c   : > { %7147 = vmatprep.subr.bf16.mxu1 %v9493_v8  ;;  %v8151_v8 = vld [vmem:[%s9599_s29 + $0x16c] ss:$20 sps:$4 sm:$0xff]  }
 0x11d   : > { %1844 = vmatmul.mubr.bf16.gmra.mrb[4].mxu0 %v8105_v39  ;;  %v8198_v39 = vld [vmem:[%s9599_s29 + $0x38] ss:$20 sps:$4 sm:$0xff]  }
 0x11e   : > { %2005 = vmatmul.mubr.bf16.gmra.mrb[4].mxu1 %v8106_v40  ;;  %1851 = vmatprep.mubr.bf16.mxu0 %v8107_v41  ;;  %v8195_v40 = vld [vmem:[%s9599_s29 + $0x280] ss:$20 sps:$4 sm:$0xff]  }
 0x11f   : > { %2012 = vmatprep.mubr.bf16.mxu1 %v8109_v42  ;;  %7148 = vmatpush3.bf16.msra.mxu1 %v9502_v10  ;;  %v8155_v10 = vld [vmem:[%s9599_s29 + $0x168] ss:$20 sps:$4 sm:$0xff]   ;;  %v8199_v41 = vld [vmem:[%s9599_s29 + $0x60] ss:$20 sps:$4 sm:$0xff]  }
 0x120   : > { %7149 = vmatprep.subr.bf16.mxu1 %v9511_v12  ;;  %7880 = vmatpush3.bf16.msra.mxu0 %v9647_v52  ;;  %v8157_v12 = vld [vmem:[%s9599_s29 + $0x194] ss:$20 sps:$4 sm:$0xff]   ;;  %v8200_v42 = vld [vmem:[%s9599_s29 + $0x2ac] ss:$20 sps:$4 sm:$0xff]  }
 0x121   : > { %7881 = vmatprep.subr.bf16.mxu0 %v9664_v57 }
 0x123   : > { %7150 = vmatpush3.bf16.msra.mxu1 %v9520_v14  ;;  %v8161_v14 = vld [vmem:[%s9599_s29 + $0x190] ss:$20 sps:$4 sm:$0xff]  }
 0x124   : > { %7151 = vmatprep.subr.bf16.mxu1 %v9529_v16  ;;  %7882 = vmatpush3.bf16.msra.mxu0 %v9664_v57  ;;  %v8163_v16 = vld [vmem:[%s9599_s29 + $0x1bc] ss:$20 sps:$4 sm:$0xff]  }
 0x125   : > { %1852 = vmatmul.mubr.bf16.gmra.mrb[8].mxu0 %v8111_v44  ;;  %7255 = vmatprep.subr.bf16.mxu0 %v9459_v1  ;;  %v8143_v1 = vld [vmem:[%s9599_s29 + $0x120] ss:$20 sps:$4 sm:$0xff]  }
 0x126   : > { %2013 = vmatmul.mubr.bf16.gmra.mrb[8].mxu1 %v8112_v45  ;;  %1859 = vmatprep.mubr.bf16.mxu0 %v8113_v46  ;;  %v9722_v44 = vld [vmem:[%s11315_s1 + $0x80] sm:$0xff]   ;;  %v8202_v45 = vld [vmem:[%s9599_s29 + $0x88] ss:$20 sps:$4 sm:$0xff]  }
 0x127   : > { %2020 = vmatprep.mubr.bf16.mxu1 %v8115_v47  ;;  %7152 = vmatpush3.bf16.msra.mxu1 %v9538_v18  ;;  %v8167_v18 = vld [vmem:[%s9599_s29 + $0x1b8] ss:$20 sps:$4 sm:$0xff]   ;;  %v8203_v46 = vld [vmem:[%s9599_s29 + $0x2a8] ss:$20 sps:$4 sm:$0xff]  }
 0x128   : > { %7153 = vmatprep.subr.bf16.mxu1 %v9547_v20  ;;  %v8169_v20 = vld [vmem:[%s9599_s29 + $0x1e4] ss:$20 sps:$4 sm:$0xff]   ;;  %v9732_v47 = vld [vmem:[%s11315_s1 + $0xc8] sm:$0xff]  }
 0x12b   : > { %7154 = vmatpush3.bf16.msra.mxu1 %v9556_v22  ;;  %v8173_v22 = vld [vmem:[%s9599_s29 + $0x1e0] ss:$20 sps:$4 sm:$0xff]  }
 0x12c   : > { %7155 = vmatprep.subr.bf16.mxu1 %v9566_v24  ;;  %v8176_v24 = vld [vmem:[%s9599_s29 + $0x20c] ss:$20 sps:$4 sm:$0xff]  }
 0x12d   : > { %1860 = vmatmul.mubr.bf16.gmra.mrb[12].mxu0 %v8117_v48  ;;  %v8204_v48 = vld [vmem:[%s9599_s29 + $0xb0] ss:$20 sps:$4 sm:$0xff]  }
 0x12e   : > { %2021 = vmatmul.mubr.bf16.gmra.mrb[12].mxu1 %v8118_v49  ;;  %1867 = vmatprep.mubr.bf16.mxu0 %v8119_v50  ;;  %v8205_v49 = vld [vmem:[%s9599_s29 + $0x2d4] ss:$20 sps:$4 sm:$0xff]  }
 0x12f   : > { %2028 = vmatprep.mubr.bf16.mxu1 %v8121_v51  ;;  %7156 = vmatpush3.bf16.msra.mxu1 %v9575_v26  ;;  %v8180_v26 = vld [vmem:[%s9599_s29 + $0x208] ss:$20 sps:$4 sm:$0xff]   ;;  %v9747_v50 = vld [vmem:[%s11315_s1 + $0xd0] sm:$0xff]   ;;  %v8207_v51 = vld [vmem:[%s9599_s29 + $0xd8] ss:$20 sps:$4 sm:$0xff]  }
 0x130   : > { %7157 = vmatprep.subr.bf16.mxu1 %v9584_v28  ;;  %v8182_v28 = vld [vmem:[%s9599_s29 + $0x234] ss:$20 sps:$4 sm:$0xff]  }
 0x133   : > { %7158 = vmatpush3.bf16.msra.mxu1 %v9593_v30  ;;  %v8186_v30 = vld [vmem:[%s9599_s29 + $0x230] ss:$20 sps:$4 sm:$0xff]  }
 0x134   : > { %7915 = vmatprep.subr.bf16.mxu1 %v9609_v36 }
 0x135   : > { %1868 = vmatmul.mubr.bf16.gmra.mrb[16].mxu0 %v8123_v53  ;;  %v9758_v53 = vld [vmem:[%s11315_s1 + $0x90] sm:$0xff]  }
 0x136   : > { %2029 = vmatmul.mubr.bf16.gmra.mrb[16].mxu1 %v8124_v54  ;;  %1875 = vmatprep.mubr.bf16.mxu0 %v8126_v55  ;;  %v8208_v54 = vld [vmem:[%s9599_s29 + $0x2d0] ss:$20 sps:$4 sm:$0xff]   ;;  %v8209_v55 = vld [vmem:[%s9599_s29 + $0x100] ss:$20 sps:$4 sm:$0xff]  }
 0x137   : > { %2036 = vmatprep.mubr.bf16.mxu1 %v8128_v56  ;;  %v8210_v56 = vld [vmem:[%s9599_s29 + $0x2fc] ss:$20 sps:$4 sm:$0xff]  }
 0x13d   : > { %1876 = vmatmul.mubr.bf16.gmra.mrb[20].mxu0 %v8130_v58  ;;  %v9775_v58 = vld [vmem:[%s11315_s1 + $0x98] sm:$0xff]  }
 0x13e   : > { %2037 = vmatmul.mubr.bf16.gmra.mrb[20].mxu1 %v8131_v59  ;;  %1883 = vmatprep.mubr.bf16.mxu0 %v8132_v60  ;;  %v9781_v59 = vld [vmem:[%s11315_s1 + $0xe0] sm:$0xff]   ;;  %v8212_v60 = vld [vmem:[%s9599_s29 + $0x128] ss:$20 sps:$4 sm:$0xff]  }
 0x13f   : > { %2044 = vmatprep.mubr.bf16.mxu1 %v8134_v61  ;;  %v9794_v61 = vld [vmem:[%s11315_s1 + $0xa0] sm:$0xff]  }
 0x145   : > { %1884 = vmatmul.mubr.bf16.gmra.mrb[24].mxu0 %v8136_v62  ;;  %v8214_v62 = vld [vmem:[%s9599_s29 + $0x150] ss:$20 sps:$4 sm:$0xff]  }
 0x146   : > { %2045 = vmatmul.mubr.bf16.gmra.mrb[24].mxu1 %v8137_v63  ;;  %1891 = vmatprep.mubr.bf16.mxu0 %v8138_v0  ;;  %v9802_v63 = vld [vmem:[%s11315_s1 + $0xe8] sm:$0xff]   ;;  %v8215_v0 = vld [vmem:[%s9599_s29 + $0x324] ss:$20 sps:$4 sm:$0xff]  }
 0x147   : > { %2052 = vmatprep.mubr.bf16.mxu1 %v8140_v2  ;;  %v9809_v2 = vld [vmem:[%s11315_s1 + $0xa8] sm:$0xff]  }
 0x14d   : > { %1892 = vmatmul.mubr.bf16.gmra.mrb[28].mxu0 %v8142_v3  ;;  %v9815_v3 = vld [vmem:[%s11315_s1 + $0xf0] sm:$0xff]  }
 0x14e   : > { %2053 = vmatmul.mubr.bf16.gmra.mrb[28].mxu1 %v8143_v1  ;;  %1899 = vmatprep.mubr.bf16.mxu0 %v8144_v4  ;;  %v8217_v1 = vld [vmem:[%s9599_s29 + $0x178] ss:$20 sps:$4 sm:$0xff]   ;;  %v9824_v4 = vld [vmem:[%s11315_s1 + $0xb0] sm:$0xff]  }
 0x14f   : > { %2060 = vmatprep.mubr.bf16.mxu1 %v8146_v5  ;;  %v8218_v5 = vld [vmem:[%s9599_s29 + $0x320] ss:$20 sps:$4 sm:$0xff]  }
 0x155   : > { %1900 = vmatmul.mubr.bf16.gmra.mrb[32].mxu0 %v8148_v6  ;;  %v8219_v6 = vld [vmem:[%s9599_s29 + $0x1a0] ss:$20 sps:$4 sm:$0xff]  }
 0x156   : > { %2061 = vmatmul.mubr.bf16.gmra.mrb[32].mxu1 %v8149_v7  ;;  %1907 = vmatprep.mubr.bf16.mxu0 %v8151_v8  ;;  %v9832_v7 = vld [vmem:[%s11315_s1 + $0xf8] sm:$0xff]   ;;  %v8220_v8 = vld [vmem:[%s9599_s29 + $0x34c] ss:$20 sps:$4 sm:$0xff]  }
 0x157   : > { %2068 = vmatprep.mubr.bf16.mxu1 %v8153_v9  ;;  %v9839_v9 = vld [vmem:[%s11315_s1 + $0xb8] sm:$0xff]  }
 0x15d   : > { %1908 = vmatmul.mubr.bf16.gmra.mrb[36].mxu0 %v8155_v10  ;;  %v9845_v10 = vld [vmem:[%s11315_s1 + $0x40] sm:$0xff]  }
 0x15e   : > { %2069 = vmatmul.mubr.bf16.gmra.mrb[36].mxu1 %v8156_v11  ;;  %1915 = vmatprep.mubr.bf16.mxu0 %v8157_v12  ;;  %v8222_v11 = vld [vmem:[%s9599_s29 + $0x1c8] ss:$20 sps:$4 sm:$0xff]  }
 0x15f   : > { %2076 = vmatprep.mubr.bf16.mxu1 %v8159_v13  ;;  %v8223_v12 = vld [vmem:[%s9599_s29 + $0x348] ss:$20 sps:$4 sm:$0xff]   ;;  %v8224_v13 = vld [vmem:[%s9599_s29 + $0x1f0] ss:$20 sps:$4 sm:$0xff]  }
 0x165   : > { %1916 = vmatmul.mubr.bf16.gmra.mrb[40].mxu0 %v8161_v14  ;;  %v8225_v14 = vld [vmem:[%s9599_s29 + $0x374] ss:$20 sps:$4 sm:$0xff]  }
 0x166   : > { %2077 = vmatmul.mubr.bf16.gmra.mrb[40].mxu1 %v8162_v15  ;;  %1923 = vmatprep.mubr.bf16.mxu0 %v8163_v16  ;;  %v8227_v15 = vld [vmem:[%s9599_s29 + $0x218] ss:$20 sps:$4 sm:$0xff]   ;;  %v8228_v16 = vld [vmem:[%s9599_s29 + $0x370] ss:$20 sps:$4 sm:$0xff]  }
 0x167   : > { %2084 = vmatprep.mubr.bf16.mxu1 %v8165_v17  ;;  %v8229_v17 = vld [vmem:[%s9599_s29 + $0x240] ss:$20 sps:$4 sm:$0xff]  }
 0x16d   : > { %1924 = vmatmul.mubr.bf16.gmra.mrb[44].mxu0 %v8167_v18  ;;  %v8230_v18 = vld [vmem:[%s9599_s29 + $0x39c] ss:$20 sps:$4 sm:$0xff]  }
 0x16e   : > { %2085 = vmatmul.mubr.bf16.gmra.mrb[44].mxu1 %v8168_v19  ;;  %1931 = vmatprep.mubr.bf16.mxu0 %v8169_v20  ;;  %v8232_v19 = vld [vmem:[%s9599_s29 + $0x268] ss:$20 sps:$4 sm:$0xff]   ;;  %v8233_v20 = vld [vmem:[%s9599_s29 + $0x398] ss:$20 sps:$4 sm:$0xff]  }
 0x16f   : > { %2092 = vmatprep.mubr.bf16.mxu1 %v8171_v21  ;;  %v8238_v21 = vld [vmem:[%s9599_s29 + $0x28c] ss:$20 sps:$4 sm:$0xff]  }
 0x175   : > { %1932 = vmatmul.mubr.bf16.gmra.mrb[48].mxu0 %v8173_v22  ;;  %v8234_v22 = vld [vmem:[%s9599_s29 + $0x3c4] ss:$20 sps:$4 sm:$0xff]  }
 0x176   : > { %2093 = vmatmul.mubr.bf16.gmra.mrb[48].mxu1 %v8174_v23  ;;  %1939 = vmatprep.mubr.bf16.mxu0 %v8176_v24  ;;  %v8236_v23 = vld [vmem:[%s9599_s29 + $0x288] ss:$20 sps:$4 sm:$0xff]   ;;  %v8239_v24 = vld [vmem:[%s9599_s29 + $0x3c0] ss:$20 sps:$4 sm:$0xff]  }
 0x177   : > { %2100 = vmatprep.mubr.bf16.mxu1 %v8178_v25  ;;  %v8240_v25 = vld [vmem:[%s9599_s29 + $0x3ec] ss:$20 sps:$4 sm:$0xff]  }
 0x17d   : > { %1940 = vmatmul.mubr.bf16.gmra.mrb[52].mxu0 %v8180_v26  ;;  %v8242_v26 = vld [vmem:[%s9599_s29 + $0x2b4] ss:$20 sps:$4 sm:$0xff]  }
 0x17e   : > { %2101 = vmatmul.mubr.bf16.gmra.mrb[52].mxu1 %v8181_v27  ;;  %1947 = vmatprep.mubr.bf16.mxu0 %v8182_v28  ;;  %v9874_v27 = vld [vmem:[%s11315_s1] sm:$0xff]   ;;  %v9880_v28 = vld [vmem:[%s11315_s1 + $0x48] sm:$0xff]  }
 0x17f   : > { %2108 = vmatprep.mubr.bf16.mxu1 %v8184_v29  ;;  %v8245_v29 = vld [vmem:[%s9599_s29 + $0x2b0] ss:$20 sps:$4 sm:$0xff]  }
 0x185   : > { %1948 = vmatmul.mubr.bf16.gmra.mrb[56].mxu0 %v8186_v30  ;;  %v8244_v30 = vld [vmem:[%s9599_s29 + $0x3e8] ss:$20 sps:$4 sm:$0xff]  }
 0x186   : > { %2109 = vmatmul.mubr.bf16.gmra.mrb[56].mxu1 %v8187_v31  ;;  %1955 = vmatprep.mubr.bf16.mxu0 %v8188_v32  ;;  %v8248_v31 = vld [vmem:[%s9599_s29 + $0x2dc] ss:$20 sps:$4 sm:$0xff]   ;;  %v9889_v32 = vld [vmem:[%s11315_s1 + $0x8] sm:$0xff]  }
 0x187   : > { %2116 = vmatprep.mubr.bf16.mxu1 %v8190_v33  ;;  %v8246_v33 = vld [vmem:[%s9599_s29 + $0x414] ss:$20 sps:$4 sm:$0xff]  }
 0x18d   : > { %1956 = vmatmul.mubr.bf16.gmra.mrb[60].mxu0 %v8192_v34  ;;  %v9896_v34 = vld [vmem:[%s11315_s1 + $0x50] sm:$0xff]  }
 0x18e   : > { %2117 = vmatmul.mubr.bf16.gmra.mrb[60].mxu1 %v8193_v35  ;;  %7883 = vmatprep.mubr.msk.bf16.mxu0 %vm1754_vm0, %v8194_v37  ;;  %v9902_v35 = vld [vmem:[%s11315_s1 + $0x10] sm:$0xff]   ;;  %v9908_v37 = vld [vmem:[%s11315_s1 + $0x58] sm:$0xff]  }
 0x18f   : > { %2863 = vmatprep.mubr.bf16.mxu1 %v8197_v38  ;;  %v8251_v38 = vld [vmem:[%s9599_s29 + $0x2d8] ss:$20 sps:$4 sm:$0xff]  }
 0x195   : > { %7884 = vmatmul.mubr.msk.bf16.vlgmr.msra.gmra.mrb[64].mxu0 %vm1754_vm0, %v8198_v39  ;;  %v8250_v39 = vld [vmem:[%s9599_s29 + $0x410] ss:$20 sps:$4 sm:$0xff]  }
 0x196   : > { %2864 = vmatmul.mubr.bf16.vlgmr.msra.gmra.mrb[64].mxu1 %v8195_v40  ;;  %7256 = vmatpush3.bf16.msra.mxu0 %v9722_v44  ;;  %v8254_v40 = vld [vmem:[%s9599_s29 + $0x304] ss:$20 sps:$4 sm:$0xff]  }
 0x197   : > { %7916 = vmatpush3.bf16.msra.mxu1 %v9609_v36  ;;  %7887 = vmatprep.mubr.msk.bf16.mxu0 %vm1754_vm0, %v8199_v41  ;;  %v9740_v36 = vld [vmem:[%s11315_s1 + $0x88] sm:$0xff]   ;;  %v8252_v41 = vld [vmem:[%s9599_s29 + $0x43c] ss:$20 sps:$4 sm:$0xff]  }
 0x198   : > { %2871 = vmatprep.mubr.bf16.mxu1 %v8200_v42  ;;  %7257 = vmatprep.subr.bf16.mxu0 %v9732_v47  ;;  %v9918_v42 = vld [vmem:[%s11315_s1 + $0x18] sm:$0xff]  }
 0x199   : > { %7917 = vmatprep.subr.bf16.mxu1 %v9627_v43 }
 0x19a   : > { %7258 = vmatpush3.bf16.msra.mxu0 %v9740_v36 }
 0x19b   : > { %7259 = vmatprep.subr.bf16.mxu0 %v9747_v50  ;;  %7918 = vmatpush3.bf16.msra.mxu1 %v9627_v43  ;;  %v9766_v43 = vld [vmem:[%s11315_s1 + $0xd8] sm:$0xff]  }
 0x19c   : > { %7919 = vmatprep.subr.bf16.mxu1 %v9647_v52 }
 0x19d   : > { %7888 = vmatmul.mubr.msk.bf16.gmra.mrb[68].mxu0 %vm1754_vm0, %v8202_v45  ;;  %v9924_v45 = vld [vmem:[%s11315_s1 + $0x60] sm:$0xff]  }
 0x19e   : > { %2872 = vmatmul.mubr.bf16.gmra.mrb[68].mxu1 %v8203_v46  ;;  %7891 = vmatprep.mubr.msk.bf16.mxu0 %vm1754_vm0, %v8204_v48  ;;  %v9930_v46 = vld [vmem:[%s11315_s1 + $0x20] sm:$0xff]  }
 0x19f   : > { %2879 = vmatprep.mubr.bf16.mxu1 %v8205_v49  ;;  %7260 = vmatpush3.bf16.msra.mxu0 %v9758_v53  ;;  %v9936_v49 = vld [vmem:[%s11315_s1 + $0x68] sm:$0xff]  }
 0x1a0   : > { %7261 = vmatprep.subr.bf16.mxu0 %v9766_v43  ;;  %7920 = vmatpush3.bf16.msra.mxu1 %v9647_v52  ;;  %v8554_v52 = vld [vmem:[%s11315_s1 + $0xc0] sm:$0xff]  }
 0x1a1   : > { %7921 = vmatprep.subr.bf16.mxu1 %v9664_v57 }
 0x1a3   : > { %7262 = vmatpush3.bf16.msra.mxu0 %v9775_v58 }
 0x1a4   : > { %7263 = vmatprep.subr.bf16.mxu0 %v9781_v59  ;;  %7922 = vmatpush3.bf16.msra.mxu1 %v9664_v57  ;;  %v8213_v57 = vld [vmem:[%s9599_s29 + $0x2f8] ss:$20 sps:$4 sm:$0xff]  }
 0x1a5   : > { %7892 = vmatmul.mubr.msk.bf16.gmra.mrb[72].mxu0 %vm1754_vm0, %v8207_v51  ;;  %7499 = vmatprep.subr.bf16.mxu1 %v8554_v52 }
 0x1a6   : > { %2880 = vmatmul.mubr.bf16.gmra.mrb[72].mxu1 %v8208_v54  ;;  %7895 = vmatprep.mubr.msk.bf16.mxu0 %vm1754_vm0, %v8209_v55  ;;  %v8257_v55 = vld [vmem:[%s9599_s29 + $0x300] ss:$20 sps:$4 sm:$0xff]  }
 0x1a7   : > { %2887 = vmatprep.mubr.bf16.mxu1 %v8210_v56  ;;  %7264 = vmatpush3.bf16.msra.mxu0 %v9794_v61 }
 0x1a8   : > { %7265 = vmatprep.subr.bf16.mxu0 %v9802_v63 }
 0x1ab   : > { %7266 = vmatpush3.bf16.msra.mxu0 %v9809_v2 }
 0x1ac   : > { %7267 = vmatprep.subr.bf16.mxu0 %v9815_v3 }
 0x1ad   : > { %7896 = vmatmul.mubr.msk.bf16.gmra.mrb[76].mxu0 %vm1754_vm0, %v8212_v60 }
 0x1ae   : > { %2888 = vmatmul.mubr.bf16.gmra.mrb[76].mxu1 %v8213_v57  ;;  %7899 = vmatprep.mubr.msk.bf16.mxu0 %vm1754_vm0, %v8214_v62  ;;  %v8256_v57 = vld [vmem:[%s9599_s29 + $0x438] ss:$20 sps:$4 sm:$0xff]  }
 0x1af   : > { %2895 = vmatprep.mubr.bf16.mxu1 %v8215_v0  ;;  %7268 = vmatpush3.bf16.msra.mxu0 %v9824_v4  ;;  %v8260_v62 = vld [vmem:[%s9599_s29 + $0x32c] ss:$20 sps:$4 sm:$0xff]  }
 0x1b0   : > { %7269 = vmatprep.subr.bf16.mxu0 %v9832_v7 }
 0x1b3   : > { %7270 = vmatpush3.bf16.msra.mxu0 %v9839_v9 }
 0x1b4   : > { %7387 = vmatprep.subr.bf16.mxu0 %v9845_v10 }
 0x1b5   : > { %7900 = vmatmul.mubr.msk.bf16.gmra.mrb[80].mxu0 %vm1754_vm0, %v8217_v1 }
 0x1b6   : > { %2896 = vmatmul.mubr.bf16.gmra.mrb[80].mxu1 %v8218_v5  ;;  %7903 = vmatprep.mubr.msk.bf16.mxu0 %vm1754_vm0, %v8219_v6  ;;  %v8258_v6 = vld [vmem:[%s9599_s29 + $0x464] ss:$20 sps:$4 sm:$0xff]  }
 0x1b7   : > { %2903 = vmatprep.mubr.bf16.mxu1 %v8220_v8  ;;  %v9946_v8 = vld [vmem:[%s11315_s1 + $0x28] sm:$0xff]  }
 0x1bd   : > { %7904 = vmatmul.mubr.msk.bf16.gmra.mrb[84].mxu0 %vm1754_vm0, %v8222_v11 }
 0x1be   : > { %2904 = vmatmul.mubr.bf16.gmra.mrb[84].mxu1 %v8223_v12  ;;  %7907 = vmatprep.mubr.msk.bf16.mxu0 %vm1754_vm0, %v8224_v13  ;;  %v9952_v13 = vld [vmem:[%s11315_s1 + $0x70] sm:$0xff]  }
 0x1bf   : > { %2911 = vmatprep.mubr.bf16.mxu1 %v8225_v14 }
 0x1c5   : > { %7908 = vmatmul.mubr.msk.bf16.gmra.mrb[88].mxu0 %vm1754_vm0, %v8227_v15 }
 0x1c6   : > { %2912 = vmatmul.mubr.bf16.gmra.mrb[88].mxu1 %v8228_v16  ;;  %7911 = vmatprep.mubr.msk.bf16.mxu0 %vm1754_vm0, %v8229_v17  ;;  %v9960_v16 = vld [vmem:[%s11315_s1 + $0x30] sm:$0xff]  }
 0x1c7   : > { %2919 = vmatprep.mubr.bf16.mxu1 %v8230_v18 }
 0x1cd   : > { %7912 = vmatmul.mubr.msk.bf16.gmra.mrb[92].mxu0 %vm1754_vm0, %v8232_v19  ;;  %v9968_v19 = vld [vmem:[%s11315_s1 + $0x78] sm:$0xff]  }
 0x1ce   : > { %2920 = vmatmul.mubr.bf16.gmra.mrb[92].mxu1 %v8233_v20  ;;  %3024 = vmatprep.mubr.bf16.mxu0 %v8238_v21 }
 0x1cf   : > { %2927 = vmatprep.mubr.bf16.mxu1 %v8234_v22  ;;  %v8263_v22 = vld [vmem:[%s9599_s29 + $0x328] ss:$20 sps:$4 sm:$0xff]  }
 0x1d5   : > { %3025 = vmatmul.mubr.bf16.vlgmr.msra.gmra.mrb[96].mxu0 %v8236_v23 }
 0x1d6   : > { %2928 = vmatmul.mubr.bf16.gmra.mrb[96].mxu1 %v8239_v24  ;;  %7388 = vmatpush3.bf16.msra.mxu0 %v9874_v27 }
 0x1d7   : > { %2935 = vmatprep.mubr.bf16.mxu1 %v8240_v25  ;;  %3032 = vmatprep.mubr.bf16.mxu0 %v8242_v26  ;;  %v8262_v26 = vld [vmem:[%s9599_s29 + $0x460] ss:$20 sps:$4 sm:$0xff]  }
 0x1d8   : > { %7389 = vmatprep.subr.bf16.mxu0 %v9880_v28 }
 0x1da   : > { %7390 = vmatpush3.bf16.msra.mxu0 %v9889_v32 }
 0x1db   : > { %7391 = vmatprep.subr.bf16.mxu0 %v9896_v34 }
 0x1dd   : > { %3033 = vmatmul.mubr.bf16.gmra.mrb[100].mxu0 %v8245_v29  ;;  %v8266_v29 = vld [vmem:[%s9599_s29 + $0x354] ss:$20 sps:$4 sm:$0xff]  }
 0x1de   : > { %2936 = vmatmul.mubr.bf16.gmra.mrb[100].mxu1 %v8244_v30  ;;  %3040 = vmatprep.mubr.bf16.mxu0 %v8248_v31 }
 0x1df   : > { %2943 = vmatprep.mubr.bf16.mxu1 %v8246_v33  ;;  %7392 = vmatpush3.bf16.msra.mxu0 %v9902_v35 }
 0x1e0   : > { %7393 = vmatprep.subr.bf16.mxu0 %v9908_v37 }
 0x1e3   : > { %7394 = vmatpush3.bf16.msra.mxu0 %v9918_v42 }
 0x1e4   : > { %7395 = vmatprep.subr.bf16.mxu0 %v9924_v45 }
 0x1e5   : > { %3041 = vmatmul.mubr.bf16.gmra.mrb[104].mxu0 %v8251_v38  ;;  %v8264_v38 = vld [vmem:[%s9599_s29 + $0x48c] ss:$20 sps:$4 sm:$0xff]  }
 0x1e6   : > { %2944 = vmatmul.mubr.bf16.gmra.mrb[104].mxu1 %v8250_v39  ;;  %3048 = vmatprep.mubr.bf16.mxu0 %v8254_v40  ;;  %v9978_v39 = vld [vmem:[%s11315_s1 + $0x38] sm:$0xff]  }
 0x1e7   : > { %2951 = vmatprep.mubr.bf16.mxu1 %v8252_v41  ;;  %7396 = vmatpush3.bf16.msra.mxu0 %v9930_v46 }
 0x1e8   : > { %v6915_v48 = vpop.f32.mrb[0].mxu0  ;;  %7397 = vmatprep.subr.bf16.mxu0 %v9936_v49 }
 0x1e9   : > { %v7027_v51 = vpop.f32.mrb[0].mxu1  ;;  %v6916_v54 = vpop.f32.mrb[1].mxu0 }
 0x1ea   : > { %v6917_v56 = vadd.f32 %v6916_v54, %v6915_v48  ;;  %v7028_v52 = vpop.f32.mrb[1].mxu1  ;;  %v6918_v60 = vpop.f32.mrb[2].mxu0  ;;  %v9984_v48 = vld [vmem:[%s11315_s1 + $0x100] sm:$0xff]  }
 0x1eb   : > { %v7029_v0 = vadd.f32 %v7028_v52, %v7027_v51  ;;  %v7030_v1 = vpop.f32.mrb[2].mxu1  ;;  %v6919_v5 = vpop.f32.mrb[3].mxu0  ;;  %7398 = vmatpush3.bf16.msra.mxu0 %v9946_v8 }
 0x1ec   : > { %v6920_v11 = vadd.f32 %v6919_v5, %v6918_v60  ;;  %v7031_v12 = vpop.f32.mrb[3].mxu1  ;;  %7399 = vmatprep.subr.bf16.mxu0 %v9952_v13  ;;  %v8268_v5 = vld [vmem:[%s9599_s29 + $0x488] ss:$20 sps:$4 sm:$0xff]  }
 0x1ed   : > { %v7032_v14 = vadd.f32 %v7031_v12, %v7030_v1  ;;  %3049 = vmatmul.mubr.bf16.gmra.mrb[108].mxu0 %v8257_v55  ;;  %v9955_v15 = vadd.f32 %v7029_v0, %v6917_v56 }
 0x1ee   : > { %2952 = vmatmul.mubr.bf16.gmra.mrb[108].mxu1 %v8256_v57  ;;  %3056 = vmatprep.mubr.bf16.mxu0 %v8260_v62  ;;  %v8269_v57 = vld [vmem:[%s9599_s29 + $0x350] ss:$20 sps:$4 sm:$0xff]  }
 0x1ef   : > { %2959 = vmatprep.mubr.bf16.mxu1 %v8258_v6  ;;  %7400 = vmatpush3.bf16.msra.mxu0 %v9960_v16  ;;  %v9963_v17 = vadd.f32 %v7032_v14, %v6920_v11  ;;  %v8272_v6 = vld [vmem:[%s9599_s29 + $0x37c] ss:$20 sps:$4 sm:$0xff]  }
 0x1f0   : > { %v6921_v18 = vpop.f32.mrb[4].mxu0  ;;  %7401 = vmatprep.subr.bf16.mxu0 %v9968_v19 }
 0x1f1   : > { %v7033_v20 = vpop.f32.mrb[4].mxu1  ;;  %v6922_v21 = vpop.f32.mrb[5].mxu0 }
 0x1f2   : > { %v6923_v23 = vadd.f32 %v6922_v21, %v6921_v18  ;;  %v7034_v24 = vpop.f32.mrb[5].mxu1  ;;  %v6924_v25 = vpop.f32.mrb[6].mxu0  ;;  %v8270_v18 = vld [vmem:[%s9599_s29 + $0x4b4] ss:$20 sps:$4 sm:$0xff]  }
 0x1f3   : > { %v7035_v30 = vadd.f32 %v7034_v24, %v7033_v20  ;;  %v7036_v31 = vpop.f32.mrb[6].mxu1  ;;  %v6925_v33 = vpop.f32.mrb[7].mxu0  ;;  %7402 = vmatpush3.bf16.msra.mxu0 %v9978_v39 }
 0x1f4   : > { %v6926_v40 = vadd.f32 %v6925_v33, %v6924_v25  ;;  %v7037_v41 = vpop.f32.mrb[7].mxu1  ;;  %7955 = vmatprep.subr.bf16.mxu0 %v9984_v48 }
 0x1f5   : > { %v7038_v51 = vadd.f32 %v7037_v41, %v7036_v31  ;;  %3057 = vmatmul.mubr.bf16.gmra.mrb[112].mxu0 %v8263_v22  ;;  %v9987_v54 = vadd.f32 %v7035_v30, %v6923_v23  ;;  %v8275_v30 = vld [vmem:[%s9599_s29 + $0x378] ss:$20 sps:$4 sm:$0xff]  }
 0x1f6   : > { %2960 = vmatmul.mubr.bf16.gmra.mrb[112].mxu1 %v8262_v26  ;;  %3064 = vmatprep.mubr.bf16.mxu0 %v8266_v29  ;;  %v8278_v41 = vld [vmem:[%s9599_s29 + $0x3a4] ss:$20 sps:$4 sm:$0xff]  }
 0x1f7   : > { %2967 = vmatprep.mubr.bf16.mxu1 %v8264_v38  ;;  %v9989_v55 = vadd.f32 %v7038_v51, %v6926_v40  ;;  %v8274_v40 = vld [vmem:[%s9599_s29 + $0x4b0] ss:$20 sps:$4 sm:$0xff]  }
 0x1f8   : > { %v6927_v56 = vpop.f32.mrb[8].mxu0 }
 0x1f9   : > { %v7039_v52 = vpop.f32.mrb[8].mxu1  ;;  %v6928_v60 = vpop.f32.mrb[9].mxu0 }
 0x1fa   : > { %v6929_v62 = vadd.f32 %v6928_v60, %v6927_v56  ;;  %v7040_v0 = vpop.f32.mrb[9].mxu1  ;;  %v6930_v1 = vpop.f32.mrb[10].mxu0  ;;  %v8276_v60 = vld [vmem:[%s9599_s29 + $0x4dc] ss:$20 sps:$4 sm:$0xff]  }
 0x1fb   : > { %v7041_v11 = vadd.f32 %v7040_v0, %v7039_v52  ;;  %v7042_v12 = vpop.f32.mrb[10].mxu1  ;;  %v6931_v14 = vpop.f32.mrb[11].mxu0 }
 0x1fc   : > { %v6932_v20 = vadd.f32 %v6931_v14, %v6930_v1  ;;  %v7043_v21 = vpop.f32.mrb[11].mxu1  ;;  %v8281_v14 = vld [vmem:[%s9599_s29 + $0x3a0] ss:$20 sps:$4 sm:$0xff]  }
 0x1fd   : > { %v7044_v22 = vadd.f32 %v7043_v21, %v7042_v12  ;;  %3065 = vmatmul.mubr.bf16.gmra.mrb[116].mxu0 %v8269_v57  ;;  %v9995_v23 = vadd.f32 %v7041_v11, %v6929_v62 }
 0x1fe   : > { %2968 = vmatmul.mubr.bf16.gmra.mrb[116].mxu1 %v8268_v5  ;;  %3072 = vmatprep.mubr.bf16.mxu0 %v8272_v6 }
 0x1ff   : > { %2975 = vmatprep.mubr.bf16.mxu1 %v8270_v18  ;;  %v9997_v24 = vadd.f32 %v7044_v22, %v6932_v20  ;;  %v8280_v22 = vld [vmem:[%s9599_s29 + $0x4d8] ss:$20 sps:$4 sm:$0xff]  }
 0x200   : > { %v6933_v25 = vpop.f32.mrb[12].mxu0 }
 0x201   : > { %v7045_v26 = vpop.f32.mrb[12].mxu1  ;;  %v6934_v29 = vpop.f32.mrb[13].mxu0 }
 0x202   : > { %v6935_v31 = vadd.f32 %v6934_v29, %v6933_v25  ;;  %v7046_v33 = vpop.f32.mrb[13].mxu1  ;;  %v6936_v38 = vpop.f32.mrb[14].mxu0  ;;  %v8282_v25 = vld [vmem:[%s9599_s29 + $0x3cc] ss:$20 sps:$4 sm:$0xff]  }
 0x203   : > { %v7047_v51 = vadd.f32 %v7046_v33, %v7045_v26  ;;  %v7048_v56 = vpop.f32.mrb[14].mxu1  ;;  %v6937_v52 = vpop.f32.mrb[15].mxu0 }
 0x204   : > { %v6938_v57 = vadd.f32 %v6937_v52, %v6936_v38  ;;  %v7049_v62 = vpop.f32.mrb[15].mxu1 }
 0x205   : > { %v7050_v0 = vadd.f32 %v7049_v62, %v7048_v56  ;;  %3073 = vmatmul.mubr.bf16.gmra.mrb[120].mxu0 %v8275_v30  ;;  %v10003_v1 = vadd.f32 %v7047_v51, %v6935_v31  ;;  %v8284_v31 = vld [vmem:[%s9599_s29 + $0x290] ss:$20 sps:$4 sm:$0xff]  }
 0x206   : > { %2976 = vmatmul.mubr.bf16.gmra.mrb[120].mxu1 %v8274_v40  ;;  %3080 = vmatprep.mubr.bf16.mxu0 %v8278_v41 }
 0x207   : > { %2983 = vmatprep.mubr.bf16.mxu1 %v8276_v60  ;;  %v10005_v5 = vadd.f32 %v7050_v0, %v6938_v57  ;;  %v8285_v57 = vld [vmem:[%s9599_s29 + $0x3c8] ss:$20 sps:$4 sm:$0xff]  }
 0x208   : > { %v6939_v6 = vpop.f32.mrb[16].mxu0 }
 0x209   : > { %v7051_v11 = vpop.f32.mrb[16].mxu1  ;;  %v6940_v12 = vpop.f32.mrb[17].mxu0 }
 0x20a   : > { %v6941_v18 = vadd.f32 %v6940_v12, %v6939_v6  ;;  %v7052_v20 = vpop.f32.mrb[17].mxu1  ;;  %v6942_v21 = vpop.f32.mrb[18].mxu0  ;;  %v8287_v12 = vld [vmem:[%s9599_s29 + $0x3f4] ss:$20 sps:$4 sm:$0xff]  }
 0x20b   : > { %v7053_v26 = vadd.f32 %v7052_v20, %v7051_v11  ;;  %v7054_v29 = vpop.f32.mrb[18].mxu1  ;;  %v6943_v30 = vpop.f32.mrb[19].mxu0  ;;  %v8286_v11 = vld [vmem:[%s9599_s29 + $0x2b8] ss:$20 sps:$4 sm:$0xff]  }
 0x20c   : > { %v6944_v33 = vadd.f32 %v6943_v30, %v6942_v21  ;;  %v7055_v38 = vpop.f32.mrb[19].mxu1  ;;  %v8289_v21 = vld [vmem:[%s9599_s29 + $0x2e0] ss:$20 sps:$4 sm:$0xff]  }
 0x20d   : > { %v7056_v40 = vadd.f32 %v7055_v38, %v7054_v29  ;;  %3081 = vmatmul.mubr.bf16.gmra.mrb[124].mxu0 %v8281_v14  ;;  %v10011_v41 = vadd.f32 %v7053_v26, %v6941_v18 }
 0x20e   : > { %2984 = vmatmul.mubr.bf16.gmra.mrb[124].mxu1 %v8280_v22  ;;  %3088 = vmatprep.mubr.bf16.mxu0 %v8282_v25 }
 0x20f   : > { %7923 = vmatprep.mubr.msk.bf16.mxu1 %vm1754_vm0, %v8284_v31  ;;  %v10014_v51 = vadd.f32 %v7056_v40, %v6944_v33  ;;  %v8290_v40 = vld [vmem:[%s9599_s29 + $0x3f0] ss:$20 sps:$4 sm:$0xff]  }
 0x210   : > { %v6945_v56 = vpop.f32.mrb[20].mxu0 }
 0x211   : > { %v7057_v52 = vpop.f32.mrb[20].mxu1  ;;  %v6946_v60 = vpop.f32.mrb[21].mxu0 }
 0x212   : > { %v6947_v62 = vadd.f32 %v6946_v60, %v6945_v56  ;;  %v7058_v0 = vpop.f32.mrb[21].mxu1  ;;  %v6948_v6 = vpop.f32.mrb[22].mxu0 }
 0x213   : > { %v7059_v20 = vadd.f32 %v7058_v0, %v7057_v52  ;;  %v7060_v14 = vpop.f32.mrb[22].mxu1  ;;  %v6949_v18 = vpop.f32.mrb[23].mxu0 }
 0x214   : > { %v6950_v22 = vadd.f32 %v6949_v18, %v6948_v6  ;;  %v7061_v25 = vpop.f32.mrb[23].mxu1 }
 0x215   : > { %v7062_v26 = vadd.f32 %v7061_v25, %v7060_v14  ;;  %3089 = vmatmul.mubr.bf16.gmra.mrb[128].mxu0 %v8285_v57  ;;  %v10020_v29 = vadd.f32 %v7059_v20, %v6947_v62  ;;  %v8291_v57 = vld [vmem:[%s9599_s29 + $0x308] ss:$20 sps:$4 sm:$0xff]  }
 0x216   : > { %7924 = vmatmul.mubr.msk.bf16.vlgmr.msra.gmra.mrb[128].mxu1 %vm1754_vm0, %v8286_v11  ;;  %3096 = vmatprep.mubr.bf16.mxu0 %v8287_v12  ;;  %v8292_v62 = vld [vmem:[%s9599_s29 + $0x41c] ss:$20 sps:$4 sm:$0xff]  }
 0x217   : > { %7500 = vmatpush3.bf16.msra.mxu1 %v9722_v44  ;;  %7927 = vmatprep.mubr.msk.bf16.mxu1 %vm1754_vm0, %v8289_v21  ;;  %v10025_v30 = vadd.f32 %v7062_v26, %v6950_v22  ;;  %v8294_v44 = vld [vmem:[%s9599_s29 + $0x330] ss:$20 sps:$4 sm:$0xff]   ;;  %v8295_v22 = vld [vmem:[%s9599_s29 + $0x418] ss:$20 sps:$4 sm:$0xff]  }
 0x218   : > { %v6951_v31 = vpop.f32.mrb[24].mxu0  ;;  %7501 = vmatprep.subr.bf16.mxu1 %v9732_v47 }
 0x219   : > { %v7063_v33 = vpop.f32.mrb[24].mxu1  ;;  %v6952_v38 = vpop.f32.mrb[25].mxu0 }
 0x21a   : > { %v6953_v56 = vadd.f32 %v6952_v38, %v6951_v31  ;;  %v7064_v52 = vpop.f32.mrb[25].mxu1  ;;  %v6954_v60 = vpop.f32.mrb[26].mxu0  ;;  %v8297_v38 = vld [vmem:[%s9599_s29 + $0x444] ss:$20 sps:$4 sm:$0xff]  }
 0x21b   : > { %v7065_v0 = vadd.f32 %v7064_v52, %v7063_v33  ;;  %v7066_v6 = vpop.f32.mrb[26].mxu1  ;;  %v6955_v11 = vpop.f32.mrb[27].mxu0  ;;  %7502 = vmatpush3.bf16.msra.mxu1 %v9740_v36  ;;  %v8296_v33 = vld [vmem:[%s9599_s29 + $0x358] ss:$20 sps:$4 sm:$0xff]  }
 0x21c   : > { %v6956_v12 = vadd.f32 %v6955_v11, %v6954_v60  ;;  %v7067_v20 = vpop.f32.mrb[27].mxu1  ;;  %7503 = vmatprep.subr.bf16.mxu1 %v9747_v50  ;;  %v8299_v60 = vld [vmem:[%s9599_s29 + $0x380] ss:$20 sps:$4 sm:$0xff]  }
 0x21d   : > { %v7068_v47 = vadd.f32 %v7067_v20, %v7066_v6  ;;  %3097 = vmatmul.mubr.bf16.gmra.mrb[132].mxu0 %v8290_v40  ;;  %v10034_v14 = vadd.f32 %v7065_v0, %v6953_v56  ;;  %v8300_v11 = vld [vmem:[%s9599_s29 + $0x440] ss:$20 sps:$4 sm:$0xff]  }
 0x21e   : > { %7928 = vmatmul.mubr.msk.bf16.gmra.mrb[132].mxu1 %vm1754_vm0, %v8291_v57  ;;  %3104 = vmatprep.mubr.bf16.mxu0 %v8292_v62 }
 0x21f   : > { %7931 = vmatprep.mubr.msk.bf16.mxu1 %vm1754_vm0, %v8294_v44  ;;  %7504 = vmatpush3.bf16.msra.mxu1 %v9758_v53  ;;  %v10039_v36 = vadd.f32 %v7068_v47, %v6956_v12  ;;  %v8301_v47 = vld [vmem:[%s9599_s29 + $0x3a8] ss:$20 sps:$4 sm:$0xff]  }
 0x220   : > { %v6957_v18 = vpop.f32.mrb[28].mxu0  ;;  %7505 = vmatprep.subr.bf16.mxu1 %v9766_v43 }
 0x221   : > { %v7069_v50 = vpop.f32.mrb[28].mxu1  ;;  %v6958_v21 = vpop.f32.mrb[29].mxu0 }
 0x222   : > { %v6959_v25 = vadd.f32 %v6958_v21, %v6957_v18  ;;  %v7070_v26 = vpop.f32.mrb[29].mxu1  ;;  %v6960_v31 = vpop.f32.mrb[30].mxu0  ;;  %v8302_v18 = vld [vmem:[%s9599_s29 + $0x46c] ss:$20 sps:$4 sm:$0xff]  }
 0x223   : > { %v7071_v40 = vadd.f32 %v7070_v26, %v7069_v50  ;;  %v7072_v56 = vpop.f32.mrb[30].mxu1  ;;  %v6961_v52 = vpop.f32.mrb[31].mxu0  ;;  %7506 = vmatpush3.bf16.msra.mxu1 %v9775_v58 }
 0x224   : > { %v6962_v53 = vadd.f32 %v6961_v52, %v6960_v31  ;;  %v7073_v57 = vpop.f32.mrb[31].mxu1  ;;  %7507 = vmatprep.subr.bf16.mxu1 %v9781_v59 }
 0x225   : > { %v7074_v43 = vadd.f32 %v7073_v57, %v7072_v56  ;;  %3105 = vmatmul.mubr.bf16.gmra.mrb[136].mxu0 %v8295_v22  ;;  %v10048_v62 = vadd.f32 %v7071_v40, %v6959_v25  ;;  %v8304_v25 = vld [vmem:[%s9599_s29 + $0x3d0] ss:$20 sps:$4 sm:$0xff]   ;;  %v8305_v40 = vld [vmem:[%s9599_s29 + $0x468] ss:$20 sps:$4 sm:$0xff]  }
 0x226   : > { %7932 = vmatmul.mubr.msk.bf16.gmra.mrb[136].mxu1 %vm1754_vm0, %v8296_v33  ;;  %3112 = vmatprep.mubr.bf16.mxu0 %v8297_v38  ;;  %v8307_v57 = vld [vmem:[%s9599_s29 + $0x494] ss:$20 sps:$4 sm:$0xff]  }
 0x227   : > { %7935 = vmatprep.mubr.msk.bf16.mxu1 %vm1754_vm0, %v8299_v60  ;;  %7508 = vmatpush3.bf16.msra.mxu1 %v9794_v61  ;;  %v10053_v58 = vadd.f32 %v7074_v43, %v6962_v53  ;;  %v8306_v53 = vld [vmem:[%s9599_s29 + $0x3f8] ss:$20 sps:$4 sm:$0xff]  }
 0x228   : > { %v6963_v0 = vpop.f32.mrb[32].mxu0  ;;  %7509 = vmatprep.subr.bf16.mxu1 %v9802_v63 }
 0x229   : > { %v7075_v59 = vpop.f32.mrb[32].mxu1  ;;  %v6964_v6 = vpop.f32.mrb[33].mxu0 }
 0x22a   : > { %v6965_v44 = vadd.f32 %v6964_v6, %v6963_v0  ;;  %v7076_v12 = vpop.f32.mrb[33].mxu1  ;;  %v6966_v20 = vpop.f32.mrb[34].mxu0  ;;  %v8309_v6 = vld [vmem:[%s9599_s29 + $0x420] ss:$20 sps:$4 sm:$0xff]  }
 0x22b   : > { %v7077_v50 = vadd.f32 %v7076_v12, %v7075_v59  ;;  %v7078_v21 = vpop.f32.mrb[34].mxu1  ;;  %v6967_v22 = vpop.f32.mrb[35].mxu0  ;;  %7510 = vmatpush3.bf16.msra.mxu1 %v9809_v2 }
 0x22c   : > { %v6968_v61 = vadd.f32 %v6967_v22, %v6966_v20  ;;  %v7079_v26 = vpop.f32.mrb[35].mxu1  ;;  %7511 = vmatprep.subr.bf16.mxu1 %v9815_v3  ;;  %v8311_v22 = vld [vmem:[%s9599_s29 + $0x448] ss:$20 sps:$4 sm:$0xff]  }
 0x22d   : > { %v7080_v63 = vadd.f32 %v7079_v26, %v7078_v21  ;;  %3113 = vmatmul.mubr.bf16.gmra.mrb[140].mxu0 %v8300_v11  ;;  %v10062_v31 = vadd.f32 %v7077_v50, %v6965_v44 }
 0x22e   : > { %7936 = vmatmul.mubr.msk.bf16.gmra.mrb[140].mxu1 %vm1754_vm0, %v8301_v47  ;;  %3120 = vmatprep.mubr.bf16.mxu0 %v8302_v18  ;;  %v8310_v18 = vld [vmem:[%s9599_s29 + $0x490] ss:$20 sps:$4 sm:$0xff]  }
 0x22f   : > { %7939 = vmatprep.mubr.msk.bf16.mxu1 %vm1754_vm0, %v8304_v25  ;;  %7512 = vmatpush3.bf16.msra.mxu1 %v9824_v4  ;;  %v10067_v2 = vadd.f32 %v7080_v63, %v6968_v61  ;;  %v8312_v25 = vld [vmem:[%s9599_s29 + $0x4bc] ss:$20 sps:$4 sm:$0xff]  }
 0x230   : > { %v6969_v33 = vpop.f32.mrb[36].mxu0  ;;  %7513 = vmatprep.subr.bf16.mxu1 %v9832_v7 }
 0x231   : > { %v7081_v3 = vpop.f32.mrb[36].mxu1  ;;  %v6970_v38 = vpop.f32.mrb[37].mxu0 }
 0x232   : > { %v6971_v56 = vadd.f32 %v6970_v38, %v6969_v33  ;;  %v7082_v52 = vpop.f32.mrb[37].mxu1  ;;  %v6972_v60 = vpop.f32.mrb[38].mxu0  ;;  %v8314_v33 = vld [vmem:[%s9599_s29 + $0x470] ss:$20 sps:$4 sm:$0xff]  }
 0x233   : > { %v7083_v43 = vadd.f32 %v7082_v52, %v7081_v3  ;;  %v7084_v0 = vpop.f32.mrb[38].mxu1  ;;  %v6973_v59 = vpop.f32.mrb[39].mxu0  ;;  %7514 = vmatpush3.bf16.msra.mxu1 %v9839_v9 }
 0x234   : > { %v6974_v4 = vadd.f32 %v6973_v59, %v6972_v60  ;;  %v7085_v11 = vpop.f32.mrb[39].mxu1  ;;  %7631 = vmatprep.subr.bf16.mxu1 %v9845_v10 }
 0x235   : > { %v7086_v7 = vadd.f32 %v7085_v11, %v7084_v0  ;;  %3121 = vmatmul.mubr.bf16.gmra.mrb[144].mxu0 %v8305_v40  ;;  %v10076_v44 = vadd.f32 %v7083_v43, %v6971_v56  ;;  %v8315_v43 = vld [vmem:[%s9599_s29 + $0x4b8] ss:$20 sps:$4 sm:$0xff]  }
 0x236   : > { %7940 = vmatmul.mubr.msk.bf16.gmra.mrb[144].mxu1 %vm1754_vm0, %v8306_v53  ;;  %3128 = vmatprep.mubr.bf16.mxu0 %v8307_v57  ;;  %v8317_v11 = vld [vmem:[%s9599_s29 + $0x4e4] ss:$20 sps:$4 sm:$0xff]  }
 0x237   : > { %7943 = vmatprep.mubr.msk.bf16.mxu1 %vm1754_vm0, %v8309_v6  ;;  %v10080_v12 = vadd.f32 %v7086_v7, %v6974_v4  ;;  %v8316_v4 = vld [vmem:[%s9599_s29 + $0x498] ss:$20 sps:$4 sm:$0xff]  }
 0x238   : > { %v6975_v20 = vpop.f32.mrb[40].mxu0 }
 0x239   : > { %v7087_v9 = vpop.f32.mrb[40].mxu1  ;;  %v6976_v47 = vpop.f32.mrb[41].mxu0 }
 0x23a   : > { %v6977_v50 = vadd.f32 %v6976_v47, %v6975_v20  ;;  %v7088_v21 = vpop.f32.mrb[41].mxu1  ;;  %v6978_v10 = vpop.f32.mrb[42].mxu0  ;;  %v8319_v47 = vld [vmem:[%s9599_s29 + $0x4c0] ss:$20 sps:$4 sm:$0xff]  }
 0x23b   : > { %v7089_v61 = vadd.f32 %v7088_v21, %v7087_v9  ;;  %v7090_v26 = vpop.f32.mrb[42].mxu1  ;;  %v6979_v63 = vpop.f32.mrb[43].mxu0 }
 0x23c   : > { %v6980_v3 = vadd.f32 %v6979_v63, %v6978_v10  ;;  %v7091_v38 = vpop.f32.mrb[43].mxu1  ;;  %v8320_v63 = vld [vmem:[%s9599_s29 + $0x4e0] ss:$20 sps:$4 sm:$0xff]  }
 0x23d   : > { %v7092_v40 = vadd.f32 %v7091_v38, %v7090_v26  ;;  %3129 = vmatmul.mubr.bf16.gmra.mrb[148].mxu0 %v8310_v18  ;;  %v10086_v56 = vadd.f32 %v7089_v61, %v6977_v50 }
 0x23e   : > { %7944 = vmatmul.mubr.msk.bf16.gmra.mrb[148].mxu1 %vm1754_vm0, %v8311_v22  ;;  %3136 = vmatprep.mubr.bf16.mxu0 %v8312_v25 }
 0x23f   : > { %7947 = vmatprep.mubr.msk.bf16.mxu1 %vm1754_vm0, %v8314_v33  ;;  %v10090_v52 = vadd.f32 %v7092_v40, %v6980_v3  ;;  %v8321_v40 = vld [vmem:[%s9599_s29 + $0x4e8] ss:$20 sps:$4 sm:$0xff]  }
 0x240   : > { %v6981_v60 = vpop.f32.mrb[44].mxu0 }
 0x241   : > { %v7093_v53 = vpop.f32.mrb[44].mxu1  ;;  %v6982_v57 = vpop.f32.mrb[45].mxu0 }
 0x242   : > { %v6983_v0 = vadd.f32 %v6982_v57, %v6981_v60  ;;  %v7094_v59 = vpop.f32.mrb[45].mxu1  ;;  %v6984_v6 = vpop.f32.mrb[46].mxu0  ;;  %v8324_v60 = vld [vmem:[%s9599_s29 + $0x504] ss:$20 sps:$4 sm:$0xff]  }
 0x243   : > { %v7095_v7 = vadd.f32 %v7094_v59, %v7093_v53  ;;  %v7096_v20 = vpop.f32.mrb[46].mxu1  ;;  %v6985_v9 = vpop.f32.mrb[47].mxu0 }
 0x244   : > { %v6986_v18 = vadd.f32 %v6985_v9, %v6984_v6  ;;  %v7097_v50 = vpop.f32.mrb[47].mxu1 }
 0x245   : > { %v7098_v21 = vadd.f32 %v7097_v50, %v7096_v20  ;;  %3137 = vmatmul.mubr.bf16.gmra.mrb[152].mxu0 %v8315_v43  ;;  %v10096_v10 = vadd.f32 %v7095_v7, %v6983_v0  ;;  %v8327_v0 = vld [vmem:[%s9599_s29 + $0x50c] ss:$20 sps:$4 sm:$0xff]  }
 0x246   : > { %7948 = vmatmul.mubr.msk.bf16.gmra.mrb[152].mxu1 %vm1754_vm0, %v8316_v4  ;;  %3144 = vmatprep.mubr.bf16.mxu0 %v8317_v11 }
 0x247   : > { %7951 = vmatprep.mubr.msk.bf16.mxu1 %vm1754_vm0, %v8319_v47  ;;  %v10100_v22 = vadd.f32 %v7098_v21, %v6986_v18  ;;  %v8322_v18 = vld [vmem:[%s9599_s29 + $0x500] ss:$20 sps:$4 sm:$0xff]  }
 0x248   : > { %v6987_v25 = vpop.f32.mrb[48].mxu0 }
 0x249   : > { %v7099_v61 = vpop.f32.mrb[48].mxu1  ;;  %v6988_v26 = vpop.f32.mrb[49].mxu0 }
 0x24a   : > { %v6989_v33 = vadd.f32 %v6988_v26, %v6987_v25  ;;  %v7100_v3 = vpop.f32.mrb[49].mxu1  ;;  %v6990_v38 = vpop.f32.mrb[50].mxu0 }
 0x24b   : > { %v7101_v53 = vadd.f32 %v7100_v3, %v7099_v61  ;;  %v7102_v57 = vpop.f32.mrb[50].mxu1  ;;  %v6991_v43 = vpop.f32.mrb[51].mxu0  ;;  %v8325_v61 = vld [vmem:[%s9599_s29 + $0x508] ss:$20 sps:$4 sm:$0xff]   ;;  %v8328_v3 = vld [vmem:[%s9599_s29 + $0x52c] ss:$20 sps:$4 sm:$0xff]  }
 0x24c   : > { %v6992_v59 = vadd.f32 %v6991_v43, %v6990_v38  ;;  %v7103_v6 = vpop.f32.mrb[51].mxu1 }
 0x24d   : > { %v7104_v4 = vadd.f32 %v7103_v6, %v7102_v57  ;;  %3145 = vmatmul.mubr.bf16.gmra.mrb[156].mxu0 %v8320_v63  ;;  %v10106_v11 = vadd.f32 %v7101_v53, %v6989_v33 }
 0x24e   : > { %7952 = vmatmul.mubr.msk.bf16.gmra.mrb[156].mxu1 %vm1754_vm0, %v8321_v40  ;;  %3923 = vmatprep.mubr.bf16.mxu0 %v8324_v60  ;;  %v8330_v60 = vld [vmem:[%s9599_s29 + $0x534] ss:$20 sps:$4 sm:$0xff]  }
 0x24f   : > { %4084 = vmatprep.mubr.bf16.mxu1 %v8327_v0  ;;  %v10109_v7 = vadd.f32 %v7104_v4, %v6992_v59  ;;  %v8332_v4 = vld [vmem:[%s9599_s29 + $0x528] ss:$20 sps:$4 sm:$0xff]  }
 0x250   : > { %v6993_v20 = vpop.f32.mrb[52].mxu0 }
 0x251   : > { %v7105_v9 = vpop.f32.mrb[52].mxu1  ;;  %v6994_v47 = vpop.f32.mrb[53].mxu0 }
 0x252   : > { %v6995_v50 = vadd.f32 %v6994_v47, %v6993_v20  ;;  %v7106_v21 = vpop.f32.mrb[53].mxu1  ;;  %v6996_v25 = vpop.f32.mrb[54].mxu0  ;;  %v10126_v20 = vld [vmem:[%s11315_s1 + $0x108] sm:$0xff]  }
 0x253   : > { %v7107_v26 = vadd.f32 %v7106_v21, %v7105_v9  ;;  %v7108_v63 = vpop.f32.mrb[54].mxu1  ;;  %v6997_v33 = vpop.f32.mrb[55].mxu0 }
 0x254   : > { %v6998_v38 = vadd.f32 %v6997_v33, %v6996_v25  ;;  %v7109_v40 = vpop.f32.mrb[55].mxu1 }
 0x255   : > { %v7110_v53 = vadd.f32 %v7109_v40, %v7108_v63  ;;  %3924 = vmatmul.mubr.bf16.vlgmr.msra.gmra.mrb[160].mxu0 %v8322_v18  ;;  %v10115_v57 = vadd.f32 %v7107_v26, %v6995_v50  ;;  %v8333_v18 = vld [vmem:[%s9599_s29 + $0x530] ss:$20 sps:$4 sm:$0xff]   ;;  %v8334_v50 = vld [vmem:[%s9599_s29 + $0x554] ss:$20 sps:$4 sm:$0xff]  }
 0x256   : > { %4085 = vmatmul.mubr.bf16.vlgmr.msra.gmra.mrb[160].mxu1 %v8325_v61  ;;  %7956 = vmatpush3.bf16.msra.mxu0 %v9984_v48  ;;  %v8336_v61 = vld [vmem:[%s9599_s29 + $0x55c] ss:$20 sps:$4 sm:$0xff]  }
 0x257   : > { %7632 = vmatpush3.bf16.msra.mxu1 %v9874_v27  ;;  %3931 = vmatprep.mubr.bf16.mxu0 %v8328_v3  ;;  %v10119_v43 = vadd.f32 %v7110_v53, %v6998_v38  ;;  %v10137_v26 = vld [vmem:[%s11315_s1 + $0x110] sm:$0xff]  }
 0x258   : > { %v6999_v0 = vpop.f32.mrb[56].mxu0  ;;  %4092 = vmatprep.mubr.bf16.mxu1 %v8330_v60  ;;  %7633 = vmatprep.subr.bf16.mxu1 %v9880_v28  ;;  %v8338_v53 = vld [vmem:[%s9599_s29 + $0x550] ss:$20 sps:$4 sm:$0xff]  }
 0x259   : > { %v7111_v59 = vpop.f32.mrb[56].mxu1  ;;  %v7000_v6 = vpop.f32.mrb[57].mxu0  ;;  %7957 = vmatprep.subr.bf16.mxu0 %v10126_v20 }
 0x25a   : > { %v7001_v9 = vadd.f32 %v7000_v6, %v6999_v0  ;;  %v7112_v27 = vpop.f32.mrb[57].mxu1  ;;  %v7002_v47 = vpop.f32.mrb[58].mxu0  ;;  %7958 = vmatpush3.bf16.msra.mxu0 %v10126_v20  ;;  %v10152_v0 = vld [vmem:[%s11315_s1 + $0x118] sm:$0xff]  }
 0x25b   : > { %v7113_v21 = vadd.f32 %v7112_v27, %v7111_v59  ;;  %v7114_v25 = vpop.f32.mrb[58].mxu1  ;;  %v7003_v28 = vpop.f32.mrb[59].mxu0  ;;  %7634 = vmatpush3.bf16.msra.mxu1 %v9889_v32  ;;  %7959 = vmatprep.subr.bf16.mxu0 %v10137_v26 }
 0x25c   : > { %v7004_v63 = vadd.f32 %v7003_v28, %v7002_v47  ;;  %v7115_v33 = vpop.f32.mrb[59].mxu1  ;;  %7635 = vmatprep.subr.bf16.mxu1 %v9896_v34 }
 0x25d   : > { %v7116_v3 = vadd.f32 %v7115_v33, %v7114_v25  ;;  %3932 = vmatmul.mubr.bf16.gmra.mrb[164].mxu0 %v8332_v4  ;;  %v10141_v38 = vadd.f32 %v7113_v21, %v7001_v9  ;;  %v8339_v4 = vld [vmem:[%s9599_s29 + $0x558] ss:$20 sps:$4 sm:$0xff]   ;;  %v8340_v9 = vld [vmem:[%s9599_s29 + $0x57c] ss:$20 sps:$4 sm:$0xff]  }
 0x25e   : > { %4093 = vmatmul.mubr.bf16.gmra.mrb[164].mxu1 %v8333_v18  ;;  %3939 = vmatprep.mubr.bf16.mxu0 %v8334_v50  ;;  %v8342_v18 = vld [vmem:[%s9599_s29 + $0x584] ss:$20 sps:$4 sm:$0xff]  }
 0x25f   : > { %4100 = vmatprep.mubr.bf16.mxu1 %v8336_v61  ;;  %7636 = vmatpush3.bf16.msra.mxu1 %v9902_v35  ;;  %v10144_v32 = vadd.f32 %v7116_v3, %v7004_v63  ;;  %v8582_v61 = vld [vmem:[%s11315_s1 + $0xc0] sm:$0xff]  }
 0x260   : > { %v7005_v40 = vpop.f32.mrb[60].mxu0  ;;  %7637 = vmatprep.subr.bf16.mxu1 %v9908_v37  ;;  %7960 = vmatpush3.bf16.msra.mxu0 %v10137_v26 }
 0x261   : > { %v7117_v34 = vpop.f32.mrb[60].mxu1  ;;  %v7006_v60 = vpop.f32.mrb[61].mxu0  ;;  %7961 = vmatprep.subr.bf16.mxu0 %v10152_v0 }
 0x262   : > { %v7007_v59 = vadd.f32 %v7006_v60, %v7005_v40  ;;  %v7118_v35 = vpop.f32.mrb[61].mxu1  ;;  %v7008_v6 = vpop.f32.mrb[62].mxu0  ;;  %v8344_v40 = vld [vmem:[%s9599_s29 + $0x578] ss:$20 sps:$4 sm:$0xff]  }
 0x263   : > { %v7119_v27 = vadd.f32 %v7118_v35, %v7117_v34  ;;  %v7120_v47 = vpop.f32.mrb[62].mxu1  ;;  %v7009_v37 = vpop.f32.mrb[63].mxu0  ;;  %7638 = vmatpush3.bf16.msra.mxu1 %v9918_v42  ;;  %v8346_v35 = vld [vmem:[%s9599_s29 + $0x5a4] ss:$20 sps:$4 sm:$0xff]  }
 0x264   : > { %v7010_v50 = vadd.f32 %v7009_v37, %v7008_v6  ;;  %v7121_v21 = vpop.f32.mrb[63].mxu1  ;;  %7639 = vmatprep.subr.bf16.mxu1 %v9924_v45  ;;  %7962 = vmatpush3.bf16.msra.mxu0 %v10152_v0 }
 0x265   : > { %v7122_v25 = vadd.f32 %v7121_v21, %v7120_v47  ;;  %3940 = vmatmul.mubr.bf16.gmra.mrb[168].mxu0 %v8338_v53  ;;  %v10161_v28 = vadd.f32 %v7119_v27, %v7007_v59  ;;  %7743 = vmatprep.subr.bf16.mxu0 %v8582_v61  ;;  %v8345_v59 = vld [vmem:[%s9599_s29 + $0x580] ss:$20 sps:$4 sm:$0xff]   ;;  %v8351_v21 = vld [vmem:[%s9599_s29 + $0x5a8] ss:$20 sps:$4 sm:$0xff]  }
 0x266   : > { %4101 = vmatmul.mubr.bf16.gmra.mrb[168].mxu1 %v8339_v4  ;;  %3947 = vmatprep.mubr.bf16.mxu0 %v8340_v9  ;;  %v8348_v9 = vld [vmem:[%s9599_s29 + $0x5ac] ss:$20 sps:$4 sm:$0xff]  }
 0x267   : > { %4108 = vmatprep.mubr.bf16.mxu1 %v8342_v18  ;;  %7640 = vmatpush3.bf16.msra.mxu1 %v9930_v46  ;;  %v10167_v42 = vadd.f32 %v7122_v25, %v7010_v50  ;;  %v8352_v25 = vld [vmem:[%s9599_s29 + $0x5cc] ss:$20 sps:$4 sm:$0xff]  }
 0x268   : > { %v7885_v45 = vpop.f32.mrb[64].mxu0  ;;  %7641 = vmatprep.subr.bf16.mxu1 %v9936_v49 }
 0x269   : > { %v10171_v63 = vadd.f32 %v7885_v45, %v9987_v54  ;;  %v2159_v33 = vpop.f32.mrb[65].mxu0  ;;  %v7159_v3 = vpop.f32.mrb[64].mxu1 }
 0x26a   : > { %v10175_v34 = vadd.f32 %v2159_v33, %v9955_v15  ;;  %v7886_v60 = vpop.f32.mrb[66].mxu0  ;;  %v7160_v53 = vpop.f32.mrb[65].mxu1 }
 0x26b   : > { %v10180_v46 = vadd.f32 %v7886_v60, %v9989_v55  ;;  %v2162_v6 = vpop.f32.mrb[67].mxu0  ;;  %v10182_v4 = vadd.f32 %v7160_v53, %v7159_v3  ;;  %v7162_v49 = vpop.f32.mrb[66].mxu1  ;;  %7642 = vmatpush3.bf16.msra.mxu1 %v9946_v8 }
 0x26c   : > { %v10187_v54 = vadd.f32 %v2162_v6, %v9963_v17  ;;  %v7163_v15 = vpop.f32.mrb[67].mxu1  ;;  %7643 = vmatprep.subr.bf16.mxu1 %v9952_v13  ;;  %v8350_v13 = vld [vmem:[%s9599_s29 + $0x5a0] ss:$20 sps:$4 sm:$0xff]  }
 0x26d   : > { %v10190_v27 = vadd.f32 %v7163_v15, %v7162_v49  ;;  %3948 = vmatmul.mubr.bf16.gmra.mrb[172].mxu0 %v8344_v40  ;;  %v8358_v6 = vld [vmem:[%s9599_s29 + $0x5f4] ss:$20 sps:$4 sm:$0xff]  }
 0x26e   : > { %4109 = vmatmul.mubr.bf16.gmra.mrb[172].mxu1 %v8345_v59  ;;  %3955 = vmatprep.mubr.bf16.mxu0 %v8346_v35 }
 0x26f   : > { %4116 = vmatprep.mubr.bf16.mxu1 %v8348_v9  ;;  %7644 = vmatpush3.bf16.msra.mxu1 %v9960_v16 }
 0x270   : > { %v7889_v55 = vpop.f32.mrb[68].mxu0  ;;  %7645 = vmatprep.subr.bf16.mxu1 %v9968_v19 }
 0x271   : > { %v10195_v8 = vadd.f32 %v7889_v55, %v10003_v1  ;;  %v2175_v17 = vpop.f32.mrb[69].mxu0  ;;  %v7165_v47 = vpop.f32.mrb[68].mxu1  ;;  %v8354_v1 = vld [vmem:[%s9599_s29 + $0x5d4] ss:$20 sps:$4 sm:$0xff]  }
 0x272   : > { %v10199_v37 = vadd.f32 %v2175_v17, %v9995_v23  ;;  %v7890_v18 = vpop.f32.mrb[70].mxu0  ;;  %v7166_v50 = vpop.f32.mrb[69].mxu1 }
 0x273   : > { %v10204_v61 = vadd.f32 %v7890_v18, %v10005_v5  ;;  %v2178_v16 = vpop.f32.mrb[71].mxu0  ;;  %v10206_v45 = vadd.f32 %v7166_v50, %v7165_v47  ;;  %v7168_v19 = vpop.f32.mrb[70].mxu1  ;;  %7646 = vmatpush3.bf16.msra.mxu1 %v9978_v39 }
 0x274   : > { %v10211_v33 = vadd.f32 %v2178_v16, %v9997_v24  ;;  %v7169_v23 = vpop.f32.mrb[71].mxu1  ;;  %7995 = vmatprep.subr.bf16.mxu1 %v9984_v48  ;;  %v8356_v24 = vld [vmem:[%s9599_s29 + $0x5c8] ss:$20 sps:$4 sm:$0xff]   ;;  %v8357_v48 = vld [vmem:[%s9599_s29 + $0x5d0] ss:$20 sps:$4 sm:$0xff]  }
 0x275   : > { %v10214_v3 = vadd.f32 %v7169_v23, %v7168_v19  ;;  %3956 = vmatmul.mubr.bf16.gmra.mrb[176].mxu0 %v8350_v13  ;;  %v8363_v19 = vld [vmem:[%s9599_s29 + $0x5f8] ss:$20 sps:$4 sm:$0xff]  }
 0x276   : > { %4117 = vmatmul.mubr.bf16.gmra.mrb[176].mxu1 %v8351_v21  ;;  %3963 = vmatprep.mubr.bf16.mxu0 %v8352_v25  ;;  %v8362_v21 = vld [vmem:[%s9599_s29 + $0x5f0] ss:$20 sps:$4 sm:$0xff]  }
 0x277   : > { %4124 = vmatprep.mubr.bf16.mxu1 %v8354_v1  ;;  %v8364_v1 = vld [vmem:[%s9599_s29 + $0x61c] ss:$20 sps:$4 sm:$0xff]  }
 0x278   : > { %v7893_v5 = vpop.f32.mrb[72].mxu0 }
 0x279   : > { %v10217_v40 = vadd.f32 %v7893_v5, %v10020_v29  ;;  %v2191_v39 = vpop.f32.mrb[73].mxu0  ;;  %v7171_v60 = vpop.f32.mrb[72].mxu1  ;;  %v8360_v29 = vld [vmem:[%s9599_s29 + $0x5fc] ss:$20 sps:$4 sm:$0xff]  }
 0x27a   : > { %v10221_v53 = vadd.f32 %v2191_v39, %v10011_v41  ;;  %v7894_v59 = vpop.f32.mrb[74].mxu0  ;;  %v7172_v35 = vpop.f32.mrb[73].mxu1 }
 0x27b   : > { %v10226_v49 = vadd.f32 %v7894_v59, %v10025_v30  ;;  %v2194_v9 = vpop.f32.mrb[75].mxu0  ;;  %v10228_v15 = vadd.f32 %v7172_v35, %v7171_v60  ;;  %v7174_v55 = vpop.f32.mrb[74].mxu1 }
 0x27c   : > { %v10232_v17 = vadd.f32 %v2194_v9, %v10014_v51  ;;  %v7175_v41 = vpop.f32.mrb[75].mxu1  ;;  %v8368_v9 = vld [vmem:[%s9599_s29 + $0x618] ss:$20 sps:$4 sm:$0xff]  }
 0x27d   : > { %v10234_v47 = vadd.f32 %v7175_v41, %v7174_v55  ;;  %3964 = vmatmul.mubr.bf16.gmra.mrb[180].mxu0 %v8356_v24  ;;  %v8369_v41 = vld [vmem:[%s9599_s29 + $0x620] ss:$20 sps:$4 sm:$0xff]  }
 0x27e   : > { %4125 = vmatmul.mubr.bf16.gmra.mrb[180].mxu1 %v8357_v48  ;;  %3971 = vmatprep.mubr.bf16.mxu0 %v8358_v6 }
 0x27f   : > { %4132 = vmatprep.mubr.bf16.mxu1 %v8360_v29 }
 0x280   : > { %v7897_v30 = vpop.f32.mrb[76].mxu0 }
 0x281   : > { %v10237_v13 = vadd.f32 %v7897_v30, %v10048_v62  ;;  %v2207_v18 = vpop.f32.mrb[77].mxu0  ;;  %v7177_v50 = vpop.f32.mrb[76].mxu1  ;;  %v8366_v62 = vld [vmem:[%s9599_s29 + $0x624] ss:$20 sps:$4 sm:$0xff]  }
 0x282   : > { %v10241_v25 = vadd.f32 %v2207_v18, %v10034_v14  ;;  %v7898_v51 = vpop.f32.mrb[78].mxu0  ;;  %v7178_v16 = vpop.f32.mrb[77].mxu1  ;;  %v8370_v30 = vld [vmem:[%s9599_s29 + $0x644] ss:$20 sps:$4 sm:$0xff]  }
 0x283   : > { %v10246_v23 = vadd.f32 %v7898_v51, %v10053_v58  ;;  %v2210_v5 = vpop.f32.mrb[79].mxu0  ;;  %v10248_v39 = vadd.f32 %v7178_v16, %v7177_v50  ;;  %v7180_v60 = vpop.f32.mrb[78].mxu1 }
 0x284   : > { %11356 = vst [vmem:[#allocation3_spill] sm:$0xff] %v10241_v25  ;;  %v10252_v24 = vadd.f32 %v2210_v5, %v10039_v36  ;;  %v7181_v14 = vpop.f32.mrb[79].mxu1 }
 0x285   : > { %11357 = vst [vmem:[#allocation4_spill] sm:$0xff] %v10246_v23  ;;  %v10254_v59 = vadd.f32 %v7181_v14, %v7180_v60  ;;  %3972 = vmatmul.mubr.bf16.gmra.mrb[184].mxu0 %v8362_v21  ;;  %v8530_v23 = vld [vmem:[%s9599_s29 + $0x8f8] ss:$20 sps:$4 sm:$0xff]  }
 0x286   : > { %11358 = vst [vmem:[#allocation5_spill] sm:$0xff] %v10252_v24  ;;  %4133 = vmatmul.mubr.bf16.gmra.mrb[184].mxu1 %v8363_v19  ;;  %3979 = vmatprep.mubr.bf16.mxu0 %v8364_v1  ;;  %v8525_v24 = vld [vmem:[%s9599_s29 + $0x8a8] ss:$20 sps:$4 sm:$0xff]  }
 0x287   : > { %4140 = vmatprep.mubr.bf16.mxu1 %v8366_v62  ;;  %v8374_v62 = vld [vmem:[%s9599_s29 + $0x640] ss:$20 sps:$4 sm:$0xff]  }
 0x288   : > { %v7901_v58 = vpop.f32.mrb[80].mxu0 }
 0x289   : > { %v10257_v35 = vadd.f32 %v7901_v58, %v10076_v44  ;;  %v2223_v48 = vpop.f32.mrb[81].mxu0  ;;  %v7183_v6 = vpop.f32.mrb[80].mxu1  ;;  %v8372_v44 = vld [vmem:[%s9599_s29 + $0x64c] ss:$20 sps:$4 sm:$0xff]  }
 0x28a   : > { %v10261_v55 = vadd.f32 %v2223_v48, %v10062_v31  ;;  %v7902_v36 = vpop.f32.mrb[82].mxu0  ;;  %v7184_v29 = vpop.f32.mrb[81].mxu1  ;;  %v8375_v48 = vld [vmem:[%s9599_s29 + $0x648] ss:$20 sps:$4 sm:$0xff]  }
 0x28b   : > { %11359 = vst [vmem:[#allocation6_spill] sm:$0xff] %v10257_v35  ;;  %v10266_v18 = vadd.f32 %v7902_v36, %v10080_v12  ;;  %v2226_v50 = vpop.f32.mrb[83].mxu0  ;;  %v10268_v21 = vadd.f32 %v7184_v29, %v7183_v6  ;;  %v7186_v51 = vpop.f32.mrb[82].mxu1  ;;  %v8376_v6 = vld [vmem:[%s9599_s29 + $0x66c] ss:$20 sps:$4 sm:$0xff]  }
 0x28c   : > { %11360 = vst [vmem:[#allocation7_spill] sm:$0xff] %v10261_v55  ;;  %v10272_v16 = vadd.f32 %v2226_v50, %v10067_v2  ;;  %v7187_v31 = vpop.f32.mrb[83].mxu1  ;;  %v8520_v35 = vld [vmem:[%s9599_s29 + $0x858] ss:$20 sps:$4 sm:$0xff]  }
 0x28d   : > { %11361 = vst [vmem:[#allocation8_spill] sm:$0xff] %v10266_v18  ;;  %v10274_v19 = vadd.f32 %v7187_v31, %v7186_v51  ;;  %3980 = vmatmul.mubr.bf16.gmra.mrb[188].mxu0 %v8368_v9  ;;  %v8424_v18 = vld [vmem:[%s9599_s29 + $0x7ac] ss:$20 sps:$4 sm:$0xff]  }
 0x28e   : > { %11362 = vst [vmem:[#allocation9_spill] sm:$0xff] %v10272_v16  ;;  %4141 = vmatmul.mubr.bf16.gmra.mrb[188].mxu1 %v8369_v41  ;;  %3987 = vmatprep.mubr.bf16.mxu0 %v8370_v30  ;;  %v8417_v16 = vld [vmem:[%s9599_s29 + $0x760] ss:$20 sps:$4 sm:$0xff]  }
 0x28f   : > { %4148 = vmatprep.mubr.bf16.mxu1 %v8372_v44 }
 0x290   : > { %v7905_v12 = vpop.f32.mrb[84].mxu0 }
 0x291   : > { %v10277_v1 = vadd.f32 %v7905_v12, %v10096_v10  ;;  %v2239_v5 = vpop.f32.mrb[85].mxu0  ;;  %v7189_v60 = vpop.f32.mrb[84].mxu1  ;;  %v8378_v10 = vld [vmem:[%s9599_s29 + $0x674] ss:$20 sps:$4 sm:$0xff]  }
 0x292   : > { %v10281_v14 = vadd.f32 %v2239_v5, %v10086_v56  ;;  %v7906_v2 = vpop.f32.mrb[86].mxu0  ;;  %v7190_v58 = vpop.f32.mrb[85].mxu1  ;;  %v8380_v12 = vld [vmem:[%s9599_s29 + $0x668] ss:$20 sps:$4 sm:$0xff]  }
 0x293   : > { %11363 = vst [vmem:[#allocation10_spill] sm:$0xff] %v10277_v1  ;;  %v10286_v9 = vadd.f32 %v7906_v2, %v10100_v22  ;;  %v2242_v36 = vpop.f32.mrb[87].mxu0  ;;  %v10288_v29 = vadd.f32 %v7190_v58, %v7189_v60  ;;  %v7192_v41 = vpop.f32.mrb[86].mxu1  ;;  %v8381_v2 = vld [vmem:[%s9599_s29 + $0x670] ss:$20 sps:$4 sm:$0xff]  }
 0x294   : > { %11364 = vst [vmem:[#allocation11_spill] sm:$0xff] %v10281_v14  ;;  %v10292_v30 = vadd.f32 %v2242_v36, %v10090_v52  ;;  %v7193_v56 = vpop.f32.mrb[87].mxu1  ;;  %v8382_v58 = vld [vmem:[%s9599_s29 + $0x694] ss:$20 sps:$4 sm:$0xff]   ;;  %v8411_v14 = vld [vmem:[%s9599_s29 + $0x738] ss:$20 sps:$4 sm:$0xff]  }
 0x295   : > { %11365 = vst [vmem:[#allocation12_spill] sm:$0xff] %v10286_v9  ;;  %v10294_v50 = vadd.f32 %v7193_v56, %v7192_v41  ;;  %3988 = vmatmul.mubr.bf16.gmra.mrb[192].mxu0 %v8374_v62 }
 0x296   : > { %11366 = vst [vmem:[#allocation13_spill] sm:$0xff] %v10292_v30  ;;  %4149 = vmatmul.mubr.bf16.gmra.mrb[192].mxu1 %v8375_v48  ;;  %3995 = vmatprep.mubr.bf16.mxu0 %v8376_v6  ;;  %v8405_v30 = vld [vmem:[%s9599_s29 + $0x710] ss:$20 sps:$4 sm:$0xff]  }
 0x297   : > { %4156 = vmatprep.mubr.bf16.mxu1 %v8378_v10 }
 0x298   : > { %v7909_v22 = vpop.f32.mrb[88].mxu0 }
 0x299   : > { %v10297_v51 = vadd.f32 %v7909_v22, %v10115_v57  ;;  %v2255_v44 = vpop.f32.mrb[89].mxu0  ;;  %v7195_v31 = vpop.f32.mrb[88].mxu1  ;;  %v8384_v57 = vld [vmem:[%s9599_s29 + $0x69c] ss:$20 sps:$4 sm:$0xff]  }
 0x29a   : > { %v10301_v5 = vadd.f32 %v2255_v44, %v10106_v11  ;;  %v7910_v52 = vpop.f32.mrb[90].mxu0  ;;  %v7196_v60 = vpop.f32.mrb[89].mxu1 }
 0x29b   : > { %11367 = vst [vmem:[#allocation14_spill] sm:$0xff] %v10297_v51  ;;  %v10306_v62 = vadd.f32 %v7910_v52, %v10119_v43  ;;  %v2258_v48 = vpop.f32.mrb[91].mxu0  ;;  %v10308_v6 = vadd.f32 %v7196_v60, %v7195_v31  ;;  %v7198_v36 = vpop.f32.mrb[90].mxu1  ;;  %v8386_v31 = vld [vmem:[%s9599_s29 + $0x690] ss:$20 sps:$4 sm:$0xff]  }
 0x29c   : > { %11368 = vst [vmem:[#allocation15_spill] sm:$0xff] %v10301_v5  ;;  %v10312_v41 = vadd.f32 %v2258_v48, %v10109_v7  ;;  %v7199_v11 = vpop.f32.mrb[91].mxu1  ;;  %v8387_v48 = vld [vmem:[%s9599_s29 + $0x698] ss:$20 sps:$4 sm:$0xff]   ;;  %v8399_v5 = vld [vmem:[%s9599_s29 + $0x6e8] ss:$20 sps:$4 sm:$0xff]  }
 0x29d   : > { %11369 = vst [vmem:[#allocation16_spill] sm:$0xff] %v10306_v62  ;;  %v10314_v10 = vadd.f32 %v7199_v11, %v7198_v36  ;;  %3996 = vmatmul.mubr.bf16.gmra.mrb[196].mxu0 %v8380_v12  ;;  %v8388_v36 = vld [vmem:[%s9599_s29 + $0x6bc] ss:$20 sps:$4 sm:$0xff]  }
 0x29e   : > { %11370 = vst [vmem:[#allocation17_spill] sm:$0xff] %v10312_v41  ;;  %4157 = vmatmul.mubr.bf16.gmra.mrb[196].mxu1 %v8381_v2  ;;  %4003 = vmatprep.mubr.bf16.mxu0 %v8382_v58  ;;  %v8394_v41 = vld [vmem:[%s9599_s29 + $0x6e4] ss:$20 sps:$4 sm:$0xff]  }
 0x29f   : > { %4164 = vmatprep.mubr.bf16.mxu1 %v8384_v57 }
 0x2a0   : > { %v7913_v43 = vpop.f32.mrb[92].mxu0 }
 0x2a1   : > { %v10317_v56 = vadd.f32 %v7913_v43, %v10161_v28  ;;  %v2271_v22 = vpop.f32.mrb[93].mxu0  ;;  %v7201_v44 = vpop.f32.mrb[92].mxu1  ;;  %v8390_v28 = vld [vmem:[%s9599_s29 + $0x6c4] ss:$20 sps:$4 sm:$0xff]  }
 0x2a2   : > { %v10321_v52 = vadd.f32 %v2271_v22, %v10141_v38  ;;  %v7914_v7 = vpop.f32.mrb[94].mxu0  ;;  %v7202_v60 = vpop.f32.mrb[93].mxu1 }
 0x2a3   : > { %11371 = vst [vmem:[#allocation18_spill] sm:$0xff] %v10317_v56  ;;  %v10326_v12 = vadd.f32 %v7914_v7, %v10167_v42  ;;  %v2274_v2 = vpop.f32.mrb[95].mxu0  ;;  %v10328_v58 = vadd.f32 %v7202_v60, %v7201_v44  ;;  %v7204_v57 = vpop.f32.mrb[94].mxu1  ;;  %v8392_v44 = vld [vmem:[%s9599_s29 + $0x6b8] ss:$20 sps:$4 sm:$0xff]  }
 0x2a4   : > { %11372 = vst [vmem:[#allocation19_spill] sm:$0xff] %v10321_v52  ;;  %v10332_v11 = vadd.f32 %v2274_v2, %v10144_v32  ;;  %v7205_v38 = vpop.f32.mrb[95].mxu1  ;;  %v8393_v52 = vld [vmem:[%s9599_s29 + $0x6c0] ss:$20 sps:$4 sm:$0xff]  }
 0x2a5   : > { %11373 = vst [vmem:[#allocation20_spill] sm:$0xff] %v10326_v12  ;;  %v10334_v43 = vadd.f32 %v7205_v38, %v7204_v57  ;;  %4004 = vmatmul.mubr.bf16.gmra.mrb[200].mxu0 %v8386_v31  ;;  %v8396_v57 = vld [vmem:[%s9599_s29 + $0x6ec] ss:$20 sps:$4 sm:$0xff]  }
 0x2a6   : > { %11374 = vst [vmem:[#allocation21_spill] sm:$0xff] %v10332_v11  ;;  %4165 = vmatmul.mubr.bf16.gmra.mrb[200].mxu1 %v8387_v48  ;;  %4011 = vmatprep.mubr.bf16.mxu0 %v8388_v36 }
 0x2a7   : > { %4172 = vmatprep.mubr.bf16.mxu1 %v8390_v28 }
 0x2a8   : > { %v7271_v42 = vpop.f32.mrb[96].mxu0 }
 0x2a9   : > { %v7272_v22 = vpop.f32.mrb[97].mxu0  ;;  %v7207_v7 = vpop.f32.mrb[96].mxu1 }
 0x2aa   : > { %v7273_v60 = vadd.f32 %v7272_v22, %v7271_v42  ;;  %v7274_v12 = vpop.f32.mrb[98].mxu0  ;;  %v7208_v56 = vpop.f32.mrb[97].mxu1 }
 0x2ab   : > { %v10339_v62 = vadd.f32 %v7208_v56, %v7207_v7  ;;  %v7275_v32 = vpop.f32.mrb[99].mxu0  ;;  %v7210_v2 = vpop.f32.mrb[98].mxu1 }
 0x2ac   : > { %v7276_v31 = vadd.f32 %v7275_v32, %v7274_v12  ;;  %v7211_v48 = vpop.f32.mrb[99].mxu1  ;;  %v10343_v36 = vadd.f32 %v7273_v60, %v10182_v4  ;;  %v8398_v12 = vld [vmem:[%s9599_s29 + $0x6e0] ss:$20 sps:$4 sm:$0xff]  }
 0x2ad   : > { %v10345_v28 = vadd.f32 %v7211_v48, %v7210_v2  ;;  %4012 = vmatmul.mubr.bf16.gmra.mrb[204].mxu0 %v8392_v44  ;;  %v8400_v4 = vld [vmem:[%s9599_s29 + $0x70c] ss:$20 sps:$4 sm:$0xff]   ;;  %v8402_v2 = vld [vmem:[%s9599_s29 + $0x714] ss:$20 sps:$4 sm:$0xff]  }
 0x2ae   : > { %4173 = vmatmul.mubr.bf16.gmra.mrb[204].mxu1 %v8393_v52  ;;  %4019 = vmatprep.mubr.bf16.mxu0 %v8394_v41  ;;  %v10348_v56 = vadd.f32 %v7276_v31, %v10190_v27 }
 0x2af   : > { %4180 = vmatprep.mubr.bf16.mxu1 %v8396_v57 }
 0x2b0   : > { %v7277_v38 = vpop.f32.mrb[100].mxu0 }
 0x2b1   : > { %v7278_v42 = vpop.f32.mrb[101].mxu0  ;;  %v7213_v22 = vpop.f32.mrb[100].mxu1 }
 0x2b2   : > { %v7279_v7 = vadd.f32 %v7278_v42, %v7277_v38  ;;  %v7280_v32 = vpop.f32.mrb[102].mxu0  ;;  %v7214_v11 = vpop.f32.mrb[101].mxu1 }
 0x2b3   : > { %v10353_v60 = vadd.f32 %v7214_v11, %v7213_v22  ;;  %v7281_v44 = vpop.f32.mrb[103].mxu0  ;;  %v7216_v52 = vpop.f32.mrb[102].mxu1  ;;  %v8404_v22 = vld [vmem:[%s9599_s29 + $0x708] ss:$20 sps:$4 sm:$0xff]  }
 0x2b4   : > { %v7282_v41 = vadd.f32 %v7281_v44, %v7280_v32  ;;  %v7217_v27 = vpop.f32.mrb[103].mxu1  ;;  %v10357_v57 = vadd.f32 %v7279_v7, %v10206_v45  ;;  %v8406_v45 = vld [vmem:[%s9599_s29 + $0x734] ss:$20 sps:$4 sm:$0xff]  }
 0x2b5   : > { %v10359_v31 = vadd.f32 %v7217_v27, %v7216_v52  ;;  %4020 = vmatmul.mubr.bf16.gmra.mrb[208].mxu0 %v8398_v12  ;;  %v8408_v52 = vld [vmem:[%s9599_s29 + $0x73c] ss:$20 sps:$4 sm:$0xff]  }
 0x2b6   : > { %4181 = vmatmul.mubr.bf16.gmra.mrb[208].mxu1 %v8399_v5  ;;  %4027 = vmatprep.mubr.bf16.mxu0 %v8400_v4  ;;  %v10362_v11 = vadd.f32 %v7282_v41, %v10214_v3 }
 0x2b7   : > { %4188 = vmatprep.mubr.bf16.mxu1 %v8402_v2 }
 0x2b8   : > { %v7283_v48 = vpop.f32.mrb[104].mxu0 }
 0x2b9   : > { %v7284_v38 = vpop.f32.mrb[105].mxu0  ;;  %v7219_v42 = vpop.f32.mrb[104].mxu1 }
 0x2ba   : > { %v7285_v32 = vadd.f32 %v7284_v38, %v7283_v48  ;;  %v7286_v44 = vpop.f32.mrb[106].mxu0  ;;  %v7220_v51 = vpop.f32.mrb[105].mxu1 }
 0x2bb   : > { %v10367_v7 = vadd.f32 %v7220_v51, %v7219_v42  ;;  %v7287_v12 = vpop.f32.mrb[107].mxu0  ;;  %v7222_v5 = vpop.f32.mrb[106].mxu1  ;;  %v8410_v42 = vld [vmem:[%s9599_s29 + $0x730] ss:$20 sps:$4 sm:$0xff]  }
 0x2bc   : > { %v7288_v4 = vadd.f32 %v7287_v12, %v7286_v44  ;;  %v7223_v3 = vpop.f32.mrb[107].mxu1  ;;  %v10371_v2 = vadd.f32 %v7285_v32, %v10228_v15  ;;  %v8412_v15 = vld [vmem:[%s9599_s29 + $0x75c] ss:$20 sps:$4 sm:$0xff]  }
 0x2bd   : > { %v10373_v41 = vadd.f32 %v7223_v3, %v7222_v5  ;;  %4028 = vmatmul.mubr.bf16.gmra.mrb[212].mxu0 %v8404_v22  ;;  %v8414_v5 = vld [vmem:[%s9599_s29 + $0x764] ss:$20 sps:$4 sm:$0xff]  }
 0x2be   : > { %4189 = vmatmul.mubr.bf16.gmra.mrb[212].mxu1 %v8405_v30  ;;  %4035 = vmatprep.mubr.bf16.mxu0 %v8406_v45  ;;  %v10376_v51 = vadd.f32 %v7288_v4, %v10234_v47 }
 0x2bf   : > { %4196 = vmatprep.mubr.bf16.mxu1 %v8408_v52 }
 0x2c0   : > { %v7289_v27 = vpop.f32.mrb[108].mxu0 }
 0x2c1   : > { %v7290_v48 = vpop.f32.mrb[109].mxu0  ;;  %v7225_v38 = vpop.f32.mrb[108].mxu1 }
 0x2c2   : > { %v7291_v44 = vadd.f32 %v7290_v48, %v7289_v27  ;;  %v7292_v12 = vpop.f32.mrb[110].mxu0  ;;  %v7226_v9 = vpop.f32.mrb[109].mxu1 }
 0x2c3   : > { %v10381_v32 = vadd.f32 %v7226_v9, %v7225_v38  ;;  %v7293_v22 = vpop.f32.mrb[111].mxu0  ;;  %v7228_v30 = vpop.f32.mrb[110].mxu1  ;;  %v8416_v38 = vld [vmem:[%s9599_s29 + $0x758] ss:$20 sps:$4 sm:$0xff]  }
 0x2c4   : > { %v7294_v45 = vadd.f32 %v7293_v22, %v7292_v12  ;;  %v7229_v47 = vpop.f32.mrb[111].mxu1  ;;  %v10385_v52 = vadd.f32 %v7291_v44, %v10248_v39  ;;  %v8418_v39 = vld [vmem:[%s9599_s29 + $0x510] ss:$20 sps:$4 sm:$0xff]  }
 0x2c5   : > { %v10387_v4 = vadd.f32 %v7229_v47, %v7228_v30  ;;  %4036 = vmatmul.mubr.bf16.gmra.mrb[216].mxu0 %v8410_v42  ;;  %v8421_v30 = vld [vmem:[%s9599_s29 + $0x784] ss:$20 sps:$4 sm:$0xff]  }
 0x2c6   : > { %4197 = vmatmul.mubr.bf16.gmra.mrb[216].mxu1 %v8411_v14  ;;  %4043 = vmatprep.mubr.bf16.mxu0 %v8412_v15  ;;  %v10390_v9 = vadd.f32 %v7294_v45, %v10254_v59 }
 0x2c7   : > { %4204 = vmatprep.mubr.bf16.mxu1 %v8414_v5 }
 0x2c8   : > { %v7295_v3 = vpop.f32.mrb[112].mxu0 }
 0x2c9   : > { %v7296_v27 = vpop.f32.mrb[113].mxu0  ;;  %v7231_v48 = vpop.f32.mrb[112].mxu1 }
 0x2ca   : > { %v7297_v12 = vadd.f32 %v7296_v27, %v7295_v3  ;;  %v7298_v22 = vpop.f32.mrb[114].mxu0  ;;  %v7232_v1 = vpop.f32.mrb[113].mxu1 }
 0x2cb   : > { %v10395_v44 = vadd.f32 %v7232_v1, %v7231_v48  ;;  %v7299_v42 = vpop.f32.mrb[115].mxu0  ;;  %v7234_v14 = vpop.f32.mrb[114].mxu1  ;;  %v8422_v48 = vld [vmem:[%s9599_s29 + $0x538] ss:$20 sps:$4 sm:$0xff]  }
 0x2cc   : > { %v7300_v15 = vadd.f32 %v7299_v42, %v7298_v22  ;;  %v7235_v59 = vpop.f32.mrb[115].mxu1  ;;  %v10399_v5 = vadd.f32 %v7297_v12, %v10268_v21  ;;  %v8419_v12 = vld [vmem:[%s9599_s29 + $0x780] ss:$20 sps:$4 sm:$0xff]  }
 0x2cd   : > { %v10401_v45 = vadd.f32 %v7235_v59, %v7234_v14  ;;  %4044 = vmatmul.mubr.bf16.gmra.mrb[220].mxu0 %v8416_v38 }
 0x2ce   : > { %4205 = vmatmul.mubr.bf16.gmra.mrb[220].mxu1 %v8417_v16  ;;  %7963 = vmatprep.mubr.msk.bf16.mxu0 %vm1754_vm0, %v8418_v39  ;;  %v10405_v1 = vadd.f32 %v7300_v15, %v10274_v19  ;;  %v8423_v16 = vld [vmem:[%s9599_s29 + $0x560] ss:$20 sps:$4 sm:$0xff]  }
 0x2cf   : > { %11375 = vst [vmem:[#allocation22_spill] sm:$0xff] %v10401_v45  ;;  %4983 = vmatprep.mubr.bf16.mxu1 %v8421_v30  ;;  %v8583_v15 = vld [vmem:[%s11315_s1 + $0x80] sm:$0xff]  }
 0x2d0   : > { %v7301_v47 = vpop.f32.mrb[116].mxu0 }
 0x2d1   : > { %v7302_v3 = vpop.f32.mrb[117].mxu0  ;;  %v7237_v27 = vpop.f32.mrb[116].mxu1 }
 0x2d2   : > { %v7303_v22 = vadd.f32 %v7302_v3, %v7301_v47  ;;  %v7304_v42 = vpop.f32.mrb[118].mxu0  ;;  %v7238_v21 = vpop.f32.mrb[117].mxu1 }
 0x2d3   : > { %v10409_v14 = vadd.f32 %v7238_v21, %v7237_v27  ;;  %v7305_v38 = vpop.f32.mrb[119].mxu0  ;;  %v7240_v59 = vpop.f32.mrb[118].mxu1  ;;  %v8585_v27 = vld [vmem:[%s11315_s1 + $0xc8] sm:$0xff]  }
 0x2d4   : > { %v7306_v45 = vadd.f32 %v7305_v38, %v7304_v42  ;;  %v7241_v39 = vpop.f32.mrb[119].mxu1  ;;  %v10414_v19 = vadd.f32 %v7303_v22, %v10288_v29  ;;  %v8584_v29 = vld [vmem:[%s11315_s1 + $0x100] sm:$0xff]   ;;  %v8586_v38 = vld [vmem:[%s11315_s1 + $0x88] sm:$0xff]  }
 0x2d5   : > { %v10416_v30 = vadd.f32 %v7241_v39, %v7240_v59  ;;  %7964 = vmatmul.mubr.msk.bf16.vlgmr.msra.gmra.mrb[224].mxu0 %vm1754_vm0, %v8422_v48 }
 0x2d6   : > { %4984 = vmatmul.mubr.bf16.vlgmr.msra.gmra.mrb[224].mxu1 %v8419_v12  ;;  %7744 = vmatpush3.bf16.msra.mxu0 %v8583_v15  ;;  %v10423_v47 = vadd.f32 %v7306_v45, %v10294_v50  ;;  %v8426_v50 = vld [vmem:[%s9599_s29 + $0x588] ss:$20 sps:$4 sm:$0xff]  }
 0x2d7   : > { %7996 = vmatpush3.bf16.msra.mxu1 %v8584_v29  ;;  %7967 = vmatprep.mubr.msk.bf16.mxu0 %vm1754_vm0, %v8423_v16  ;;  %v8427_v12 = vld [vmem:[%s9599_s29 + $0x7a8] ss:$20 sps:$4 sm:$0xff]   ;;  %v8587_v29 = vld [vmem:[%s11315_s1 + $0xd0] sm:$0xff]  }
 0x2d8   : > { %v7307_v3 = vpop.f32.mrb[120].mxu0  ;;  %4991 = vmatprep.mubr.bf16.mxu1 %v8424_v18  ;;  %7745 = vmatprep.subr.bf16.mxu0 %v8585_v27  ;;  %v8428_v18 = vld [vmem:[%s9599_s29 + $0x5b0] ss:$20 sps:$4 sm:$0xff]   ;;  %v8429_v15 = vld [vmem:[%s9599_s29 + $0x7d4] ss:$20 sps:$4 sm:$0xff]  }
 0x2d9   : > { %v7308_v48 = vpop.f32.mrb[121].mxu0  ;;  %v7243_v22 = vpop.f32.mrb[120].mxu1  ;;  %7997 = vmatprep.subr.bf16.mxu1 %v10126_v20 }
 0x2da   : > { %v7309_v45 = vadd.f32 %v7308_v48, %v7307_v3  ;;  %v7310_v42 = vpop.f32.mrb[122].mxu0  ;;  %v7244_v21 = vpop.f32.mrb[121].mxu1  ;;  %7746 = vmatpush3.bf16.msra.mxu0 %v8586_v38 }
 0x2db   : > { %v10439_v59 = vadd.f32 %v7244_v21, %v7243_v22  ;;  %v7311_v16 = vpop.f32.mrb[123].mxu0  ;;  %v7246_v39 = vpop.f32.mrb[122].mxu1  ;;  %7747 = vmatprep.subr.bf16.mxu0 %v8587_v29  ;;  %7998 = vmatpush3.bf16.msra.mxu1 %v10126_v20  ;;  %v8588_v20 = vld [vmem:[%s11315_s1 + $0x90] sm:$0xff]  }
 0x2dc   : > { %v7312_v3 = vadd.f32 %v7311_v16, %v7310_v42  ;;  %v7247_v27 = vpop.f32.mrb[123].mxu1  ;;  %v10447_v48 = vadd.f32 %v7309_v45, %v10308_v6  ;;  %7999 = vmatprep.subr.bf16.mxu1 %v10137_v26  ;;  %v8432_v16 = vld [vmem:[%s9599_s29 + $0x7d0] ss:$20 sps:$4 sm:$0xff]  }
 0x2dd   : > { %v10450_v22 = vadd.f32 %v7247_v27, %v7246_v39  ;;  %7968 = vmatmul.mubr.msk.bf16.gmra.mrb[228].mxu0 %vm1754_vm0, %v8426_v50  ;;  %v8589_v50 = vld [vmem:[%s11315_s1 + $0xd8] sm:$0xff]   ;;  %v8433_v39 = vld [vmem:[%s9599_s29 + $0x600] ss:$20 sps:$4 sm:$0xff]  }
 0x2de   : > { %4992 = vmatmul.mubr.bf16.gmra.mrb[228].mxu1 %v8427_v12  ;;  %7971 = vmatprep.mubr.msk.bf16.mxu0 %vm1754_vm0, %v8428_v18  ;;  %v10455_v21 = vadd.f32 %v7312_v3, %v10314_v10  ;;  %v8431_v10 = vld [vmem:[%s9599_s29 + $0x5d8] ss:$20 sps:$4 sm:$0xff]   ;;  %v8434_v27 = vld [vmem:[%s9599_s29 + $0x7fc] ss:$20 sps:$4 sm:$0xff]  }
 0x2df   : > { %4999 = vmatprep.mubr.bf16.mxu1 %v8429_v15  ;;  %7748 = vmatpush3.bf16.msra.mxu0 %v8588_v20  ;;  %v8590_v20 = vld [vmem:[%s11315_s1 + $0x98] sm:$0xff]  }
 0x2e0   : > { %v7313_v6 = vpop.f32.mrb[124].mxu0  ;;  %7749 = vmatprep.subr.bf16.mxu0 %v8589_v50  ;;  %8000 = vmatpush3.bf16.msra.mxu1 %v10137_v26 }
 0x2e1   : > { %v7314_v45 = vpop.f32.mrb[125].mxu0  ;;  %v7249_v42 = vpop.f32.mrb[124].mxu1  ;;  %8001 = vmatprep.subr.bf16.mxu1 %v10152_v0 }
 0x2e2   : > { %v7315_v12 = vadd.f32 %v7314_v45, %v7313_v6  ;;  %v7316_v38 = vpop.f32.mrb[126].mxu0  ;;  %v7250_v18 = vpop.f32.mrb[125].mxu1  ;;  %v8591_v6 = vld [vmem:[%s11315_s1 + $0xe0] sm:$0xff]  }
 0x2e3   : > { %v10468_v15 = vadd.f32 %v7250_v18, %v7249_v42  ;;  %v7317_v29 = vpop.f32.mrb[127].mxu0  ;;  %v7252_v3 = vpop.f32.mrb[126].mxu1  ;;  %7750 = vmatpush3.bf16.msra.mxu0 %v8590_v20  ;;  %v8438_v20 = vld [vmem:[%s9599_s29 + $0x650] ss:$20 sps:$4 sm:$0xff]  }
 0x2e4   : > { %v7318_v26 = vadd.f32 %v7317_v29, %v7316_v38  ;;  %v7253_v50 = vpop.f32.mrb[127].mxu1  ;;  %7751 = vmatprep.subr.bf16.mxu0 %v8591_v6  ;;  %v10478_v45 = vadd.f32 %v7315_v12, %v10328_v58  ;;  %8002 = vmatpush3.bf16.msra.mxu1 %v10152_v0  ;;  %v8592_v58 = vld [vmem:[%s11315_s1 + $0xa0] sm:$0xff]  }
 0x2e5   : > { %v10481_v42 = vadd.f32 %v7253_v50, %v7252_v3  ;;  %7972 = vmatmul.mubr.msk.bf16.gmra.mrb[232].mxu0 %vm1754_vm0, %v8431_v10  ;;  %v8593_v10 = vld [vmem:[%s11315_s1 + $0xe8] sm:$0xff]  }
 0x2e6   : > { %5000 = vmatmul.mubr.bf16.gmra.mrb[232].mxu1 %v8432_v16  ;;  %7975 = vmatprep.mubr.msk.bf16.mxu0 %vm1754_vm0, %v8433_v39  ;;  %v10486_v38 = vadd.f32 %v7318_v26, %v10334_v43  ;;  %v8436_v16 = vld [vmem:[%s9599_s29 + $0x628] ss:$20 sps:$4 sm:$0xff]  }
 0x2e7   : > { %11376 = vst [vmem:[#allocation23_spill] sm:$0xff] %v10481_v42  ;;  %5007 = vmatprep.mubr.bf16.mxu1 %v8434_v27  ;;  %7752 = vmatpush3.bf16.msra.mxu0 %v8592_v58  ;;  %v8437_v27 = vld [vmem:[%s9599_s29 + $0x7f8] ss:$20 sps:$4 sm:$0xff]  }
 0x2e8   : > { %v7319_v0 = vpop.f32.mrb[128].mxu0  ;;  %7753 = vmatprep.subr.bf16.mxu0 %v8593_v10  ;;  %v8439_v58 = vld [vmem:[%s9599_s29 + $0x824] ss:$20 sps:$4 sm:$0xff]   ;;  %v8594_v10 = vld [vmem:[%s11315_s1 + $0xa8] sm:$0xff]  }
 0x2e9   : > { %v7925_v12 = vpop.f32.mrb[128].mxu1  ;;  %v7320_v18 = vpop.f32.mrb[129].mxu0  ;;  %v8444_v42 = vld [vmem:[%s9599_s29 + $0x84c] ss:$20 sps:$4 sm:$0xff]  }
 0x2ea   : > { %v10496_v39 = vadd.f32 %v7925_v12, %v10357_v57  ;;  %v7321_v43 = vadd.f32 %v7320_v18, %v7319_v0  ;;  %v3187_v29 = vpop.f32.mrb[129].mxu1  ;;  %v7322_v3 = vpop.f32.mrb[130].mxu0 }
 0x2eb   : > { %v10501_v26 = vadd.f32 %v3187_v29, %v10343_v36  ;;  %v7926_v50 = vpop.f32.mrb[130].mxu1  ;;  %v7323_v6 = vpop.f32.mrb[131].mxu0  ;;  %7754 = vmatpush3.bf16.msra.mxu0 %v8594_v10  ;;  %v8595_v36 = vld [vmem:[%s11315_s1 + $0xf0] sm:$0xff]  }
 0x2ec   : > { %v10510_v0 = vadd.f32 %v7926_v50, %v10362_v11  ;;  %v7324_v12 = vadd.f32 %v7323_v6, %v7322_v3  ;;  %v3190_v18 = vpop.f32.mrb[131].mxu1  ;;  %7755 = vmatprep.subr.bf16.mxu0 %v8595_v36  ;;  %v10516_v29 = vadd.f32 %v7321_v43, %v10339_v62  ;;  %v8597_v43 = vld [vmem:[%s11315_s1 + $0xf8] sm:$0xff]   ;;  %v8443_v36 = vld [vmem:[%s9599_s29 + $0x6a0] ss:$20 sps:$4 sm:$0xff]  }
 0x2ed   : > { %v10521_v10 = vadd.f32 %v3190_v18, %v10348_v56  ;;  %7976 = vmatmul.mubr.msk.bf16.gmra.mrb[236].mxu0 %vm1754_vm0, %v8436_v16  ;;  %v8596_v56 = vld [vmem:[%s11315_s1 + $0xb0] sm:$0xff]  }
 0x2ee   : > { %5008 = vmatmul.mubr.bf16.gmra.mrb[236].mxu1 %v8437_v27  ;;  %7979 = vmatprep.mubr.msk.bf16.mxu0 %vm1754_vm0, %v8438_v20  ;;  %v10528_v3 = vadd.f32 %v7324_v12, %v10345_v28  ;;  %v8441_v20 = vld [vmem:[%s9599_s29 + $0x678] ss:$20 sps:$4 sm:$0xff]   ;;  %v8442_v18 = vld [vmem:[%s9599_s29 + $0x820] ss:$20 sps:$4 sm:$0xff]  }
 0x2ef   : > { %5015 = vmatprep.mubr.bf16.mxu1 %v8439_v58  ;;  %7756 = vmatpush3.bf16.msra.mxu0 %v8596_v56 }
 0x2f0   : > { %v7325_v16 = vpop.f32.mrb[132].mxu0  ;;  %7757 = vmatprep.subr.bf16.mxu0 %v8597_v43  ;;  %v8598_v43 = vld [vmem:[%s11315_s1 + $0xb8] sm:$0xff]  }
 0x2f1   : > { %v7929_v27 = vpop.f32.mrb[132].mxu1  ;;  %v7326_v28 = vpop.f32.mrb[133].mxu0 }
 0x2f2   : > { %v10540_v50 = vadd.f32 %v7929_v27, %v10385_v52  ;;  %v7327_v6 = vadd.f32 %v7326_v28, %v7325_v16  ;;  %v3203_v58 = vpop.f32.mrb[133].mxu1  ;;  %v7328_v12 = vpop.f32.mrb[134].mxu0  ;;  %v8449_v52 = vld [vmem:[%s9599_s29 + $0x874] ss:$20 sps:$4 sm:$0xff]  }
 0x2f3   : > { %v10545_v56 = vadd.f32 %v3203_v58, %v10371_v2  ;;  %v7930_v62 = vpop.f32.mrb[134].mxu1  ;;  %v7329_v11 = vpop.f32.mrb[135].mxu0  ;;  %7758 = vmatpush3.bf16.msra.mxu0 %v8598_v43 }
 0x2f4   : > { %v10554_v16 = vadd.f32 %v7930_v62, %v10390_v9  ;;  %v7330_v27 = vadd.f32 %v7329_v11, %v7328_v12  ;;  %v3206_v28 = vpop.f32.mrb[135].mxu1  ;;  %v10557_v2 = vadd.f32 %v7327_v6, %v10353_v60  ;;  %v8446_v12 = vld [vmem:[%s9599_s29 + $0x6c8] ss:$20 sps:$4 sm:$0xff]  }
 0x2f5   : > { %v10562_v57 = vadd.f32 %v3206_v28, %v10376_v51  ;;  %7980 = vmatmul.mubr.msk.bf16.gmra.mrb[240].mxu0 %vm1754_vm0, %v8441_v20  ;;  %v8447_v9 = vld [vmem:[%s9599_s29 + $0x848] ss:$20 sps:$4 sm:$0xff]  }
 0x2f6   : > { %5016 = vmatmul.mubr.bf16.gmra.mrb[240].mxu1 %v8442_v18  ;;  %7983 = vmatprep.mubr.msk.bf16.mxu0 %vm1754_vm0, %v8443_v36  ;;  %v10569_v11 = vadd.f32 %v7330_v27, %v10359_v31  ;;  %v8448_v36 = vld [vmem:[%s9599_s29 + $0x6f0] ss:$20 sps:$4 sm:$0xff]  }
 0x2f7   : > { %5023 = vmatprep.mubr.bf16.mxu1 %v8444_v42  ;;  %v8454_v42 = vld [vmem:[%s9599_s29 + $0x89c] ss:$20 sps:$4 sm:$0xff]  }
 0x2f8   : > { %v7331_v51 = vpop.f32.mrb[136].mxu0 }
 0x2f9   : > { %v7933_v62 = vpop.f32.mrb[136].mxu1  ;;  %v7332_v6 = vpop.f32.mrb[137].mxu0 }
 0x2fa   : > { %v10575_v20 = vadd.f32 %v7933_v62, %v10414_v19  ;;  %v7333_v43 = vadd.f32 %v7332_v6, %v7331_v51  ;;  %v3219_v28 = vpop.f32.mrb[137].mxu1  ;;  %v7334_v18 = vpop.f32.mrb[138].mxu0 }
 0x2fb   : > { %v10580_v31 = vadd.f32 %v3219_v28, %v10399_v5  ;;  %v7934_v27 = vpop.f32.mrb[138].mxu1  ;;  %v7335_v58 = vpop.f32.mrb[139].mxu0 }
 0x2fc   : > { %v10586_v60 = vadd.f32 %v7934_v27, %v10423_v47  ;;  %v7336_v19 = vadd.f32 %v7335_v58, %v7334_v18  ;;  %v3222_v62 = vpop.f32.mrb[139].mxu1  ;;  %v10589_v51 = vadd.f32 %v7333_v43, %v10367_v7  ;;  %v8451_v18 = vld [vmem:[%s9599_s29 + $0x718] ss:$20 sps:$4 sm:$0xff]   ;;  %v8452_v47 = vld [vmem:[%s9599_s29 + $0x870] ss:$20 sps:$4 sm:$0xff]  }
 0x2fd   : > { %v10594_v5 = vadd.f32 %v3222_v62, %v10405_v1  ;;  %7984 = vmatmul.mubr.msk.bf16.gmra.mrb[244].mxu0 %vm1754_vm0, %v8446_v12 }
 0x2fe   : > { %5024 = vmatmul.mubr.bf16.gmra.mrb[244].mxu1 %v8447_v9  ;;  %7987 = vmatprep.mubr.msk.bf16.mxu0 %vm1754_vm0, %v8448_v36  ;;  %v10601_v58 = vadd.f32 %v7336_v19, %v10373_v41  ;;  %v8453_v36 = vld [vmem:[%s9599_s29 + $0x740] ss:$20 sps:$4 sm:$0xff]  }
 0x2ff   : > { %5031 = vmatprep.mubr.bf16.mxu1 %v8449_v52  ;;  %v8460_v52 = vld [vmem:[%s9599_s29 + $0x8c4] ss:$20 sps:$4 sm:$0xff]  }
 0x300   : > { %v7337_v1 = vpop.f32.mrb[140].mxu0 }
 0x301   : > { %v7937_v43 = vpop.f32.mrb[140].mxu1  ;;  %v7338_v28 = vpop.f32.mrb[141].mxu0 }
 0x302   : > { %v10607_v12 = vadd.f32 %v7937_v43, %v10478_v45  ;;  %v7339_v27 = vadd.f32 %v7338_v28, %v7337_v1  ;;  %v3235_v62 = vpop.f32.mrb[141].mxu1  ;;  %v7340_v9 = vpop.f32.mrb[142].mxu0  ;;  %v8463_v28 = vld [vmem:[%s9599_s29 + $0x78c] ss:$20 sps:$4 sm:$0xff]  }
 0x303   : > { %v10612_v41 = vadd.f32 %v3235_v62, %v10447_v48  ;;  %v7938_v19 = vpop.f32.mrb[142].mxu1  ;;  %v7341_v6 = vpop.f32.mrb[143].mxu0 }
 0x304   : > { %v10618_v7 = vadd.f32 %v7938_v19, %v10486_v38  ;;  %v7342_v45 = vadd.f32 %v7341_v6, %v7340_v9  ;;  %v3238_v43 = vpop.f32.mrb[143].mxu1  ;;  %v3115_v1 = vadd.f32 %v7339_v27, %v10381_v32  ;;  %v8456_v9 = vld [vmem:[%s9599_s29 + $0x768] ss:$20 sps:$4 sm:$0xff]  }
 0x305   : > { %11377 = vst [vmem:[#allocation24_spill] sm:$0xff] %v10612_v41  ;;  %v10624_v48 = vadd.f32 %v3238_v43, %v10455_v21  ;;  %7988 = vmatmul.mubr.msk.bf16.gmra.mrb[248].mxu0 %vm1754_vm0, %v8451_v18 }
 0x306   : > { %11378 = vst [vmem:[#allocation25_spill] sm:$0xff] %v10618_v7  ;;  %5032 = vmatmul.mubr.bf16.gmra.mrb[248].mxu1 %v8452_v47  ;;  %7991 = vmatprep.mubr.msk.bf16.mxu0 %vm1754_vm0, %v8453_v36  ;;  %v3118_v38 = vadd.f32 %v7342_v45, %v10387_v4  ;;  %v8457_v47 = vld [vmem:[%s9599_s29 + $0x898] ss:$20 sps:$4 sm:$0xff]  }
 0x307   : > { %11379 = vst [vmem:[#allocation26_spill] sm:$0xff] %v10624_v48  ;;  %5039 = vmatprep.mubr.bf16.mxu1 %v8454_v42  ;;  %v8469_v42 = vld [vmem:[%s9599_s29 + $0x7b4] ss:$20 sps:$4 sm:$0xff]  }
 0x308   : > { %v7343_v6 = vpop.f32.mrb[144].mxu0 }
 0x309   : > { %v7941_v21 = vpop.f32.mrb[144].mxu1  ;;  %v7344_v27 = vpop.f32.mrb[145].mxu0 }
 0x30a   : > { %v10635_v18 = vadd.f32 %v7941_v21, %v10557_v2  ;;  %v7345_v19 = vadd.f32 %v7344_v27, %v7343_v6  ;;  %v3251_v43 = vpop.f32.mrb[145].mxu1  ;;  %v7346_v62 = vpop.f32.mrb[146].mxu0 }
 0x30b   : > { %v10640_v36 = vadd.f32 %v3251_v43, %v10516_v29  ;;  %v7942_v4 = vpop.f32.mrb[146].mxu1  ;;  %v7347_v45 = vpop.f32.mrb[147].mxu0 }
 0x30c   : > { %11380 = vst [vmem:[#allocation27_spill] sm:$0xff] %v10635_v18  ;;  %v10646_v32 = vadd.f32 %v7942_v4, %v10569_v11  ;;  %v7348_v2 = vadd.f32 %v7347_v45, %v7346_v62  ;;  %v3254_v21 = vpop.f32.mrb[147].mxu1  ;;  %v3123_v6 = vadd.f32 %v7345_v19, %v10395_v44  ;;  %v11385_v11 = vld [vmem:[#allocation22_spill] sm:$0xff]  ;;  %v8458_v18 = vld [vmem:[%s9599_s29 + $0x8c0] ss:$20 sps:$4 sm:$0xff]  }
 0x30d   : > { %11381 = vst [vmem:[#allocation28_spill] sm:$0xff] %v10640_v36  ;;  %v10652_v29 = vadd.f32 %v3254_v21, %v10528_v3  ;;  %7992 = vmatmul.mubr.msk.bf16.gmra.mrb[252].mxu0 %vm1754_vm0, %v8456_v9  ;;  %v8461_v21 = vld [vmem:[%s9599_s29 + $0x788] ss:$20 sps:$4 sm:$0xff]  }
 0x30e   : > { %11382 = vst [vmem:[#allocation29_spill] sm:$0xff] %v10646_v32  ;;  %5040 = vmatmul.mubr.bf16.gmra.mrb[252].mxu1 %v8457_v47  ;;  %5144 = vmatprep.mubr.bf16.mxu0 %v8463_v28  ;;  %v3126_v62 = vadd.f32 %v7348_v2, %v11385_v11  ;;  %v8466_v11 = vld [vmem:[%s9599_s29 + $0x8ec] ss:$20 sps:$4 sm:$0xff]   ;;  %v8515_v44 = vld [vmem:[%s9599_s29 + $0x808] ss:$20 sps:$4 sm:$0xff]  }
 0x30f   : > { %11383 = vst [vmem:[#allocation30_spill] sm:$0xff] %v10652_v29  ;;  %5047 = vmatprep.mubr.bf16.mxu1 %v8460_v52 }
 0x310   : > { %v7349_v19 = vpop.f32.mrb[148].mxu0 }
 0x311   : > { %v7945_v45 = vpop.f32.mrb[148].mxu1  ;;  %v7350_v3 = vpop.f32.mrb[149].mxu0 }
 0x312   : > { %v10661_v27 = vadd.f32 %v7945_v45, %v3115_v1  ;;  %v7351_v9 = vadd.f32 %v7350_v3, %v7349_v19  ;;  %v3267_v36 = vpop.f32.mrb[149].mxu1  ;;  %v7352_v55 = vpop.f32.mrb[150].mxu0 }
 0x313   : > { %v10666_v28 = vadd.f32 %v3267_v36, %v10589_v51  ;;  %v7946_v47 = vpop.f32.mrb[150].mxu1  ;;  %v7353_v2 = vpop.f32.mrb[151].mxu0  ;;  %v8475_v36 = vld [vmem:[%s9599_s29 + $0x7dc] ss:$20 sps:$4 sm:$0xff]   ;;  %v8508_v51 = vld [vmem:[%s9599_s29 + $0x8cc] ss:$20 sps:$4 sm:$0xff]  }
 0x314   : > { %11387 = vst [vmem:[#allocation22_spill] sm:$0xff] %v10661_v27  ;;  %v10671_v29 = vadd.f32 %v7946_v47, %v3118_v38  ;;  %v7354_v4 = vadd.f32 %v7353_v2, %v7352_v55  ;;  %v3270_v1 = vpop.f32.mrb[151].mxu1  ;;  %v3131_v19 = vadd.f32 %v7351_v9, %v10409_v14  ;;  %v8513_v27 = vld [vmem:[%s9599_s29 + $0x8f4] ss:$20 sps:$4 sm:$0xff]  }
 0x315   : > { %11388 = vst [vmem:[#allocation31_spill] sm:$0xff] %v10666_v28  ;;  %v10677_v32 = vadd.f32 %v3270_v1, %v10601_v58  ;;  %5145 = vmatmul.mubr.bf16.vlgmr.msra.gmra.mrb[0].mxu0 %v8461_v21  ;;  %v8467_v58 = vld [vmem:[%s9599_s29 + $0x7b0] ss:$20 sps:$4 sm:$0xff]   ;;  %v8464_v28 = vld [vmem:[%s9599_s29 + $0x8e8] ss:$20 sps:$4 sm:$0xff]  }
 0x316   : > { %11390 = vst [vmem:[#allocation32_spill] sm:$0xff] %v10671_v29  ;;  %5048 = vmatmul.mubr.bf16.gmra.mrb[0].mxu1 %v8458_v18  ;;  %v3134_v38 = vadd.f32 %v7354_v4, %v10416_v30  ;;  %5152 = vmatprep.mubr.bf16.mxu0 %v8469_v42  ;;  %v8472_v4 = vld [vmem:[%s9599_s29 + $0x914] ss:$20 sps:$4 sm:$0xff]  }
 0x317   : > { %11392 = vst [vmem:[#allocation33_spill] sm:$0xff] %v10677_v32  ;;  %5055 = vmatprep.mubr.bf16.mxu1 %v8466_v11 }
 0x318   : > { %v7355_v9 = vpop.f32.mrb[152].mxu0 }
 0x319   : > { %v7949_v47 = vpop.f32.mrb[152].mxu1  ;;  %v7356_v2 = vpop.f32.mrb[153].mxu0 }
 0x31a   : > { %v10685_v1 = vadd.f32 %v7949_v47, %v3131_v19  ;;  %v7357_v21 = vadd.f32 %v7356_v2, %v7355_v9  ;;  %v3283_v3 = vpop.f32.mrb[153].mxu1  ;;  %v7358_v52 = vpop.f32.mrb[154].mxu0  ;;  %v8473_v47 = vld [vmem:[%s9599_s29 + $0x7d8] ss:$20 sps:$4 sm:$0xff]  }
 0x31b   : > { %v10689_v18 = vadd.f32 %v3283_v3, %v3123_v6  ;;  %v7950_v30 = vpop.f32.mrb[154].mxu1  ;;  %v7359_v42 = vpop.f32.mrb[155].mxu0 }
 0x31c   : > { %11395 = vst [vmem:[#allocation34_spill] sm:$0xff] %v10685_v1  ;;  %v10694_v11 = vadd.f32 %v7950_v30, %v3134_v38  ;;  %v7360_v32 = vadd.f32 %v7359_v42, %v7358_v52  ;;  %v3286_v55 = vpop.f32.mrb[155].mxu1  ;;  %v3139_v19 = vadd.f32 %v7357_v21, %v10439_v59  ;;  %v8505_v1 = vld [vmem:[%s9599_s29 + $0x8a4] ss:$20 sps:$4 sm:$0xff]  }
 0x31d   : > { %11396 = vst [vmem:[#allocation35_spill] sm:$0xff] %v10689_v18  ;;  %v10699_v2 = vadd.f32 %v3286_v55, %v3126_v62  ;;  %5153 = vmatmul.mubr.bf16.gmra.mrb[4].mxu0 %v8467_v58  ;;  %v8470_v58 = vld [vmem:[%s9599_s29 + $0x910] ss:$20 sps:$4 sm:$0xff]  }
 0x31e   : > { %11398 = vst [vmem:[#allocation36_spill] sm:$0xff] %v10694_v11  ;;  %5056 = vmatmul.mubr.bf16.gmra.mrb[4].mxu1 %v8464_v28  ;;  %v3142_v38 = vadd.f32 %v7360_v32, %v10450_v22  ;;  %5160 = vmatprep.mubr.bf16.mxu0 %v8475_v36  ;;  %v8481_v18 = vld [vmem:[%s9599_s29 + $0x804] ss:$20 sps:$4 sm:$0xff]   ;;  %v8478_v22 = vld [vmem:[%s9599_s29 + $0x93c] ss:$20 sps:$4 sm:$0xff]  }
 0x31f   : > { %11400 = vst [vmem:[#allocation37_spill] sm:$0xff] %v10699_v2  ;;  %5063 = vmatprep.mubr.bf16.mxu1 %v8472_v4  ;;  %v8499_v11 = vld [vmem:[%s9599_s29 + $0x87c] ss:$20 sps:$4 sm:$0xff]  }
 0x320   : > { %v7361_v59 = vpop.f32.mrb[156].mxu0 }
 0x321   : > { %v7953_v21 = vpop.f32.mrb[156].mxu1  ;;  %v7362_v42 = vpop.f32.mrb[157].mxu0 }
 0x322   : > { %v7363_v62 = vadd.f32 %v7362_v42, %v7361_v59  ;;  %v3299_v55 = vpop.f32.mrb[157].mxu1  ;;  %v7364_v14 = vpop.f32.mrb[158].mxu0  ;;  %v11407_v42 = vld [vmem:[#allocation23_spill] sm:$0xff] }
 0x323   : > { %v10709_v9 = vadd.f32 %v3299_v55, %v3139_v19  ;;  %v7954_v28 = vpop.f32.mrb[158].mxu1  ;;  %v7365_v3 = vpop.f32.mrb[159].mxu0 }
 0x324   : > { %v3147_v32 = vadd.f32 %v7363_v62, %v10468_v15  ;;  %v7366_v36 = vadd.f32 %v7365_v3, %v7364_v14  ;;  %v3302_v30 = vpop.f32.mrb[159].mxu1 }
 0x325   : > { %11403 = vst [vmem:[#allocation38_spill] sm:$0xff] %v10709_v9  ;;  %v10715_v52 = vadd.f32 %v3302_v30, %v3142_v38  ;;  %5161 = vmatmul.mubr.bf16.gmra.mrb[8].mxu0 %v8473_v47 }
 0x326   : > { %v10717_v59 = vadd.f32 %v7953_v21, %v3147_v32  ;;  %v3150_v19 = vadd.f32 %v7366_v36, %v11407_v42  ;;  %5064 = vmatmul.mubr.bf16.gmra.mrb[8].mxu1 %v8470_v58  ;;  %5168 = vmatprep.mubr.bf16.mxu0 %v8481_v18  ;;  %v8479_v21 = vld [vmem:[%s9599_s29 + $0x800] ss:$20 sps:$4 sm:$0xff]   ;;  %v8476_v36 = vld [vmem:[%s9599_s29 + $0x938] ss:$20 sps:$4 sm:$0xff]   ;;  %v8485_v42 = vld [vmem:[%s9599_s29 + $0x828] ss:$20 sps:$4 sm:$0xff]  }
 0x327   : > { %11405 = vst [vmem:[#allocation39_spill] sm:$0xff] %v10715_v52  ;;  %5071 = vmatprep.mubr.bf16.mxu1 %v8478_v22  ;;  %v8487_v58 = vld [vmem:[%s9599_s29 + $0x82c] ss:$20 sps:$4 sm:$0xff]  }
 0x328   : > { %11406 = vst [vmem:[#allocation40_spill] sm:$0xff] %v10717_v59  ;;  %v10722_v14 = vadd.f32 %v7954_v28, %v3150_v19  ;;  %v7403_v3 = vpop.f32.mrb[160].mxu0  ;;  %v8484_v19 = vld [vmem:[%s9599_s29 + $0x964] ss:$20 sps:$4 sm:$0xff]   ;;  %v8493_v59 = vld [vmem:[%s9599_s29 + $0x854] ss:$20 sps:$4 sm:$0xff]  }
 0x329   : > { %v7515_v47 = vpop.f32.mrb[160].mxu1  ;;  %v7404_v62 = vpop.f32.mrb[161].mxu0 }
 0x32a   : > { %11409 = vst [vmem:[#allocation23_spill] sm:$0xff] %v10722_v14  ;;  %v7405_v32 = vadd.f32 %v7404_v62, %v7403_v3  ;;  %v7516_v2 = vpop.f32.mrb[161].mxu1  ;;  %v7406_v9 = vpop.f32.mrb[162].mxu0 }
 0x32b   : > { %v7517_v15 = vadd.f32 %v7516_v2, %v7515_v47  ;;  %v7518_v22 = vpop.f32.mrb[162].mxu1  ;;  %v7407_v28 = vpop.f32.mrb[163].mxu0 }
 0x32c   : > { %v7408_v52 = vadd.f32 %v7407_v28, %v7406_v9  ;;  %v7519_v55 = vpop.f32.mrb[163].mxu1  ;;  %v8482_v28 = vld [vmem:[%s9599_s29 + $0x960] ss:$20 sps:$4 sm:$0xff]  }
 0x32d   : > { %v7520_v30 = vadd.f32 %v7519_v55, %v7518_v22  ;;  %5169 = vmatmul.mubr.bf16.gmra.mrb[12].mxu0 %v8479_v21  ;;  %v10732_v4 = vadd.f32 %v7517_v15, %v7405_v32  ;;  %v8490_v21 = vld [vmem:[%s9599_s29 + $0x98c] ss:$20 sps:$4 sm:$0xff]  }
 0x32e   : > { %5072 = vmatmul.mubr.bf16.gmra.mrb[12].mxu1 %v8476_v36  ;;  %5176 = vmatprep.mubr.bf16.mxu0 %v8487_v58 }
 0x32f   : > { %5079 = vmatprep.mubr.bf16.mxu1 %v8484_v19  ;;  %v10734_v3 = vadd.f32 %v7520_v30, %v7408_v52 }
 0x330   : > { %v7409_v62 = vpop.f32.mrb[164].mxu0 }
 0x331   : > { %v7521_v2 = vpop.f32.mrb[164].mxu1  ;;  %v7410_v47 = vpop.f32.mrb[165].mxu0 }
 0x332   : > { %v7411_v14 = vadd.f32 %v7410_v47, %v7409_v62  ;;  %v7522_v18 = vpop.f32.mrb[165].mxu1  ;;  %v7412_v9 = vpop.f32.mrb[166].mxu0  ;;  %v8491_v62 = vld [vmem:[%s9599_s29 + $0x850] ss:$20 sps:$4 sm:$0xff]  }
 0x333   : > { %v7523_v38 = vadd.f32 %v7522_v18, %v7521_v2  ;;  %v7524_v55 = vpop.f32.mrb[166].mxu1  ;;  %v7413_v15 = vpop.f32.mrb[167].mxu0 }
 0x334   : > { %v7414_v32 = vadd.f32 %v7413_v15, %v7412_v9  ;;  %v7525_v36 = vpop.f32.mrb[167].mxu1  ;;  %v8488_v15 = vld [vmem:[%s9599_s29 + $0x988] ss:$20 sps:$4 sm:$0xff]  }
 0x335   : > { %v7526_v52 = vadd.f32 %v7525_v36, %v7524_v55  ;;  %5177 = vmatmul.mubr.bf16.gmra.mrb[16].mxu0 %v8485_v42  ;;  %v10740_v30 = vadd.f32 %v7523_v38, %v7411_v14  ;;  %v8496_v38 = vld [vmem:[%s9599_s29 + $0x9b4] ss:$20 sps:$4 sm:$0xff]  }
 0x336   : > { %5080 = vmatmul.mubr.bf16.gmra.mrb[16].mxu1 %v8482_v28  ;;  %5184 = vmatprep.mubr.bf16.mxu0 %v8493_v59 }
 0x337   : > { %5087 = vmatprep.mubr.bf16.mxu1 %v8490_v21  ;;  %v10742_v58 = vadd.f32 %v7526_v52, %v7414_v32 }
 0x338   : > { %v7415_v22 = vpop.f32.mrb[168].mxu0 }
 0x339   : > { %v7527_v18 = vpop.f32.mrb[168].mxu1  ;;  %v7416_v19 = vpop.f32.mrb[169].mxu0 }
 0x33a   : > { %v7417_v2 = vadd.f32 %v7416_v19, %v7415_v22  ;;  %v7528_v47 = vpop.f32.mrb[169].mxu1  ;;  %v7418_v9 = vpop.f32.mrb[170].mxu0 }
 0x33b   : > { %v7529_v6 = vadd.f32 %v7528_v47, %v7527_v18  ;;  %v7530_v42 = vpop.f32.mrb[170].mxu1  ;;  %v7419_v14 = vpop.f32.mrb[171].mxu0  ;;  %v8497_v18 = vld [vmem:[%s9599_s29 + $0x878] ss:$20 sps:$4 sm:$0xff]  }
 0x33c   : > { %v7420_v28 = vadd.f32 %v7419_v14, %v7418_v9  ;;  %v7531_v59 = vpop.f32.mrb[171].mxu1  ;;  %v8494_v14 = vld [vmem:[%s9599_s29 + $0x9b0] ss:$20 sps:$4 sm:$0xff]  }
 0x33d   : > { %v7532_v55 = vadd.f32 %v7531_v59, %v7530_v42  ;;  %5185 = vmatmul.mubr.bf16.gmra.mrb[20].mxu0 %v8491_v62  ;;  %v10748_v21 = vadd.f32 %v7529_v6, %v7417_v2  ;;  %v8502_v2 = vld [vmem:[%s9599_s29 + $0x9dc] ss:$20 sps:$4 sm:$0xff]  }
 0x33e   : > { %5088 = vmatmul.mubr.bf16.gmra.mrb[20].mxu1 %v8488_v15  ;;  %5192 = vmatprep.mubr.bf16.mxu0 %v8499_v11 }
 0x33f   : > { %5095 = vmatprep.mubr.bf16.mxu1 %v8496_v38  ;;  %v10750_v32 = vadd.f32 %v7532_v55, %v7420_v28 }
 0x340   : > { %v7421_v36 = vpop.f32.mrb[172].mxu0 }
 0x341   : > { %v7533_v52 = vpop.f32.mrb[172].mxu1  ;;  %v7422_v22 = vpop.f32.mrb[173].mxu0 }
 0x342   : > { %v7423_v19 = vadd.f32 %v7422_v22, %v7421_v36  ;;  %v7534_v47 = vpop.f32.mrb[173].mxu1  ;;  %v7424_v9 = vpop.f32.mrb[174].mxu0 }
 0x343   : > { %v7535_v29 = vadd.f32 %v7534_v47, %v7533_v52  ;;  %v7536_v62 = vpop.f32.mrb[174].mxu1  ;;  %v7425_v6 = vpop.f32.mrb[175].mxu0  ;;  %v8503_v52 = vld [vmem:[%s9599_s29 + $0x8a0] ss:$20 sps:$4 sm:$0xff]  }
 0x344   : > { %v7426_v15 = vadd.f32 %v7425_v6, %v7424_v9  ;;  %v7537_v11 = vpop.f32.mrb[175].mxu1  ;;  %v8500_v6 = vld [vmem:[%s9599_s29 + $0x9d8] ss:$20 sps:$4 sm:$0xff]  }
 0x345   : > { %v7538_v42 = vadd.f32 %v7537_v11, %v7536_v62  ;;  %5193 = vmatmul.mubr.bf16.gmra.mrb[24].mxu0 %v8497_v18  ;;  %v10756_v38 = vadd.f32 %v7535_v29, %v7423_v19  ;;  %v8509_v19 = vld [vmem:[%s9599_s29 + $0x790] ss:$20 sps:$4 sm:$0xff]  }
 0x346   : > { %5096 = vmatmul.mubr.bf16.gmra.mrb[24].mxu1 %v8494_v14  ;;  %5200 = vmatprep.mubr.bf16.mxu0 %v8505_v1 }
 0x347   : > { %5103 = vmatprep.mubr.bf16.mxu1 %v8502_v2  ;;  %v10758_v28 = vadd.f32 %v7538_v42, %v7426_v15 }
 0x348   : > { %v7427_v59 = vpop.f32.mrb[176].mxu0 }
 0x349   : > { %v7539_v55 = vpop.f32.mrb[176].mxu1  ;;  %v7428_v36 = vpop.f32.mrb[177].mxu0 }
 0x34a   : > { %v7429_v22 = vadd.f32 %v7428_v36, %v7427_v59  ;;  %v7540_v47 = vpop.f32.mrb[177].mxu1  ;;  %v7430_v9 = vpop.f32.mrb[178].mxu0 }
 0x34b   : > { %v7541_v45 = vadd.f32 %v7540_v47, %v7539_v55  ;;  %v7542_v18 = vpop.f32.mrb[178].mxu1  ;;  %v7431_v29 = vpop.f32.mrb[179].mxu0  ;;  %v8506_v55 = vld [vmem:[%s9599_s29 + $0x8c8] ss:$20 sps:$4 sm:$0xff]  }
 0x34c   : > { %v7432_v14 = vadd.f32 %v7431_v29, %v7430_v9  ;;  %v7543_v1 = vpop.f32.mrb[179].mxu1  ;;  %v8510_v29 = vld [vmem:[%s9599_s29 + $0x7b8] ss:$20 sps:$4 sm:$0xff]  }
 0x34d   : > { %v7544_v62 = vadd.f32 %v7543_v1, %v7542_v18  ;;  %5201 = vmatmul.mubr.bf16.gmra.mrb[28].mxu0 %v8503_v52  ;;  %v10764_v2 = vadd.f32 %v7541_v45, %v7429_v22  ;;  %v8514_v22 = vld [vmem:[%s9599_s29 + $0x7e0] ss:$20 sps:$4 sm:$0xff]  }
 0x34e   : > { %5104 = vmatmul.mubr.bf16.gmra.mrb[28].mxu1 %v8500_v6  ;;  %5208 = vmatprep.mubr.bf16.mxu0 %v8508_v51 }
 0x34f   : > { %8003 = vmatprep.mubr.msk.bf16.mxu1 %vm1754_vm0, %v8509_v19  ;;  %v10767_v15 = vadd.f32 %v7544_v62, %v7432_v14 }
 0x350   : > { %v7433_v11 = vpop.f32.mrb[180].mxu0 }
 0x351   : > { %v7545_v42 = vpop.f32.mrb[180].mxu1  ;;  %v7434_v59 = vpop.f32.mrb[181].mxu0 }
 0x352   : > { %v7435_v36 = vadd.f32 %v7434_v59, %v7433_v11  ;;  %v7546_v47 = vpop.f32.mrb[181].mxu1  ;;  %v7436_v9 = vpop.f32.mrb[182].mxu0  ;;  %v8511_v59 = vld [vmem:[%s9599_s29 + $0x8f0] ss:$20 sps:$4 sm:$0xff]  }
 0x353   : > { %v7547_v18 = vadd.f32 %v7546_v47, %v7545_v42  ;;  %v7548_v45 = vpop.f32.mrb[182].mxu1  ;;  %v7437_v52 = vpop.f32.mrb[183].mxu0 }
 0x354   : > { %v7438_v6 = vadd.f32 %v7437_v52, %v7436_v9  ;;  %v7549_v51 = vpop.f32.mrb[183].mxu1 }
 0x355   : > { %v7550_v19 = vadd.f32 %v7549_v51, %v7548_v45  ;;  %5209 = vmatmul.mubr.bf16.gmra.mrb[32].mxu0 %v8506_v55  ;;  %v10773_v14 = vadd.f32 %v7547_v18, %v7435_v36  ;;  %v8518_v45 = vld [vmem:[%s9599_s29 + $0x91c] ss:$20 sps:$4 sm:$0xff]  }
 0x356   : > { %8004 = vmatmul.mubr.msk.bf16.vlgmr.msra.gmra.mrb[32].mxu1 %vm1754_vm0, %v8510_v29  ;;  %5216 = vmatprep.mubr.bf16.mxu0 %v8513_v27  ;;  %v8519_v29 = vld [vmem:[%s9599_s29 + $0x830] ss:$20 sps:$4 sm:$0xff]  }
 0x357   : > { %8007 = vmatprep.mubr.msk.bf16.mxu1 %vm1754_vm0, %v8514_v22  ;;  %v10777_v1 = vadd.f32 %v7550_v19, %v7438_v6 }
 0x358   : > { %v7439_v62 = vpop.f32.mrb[184].mxu0 }
 0x359   : > { %v7551_v11 = vpop.f32.mrb[184].mxu1  ;;  %v7440_v42 = vpop.f32.mrb[185].mxu0 }
 0x35a   : > { %v7441_v47 = vadd.f32 %v7440_v42, %v7439_v62  ;;  %v7552_v9 = vpop.f32.mrb[185].mxu1  ;;  %v7442_v52 = vpop.f32.mrb[186].mxu0 }
 0x35b   : > { %v7553_v55 = vadd.f32 %v7552_v9, %v7551_v11  ;;  %v7554_v36 = vpop.f32.mrb[186].mxu1  ;;  %v7443_v18 = vpop.f32.mrb[187].mxu0  ;;  %v8516_v9 = vld [vmem:[%s9599_s29 + $0x918] ss:$20 sps:$4 sm:$0xff]  }
 0x35c   : > { %v7444_v51 = vadd.f32 %v7443_v18, %v7442_v52  ;;  %v7555_v27 = vpop.f32.mrb[187].mxu1 }
 0x35d   : > { %v7556_v22 = vadd.f32 %v7555_v27, %v7554_v36  ;;  %5217 = vmatmul.mubr.bf16.gmra.mrb[36].mxu0 %v8511_v59  ;;  %v10783_v6 = vadd.f32 %v7553_v55, %v7441_v47  ;;  %v8523_v36 = vld [vmem:[%s9599_s29 + $0x944] ss:$20 sps:$4 sm:$0xff]  }
 0x35e   : > { %8008 = vmatmul.mubr.msk.bf16.gmra.mrb[36].mxu1 %vm1754_vm0, %v8515_v44  ;;  %5224 = vmatprep.mubr.bf16.mxu0 %v8518_v45  ;;  %v8524_v44 = vld [vmem:[%s9599_s29 + $0x880] ss:$20 sps:$4 sm:$0xff]  }
 0x35f   : > { %8011 = vmatprep.mubr.msk.bf16.mxu1 %vm1754_vm0, %v8519_v29  ;;  %v10787_v19 = vadd.f32 %v7556_v22, %v7444_v51 }
 0x360   : > { %v7445_v62 = vpop.f32.mrb[188].mxu0 }
 0x361   : > { %11412 = vst [vmem:[#allocation41_spill] sm:$0xff] %v10787_v19  ;;  %v7557_v11 = vpop.f32.mrb[188].mxu1  ;;  %v7446_v42 = vpop.f32.mrb[189].mxu0 }
 0x362   : > { %v7447_v52 = vadd.f32 %v7446_v42, %v7445_v62  ;;  %v7558_v18 = vpop.f32.mrb[189].mxu1  ;;  %v7448_v43 = vpop.f32.mrb[190].mxu0 }
 0x363   : > { %v7559_v59 = vadd.f32 %v7558_v18, %v7557_v11  ;;  %v7560_v47 = vpop.f32.mrb[190].mxu1  ;;  %v7449_v55 = vpop.f32.mrb[191].mxu0  ;;  %v8521_v18 = vld [vmem:[%s9599_s29 + $0x940] ss:$20 sps:$4 sm:$0xff]  }
 0x364   : > { %v7450_v27 = vadd.f32 %v7449_v55, %v7448_v43  ;;  %v7561_v45 = vpop.f32.mrb[191].mxu1 }
 0x365   : > { %v7562_v29 = vadd.f32 %v7561_v45, %v7560_v47  ;;  %5225 = vmatmul.mubr.bf16.gmra.mrb[40].mxu0 %v8516_v9  ;;  %v10793_v51 = vadd.f32 %v7559_v59, %v7447_v52  ;;  %v8528_v47 = vld [vmem:[%s9599_s29 + $0x96c] ss:$20 sps:$4 sm:$0xff]  }
 0x366   : > { %8012 = vmatmul.mubr.msk.bf16.gmra.mrb[40].mxu1 %vm1754_vm0, %v8520_v35  ;;  %5232 = vmatprep.mubr.bf16.mxu0 %v8523_v36  ;;  %v8529_v35 = vld [vmem:[%s9599_s29 + $0x8d0] ss:$20 sps:$4 sm:$0xff]  }
 0x367   : > { %8015 = vmatprep.mubr.msk.bf16.mxu1 %vm1754_vm0, %v8524_v44  ;;  %v10797_v22 = vadd.f32 %v7562_v29, %v7450_v27 }
 0x368   : > { %v7451_v62 = vpop.f32.mrb[192].mxu0 }
 0x369   : > { %v7563_v11 = vpop.f32.mrb[192].mxu1  ;;  %v7452_v42 = vpop.f32.mrb[193].mxu0 }
 0x36a   : > { %v7453_v43 = vadd.f32 %v7452_v42, %v7451_v62  ;;  %v7564_v55 = vpop.f32.mrb[193].mxu1  ;;  %v7454_v48 = vpop.f32.mrb[194].mxu0 }
 0x36b   : > { %v7565_v9 = vadd.f32 %v7564_v55, %v7563_v11  ;;  %v7566_v52 = vpop.f32.mrb[194].mxu1  ;;  %v7455_v59 = vpop.f32.mrb[195].mxu0  ;;  %v8526_v55 = vld [vmem:[%s9599_s29 + $0x968] ss:$20 sps:$4 sm:$0xff]  }
 0x36c   : > { %v7456_v45 = vadd.f32 %v7455_v59, %v7454_v48  ;;  %v7567_v36 = vpop.f32.mrb[195].mxu1 }
 0x36d   : > { %v7568_v44 = vadd.f32 %v7567_v36, %v7566_v52  ;;  %5233 = vmatmul.mubr.bf16.gmra.mrb[44].mxu0 %v8521_v18  ;;  %v10803_v27 = vadd.f32 %v7565_v9, %v7453_v43  ;;  %v8533_v52 = vld [vmem:[%s9599_s29 + $0x994] ss:$20 sps:$4 sm:$0xff]  }
 0x36e   : > { %8016 = vmatmul.mubr.msk.bf16.gmra.mrb[44].mxu1 %vm1754_vm0, %v8525_v24  ;;  %5240 = vmatprep.mubr.bf16.mxu0 %v8528_v47  ;;  %v8534_v24 = vld [vmem:[%s9599_s29 + $0x920] ss:$20 sps:$4 sm:$0xff]  }
 0x36f   : > { %11413 = vst [vmem:[#allocation42_spill] sm:$0xff] %v10803_v27  ;;  %8019 = vmatprep.mubr.msk.bf16.mxu1 %vm1754_vm0, %v8529_v35  ;;  %v10807_v29 = vadd.f32 %v7568_v44, %v7456_v45  ;;  %v8535_v27 = vld [vmem:[%s9599_s29 + $0x948] ss:$20 sps:$4 sm:$0xff]  }
 0x370   : > { %v7457_v62 = vpop.f32.mrb[196].mxu0 }
 0x371   : > { %11414 = vst [vmem:[#allocation43_spill] sm:$0xff] %v10807_v29  ;;  %v7569_v11 = vpop.f32.mrb[196].mxu1  ;;  %v7458_v42 = vpop.f32.mrb[197].mxu0 }
 0x372   : > { %v7459_v48 = vadd.f32 %v7458_v42, %v7457_v62  ;;  %v7570_v59 = vpop.f32.mrb[197].mxu1  ;;  %v7460_v7 = vpop.f32.mrb[198].mxu0 }
 0x373   : > { %v7571_v18 = vadd.f32 %v7570_v59, %v7569_v11  ;;  %v7572_v43 = vpop.f32.mrb[198].mxu1  ;;  %v7461_v9 = vpop.f32.mrb[199].mxu0  ;;  %v8531_v59 = vld [vmem:[%s9599_s29 + $0x990] ss:$20 sps:$4 sm:$0xff]  }
 0x374   : > { %v7462_v36 = vadd.f32 %v7461_v9, %v7460_v7  ;;  %v7573_v47 = vpop.f32.mrb[199].mxu1 }
 0x375   : > { %v7574_v35 = vadd.f32 %v7573_v47, %v7572_v43  ;;  %5241 = vmatmul.mubr.bf16.gmra.mrb[48].mxu0 %v8526_v55  ;;  %v10813_v45 = vadd.f32 %v7571_v18, %v7459_v48  ;;  %v8538_v43 = vld [vmem:[%s9599_s29 + $0x9bc] ss:$20 sps:$4 sm:$0xff]  }
 0x376   : > { %8020 = vmatmul.mubr.msk.bf16.gmra.mrb[48].mxu1 %vm1754_vm0, %v8530_v23  ;;  %5248 = vmatprep.mubr.bf16.mxu0 %v8533_v52  ;;  %v8539_v23 = vld [vmem:[%s9599_s29 + $0x970] ss:$20 sps:$4 sm:$0xff]  }
 0x377   : > { %11415 = vst [vmem:[#allocation44_spill] sm:$0xff] %v10813_v45  ;;  %8023 = vmatprep.mubr.msk.bf16.mxu1 %vm1754_vm0, %v8534_v24  ;;  %v10817_v44 = vadd.f32 %v7574_v35, %v7462_v36  ;;  %v8540_v45 = vld [vmem:[%s9599_s29 + $0x998] ss:$20 sps:$4 sm:$0xff]  }
 0x378   : > { %v7463_v62 = vpop.f32.mrb[200].mxu0 }
 0x379   : > { %11416 = vst [vmem:[#allocation45_spill] sm:$0xff] %v10817_v44  ;;  %v7575_v11 = vpop.f32.mrb[200].mxu1  ;;  %v7464_v42 = vpop.f32.mrb[201].mxu0 }
 0x37a   : > { %v7465_v7 = vadd.f32 %v7464_v42, %v7463_v62  ;;  %v7576_v9 = vpop.f32.mrb[201].mxu1  ;;  %v7466_v29 = vpop.f32.mrb[202].mxu0 }
 0x37b   : > { %v7577_v55 = vadd.f32 %v7576_v9, %v7575_v11  ;;  %v7578_v48 = vpop.f32.mrb[202].mxu1  ;;  %v7467_v18 = vpop.f32.mrb[203].mxu0  ;;  %v8536_v9 = vld [vmem:[%s9599_s29 + $0x9b8] ss:$20 sps:$4 sm:$0xff]  }
 0x37c   : > { %v7468_v47 = vadd.f32 %v7467_v18, %v7466_v29  ;;  %v7579_v52 = vpop.f32.mrb[203].mxu1 }
 0x37d   : > { %v7580_v24 = vadd.f32 %v7579_v52, %v7578_v48  ;;  %5249 = vmatmul.mubr.bf16.gmra.mrb[52].mxu0 %v8531_v59  ;;  %v10823_v36 = vadd.f32 %v7577_v55, %v7465_v7  ;;  %v8543_v48 = vld [vmem:[%s9599_s29 + $0x9e4] ss:$20 sps:$4 sm:$0xff]  }
 0x37e   : > { %8024 = vmatmul.mubr.msk.bf16.gmra.mrb[52].mxu1 %vm1754_vm0, %v8535_v27  ;;  %5256 = vmatprep.mubr.bf16.mxu0 %v8538_v43  ;;  %v8544_v27 = vld [vmem:[%s9599_s29 + $0x9c0] ss:$20 sps:$4 sm:$0xff]  }
 0x37f   : > { %11417 = vst [vmem:[#allocation46_spill] sm:$0xff] %v10823_v36  ;;  %8027 = vmatprep.mubr.msk.bf16.mxu1 %vm1754_vm0, %v8539_v23  ;;  %v10827_v35 = vadd.f32 %v7580_v24, %v7468_v47 }
 0x380   : > { %v7469_v62 = vpop.f32.mrb[204].mxu0 }
 0x381   : > { %11418 = vst [vmem:[#allocation47_spill] sm:$0xff] %v10827_v35  ;;  %v7581_v11 = vpop.f32.mrb[204].mxu1  ;;  %v7470_v42 = vpop.f32.mrb[205].mxu0 }
 0x382   : > { %v7471_v29 = vadd.f32 %v7470_v42, %v7469_v62  ;;  %v7582_v18 = vpop.f32.mrb[205].mxu1  ;;  %v7472_v44 = vpop.f32.mrb[206].mxu0 }
 0x383   : > { %v7583_v59 = vadd.f32 %v7582_v18, %v7581_v11  ;;  %v7584_v7 = vpop.f32.mrb[206].mxu1  ;;  %v7473_v55 = vpop.f32.mrb[207].mxu0  ;;  %v8541_v18 = vld [vmem:[%s9599_s29 + $0x9e0] ss:$20 sps:$4 sm:$0xff]  }
 0x384   : > { %v7474_v52 = vadd.f32 %v7473_v55, %v7472_v44  ;;  %v7585_v43 = vpop.f32.mrb[207].mxu1  ;;  %v8545_v55 = vld [vmem:[%s9599_s29 + $0x9e8] ss:$20 sps:$4 sm:$0xff]   ;;  %s6027_s29 = sshll.u32 %s5763_s15, 5 }
 0x385   : > { %v7586_v23 = vadd.f32 %v7585_v43, %v7584_v7  ;;  %5257 = vmatmul.mubr.bf16.gmra.mrb[56].mxu0 %v8536_v9  ;;  %v10833_v47 = vadd.f32 %v7583_v59, %v7471_v29  ;;  %p964_p8 = scmp.lt.s32.totalorder %s6027_s29, 63 }
 0x386   : > { %8028 = vmatmul.mubr.msk.bf16.gmra.mrb[56].mxu1 %vm1754_vm0, %v8540_v45  ;;  %5264 = vmatprep.mubr.bf16.mxu0 %v8543_v48 }
 0x387   : > { %11419 = vst [vmem:[#allocation48_spill] sm:$0xff] %v10833_v47  ;;  %8031 = vmatprep.mubr.msk.bf16.mxu1 %vm1754_vm0, %v8544_v27  ;;  %v10837_v24 = vadd.f32 %v7586_v23, %v7474_v52  ;;  %s11542_s29 = smov (!%p964_p8, %s6027_s29), 63 }
 0x388   : > { %v7475_v62 = vpop.f32.mrb[208].mxu0  ;;  %s6028_s14 = sshll.u32 %s11542_s29, 2 }
 0x389   : > { %11420 = vst [vmem:[#allocation49_spill] sm:$0xff] %v10837_v24  ;;  %v7587_v11 = vpop.f32.mrb[208].mxu1  ;;  %v7476_v42 = vpop.f32.mrb[209].mxu0  ;;  %s11191_s20 = scalar_lea.vmem %s11317_s3, %s6028_s14 }
 0x38a   : > { %v7477_v35 = vadd.f32 %v7476_v42, %v7475_v62  ;;  %v7588_v36 = vpop.f32.mrb[209].mxu1  ;;  %v7478_v44 = vpop.f32.mrb[210].mxu0 }
 0x38b   : > { %v7589_v19 = vadd.f32 %v7588_v36, %v7587_v11  ;;  %v7590_v7 = vpop.f32.mrb[210].mxu1  ;;  %v7479_v9 = vpop.f32.mrb[211].mxu0 }
 0x38c   : > { %v7480_v29 = vadd.f32 %v7479_v9, %v7478_v44  ;;  %v7591_v59 = vpop.f32.mrb[211].mxu1 }
 0x38d   : > { %v7592_v43 = vadd.f32 %v7591_v59, %v7590_v7  ;;  %5265 = vmatmul.mubr.bf16.gmra.mrb[60].mxu0 %v8541_v18  ;;  %v10841_v45 = vadd.f32 %v7589_v19, %v7477_v35 }
 0x38e   : > { %8032 = vmatmul.mubr.msk.bf16.gmra.mrb[60].mxu1 %vm1754_vm0, %v8545_v55 }
 0x38f   : > { %11421 = vst [vmem:[#allocation50_spill] sm:$0xff] %v10841_v45  ;;  %v10844_v48 = vadd.f32 %v7592_v43, %v7480_v29 }
 0x390   : > { %v7481_v27 = vpop.f32.mrb[212].mxu0 }
 0x391   : > { %11422 = vst [vmem:[#allocation51_spill] sm:$0xff] %v10844_v48  ;;  %v7593_v52 = vpop.f32.mrb[212].mxu1  ;;  %v7482_v23 = vpop.f32.mrb[213].mxu0 }
 0x392   : > { %v7483_v62 = vadd.f32 %v7482_v23, %v7481_v27  ;;  %v7594_v42 = vpop.f32.mrb[213].mxu1  ;;  %v7484_v24 = vpop.f32.mrb[214].mxu0 }
 0x393   : > { %v7595_v47 = vadd.f32 %v7594_v42, %v7593_v52  ;;  %v7596_v36 = vpop.f32.mrb[214].mxu1  ;;  %v7485_v11 = vpop.f32.mrb[215].mxu0 }
 0x394   : > { %v7486_v41 = vadd.f32 %v7485_v11, %v7484_v24  ;;  %v7597_v44 = vpop.f32.mrb[215].mxu1 }
 0x395   : > { %v7598_v9 = vadd.f32 %v7597_v44, %v7596_v36  ;;  %v10846_v7 = vadd.f32 %v7595_v47, %v7483_v62 }
 0x397   : > { %11423 = vst [vmem:[#allocation52_spill] sm:$0xff] %v10846_v7  ;;  %v10848_v19 = vadd.f32 %v7598_v9, %v7486_v41 }
 0x398   : > { %v7487_v35 = vpop.f32.mrb[216].mxu0 }
 0x399   : > { %11424 = vst [vmem:[#allocation53_spill] sm:$0xff] %v10848_v19  ;;  %v7599_v18 = vpop.f32.mrb[216].mxu1  ;;  %v7488_v55 = vpop.f32.mrb[217].mxu0 }
 0x39a   : > { %v7489_v29 = vadd.f32 %v7488_v55, %v7487_v35  ;;  %v7600_v59 = vpop.f32.mrb[217].mxu1  ;;  %v7490_v43 = vpop.f32.mrb[218].mxu0 }
 0x39b   : > { %v7601_v48 = vadd.f32 %v7600_v59, %v7599_v18  ;;  %v7602_v27 = vpop.f32.mrb[218].mxu1  ;;  %v7491_v23 = vpop.f32.mrb[219].mxu0 }
 0x39c   : > { %v7492_v45 = vadd.f32 %v7491_v23, %v7490_v43  ;;  %v7603_v52 = vpop.f32.mrb[219].mxu1 }
 0x39d   : > { %v7604_v42 = vadd.f32 %v7603_v52, %v7602_v27  ;;  %v10850_v25 = vadd.f32 %v7601_v48, %v7489_v29 }
 0x39f   : > { %v10852_v24 = vadd.f32 %v7604_v42, %v7492_v45 }
 0x3a0   : > { %v7493_v47 = vpop.f32.mrb[220].mxu0 }
 0x3a1   : > { %v7605_v62 = vpop.f32.mrb[220].mxu1  ;;  %v7494_v41 = vpop.f32.mrb[221].mxu0 }
 0x3a2   : > { %v7495_v36 = vadd.f32 %v7494_v41, %v7493_v47  ;;  %v7606_v11 = vpop.f32.mrb[221].mxu1  ;;  %v7496_v44 = vpop.f32.mrb[222].mxu0  ;;  %v11425_v47 = vmax.f32 %v10171_v63, %v10496_v39 }
 0x3a3   : > { %v7607_v9 = vadd.f32 %v7606_v11, %v7605_v62  ;;  %v7608_v35 = vpop.f32.mrb[222].mxu1  ;;  %v7497_v55 = vpop.f32.mrb[223].mxu0 }
 0x3a4   : > { %v7498_v19 = vadd.f32 %v7497_v55, %v7496_v44  ;;  %v7609_v18 = vpop.f32.mrb[223].mxu1 }
 0x3a5   : > { %v7610_v59 = vadd.f32 %v7609_v18, %v7608_v35  ;;  %v10854_v7 = vadd.f32 %v7607_v9, %v7495_v36  ;;  %v11427_v35 = vmax.f32 %v10180_v46, %v10510_v0  ;;  %v11429_v46 = vmax.f32 %v10195_v8, %v10540_v50 }
 0x3a7   : > { %v10856_v43 = vadd.f32 %v7610_v59, %v7498_v19 }
 0x3a8   : > { %v7965_v48 = vpop.f32.mrb[224].mxu0 }
 0x3a9   : > { %v4256_v45 = vadd.f32 %v7965_v48, %v10740_v30  ;;  %v4247_v29 = vpop.f32.mrb[225].mxu0  ;;  %v7647_v27 = vpop.f32.mrb[224].mxu1  ;;  %v11426_v30 = vmax.f32 %v10175_v34, %v10501_v26 }
 0x3aa   : > { %v4248_v23 = vadd.f32 %v4247_v29, %v10732_v4  ;;  %v7966_v52 = vpop.f32.mrb[226].mxu0  ;;  %v7648_v42 = vpop.f32.mrb[225].mxu1 }
 0x3ab   : > { %v10863_v62 = vmax.f32 %v11425_v47, %v4256_v45  ;;  %v4259_v41 = vadd.f32 %v7966_v52, %v10742_v58  ;;  %v4250_v36 = vpop.f32.mrb[227].mxu0  ;;  %v10866_v11 = vadd.f32 %v7648_v42, %v7647_v27  ;;  %v7650_v19 = vpop.f32.mrb[226].mxu1  ;;  %v11428_v58 = vmax.f32 %v10187_v54, %v10521_v10 }
 0x3ac   : > { %v10871_v44 = vmax.f32 %v11426_v30, %v4248_v23  ;;  %v4251_v4 = vadd.f32 %v4250_v36, %v10734_v3  ;;  %v7651_v9 = vpop.f32.mrb[227].mxu1  ;;  %v11431_v42 = vmax.f32 %v10204_v61, %v10554_v16  ;;  %v11433_v61 = vmax.f32 %v10217_v40, %v10575_v20 }
 0x3ad   : > { %v10877_v63 = vmax.f32 %v11427_v35, %v4259_v41  ;;  %v10879_v39 = vadd.f32 %v7651_v9, %v7650_v19 }
 0x3ae   : > { %v10884_v55 = vmax.f32 %v11428_v58, %v4251_v4 }
 0x3b0   : > { %v7969_v18 = vpop.f32.mrb[228].mxu0 }
 0x3b1   : > { %v4272_v34 = vadd.f32 %v7969_v18, %v10756_v38  ;;  %v4263_v26 = vpop.f32.mrb[229].mxu0  ;;  %v7653_v59 = vpop.f32.mrb[228].mxu1  ;;  %v11430_v38 = vmax.f32 %v10199_v37, %v10545_v56  ;;  %v11435_v18 = vmax.f32 %v10226_v49, %v10586_v60  ;;  %v11437_v49 = vmax.f32 %v10237_v13, %v10607_v12 }
 0x3b2   : > { %v4264_v3 = vadd.f32 %v4263_v26, %v10748_v21  ;;  %v7970_v48 = vpop.f32.mrb[230].mxu0  ;;  %v7654_v45 = vpop.f32.mrb[229].mxu1 }
 0x3b3   : > { %v10891_v0 = vmax.f32 %v11429_v46, %v4272_v34  ;;  %v4275_v29 = vadd.f32 %v7970_v48, %v10758_v28  ;;  %v4266_v27 = vpop.f32.mrb[231].mxu0  ;;  %v10894_v54 = vadd.f32 %v7654_v45, %v7653_v59  ;;  %v7656_v10 = vpop.f32.mrb[230].mxu1  ;;  %v11432_v28 = vmax.f32 %v10211_v33, %v10562_v57 }
 0x3b4   : > { %v10899_v23 = vmax.f32 %v11430_v38, %v4264_v3  ;;  %v4267_v21 = vadd.f32 %v4266_v27, %v10750_v32  ;;  %v7657_v52 = vpop.f32.mrb[231].mxu1  ;;  %v11439_v27 = vld [vmem:[#allocation24_spill] sm:$0xff]  ;;  %v11441_v38 = vld [vmem:[#allocation41_spill] sm:$0xff] }
 0x3b5   : > { %v10905_v8 = vmax.f32 %v11431_v42, %v4275_v29  ;;  %v10907_v50 = vadd.f32 %v7657_v52, %v7656_v10  ;;  %v11438_v29 = vld [vmem:[#allocation3_spill] sm:$0xff]  ;;  %v11442_v52 = vld [vmem:[#allocation4_spill] sm:$0xff]  ;;  %v11443_v42 = vld [vmem:[#allocation25_spill] sm:$0xff] }
 0x3b6   : > { %v10912_v47 = vmax.f32 %v11432_v28, %v4267_v21  ;;  %v11444_v28 = vmax.f32 %v11442_v52, %v11443_v42  ;;  %v11461_v52 = vld [vmem:[#allocation9_spill] sm:$0xff]  ;;  %v11462_v42 = vld [vmem:[#allocation30_spill] sm:$0xff] }
 0x3b8   : > { %v7973_v41 = vpop.f32.mrb[232].mxu0 }
 0x3b9   : > { %v4288_v37 = vadd.f32 %v7973_v41, %v10773_v14  ;;  %v4279_v56 = vpop.f32.mrb[233].mxu0  ;;  %v7659_v36 = vpop.f32.mrb[232].mxu1  ;;  %v11434_v14 = vmax.f32 %v10221_v53, %v10580_v31  ;;  %v11446_v41 = vld [vmem:[#allocation26_spill] sm:$0xff] }
 0x3ba   : > { %v4280_v32 = vadd.f32 %v4279_v56, %v10764_v2  ;;  %v7974_v19 = vpop.f32.mrb[234].mxu0  ;;  %v7660_v30 = vpop.f32.mrb[233].mxu1 }
 0x3bb   : > { %v10919_v16 = vmax.f32 %v11433_v61, %v4288_v37  ;;  %v4291_v4 = vadd.f32 %v7974_v19, %v10777_v1  ;;  %v4282_v9 = vpop.f32.mrb[235].mxu0  ;;  %v10922_v33 = vadd.f32 %v7660_v30, %v7659_v36  ;;  %v7662_v57 = vpop.f32.mrb[234].mxu1  ;;  %v11436_v1 = vmax.f32 %v10232_v17, %v10594_v5 }
 0x3bc   : > { %v10927_v35 = vmax.f32 %v11434_v14, %v4280_v32  ;;  %v4283_v2 = vadd.f32 %v4282_v9, %v10767_v15  ;;  %v7663_v58 = vpop.f32.mrb[235].mxu1  ;;  %v11448_v32 = vld [vmem:[#allocation44_spill] sm:$0xff] }
 0x3bd   : > { %v10933_v40 = vmax.f32 %v11435_v18, %v4291_v4  ;;  %v10935_v20 = vadd.f32 %v7663_v58, %v7662_v57  ;;  %v11449_v4 = vld [vmem:[#allocation42_spill] sm:$0xff]  ;;  %v11451_v58 = vld [vmem:[#allocation27_spill] sm:$0xff] }
 0x3be   : > { %v10940_v34 = vmax.f32 %v11436_v1, %v4283_v2  ;;  %v11450_v2 = vld [vmem:[#allocation6_spill] sm:$0xff] }
 0x3bf   : > { %v11452_v18 = vmax.f32 %v11450_v2, %v11451_v58 }
 0x3c0   : > { %v7977_v26 = vpop.f32.mrb[236].mxu0 }
 0x3c1   : > { %v4304_v53 = vadd.f32 %v7977_v26, %v10793_v51  ;;  %v4295_v31 = vpop.f32.mrb[237].mxu0  ;;  %v7665_v59 = vpop.f32.mrb[236].mxu1  ;;  %v11440_v51 = vmax.f32 %v11438_v29, %v11439_v27  ;;  %v11453_v26 = vld [vmem:[#allocation45_spill] sm:$0xff]  ;;  %v11458_v27 = vld [vmem:[#allocation8_spill] sm:$0xff] }
 0x3c2   : > { %v4296_v15 = vadd.f32 %v4295_v31, %v10783_v6  ;;  %v7978_v3 = vpop.f32.mrb[238].mxu0  ;;  %v7666_v48 = vpop.f32.mrb[237].mxu1 }
 0x3c3   : > { %v10947_v60 = vmax.f32 %v11437_v49, %v4304_v53  ;;  %v4307_v45 = vadd.f32 %v7978_v3, %v10797_v22  ;;  %v4298_v46 = vpop.f32.mrb[239].mxu0  ;;  %v10950_v17 = vadd.f32 %v7666_v48, %v7665_v59  ;;  %v7668_v5 = vpop.f32.mrb[238].mxu1  ;;  %v11445_v22 = vld [vmem:[#allocation5_spill] sm:$0xff]  ;;  %v11454_v3 = vld [vmem:[#allocation7_spill] sm:$0xff]  ;;  %v11455_v48 = vld [vmem:[#allocation28_spill] sm:$0xff] }
 0x3c4   : > { %v10955_v10 = vmax.f32 %v11440_v51, %v4296_v15  ;;  %v4299_v6 = vadd.f32 %v4298_v46, %v11441_v38  ;;  %v7669_v21 = vpop.f32.mrb[239].mxu1  ;;  %v11447_v37 = vmax.f32 %v11445_v22, %v11446_v41  ;;  %v11456_v49 = vmax.f32 %v11454_v3, %v11455_v48  ;;  %v11457_v46 = vld [vmem:[#allocation43_spill] sm:$0xff]  ;;  %v11459_v51 = vld [vmem:[#allocation29_spill] sm:$0xff] }
 0x3c5   : > { %v10961_v13 = vmax.f32 %v11444_v28, %v4307_v45  ;;  %v10963_v12 = vadd.f32 %v7669_v21, %v7668_v5  ;;  %v11460_v38 = vmax.f32 %v11458_v27, %v11459_v51  ;;  %v11463_v28 = vmax.f32 %v11461_v52, %v11462_v42  ;;  %v11471_v3 = vld [vmem:[#allocation11_spill] sm:$0xff]  ;;  %v11476_v51 = vld [vmem:[#allocation12_spill] sm:$0xff] }
 0x3c6   : > { %v10968_v56 = vmax.f32 %v11447_v37, %v4299_v6  ;;  %v11464_v37 = vld [vmem:[#allocation48_spill] sm:$0xff]  ;;  %v11472_v48 = vld [vmem:[#allocation31_spill] sm:$0xff] }
 0x3c8   : > { %v7981_v36 = vpop.f32.mrb[240].mxu0 }
 0x3c9   : > { %v4320_v19 = vadd.f32 %v7981_v36, %v11448_v32  ;;  %v4311_v30 = vpop.f32.mrb[241].mxu0  ;;  %v7671_v61 = vpop.f32.mrb[240].mxu1 }
 0x3ca   : > { %v4312_v9 = vadd.f32 %v4311_v30, %v11449_v4  ;;  %v7982_v57 = vpop.f32.mrb[242].mxu0  ;;  %v7672_v14 = vpop.f32.mrb[241].mxu1  ;;  %v11465_v30 = vld [vmem:[#allocation46_spill] sm:$0xff] }
 0x3cb   : > { %v10975_v1 = vmax.f32 %v11452_v18, %v4320_v19  ;;  %v4323_v53 = vadd.f32 %v7982_v57, %v11453_v26  ;;  %v4314_v31 = vpop.f32.mrb[243].mxu0  ;;  %v10978_v59 = vadd.f32 %v7672_v14, %v7671_v61  ;;  %v7674_v15 = vpop.f32.mrb[242].mxu1  ;;  %v11466_v57 = vld [vmem:[#allocation10_spill] sm:$0xff]  ;;  %v11470_v18 = vld [vmem:[#allocation49_spill] sm:$0xff] }
 0x3cc   : > { %v10983_v45 = vmax.f32 %v11456_v49, %v4312_v9  ;;  %v4315_v5 = vadd.f32 %v4314_v31, %v11457_v46  ;;  %v7675_v29 = vpop.f32.mrb[243].mxu1  ;;  %v11467_v14 = vld [vmem:[#allocation22_spill] sm:$0xff]  ;;  %v11473_v49 = vmax.f32 %v11471_v3, %v11472_v48 }
 0x3cd   : > { %v10989_v6 = vmax.f32 %v11460_v38, %v4323_v53  ;;  %v10991_v21 = vadd.f32 %v7675_v29, %v7674_v15  ;;  %v11468_v2 = vmax.f32 %v11466_v57, %v11467_v14  ;;  %v11477_v38 = vld [vmem:[#allocation32_spill] sm:$0xff]  ;;  %v11485_v57 = vld [vmem:[#allocation50_spill] sm:$0xff] }
 0x3ce   : > { %v10996_v22 = vmax.f32 %v11463_v28, %v4315_v5  ;;  %v11475_v5 = vld [vmem:[#allocation47_spill] sm:$0xff]  ;;  %v11478_v52 = vmax.f32 %v11476_v51, %v11477_v38  ;;  %v11487_v3 = vld [vmem:[#allocation34_spill] sm:$0xff] }
 0x3cf   : > { %v11491_v51 = vld [vmem:[#allocation15_spill] sm:$0xff] }
 0x3d0   : > { %v7985_v41 = vpop.f32.mrb[244].mxu0  ;;  %v11492_v38 = vld [vmem:[#allocation35_spill] sm:$0xff] }
 0x3d1   : > { %v4336_v36 = vadd.f32 %v7985_v41, %v11464_v37  ;;  %v4327_v32 = vpop.f32.mrb[245].mxu0  ;;  %v7677_v19 = vpop.f32.mrb[244].mxu1  ;;  %v11480_v41 = vld [vmem:[#allocation13_spill] sm:$0xff] }
 0x3d2   : > { %v4328_v61 = vadd.f32 %v4327_v32, %v11465_v30  ;;  %v7986_v4 = vpop.f32.mrb[246].mxu0  ;;  %v7678_v9 = vpop.f32.mrb[245].mxu1  ;;  %v11481_v37 = vld [vmem:[#allocation33_spill] sm:$0xff]  ;;  %v11484_v30 = vld [vmem:[#allocation52_spill] sm:$0xff] }
 0x3d3   : > { %v11003_v58 = vmax.f32 %v11468_v2, %v4336_v36  ;;  %v4339_v26 = vadd.f32 %v7986_v4, %v11470_v18  ;;  %v4330_v53 = vpop.f32.mrb[247].mxu0  ;;  %v11006_v31 = vadd.f32 %v7678_v9, %v7677_v19  ;;  %v7680_v15 = vpop.f32.mrb[246].mxu1  ;;  %v11482_v36 = vmax.f32 %v11480_v41, %v11481_v37  ;;  %v11495_v37 = vld [vmem:[#allocation51_spill] sm:$0xff] }
 0x3d4   : > { %v11011_v46 = vmax.f32 %v11473_v49, %v4328_v61  ;;  %v4331_v29 = vadd.f32 %v4330_v53, %v11475_v5  ;;  %v7681_v27 = vpop.f32.mrb[247].mxu1  ;;  %v11486_v53 = vld [vmem:[#allocation14_spill] sm:$0xff] }
 0x3d5   : > { %11469 = vst [vmem:[#allocation3_spill] sm:$0xff] %v11003_v58  ;;  %v11017_v42 = vmax.f32 %v11478_v52, %v4339_v26  ;;  %v11019_v28 = vadd.f32 %v7681_v27, %v7680_v15  ;;  %v11488_v26 = vmax.f32 %v11486_v53, %v11487_v3  ;;  %v11490_v15 = vld [vmem:[#allocation53_spill] sm:$0xff]  ;;  %v11493_v52 = vmax.f32 %v11491_v51, %v11492_v38 }
 0x3d6   : > { %11474 = vst [vmem:[#allocation24_spill] sm:$0xff] %v11011_v46  ;;  %v11024_v32 = vmax.f32 %v11482_v36, %v4331_v29  ;;  %v11501_v3 = vld [vmem:[#allocation37_spill] sm:$0xff] }
 0x3d7   : > { %11479 = vst [vmem:[#allocation41_spill] sm:$0xff] %v11017_v42 }
 0x3d8   : > { %11483 = vst [vmem:[#allocation4_spill] sm:$0xff] %v11024_v32  ;;  %v7989_v19 = vpop.f32.mrb[248].mxu0 }
 0x3d9   : > { %v4352_v4 = vadd.f32 %v7989_v19, %v11484_v30  ;;  %v4343_v61 = vpop.f32.mrb[249].mxu0  ;;  %v7683_v9 = vpop.f32.mrb[248].mxu1  ;;  %v11496_v30 = vld [vmem:[#allocation16_spill] sm:$0xff] }
 0x3da   : > { %v4344_v14 = vadd.f32 %v4343_v61, %v11485_v57  ;;  %v7990_v2 = vpop.f32.mrb[250].mxu0  ;;  %v7684_v18 = vpop.f32.mrb[249].mxu1  ;;  %v11497_v61 = vld [vmem:[#allocation36_spill] sm:$0xff] }
 0x3db   : > { %v11031_v48 = vmax.f32 %v11488_v26, %v4352_v4  ;;  %v4355_v49 = vadd.f32 %v7990_v2, %v11490_v15  ;;  %v4346_v5 = vpop.f32.mrb[251].mxu0  ;;  %v11034_v27 = vadd.f32 %v7684_v18, %v7683_v9  ;;  %v7686_v29 = vpop.f32.mrb[250].mxu1  ;;  %v11498_v57 = vmax.f32 %v11496_v30, %v11497_v61  ;;  %v11500_v2 = vld [vmem:[#allocation17_spill] sm:$0xff]  ;;  %v11505_v30 = vld [vmem:[#allocation40_spill] sm:$0xff] }
 0x3dc   : > { %v11039_v41 = vmax.f32 %v11493_v52, %v4344_v14  ;;  %v4347_v36 = vadd.f32 %v4346_v5, %v11495_v37  ;;  %v7687_v19 = vpop.f32.mrb[251].mxu1  ;;  %v11502_v9 = vmax.f32 %v11500_v2, %v11501_v3  ;;  %v11504_v37 = vld [vmem:[#allocation18_spill] sm:$0xff]  ;;  %v11508_v2 = vld [vmem:[#allocation19_spill] sm:$0xff] }
 0x3dd   : > { %11489 = vst [vmem:[#allocation25_spill] sm:$0xff] %v11031_v48  ;;  %v11045_v53 = vmax.f32 %v11498_v57, %v4355_v49  ;;  %v11047_v4 = vadd.f32 %v7687_v19, %v7686_v29  ;;  %v11506_v49 = vmax.f32 %v11504_v37, %v11505_v30  ;;  %v11509_v3 = vld [vmem:[#allocation38_spill] sm:$0xff] }
 0x3de   : > { %11494 = vst [vmem:[#allocation5_spill] sm:$0xff] %v11039_v41  ;;  %v11052_v18 = vmax.f32 %v11502_v9, %v4347_v36 }
 0x3df   : > { %11499 = vst [vmem:[#allocation26_spill] sm:$0xff] %v11045_v53 }
 0x3e0   : > { %11503 = vst [vmem:[#allocation44_spill] sm:$0xff] %v11052_v18  ;;  %v7993_v26 = vpop.f32.mrb[252].mxu0  ;;  %v11513_v18 = vld [vmem:[#allocation23_spill] sm:$0xff] }
 0x3e1   : > { %v4368_v15 = vadd.f32 %v7993_v26, %v10854_v7  ;;  %v4359_v14 = vpop.f32.mrb[253].mxu0  ;;  %v7689_v51 = vpop.f32.mrb[252].mxu1  ;;  %v11510_v7 = vmax.f32 %v11508_v2, %v11509_v3 }
 0x3e2   : > { %v4360_v5 = vadd.f32 %v4359_v14, %v10850_v25  ;;  %v7994_v38 = vpop.f32.mrb[254].mxu0  ;;  %v7690_v52 = vpop.f32.mrb[253].mxu1  ;;  %v11512_v14 = vld [vmem:[#allocation20_spill] sm:$0xff] }
 0x3e3   : > { %v11059_v61 = vmax.f32 %v11506_v49, %v4368_v15  ;;  %v4371_v29 = vadd.f32 %v7994_v38, %v10856_v43  ;;  %v4362_v19 = vpop.f32.mrb[255].mxu0  ;;  %v11062_v57 = vadd.f32 %v7690_v52, %v7689_v51  ;;  %v7692_v36 = vpop.f32.mrb[254].mxu1  ;;  %v11514_v53 = vmax.f32 %v11512_v14, %v11513_v18  ;;  %v11516_v43 = vld [vmem:[#allocation21_spill] sm:$0xff]  ;;  %v11517_v38 = vld [vmem:[#allocation39_spill] sm:$0xff] }
 0x3e4   : > { %v11067_v9 = vmax.f32 %v11510_v7, %v4360_v5  ;;  %v4363_v25 = vadd.f32 %v4362_v19, %v10852_v24  ;;  %v7693_v26 = vpop.f32.mrb[255].mxu1  ;;  %v11518_v51 = vmax.f32 %v11516_v43, %v11517_v38 }
 0x3e5   : > { %11507 = vst [vmem:[#allocation42_spill] sm:$0xff] %v11059_v61  ;;  %v11073_v37 = vmax.f32 %v11514_v53, %v4371_v29  ;;  %v11075_v15 = vadd.f32 %v7693_v26, %v7692_v36 }
 0x3e6   : > { %11511 = vst [vmem:[#allocation6_spill] sm:$0xff] %v11067_v9  ;;  %v11080_v52 = vmax.f32 %v11518_v51, %v4363_v25 }
 0x3e7   : > { %11515 = vst [vmem:[#allocation27_spill] sm:$0xff] %v11073_v37 }
 0x3e8   : > { %11519 = vst [vmem:[#allocation45_spill] sm:$0xff] %v11080_v52  ;;  %v7759_v30 = vpop.f32.mrb[0].mxu0 }
 0x3e9   : > { %v7760_v49 = vpop.f32.mrb[1].mxu0  ;;  %v7695_v2 = vpop.f32.mrb[0].mxu1 }
 0x3ea   : > { %v7761_v5 = vadd.f32 %v7760_v49, %v7759_v30  ;;  %v7762_v3 = vpop.f32.mrb[2].mxu0  ;;  %v7696_v7 = vpop.f32.mrb[1].mxu1 }
 0x3eb   : > { %v11082_v24 = vadd.f32 %v7696_v7, %v7695_v2  ;;  %v7763_v19 = vpop.f32.mrb[3].mxu0  ;;  %v7698_v61 = vpop.f32.mrb[2].mxu1 }
 0x3ec   : > { %v7764_v18 = vadd.f32 %v7763_v19, %v7762_v3  ;;  %v7699_v53 = vpop.f32.mrb[3].mxu1  ;;  %v11085_v29 = vadd.f32 %v7761_v5, %v10866_v11 }
 0x3ed   : > { %v11087_v36 = vadd.f32 %v7699_v53, %v7698_v61 }
 0x3ee   : > { %v11090_v25 = vadd.f32 %v7764_v18, %v10879_v39 }
 0x3f0   : > { %v7765_v26 = vpop.f32.mrb[4].mxu0 }
 0x3f1   : > { %v7766_v14 = vpop.f32.mrb[5].mxu0  ;;  %v7701_v43 = vpop.f32.mrb[4].mxu1 }
 0x3f2   : > { %v7767_v38 = vadd.f32 %v7766_v14, %v7765_v26  ;;  %v7768_v51 = vpop.f32.mrb[6].mxu0  ;;  %v7702_v30 = vpop.f32.mrb[5].mxu1 }
 0x3f3   : > { %v11092_v49 = vadd.f32 %v7702_v30, %v7701_v43  ;;  %v7769_v2 = vpop.f32.mrb[7].mxu0  ;;  %v7704_v7 = vpop.f32.mrb[6].mxu1 }
 0x3f4   : > { %v7770_v3 = vadd.f32 %v7769_v2, %v7768_v51  ;;  %v7705_v19 = vpop.f32.mrb[7].mxu1  ;;  %v11095_v11 = vadd.f32 %v7767_v38, %v10894_v54 }
 0x3f5   : > { %v11097_v61 = vadd.f32 %v7705_v19, %v7704_v7 }
 0x3f6   : > { %v11100_v39 = vadd.f32 %v7770_v3, %v10907_v50 }
 0x3f8   : > { %v7771_v5 = vpop.f32.mrb[8].mxu0 }
 0x3f9   : > { %v7772_v18 = vpop.f32.mrb[9].mxu0  ;;  %v7707_v53 = vpop.f32.mrb[8].mxu1 }
 0x3fa   : > { %v7773_v26 = vadd.f32 %v7772_v18, %v7771_v5  ;;  %v7774_v14 = vpop.f32.mrb[10].mxu0  ;;  %v7708_v37 = vpop.f32.mrb[9].mxu1 }
 0x3fb   : > { %v11102_v43 = vadd.f32 %v7708_v37, %v7707_v53  ;;  %v7775_v30 = vpop.f32.mrb[11].mxu0  ;;  %v7710_v52 = vpop.f32.mrb[10].mxu1 }
 0x3fc   : > { %v7776_v51 = vadd.f32 %v7775_v30, %v7774_v14  ;;  %v7711_v2 = vpop.f32.mrb[11].mxu1  ;;  %v11105_v54 = vadd.f32 %v7773_v26, %v10922_v33 }
 0x3fd   : > { %v11107_v38 = vadd.f32 %v7711_v2, %v7710_v52 }
 0x3fe   : > { %v11110_v50 = vadd.f32 %v7776_v51, %v10935_v20 }
 0x400   : > { %v7777_v7 = vpop.f32.mrb[12].mxu0 }
 0x401   : > { %v7778_v3 = vpop.f32.mrb[13].mxu0  ;;  %v7713_v19 = vpop.f32.mrb[12].mxu1 }
 0x402   : > { %v7779_v5 = vadd.f32 %v7778_v3, %v7777_v7  ;;  %v7780_v18 = vpop.f32.mrb[14].mxu0  ;;  %v7714_v9 = vpop.f32.mrb[13].mxu1 }
 0x403   : > { %v11112_v37 = vadd.f32 %v7714_v9, %v7713_v19  ;;  %v7781_v53 = vpop.f32.mrb[15].mxu0  ;;  %v7716_v41 = vpop.f32.mrb[14].mxu1 }
 0x404   : > { %v7782_v14 = vadd.f32 %v7781_v53, %v7780_v18  ;;  %v7717_v30 = vpop.f32.mrb[15].mxu1  ;;  %v11115_v33 = vadd.f32 %v7779_v5, %v10950_v17 }
 0x405   : > { %v11117_v52 = vadd.f32 %v7717_v30, %v7716_v41 }
 0x406   : > { %v11120_v20 = vadd.f32 %v7782_v14, %v10963_v12 }
 0x408   : > { %v7783_v26 = vpop.f32.mrb[16].mxu0 }
 0x409   : > { %v7784_v51 = vpop.f32.mrb[17].mxu0  ;;  %v7719_v2 = vpop.f32.mrb[16].mxu1 }
 0x40a   : > { %v7785_v7 = vadd.f32 %v7784_v51, %v7783_v26  ;;  %v7786_v3 = vpop.f32.mrb[18].mxu0  ;;  %v7720_v48 = vpop.f32.mrb[17].mxu1 }
 0x40b   : > { %v11122_v9 = vadd.f32 %v7720_v48, %v7719_v2  ;;  %v7787_v19 = vpop.f32.mrb[19].mxu0  ;;  %v7722_v32 = vpop.f32.mrb[18].mxu1 }
 0x40c   : > { %v7788_v18 = vadd.f32 %v7787_v19, %v7786_v3  ;;  %v7723_v53 = vpop.f32.mrb[19].mxu1  ;;  %v11125_v17 = vadd.f32 %v7785_v7, %v10978_v59 }
 0x40d   : > { %v11127_v41 = vadd.f32 %v7723_v53, %v7722_v32 }
 0x40e   : > { %v11130_v12 = vadd.f32 %v7788_v18, %v10991_v21 }
 0x410   : > { %v7789_v5 = vpop.f32.mrb[20].mxu0 }
 0x411   : > { %v7790_v14 = vpop.f32.mrb[21].mxu0  ;;  %v7725_v30 = vpop.f32.mrb[20].mxu1 }
 0x412   : > { %v7791_v26 = vadd.f32 %v7790_v14, %v7789_v5  ;;  %v7792_v51 = vpop.f32.mrb[22].mxu0  ;;  %v7726_v42 = vpop.f32.mrb[21].mxu1 }
 0x413   : > { %v11132_v48 = vadd.f32 %v7726_v42, %v7725_v30  ;;  %v7793_v2 = vpop.f32.mrb[23].mxu0  ;;  %v7728_v46 = vpop.f32.mrb[22].mxu1 }
 0x414   : > { %v7794_v3 = vadd.f32 %v7793_v2, %v7792_v51  ;;  %v7729_v19 = vpop.f32.mrb[23].mxu1  ;;  %v11135_v59 = vadd.f32 %v7791_v26, %v11006_v31 }
 0x415   : > { %11520 = vst [vmem:[#allocation7_spill] sm:$0xff] %v11132_v48  ;;  %v11137_v32 = vadd.f32 %v7729_v19, %v7728_v46 }
 0x416   : > { %v11140_v21 = vadd.f32 %v7794_v3, %v11019_v28 }
 0x417   : > { %11521 = vst [vmem:[#allocation28_spill] sm:$0xff] %v11137_v32 }
 0x418   : > { %v7795_v7 = vpop.f32.mrb[24].mxu0 }
 0x419   : > { %v7796_v18 = vpop.f32.mrb[25].mxu0  ;;  %v7731_v53 = vpop.f32.mrb[24].mxu1 }
 0x41a   : > { %v7797_v5 = vadd.f32 %v7796_v18, %v7795_v7  ;;  %v7798_v14 = vpop.f32.mrb[26].mxu0  ;;  %v7732_v58 = vpop.f32.mrb[25].mxu1 }
 0x41b   : > { %v11142_v42 = vadd.f32 %v7732_v58, %v7731_v53  ;;  %v7799_v30 = vpop.f32.mrb[27].mxu0  ;;  %v7734_v48 = vpop.f32.mrb[26].mxu1 }
 0x41c   : > { %v7800_v51 = vadd.f32 %v7799_v30, %v7798_v14  ;;  %v7735_v2 = vpop.f32.mrb[27].mxu1  ;;  %v11145_v31 = vadd.f32 %v7797_v5, %v11034_v27 }
 0x41d   : > { %11522 = vst [vmem:[#allocation43_spill] sm:$0xff] %v11142_v42  ;;  %v11147_v46 = vadd.f32 %v7735_v2, %v7734_v48 }
 0x41e   : > { %v11150_v28 = vadd.f32 %v7800_v51, %v11047_v4 }
 0x420   : > { %v7801_v26 = vpop.f32.mrb[28].mxu0 }
 0x421   : > { %v7802_v3 = vpop.f32.mrb[29].mxu0  ;;  %v7737_v19 = vpop.f32.mrb[28].mxu1 }
 0x422   : > { %v7803_v7 = vadd.f32 %v7802_v3, %v7801_v26  ;;  %v7804_v18 = vpop.f32.mrb[30].mxu0  ;;  %v7738_v58 = vpop.f32.mrb[29].mxu1 }
 0x423   : > { %v11152_v53 = vadd.f32 %v7738_v58, %v7737_v19  ;;  %v7805_v42 = vpop.f32.mrb[31].mxu0  ;;  %v7740_v14 = vpop.f32.mrb[30].mxu1 }
 0x424   : > { %v7806_v30 = vadd.f32 %v7805_v42, %v7804_v18  ;;  %v7741_v32 = vpop.f32.mrb[31].mxu1  ;;  %v11155_v27 = vadd.f32 %v7803_v7, %v11062_v57  ;;  %v11168_v57 = vld [vmem:[%s11316_s2] ss:$0 sm:$0xff] }
 0x425   : > { %v11157_v48 = vadd.f32 %v7741_v32, %v7740_v14 }
 0x426   : > { %v11162_v4 = vadd.f32 %v7806_v30, %v11075_v15 }
 0x428   : > { %v7807_v5 = vpop.f32.mrb[32].mxu0 }
 0x429   : > { %v8005_v51 = vpop.f32.mrb[32].mxu1  ;;  %v7808_v2 = vpop.f32.mrb[33].mxu0 }
 0x42a   : > { %v5316_v26 = vadd.f32 %v8005_v51, %v11095_v11  ;;  %v7809_v3 = vadd.f32 %v7808_v2, %v7807_v5  ;;  %v5307_v19 = vpop.f32.mrb[33].mxu1  ;;  %v7810_v42 = vpop.f32.mrb[34].mxu0 }
 0x42b   : > { %v5308_v32 = vadd.f32 %v5307_v19, %v11085_v29  ;;  %v8006_v7 = vpop.f32.mrb[34].mxu1  ;;  %v7811_v18 = vpop.f32.mrb[35].mxu0 }
 0x42c   : > { %v5436_v15 = vmax.f32 %v10863_v62, %v5316_v26  ;;  %v5319_v58 = vadd.f32 %v8006_v7, %v11100_v39  ;;  %v7812_v14 = vadd.f32 %v7811_v18, %v7810_v42  ;;  %v5310_v30 = vpop.f32.mrb[35].mxu1  ;;  %v11174_v11 = vadd.f32 %v7809_v3, %v11082_v24 }
 0x42d   : > { %v5434_v5 = vmax.f32 %v10871_v44, %v5308_v32  ;;  %v5311_v51 = vadd.f32 %v5310_v30, %v11090_v25 }
 0x42e   : > { %v5475_v2 = vadd.f32 %v11168_v57, %v5436_v15  ;;  %v5437_v29 = vmax.f32 %v10877_v63, %v5319_v58  ;;  %v11181_v19 = vadd.f32 %v7812_v14, %v11087_v36 }
 0x42f   : > { %v5473_v62 = vadd.f32 %v11168_v57, %v5434_v5  ;;  %v5435_v39 = vmax.f32 %v10884_v55, %v5311_v51 }
 0x430   : > { %v5476_v26 = vadd.f32 %v11168_v57, %v5437_v29  ;;  %v7813_v24 = vpop.f32.mrb[36].mxu0  ;;  %v5507_v25 = vmax.f32 %v5475_v2, 0.0 }
 0x431   : > { %v5474_v3 = vadd.f32 %v11168_v57, %v5435_v39  ;;  %v8009_v44 = vpop.f32.mrb[36].mxu1  ;;  %v7814_v42 = vpop.f32.mrb[37].mxu0  ;;  %v5505_v15 = vmax.f32 %v5473_v62, 0.0 }
 0x432   : > { %v5508_v32 = vmax.f32 %v5476_v26, 0.0  ;;  %v5332_v7 = vadd.f32 %v8009_v44, %v11115_v33  ;;  %v7815_v63 = vadd.f32 %v7814_v42, %v7813_v24  ;;  %v5323_v18 = vpop.f32.mrb[37].mxu1  ;;  %v7816_v36 = vpop.f32.mrb[38].mxu0 }
 0x433   : > { %v5506_v55 = vmax.f32 %v5474_v3, 0.0  ;;  %v5324_v58 = vadd.f32 %v5323_v18, %v11105_v54  ;;  %v8010_v14 = vpop.f32.mrb[38].mxu1  ;;  %v7817_v30 = vpop.f32.mrb[39].mxu0 }
 0x434   : > { %v6812_v5 = vpack.c.bf16 %v5508_v32, %v5507_v25  ;;  %v5440_v51 = vmax.f32 %v10891_v0, %v5332_v7  ;;  %v5335_v33 = vadd.f32 %v8010_v14, %v11120_v20  ;;  %v7818_v2 = vadd.f32 %v7817_v30, %v7816_v36  ;;  %v5326_v29 = vpop.f32.mrb[39].mxu1 }
 0x435   : > { %v6807_v62 = vpack.c.bf16 %v5506_v55, %v5505_v15  ;;  %v5438_v39 = vmax.f32 %v10899_v23, %v5324_v58  ;;  %v5327_v26 = vadd.f32 %v5326_v29, %v11110_v50  ;;  %v11199_v24 = vadd.f32 %v7815_v63, %v11092_v49 }
 0x436   : > { %6884 = vst [vmem:[%s11191_s20 + $0x8] sm:$0xff] %v6812_v5   ;;  %v5479_v54 = vadd.f32 %v11168_v57, %v5440_v51  ;;  %v5441_v3 = vmax.f32 %v10905_v8, %v5335_v33  ;;  %v11205_v44 = vadd.f32 %v7818_v2, %v11097_v61 }
 0x437   : > { %6808 = vst [vmem:[%s11191_s20] sm:$0xff] %v6807_v62   ;;  %v5477_v0 = vadd.f32 %v11168_v57, %v5438_v39  ;;  %v5439_v20 = vmax.f32 %v10912_v47, %v5327_v26 }
 0x438   : > { %v5480_v23 = vadd.f32 %v11168_v57, %v5441_v3  ;;  %v7819_v42 = vpop.f32.mrb[40].mxu0  ;;  %v5511_v32 = vmax.f32 %v5479_v54, 0.0 }
 0x439   : > { %v5478_v50 = vadd.f32 %v11168_v57, %v5439_v20  ;;  %v8013_v49 = vpop.f32.mrb[40].mxu1  ;;  %v7820_v25 = vpop.f32.mrb[41].mxu0  ;;  %v5509_v36 = vmax.f32 %v5477_v0, 0.0 }
 0x43a   : > { %v5512_v7 = vmax.f32 %v5480_v23, 0.0  ;;  %v5348_v63 = vadd.f32 %v8013_v49, %v11135_v59  ;;  %v7821_v8 = vadd.f32 %v7820_v25, %v7819_v42  ;;  %v5339_v18 = vpop.f32.mrb[41].mxu1  ;;  %v7822_v61 = vpop.f32.mrb[42].mxu0 }
 0x43b   : > { %v5510_v15 = vmax.f32 %v5478_v50, 0.0  ;;  %v5340_v55 = vadd.f32 %v5339_v18, %v11125_v17  ;;  %v8014_v47 = vpop.f32.mrb[42].mxu1  ;;  %v7823_v58 = vpop.f32.mrb[43].mxu0 }
 0x43c   : > { %v6822_v14 = vpack.c.bf16 %v5512_v7, %v5511_v32  ;;  %v5444_v30 = vmax.f32 %v10919_v16, %v5348_v63  ;;  %v5351_v5 = vadd.f32 %v8014_v47, %v11140_v21  ;;  %v7824_v51 = vadd.f32 %v7823_v58, %v7822_v61  ;;  %v5342_v33 = vpop.f32.mrb[43].mxu1 }
 0x43d   : > { %v6817_v2 = vpack.c.bf16 %v5510_v15, %v5509_v36  ;;  %v5442_v59 = vmax.f32 %v10927_v35, %v5340_v55  ;;  %v5343_v29 = vadd.f32 %v5342_v33, %v11130_v12  ;;  %v11219_v62 = vadd.f32 %v7821_v8, %v11102_v43 }
 0x43e   : > { %6886 = vst [vmem:[%s11191_s20 + $0x18] sm:$0xff] %v6822_v14   ;;  %v5483_v17 = vadd.f32 %v11168_v57, %v5444_v30  ;;  %v5445_v39 = vmax.f32 %v10933_v40, %v5351_v5  ;;  %v11225_v26 = vadd.f32 %v7824_v51, %v11107_v38 }
 0x43f   : > { %6885 = vst [vmem:[%s11191_s20 + $0x10] sm:$0xff] %v6817_v2   ;;  %v5481_v16 = vadd.f32 %v11168_v57, %v5442_v59  ;;  %v5443_v21 = vmax.f32 %v10940_v34, %v5343_v29 }
 0x440   : > { %v5484_v35 = vadd.f32 %v11168_v57, %v5445_v39  ;;  %v7825_v54 = vpop.f32.mrb[44].mxu0  ;;  %v5515_v0 = vmax.f32 %v5483_v17, 0.0 }
 0x441   : > { %v5482_v12 = vadd.f32 %v11168_v57, %v5443_v21  ;;  %v8017_v43 = vpop.f32.mrb[44].mxu1  ;;  %v7826_v3 = vpop.f32.mrb[45].mxu0  ;;  %v5513_v50 = vmax.f32 %v5481_v16, 0.0 }
 0x442   : > { %v5516_v20 = vmax.f32 %v5484_v35, 0.0  ;;  %v5364_v23 = vadd.f32 %v8017_v43, %v11155_v27  ;;  %v7827_v40 = vadd.f32 %v7826_v3, %v7825_v54  ;;  %v5355_v42 = vpop.f32.mrb[45].mxu1  ;;  %v7828_v38 = vpop.f32.mrb[46].mxu0 }
 0x443   : > { %v5514_v49 = vmax.f32 %v5482_v12, 0.0  ;;  %v5356_v25 = vadd.f32 %v5355_v42, %v11145_v31  ;;  %v8018_v34 = vpop.f32.mrb[46].mxu1  ;;  %v7829_v32 = vpop.f32.mrb[47].mxu0 }
 0x444   : > { %v6832_v7 = vpack.c.bf16 %v5516_v20, %v5515_v0  ;;  %v5448_v63 = vmax.f32 %v10947_v60, %v5364_v23  ;;  %v5367_v8 = vadd.f32 %v8018_v34, %v11162_v4  ;;  %v7830_v18 = vadd.f32 %v7829_v32, %v7828_v38  ;;  %v5358_v61 = vpop.f32.mrb[47].mxu1 }
 0x445   : > { %v6827_v36 = vpack.c.bf16 %v5514_v49, %v5513_v50  ;;  %v5446_v27 = vmax.f32 %v10955_v10, %v5356_v25  ;;  %v5359_v15 = vadd.f32 %v5358_v61, %v11150_v28  ;;  %v5235_v55 = vadd.f32 %v7827_v40, %v11112_v37 }
 0x446   : > { %6888 = vst [vmem:[%s11191_s20 + $0x28] sm:$0xff] %v6832_v7   ;;  %v5487_v31 = vadd.f32 %v11168_v57, %v5448_v63  ;;  %v5449_v47 = vmax.f32 %v10961_v13, %v5367_v8  ;;  %v5238_v58 = vadd.f32 %v7830_v18, %v11117_v52  ;;  %v11523_v18 = vld [vmem:[#allocation3_spill] sm:$0xff] }
 0x447   : > { %6887 = vst [vmem:[%s11191_s20 + $0x20] sm:$0xff] %v6827_v36   ;;  %v5485_v60 = vadd.f32 %v11168_v57, %v5446_v27  ;;  %v5447_v4 = vmax.f32 %v10968_v56, %v5359_v15 }
 0x448   : > { %v5488_v14 = vadd.f32 %v11168_v57, %v5449_v47  ;;  %v7831_v30 = vpop.f32.mrb[48].mxu0  ;;  %v5519_v37 = vmax.f32 %v5487_v31, 0.0  ;;  %v11524_v47 = vld [vmem:[#allocation24_spill] sm:$0xff] }
 0x449   : > { %v5486_v10 = vadd.f32 %v11168_v57, %v5447_v4  ;;  %v8021_v28 = vpop.f32.mrb[48].mxu1  ;;  %v7832_v5 = vpop.f32.mrb[49].mxu0  ;;  %v5517_v59 = vmax.f32 %v5485_v60, 0.0  ;;  %v11525_v4 = vld [vmem:[#allocation7_spill] sm:$0xff] }
 0x44a   : > { %v5520_v51 = vmax.f32 %v5488_v14, 0.0  ;;  %v5380_v33 = vadd.f32 %v8021_v28, %v11199_v24  ;;  %v7833_v2 = vadd.f32 %v7832_v5, %v7831_v30  ;;  %v5371_v13 = vpop.f32.mrb[49].mxu1  ;;  %v7834_v52 = vpop.f32.mrb[50].mxu0  ;;  %v11527_v28 = vld [vmem:[#allocation28_spill] sm:$0xff] }
 0x44b   : > { %v5518_v29 = vmax.f32 %v5486_v10, 0.0  ;;  %v5372_v17 = vadd.f32 %v5371_v13, %v11174_v11  ;;  %v8022_v56 = vpop.f32.mrb[50].mxu1  ;;  %v7835_v39 = vpop.f32.mrb[51].mxu0 }
 0x44c   : > { %v6842_v16 = vpack.c.bf16 %v5520_v51, %v5519_v37  ;;  %v5452_v21 = vmax.f32 %v10975_v1, %v5380_v33  ;;  %v5383_v35 = vadd.f32 %v8022_v56, %v11205_v44  ;;  %v7836_v54 = vadd.f32 %v7835_v39, %v7834_v52  ;;  %v5374_v12 = vpop.f32.mrb[51].mxu1 }
 0x44d   : > { %v6837_v43 = vpack.c.bf16 %v5518_v29, %v5517_v59  ;;  %v5450_v24 = vmax.f32 %v10983_v45, %v5372_v17  ;;  %v5375_v3 = vadd.f32 %v5374_v12, %v11181_v19  ;;  %v5243_v0 = vadd.f32 %v7833_v2, %v11122_v9 }
 0x44e   : > { %6890 = vst [vmem:[%s11191_s20 + $0x38] sm:$0xff] %v6842_v16   ;;  %v5491_v11 = vadd.f32 %v11168_v57, %v5452_v21  ;;  %v5453_v20 = vmax.f32 %v10989_v6, %v5383_v35  ;;  %v5246_v23 = vadd.f32 %v7836_v54, %v11127_v41 }
 0x44f   : > { %6889 = vst [vmem:[%s11191_s20 + $0x30] sm:$0xff] %v6837_v43   ;;  %v5489_v1 = vadd.f32 %v11168_v57, %v5450_v24  ;;  %v5451_v44 = vmax.f32 %v10996_v22, %v5375_v3  ;;  %v11529_v3 = vld [vmem:[#allocation25_spill] sm:$0xff] }
 0x450   : > { %v5492_v40 = vadd.f32 %v11168_v57, %v5453_v20  ;;  %v7837_v42 = vpop.f32.mrb[52].mxu0  ;;  %v5523_v9 = vmax.f32 %v5491_v11, 0.0 }
 0x451   : > { %v5490_v45 = vadd.f32 %v11168_v57, %v5451_v44  ;;  %v8025_v19 = vpop.f32.mrb[52].mxu1  ;;  %v7838_v38 = vpop.f32.mrb[53].mxu0  ;;  %v5521_v41 = vmax.f32 %v5489_v1, 0.0 }
 0x452   : > { %v5524_v50 = vmax.f32 %v5492_v40, 0.0  ;;  %v5396_v49 = vadd.f32 %v8025_v19, %v5235_v55  ;;  %v7839_v25 = vadd.f32 %v7838_v38, %v7837_v42  ;;  %v5387_v34 = vpop.f32.mrb[53].mxu1  ;;  %v7840_v6 = vpop.f32.mrb[54].mxu0  ;;  %v11530_v42 = vld [vmem:[#allocation5_spill] sm:$0xff]  ;;  %v11531_v38 = vld [vmem:[#allocation43_spill] sm:$0xff] }
 0x453   : > { %v5522_v32 = vmax.f32 %v5490_v45, 0.0  ;;  %v5388_v7 = vadd.f32 %v5387_v34, %v11219_v62  ;;  %v8026_v22 = vpop.f32.mrb[54].mxu1  ;;  %v7841_v63 = vpop.f32.mrb[55].mxu0  ;;  %v11526_v62 = vld [vmem:[#allocation41_spill] sm:$0xff] }
 0x454   : > { %v6852_v8 = vpack.c.bf16 %v5524_v50, %v5523_v9  ;;  %v5456_v61 = vmax.f32 %v11523_v18, %v5396_v49  ;;  %v5399_v36 = vadd.f32 %v8026_v22, %v5238_v58  ;;  %v7842_v27 = vadd.f32 %v7841_v63, %v7840_v6  ;;  %v5390_v15 = vpop.f32.mrb[55].mxu1  ;;  %v11528_v58 = vld [vmem:[#allocation4_spill] sm:$0xff]  ;;  %v11532_v49 = vld [vmem:[#allocation26_spill] sm:$0xff] }
 0x455   : > { %v6847_v31 = vpack.c.bf16 %v5522_v32, %v5521_v41  ;;  %v5454_v55 = vmax.f32 %v11524_v47, %v5388_v7  ;;  %v5391_v60 = vadd.f32 %v5390_v15, %v11225_v26  ;;  %v5251_v14 = vadd.f32 %v7839_v25, %v11525_v4  ;;  %v11533_v6 = vld [vmem:[#allocation44_spill] sm:$0xff] }
 0x456   : > { %6892 = vst [vmem:[%s11191_s20 + $0x48] sm:$0xff] %v6852_v8   ;;  %v5495_v30 = vadd.f32 %v11168_v57, %v5456_v61  ;;  %v5457_v10 = vmax.f32 %v11526_v62, %v5399_v36  ;;  %v5254_v5 = vadd.f32 %v7842_v27, %v11527_v28 }
 0x457   : > { %6891 = vst [vmem:[%s11191_s20 + $0x40] sm:$0xff] %v6847_v31   ;;  %v5493_v37 = vadd.f32 %v11168_v57, %v5454_v55  ;;  %v5455_v51 = vmax.f32 %v11528_v58, %v5391_v60 }
 0x458   : > { %v5496_v33 = vadd.f32 %v11168_v57, %v5457_v10  ;;  %v7843_v2 = vpop.f32.mrb[56].mxu0  ;;  %v5527_v59 = vmax.f32 %v5495_v30, 0.0  ;;  %v11534_v10 = vld [vmem:[#allocation6_spill] sm:$0xff] }
 0x459   : > { %v5494_v13 = vadd.f32 %v11168_v57, %v5455_v51  ;;  %v8029_v26 = vpop.f32.mrb[56].mxu1  ;;  %v7844_v52 = vpop.f32.mrb[57].mxu0  ;;  %v5525_v21 = vmax.f32 %v5493_v37, 0.0 }
 0x45a   : > { %v5528_v29 = vmax.f32 %v5496_v33, 0.0  ;;  %v5412_v17 = vadd.f32 %v8029_v26, %v5251_v14  ;;  %v7845_v56 = vadd.f32 %v7844_v52, %v7843_v2  ;;  %v5403_v39 = vpop.f32.mrb[57].mxu1  ;;  %v7846_v16 = vpop.f32.mrb[58].mxu0  ;;  %v11535_v33 = vld [vmem:[#allocation45_spill] sm:$0xff] }
 0x45b   : > { %v5526_v35 = vmax.f32 %v5494_v13, 0.0  ;;  %v5404_v54 = vadd.f32 %v5403_v39, %v5243_v0  ;;  %v8030_v12 = vpop.f32.mrb[58].mxu1  ;;  %v7847_v43 = vpop.f32.mrb[59].mxu0  ;;  %v11536_v13 = vld [vmem:[#allocation42_spill] sm:$0xff] }
 0x45c   : > { %v6862_v24 = vpack.c.bf16 %v5528_v29, %v5527_v59  ;;  %v5460_v11 = vmax.f32 %v11529_v3, %v5412_v17  ;;  %v5415_v20 = vadd.f32 %v8030_v12, %v5254_v5  ;;  %v7848_v1 = vadd.f32 %v7847_v43, %v7846_v16  ;;  %v5406_v44 = vpop.f32.mrb[59].mxu1  ;;  %v11537_v29 = vld [vmem:[#allocation27_spill] sm:$0xff] }
 0x45d   : > { %v6857_v40 = vpack.c.bf16 %v5526_v35, %v5525_v21  ;;  %v5458_v45 = vmax.f32 %v11530_v42, %v5404_v54  ;;  %v5407_v19 = vadd.f32 %v5406_v44, %v5246_v23  ;;  %v5259_v9 = vadd.f32 %v7845_v56, %v11531_v38 }
 0x45e   : > { %6894 = vst [vmem:[%s11191_s20 + $0x58] sm:$0xff] %v6862_v24   ;;  %v5499_v50 = vadd.f32 %v11168_v57, %v5460_v11  ;;  %v5461_v0 = vmax.f32 %v11532_v49, %v5415_v20  ;;  %v5262_v25 = vadd.f32 %v7848_v1, %v11147_v46 }
 0x45f   : > { %6893 = vst [vmem:[%s11191_s20 + $0x50] sm:$0xff] %v6857_v40   ;;  %v5497_v34 = vadd.f32 %v11168_v57, %v5458_v45  ;;  %v5459_v41 = vmax.f32 %v11533_v6, %v5407_v19 }
 0x460   : > { %v5500_v32 = vadd.f32 %v11168_v57, %v5461_v0  ;;  %v7849_v7 = vpop.f32.mrb[60].mxu0  ;;  %v5531_v8 = vmax.f32 %v5499_v50, 0.0 }
 0x461   : > { %v5498_v22 = vadd.f32 %v11168_v57, %v5459_v41  ;;  %v8033_v23 = vpop.f32.mrb[60].mxu1  ;;  %v7850_v63 = vpop.f32.mrb[61].mxu0  ;;  %v5529_v46 = vmax.f32 %v5497_v34, 0.0 }
 0x462   : > { %v5532_v18 = vmax.f32 %v5500_v32, 0.0  ;;  %v7851_v61 = vadd.f32 %v7850_v63, %v7849_v7  ;;  %v5419_v36 = vpop.f32.mrb[61].mxu1  ;;  %v7852_v27 = vpop.f32.mrb[62].mxu0 }
 0x463   : > { %v5530_v15 = vmax.f32 %v5498_v22, 0.0  ;;  %v5420_v31 = vadd.f32 %v5419_v36, %v5259_v9  ;;  %v8034_v47 = vpop.f32.mrb[62].mxu1  ;;  %v7853_v55 = vpop.f32.mrb[63].mxu0 }
 0x464   : > { %v6872_v60 = vpack.c.bf16 %v5532_v18, %v5531_v8  ;;  %v5267_v4 = vadd.f32 %v7851_v61, %v11152_v53  ;;  %v7854_v14 = vadd.f32 %v7853_v55, %v7852_v27  ;;  %v5422_v30 = vpop.f32.mrb[63].mxu1 }
 0x465   : > { %v6867_v62 = vpack.c.bf16 %v5530_v15, %v5529_v46  ;;  %v5462_v28 = vmax.f32 %v11534_v10, %v5420_v31  ;;  %v5423_v5 = vadd.f32 %v5422_v30, %v5262_v25 }
 0x466   : > { %6896 = vst [vmem:[%s11191_s20 + $0x68] sm:$0xff] %v6872_v60   ;;  %v5428_v37 = vadd.f32 %v8033_v23, %v5267_v4  ;;  %v5270_v58 = vadd.f32 %v7854_v14, %v11157_v48 }
 0x467   : > { %6895 = vst [vmem:[%s11191_s20 + $0x60] sm:$0xff] %v6867_v62   ;;  %v5501_v51 = vadd.f32 %v11168_v57, %v5462_v28  ;;  %v5463_v2 = vmax.f32 %v11535_v33, %v5423_v5 }
 0x468   : > { %v5464_v26 = vmax.f32 %v11536_v13, %v5428_v37  ;;  %v5431_v53 = vadd.f32 %v8034_v47, %v5270_v58 }
 0x469   : > { %v5502_v52 = vadd.f32 %v11168_v57, %v5463_v2  ;;  %v5533_v56 = vmax.f32 %v5501_v51, 0.0 }
 0x46a   : > { %v5503_v59 = vadd.f32 %v11168_v57, %v5464_v26  ;;  %v5465_v17 = vmax.f32 %v11537_v29, %v5431_v53 }
 0x46b   : > { %v5534_v39 = vmax.f32 %v5502_v52, 0.0 }
 0x46c   : > { %v5504_v16 = vadd.f32 %v11168_v57, %v5465_v17  ;;  %v5535_v21 = vmax.f32 %v5503_v59, 0.0 }
 0x46d   : > { %v6877_v48 = vpack.c.bf16 %v5534_v39, %v5533_v56 }
 0x46e   : > { %v5536_v35 = vmax.f32 %v5504_v16, 0.0 }
 0x46f   : > { %6897 = vst [vmem:[%s11191_s20 + $0x70] sm:$0xff] %v6877_v48  }
 0x470   : > { %v6882_v54 = vpack.c.bf16 %v5536_v35, %v5535_v21 }
 0x472   : > { %6898 = vst [vmem:[%s11191_s20 + $0x78] sm:$0xff] %v6882_v54  }
 0x473 PF: > { %p10_p9 = scmp.ge.s32.totalorder %s8660_s16, 4   ;;  %s11538_s12 = smov %s8617_s13 }
 0x474   : > { %s11539_s13 = smov %s8669_s19  ;;  %s11540_s14 = smov %s8660_s16 }
 0x475   :  { %12 = sbr.rel (!%p10_p9) target bundleno = 2 (0x2), region = 102 }

</bundles_post_ra>
